<compile_context>
chip_gen: v7x
topology: tpu7x:2x2x1
jax: 0.10.0
libtpu: 0.0.40
codegen_flags: <defaults>
</compile_context>

<pallas_src>
import jax
import jax.numpy as jnp
from jax.experimental import pallas as pl
from jax.experimental.pallas import tpu as pltpu


def _round_up(x, m):
    return (x + m - 1) // m * m


# ------------------------------ fused kernel ------------------------------- #

def _make_rrdb_kernel(c0, g, c0p, gp, W, M, base, P, n_blocks):
    """Builds the fused RRDB kernel (n_blocks rrdb_blocks, 5 convs each).

    Layouts (all (rows, lanes), lanes = flattened H*W):
      pad_ref : (max(c0p,gp), P) staging buffer with `base` (>= W+1) zero lanes
                on the left and >= W+1 zero lanes on the right, so every
                shifted 3x3-tap read stays in bounds and vertically
                out-of-range taps read zeros.
      tap_ref : (9*(c0p + 4*gp), M) tap-expanded activation slab.  Group j
                (x, z1..z4) occupies rows [group_base[j], +9*cgp), tap-major /
                channel-minor, so conv i is ONE matmul against rows
                [0, 9*(c0p + i*gp)).
      act_ref : (c0, M) f32 running block activation (residual path).
    Horizontal wrap (dx = +-1 at the image edge) is removed by multiplying the
    shifted slice with a per-column mask before it is written into tap_ref.
    """
    taps = [((ky - 1) * W + (kx - 1), kx) for ky in range(3) for kx in range(3)]
    group_rows = [c0p, gp, gp, gp, gp]
    group_base = [0]
    for r in group_rows[:-1]:
        group_base.append(group_base[-1] + 9 * r)
    pad_rows = max(c0p, gp)
    rpad = P - base - M                      # right zero-pad width (mult. of 128)

    def kernel(*refs):
        x_ref = refs[0]
        o_ref = refs[1 + 10 * n_blocks]
        pad_ref, tap_ref, act_ref = refs[2 + 10 * n_blocks:]
        cdt = pad_ref.dtype

        # Pad-lane strips must read as zero.  They are never written by the
        # data path, but the scratch may hold garbage on entry and "parallel"
        # grid sharding gives no guarantee which core sees step 0, so clear
        # just the two small strips every step (cheap, lane-aligned stores) —
        # the data region is always fully overwritten before being read.
        pad_ref[:, pl.ds(0, base)] = jnp.zeros((pad_rows, base), cdt)
        pad_ref[:, pl.ds(base + M, rpad)] = jnp.zeros((pad_rows, rpad), cdt)

        # Column-validity masks for the dx = -1 / +1 taps (in-register).
        col = jax.lax.broadcasted_iota(jnp.int32, (1, M), 1) % W
        mask_l = (col >= 1).astype(cdt)
        mask_r = (col <= W - 2).astype(cdt)

        def build_group_taps(gidx, z_cdt):
            """Stage z into the padded buffer, then write its 9 shifted,
            boundary-masked copies into the tap slab (done once per block per
            group, reused by every later conv of that block)."""
            rows = z_cdt.shape[0]
            pad_ref[pl.ds(0, rows), pl.ds(base, M)] = z_cdt
            cgp, gb = group_rows[gidx], group_base[gidx]
            for t, (s, kx) in enumerate(taps):
                sl = pad_ref[pl.ds(0, cgp), pl.ds(base + s, M)]
                if kx == 0:
                    sl = sl * mask_l
                elif kx == 2:
                    sl = sl * mask_r
                tap_ref[pl.ds(gb + t * cgp, cgp), :] = sl

        act_ref[...] = x_ref[0].astype(jnp.float32)

        for b in range(n_blocks):
            build_group_taps(0, act_ref[...].astype(cdt))
            for i in range(5):
                w_ref = refs[1 + 2 * (5 * b + i)]
                bias_ref = refs[2 + 2 * (5 * b + i)]
                K = 9 * c0p + 9 * i * gp
                # single tap-stacked MXU matmul per conv, f32 accumulation
                z = jnp.dot(w_ref[...], tap_ref[pl.ds(0, K), :],
                            preferred_element_type=jnp.float32)
                z = z + bias_ref[...]                       # (cout, 1) broadcast
                if i < 4:
                    z = jnp.where(z >= 0.0, z, 0.2 * z)     # LeakyReLU(0.2)
                    build_group_taps(i + 1, z.astype(cdt))
                else:
                    act_ref[...] = 0.2 * z + act_ref[...]   # block residual

        # RRDB-level epilogue; x_ref's block stays resident for the whole step.
        o_ref[0] = (0.2 * act_ref[...]
                    + x_ref[0].astype(jnp.float32)).astype(o_ref.dtype)

    return kernel


# ------------------------------ host wrapper ------------------------------- #

def _reorder_weight(w, c0, g, c0p, gp, compute_dtype):
    """torch (Cout, Cin, 3, 3) -> (Cout, 9*Cin_padded) matching the tap slab:
    contraction index = group_base + tap*group_ch_padded + ch; weight columns
    for the channel-padding rows are zero."""
    cout, cin = int(w.shape[0]), int(w.shape[1])
    n_groups = 1 + (cin - c0) // g
    assert c0 + (n_groups - 1) * g == cin
    chunks, off = [], 0
    for j in range(n_groups):
        cg = c0 if j == 0 else g
        cgp = c0p if j == 0 else gp
        wj = jnp.transpose(w[:, off:off + cg], (0, 2, 3, 1)).reshape(cout, 9, cg)
        off += cg
        if cgp > cg:
            wj = jnp.pad(wj, ((0, 0), (0, 0), (0, cgp - cg)))
        chunks.append(wj.reshape(cout, 9 * cgp))
    return jnp.concatenate(chunks, axis=1).astype(compute_dtype)


def rrdb_forward(x_nchw, block_params, compute_dtype=jnp.bfloat16):
    """RRDB.forward: one fused Pallas kernel.  Input / output NCHW (f32)."""
    N, C, H, W = x_nchw.shape
    M = H * W
    c0 = C
    g = int(block_params[0][0][0].shape[0])
    n_blocks = len(block_params)

    assert c0 % 8 == 0 and g % 8 == 0, "channel counts must be sublane aligned"
    assert M % 128 == 0, "H*W must be a multiple of 128 (lane-dense layout)"
    # TODO(synk): spatial row tiling with a (5*n_blocks)-row halo for H*W that
    # does not fit VMEM (production ESRGAN sizes, esp. v7x 64 MiB budget).

    # Pad channel groups so every tap-slab store is a full packed-tile store.
    sub_pack = 16 if compute_dtype == jnp.bfloat16 else 8
    c0p = _round_up(c0, sub_pack)
    gp = _round_up(g, sub_pack)

    base = _round_up(W + 1, 128)              # left zero pad,  >= W+1 lanes
    P = base + _round_up(M + W + 1, 128)      # right zero pad, >= W+1 lanes

    x0 = x_nchw.reshape(N, C, M)    # pure reshape: channels->sublane, HW->lane

    args = [x0]
    in_specs = [pl.BlockSpec((1, c0, M), lambda n: (n, 0, 0))]
    for p in block_params:
        for (w, b) in p:
            wr = _reorder_weight(w, c0, g, c0p, gp, compute_dtype)
            args.append(wr)
            in_specs.append(pl.BlockSpec(wr.shape, lambda n: (0, 0)))
            br = b.reshape(-1, 1).astype(jnp.float32)
            args.append(br)
            in_specs.append(pl.BlockSpec(br.shape, lambda n: (0, 0)))

    kernel = _make_rrdb_kernel(c0, g, c0p, gp, W, M, base, P, n_blocks)

    out = pl.pallas_call(
        kernel,
        out_shape=jax.ShapeDtypeStruct((N, c0, M), x_nchw.dtype),
        grid=(N,),
        in_specs=in_specs,
        out_specs=pl.BlockSpec((1, c0, M), lambda n: (n, 0, 0)),
        scratch_shapes=[
            pltpu.VMEM((max(c0p, gp), P), compute_dtype),         # pad_ref
            pltpu.VMEM((9 * (c0p + 4 * gp), M), compute_dtype),   # tap_ref
            pltpu.VMEM((c0, M), jnp.float32),                     # act_ref
        ],
        compiler_params=pltpu.CompilerParams(
            dimension_semantics=("parallel",)),
    )(*args)
    return out.reshape(N, C, H, W)


# ------------------------- parameter initialization ------------------------ #

def init_rrdb_block_params(key, num_feat, num_grow_ch):
    """Mimics rrdb_block.__init__: kaiming_normal_ * 0.1 weights, default bias."""
    dims = [
        (num_grow_ch, num_feat),
        (num_grow_ch, num_feat + num_grow_ch),
        (num_grow_ch, num_feat + 2 * num_grow_ch),
        (num_grow_ch, num_feat + 3 * num_grow_ch),
        (num_feat, num_feat + 4 * num_grow_ch),
    ]
    params = []
    for (cout, cin) in dims:
        key, kw, kb = jax.random.split(key, 3)
        fan_in = cin * 9
        std = (2.0 / fan_in) ** 0.5                               # kaiming_normal_
        w = jax.random.normal(kw, (cout, cin, 3, 3), jnp.float32) * std * 0.1
        bound = 1.0 / fan_in ** 0.5                               # torch default bias
        b = jax.random.uniform(kb, (cout,), jnp.float32, minval=-bound, maxval=bound)
        params.append((w, b))
    return params, key


def init_rrdb_params(key, num_feat, num_grow_ch):
    blocks = []
    for _ in range(3):
        p, key = init_rrdb_block_params(key, num_feat, num_grow_ch)
        blocks.append(p)
    return blocks, key


# ---------------------------- pure-JAX reference ---------------------------- #

def _lrelu(x):
    return jnp.where(x >= 0.0, x, 0.2 * x)


def _ref_conv(x, w, b):
    y = jax.lax.conv_general_dilated(
        x, w, window_strides=(1, 1), padding=((1, 1), (1, 1)),
        dimension_numbers=("NCHW", "OIHW", "NCHW"),
        precision=jax.lax.Precision.HIGHEST)
    return y + b[None, :, None, None]


def rrdb_reference(x, block_params):
    out = x
    for p in block_params:
        (w1, b1), (w2, b2), (w3, b3), (w4, b4), (w5, b5) = p
        z1 = _lrelu(_ref_conv(out, w1, b1))
        z2 = _lrelu(_ref_conv(jnp.concatenate([out, z1], 1), w2, b2))
        z3 = _lrelu(_ref_conv(jnp.concatenate([out, z1, z2], 1), w3, b3))
        z4 = _lrelu(_ref_conv(jnp.concatenate([out, z1, z2, z3], 1), w4, b4))
        z5 = _ref_conv(jnp.concatenate([out, z1, z2, z3, z4], 1), w5, b5)
        out = z5 * 0.2 + out
    return out * 0.2 + x


# ---------------------------------- main ------------------------------------ #

if __name__ == "__main__":
    num_feat, num_grow_ch = 16, 8
    N, H, W = 2, 16, 16

    key = jax.random.PRNGKey(0)
    key, kx = jax.random.split(key)
    x = jax.random.normal(kx, (N, num_feat, H, W), jnp.float32)   # NCHW like PyTorch

    params, key = init_rrdb_params(key, num_feat, num_grow_ch)

    out = jax.jit(rrdb_forward)(x, params)
    out = jax.block_until_ready(out)

    assert out.shape == x.shape and out.dtype == x.dtype
    ref = rrdb_reference(x, params)
    max_err = float(jnp.max(jnp.abs(out - ref)))
    # bf16 matmul operands with f32 accumulation; expected error well below 1e-2.
    assert max_err < 1e-2, f"numerical mismatch vs reference: {max_err}"
    print("KERNEL_OK")
</pallas_src>

<mosaic_0001>
module attributes {stable_mosaic.version = 11 : i64} {
  func.func @kernel(%arg0: i32, %arg1: memref<1x16x256xf32, #tpu.memory_space<vmem>>, %arg2: memref<8x144xbf16, #tpu.memory_space<vmem>>, %arg3: memref<8x1xf32, #tpu.memory_space<vmem>>, %arg4: memref<8x288xbf16, #tpu.memory_space<vmem>>, %arg5: memref<8x1xf32, #tpu.memory_space<vmem>>, %arg6: memref<8x432xbf16, #tpu.memory_space<vmem>>, %arg7: memref<8x1xf32, #tpu.memory_space<vmem>>, %arg8: memref<8x576xbf16, #tpu.memory_space<vmem>>, %arg9: memref<8x1xf32, #tpu.memory_space<vmem>>, %arg10: memref<16x720xbf16, #tpu.memory_space<vmem>>, %arg11: memref<16x1xf32, #tpu.memory_space<vmem>>, %arg12: memref<8x144xbf16, #tpu.memory_space<vmem>>, %arg13: memref<8x1xf32, #tpu.memory_space<vmem>>, %arg14: memref<8x288xbf16, #tpu.memory_space<vmem>>, %arg15: memref<8x1xf32, #tpu.memory_space<vmem>>, %arg16: memref<8x432xbf16, #tpu.memory_space<vmem>>, %arg17: memref<8x1xf32, #tpu.memory_space<vmem>>, %arg18: memref<8x576xbf16, #tpu.memory_space<vmem>>, %arg19: memref<8x1xf32, #tpu.memory_space<vmem>>, %arg20: memref<16x720xbf16, #tpu.memory_space<vmem>>, %arg21: memref<16x1xf32, #tpu.memory_space<vmem>>, %arg22: memref<8x144xbf16, #tpu.memory_space<vmem>>, %arg23: memref<8x1xf32, #tpu.memory_space<vmem>>, %arg24: memref<8x288xbf16, #tpu.memory_space<vmem>>, %arg25: memref<8x1xf32, #tpu.memory_space<vmem>>, %arg26: memref<8x432xbf16, #tpu.memory_space<vmem>>, %arg27: memref<8x1xf32, #tpu.memory_space<vmem>>, %arg28: memref<8x576xbf16, #tpu.memory_space<vmem>>, %arg29: memref<8x1xf32, #tpu.memory_space<vmem>>, %arg30: memref<16x720xbf16, #tpu.memory_space<vmem>>, %arg31: memref<16x1xf32, #tpu.memory_space<vmem>>, %arg32: memref<1x16x256xf32, #tpu.memory_space<vmem>>, %arg33: memref<16x512xbf16, #tpu.memory_space<vmem>>, %arg34: memref<720x256xbf16, #tpu.memory_space<vmem>>, %arg35: memref<16x256xf32, #tpu.memory_space<vmem>>) attributes {dimension_semantics = [#tpu.dimension_semantics<parallel>], iteration_bounds = array<i64: 2>, scalar_prefetch = 0 : i64, scratch_operands = 3 : i64, tpu.core_type = #tpu.core_type<tc>, window_params = [{transform_indices = @transform_0, window_bounds = array<i64: 1, 16, 256>}, {pipeline_mode = #tpu.pipeline_mode<synchronous>, transform_indices = @transform_1, window_bounds = array<i64: 8, 144>}, {pipeline_mode = #tpu.pipeline_mode<synchronous>, transform_indices = @transform_2, window_bounds = array<i64: 8, 1>}, {pipeline_mode = #tpu.pipeline_mode<synchronous>, transform_indices = @transform_3, window_bounds = array<i64: 8, 288>}, {pipeline_mode = #tpu.pipeline_mode<synchronous>, transform_indices = @transform_4, window_bounds = array<i64: 8, 1>}, {pipeline_mode = #tpu.pipeline_mode<synchronous>, transform_indices = @transform_5, window_bounds = array<i64: 8, 432>}, {pipeline_mode = #tpu.pipeline_mode<synchronous>, transform_indices = @transform_6, window_bounds = array<i64: 8, 1>}, {pipeline_mode = #tpu.pipeline_mode<synchronous>, transform_indices = @transform_7, window_bounds = array<i64: 8, 576>}, {pipeline_mode = #tpu.pipeline_mode<synchronous>, transform_indices = @transform_8, window_bounds = array<i64: 8, 1>}, {pipeline_mode = #tpu.pipeline_mode<synchronous>, transform_indices = @transform_9, window_bounds = array<i64: 16, 720>}, {pipeline_mode = #tpu.pipeline_mode<synchronous>, transform_indices = @transform_10, window_bounds = array<i64: 16, 1>}, {pipeline_mode = #tpu.pipeline_mode<synchronous>, transform_indices = @transform_11, window_bounds = array<i64: 8, 144>}, {pipeline_mode = #tpu.pipeline_mode<synchronous>, transform_indices = @transform_12, window_bounds = array<i64: 8, 1>}, {pipeline_mode = #tpu.pipeline_mode<synchronous>, transform_indices = @transform_13, window_bounds = array<i64: 8, 288>}, {pipeline_mode = #tpu.pipeline_mode<synchronous>, transform_indices = @transform_14, window_bounds = array<i64: 8, 1>}, {pipeline_mode = #tpu.pipeline_mode<synchronous>, transform_indices = @transform_15, window_bounds = array<i64: 8, 432>}, {pipeline_mode = #tpu.pipeline_mode<synchronous>, transform_indices = @transform_16, window_bounds = array<i64: 8, 1>}, {pipeline_mode = #tpu.pipeline_mode<synchronous>, transform_indices = @transform_17, window_bounds = array<i64: 8, 576>}, {pipeline_mode = #tpu.pipeline_mode<synchronous>, transform_indices = @transform_18, window_bounds = array<i64: 8, 1>}, {pipeline_mode = #tpu.pipeline_mode<synchronous>, transform_indices = @transform_19, window_bounds = array<i64: 16, 720>}, {pipeline_mode = #tpu.pipeline_mode<synchronous>, transform_indices = @transform_20, window_bounds = array<i64: 16, 1>}, {pipeline_mode = #tpu.pipeline_mode<synchronous>, transform_indices = @transform_21, window_bounds = array<i64: 8, 144>}, {pipeline_mode = #tpu.pipeline_mode<synchronous>, transform_indices = @transform_22, window_bounds = array<i64: 8, 1>}, {pipeline_mode = #tpu.pipeline_mode<synchronous>, transform_indices = @transform_23, window_bounds = array<i64: 8, 288>}, {pipeline_mode = #tpu.pipeline_mode<synchronous>, transform_indices = @transform_24, window_bounds = array<i64: 8, 1>}, {pipeline_mode = #tpu.pipeline_mode<synchronous>, transform_indices = @transform_25, window_bounds = array<i64: 8, 432>}, {pipeline_mode = #tpu.pipeline_mode<synchronous>, transform_indices = @transform_26, window_bounds = array<i64: 8, 1>}, {pipeline_mode = #tpu.pipeline_mode<synchronous>, transform_indices = @transform_27, window_bounds = array<i64: 8, 576>}, {pipeline_mode = #tpu.pipeline_mode<synchronous>, transform_indices = @transform_28, window_bounds = array<i64: 8, 1>}, {pipeline_mode = #tpu.pipeline_mode<synchronous>, transform_indices = @transform_29, window_bounds = array<i64: 16, 720>}, {pipeline_mode = #tpu.pipeline_mode<synchronous>, transform_indices = @transform_30, window_bounds = array<i64: 16, 1>}, {transform_indices = @transform_31, window_bounds = array<i64: 1, 16, 256>}]} {
    %cst = arith.constant 0.000000e+00 : bf16
    %0 = vector.broadcast %cst : bf16 to vector<16x128xbf16>
    %c0 = arith.constant 0 : index
    %c0_0 = arith.constant 0 : index
    %1 = vector.load %arg33[%c0, %c0_0] : memref<16x512xbf16, #tpu.memory_space<vmem>>, vector<16x128xbf16>
    tpu.vector_store %arg33[%c0, %c0_0], %0 {strides = array<i32>} : memref<16x512xbf16, #tpu.memory_space<vmem>>, vector<16x128xbf16>,
    %cst_1 = arith.constant 0.000000e+00 : bf16
    %2 = vector.broadcast %cst_1 : bf16 to vector<16x128xbf16>
    %c0_2 = arith.constant 0 : index
    %c384 = arith.constant 384 : index
    %3 = vector.load %arg33[%c0_2, %c384] : memref<16x512xbf16, #tpu.memory_space<vmem>>, vector<16x128xbf16>
    tpu.vector_store %arg33[%c0_2, %c384], %2 {strides = array<i32>} : memref<16x512xbf16, #tpu.memory_space<vmem>>, vector<16x128xbf16>,
    %4 = tpu.iota {dimensions = array<i32: 1>} : vector<1x256xi32>
    %c16_i32 = arith.constant 16 : i32
    %c0_i32 = arith.constant 0 : i32
    %5 = arith.cmpi eq, %c16_i32, %c0_i32 : i32
    %c1_i32 = arith.constant 1 : i32
    %6 = arith.select %5, %c1_i32, %c16_i32 : i32
    %7 = vector.broadcast %6 : i32 to vector<1x256xi32>
    %8 = arith.remsi %4, %7 : vector<1x256xi32>
    %c0_i32_3 = arith.constant 0 : i32
    %9 = vector.broadcast %c0_i32_3 : i32 to vector<1x256xi32>
    %10 = arith.cmpi ne, %8, %9 : vector<1x256xi32>
    %c0_i32_4 = arith.constant 0 : i32
    %11 = vector.broadcast %c0_i32_4 : i32 to vector<1x256xi32>
    %12 = arith.cmpi slt, %8, %11 : vector<1x256xi32>
    %c0_i32_5 = arith.constant 0 : i32
    %13 = arith.cmpi slt, %6, %c0_i32_5 : i32
    %14 = vector.broadcast %13 : i1 to vector<1x256xi1>
    %15 = vector.broadcast %14 : vector<1x256xi1> to vector<1x256xi1>
    %16 = arith.xori %12, %15 : vector<1x256xi1>
    %17 = arith.andi %16, %10 : vector<1x256xi1>
    %18 = vector.broadcast %6 : i32 to vector<1x256xi32>
    %19 = arith.addi %8, %18 : vector<1x256xi32>
    %20 = arith.select %17, %19, %8 : vector<1x256xi1>, vector<1x256xi32>
    %c1_i32_6 = arith.constant 1 : i32
    %21 = vector.broadcast %c1_i32_6 : i32 to vector<1x256xi32>
    %22 = arith.cmpi sge, %20, %21 : vector<1x256xi32>
    %23 = arith.extui %22 : vector<1x256xi1> to vector<1x256xi32>
    %24 = arith.sitofp %23 : vector<1x256xi32> to vector<1x256xf32>
    %25 = arith.truncf %24 : vector<1x256xf32> to vector<1x256xbf16>
    %c14_i32 = arith.constant 14 : i32
    %26 = vector.broadcast %c14_i32 : i32 to vector<1x256xi32>
    %27 = arith.cmpi sle, %20, %26 : vector<1x256xi32>
    %28 = arith.extui %27 : vector<1x256xi1> to vector<1x256xi32>
    %29 = arith.sitofp %28 : vector<1x256xi32> to vector<1x256xf32>
    %30 = arith.truncf %29 : vector<1x256xf32> to vector<1x256xbf16>
    %c0_7 = arith.constant 0 : index
    %c0_8 = arith.constant 0 : index
    %c0_9 = arith.constant 0 : index
    %31 = vector.load %arg1[%c0_7, %c0_8, %c0_9] : memref<1x16x256xf32, #tpu.memory_space<vmem>>, vector<1x16x256xf32>
    %32 = vector.shape_cast %31 : vector<1x16x256xf32> to vector<16x256xf32>
    %c0_10 = arith.constant 0 : index
    %c0_11 = arith.constant 0 : index
    %33 = vector.load %arg35[%c0_10, %c0_11] : memref<16x256xf32, #tpu.memory_space<vmem>>, vector<16x256xf32>
    tpu.vector_store %arg35[%c0_10, %c0_11], %32 {strides = array<i32>} : memref<16x256xf32, #tpu.memory_space<vmem>>, vector<16x256xf32>,
    %c0_12 = arith.constant 0 : index
    %c0_13 = arith.constant 0 : index
    %34 = vector.load %arg35[%c0_12, %c0_13] : memref<16x256xf32, #tpu.memory_space<vmem>>, vector<16x256xf32>
    %35 = arith.truncf %34 : vector<16x256xf32> to vector<16x256xbf16>
    %c0_14 = arith.constant 0 : index
    %c128 = arith.constant 128 : index
    %36 = vector.load %arg33[%c0_14, %c128] : memref<16x512xbf16, #tpu.memory_space<vmem>>, vector<16x256xbf16>
    tpu.vector_store %arg33[%c0_14, %c128], %35 {strides = array<i32>} : memref<16x512xbf16, #tpu.memory_space<vmem>>, vector<16x256xbf16>,
    %c0_15 = arith.constant 0 : index
    %c111 = arith.constant 111 : index
    %37 = vector.load %arg33[%c0_15, %c111] : memref<16x512xbf16, #tpu.memory_space<vmem>>, vector<16x256xbf16>
    %38 = vector.broadcast %25 : vector<1x256xbf16> to vector<16x256xbf16>
    %39 = arith.mulf %37, %38 : vector<16x256xbf16>
    %c0_16 = arith.constant 0 : index
    %c0_17 = arith.constant 0 : index
    %40 = vector.load %arg34[%c0_16, %c0_17] : memref<720x256xbf16, #tpu.memory_space<vmem>>, vector<16x256xbf16>
    tpu.vector_store %arg34[%c0_16, %c0_17], %39 {strides = array<i32>} : memref<720x256xbf16, #tpu.memory_space<vmem>>, vector<16x256xbf16>,
    %c0_18 = arith.constant 0 : index
    %c112 = arith.constant 112 : index
    %41 = vector.load %arg33[%c0_18, %c112] : memref<16x512xbf16, #tpu.memory_space<vmem>>, vector<16x256xbf16>
    %c16 = arith.constant 16 : index
    %c0_19 = arith.constant 0 : index
    %42 = vector.load %arg34[%c16, %c0_19] : memref<720x256xbf16, #tpu.memory_space<vmem>>, vector<16x256xbf16>
    tpu.vector_store %arg34[%c16, %c0_19], %41 {strides = array<i32>} : memref<720x256xbf16, #tpu.memory_space<vmem>>, vector<16x256xbf16>,
    %c0_20 = arith.constant 0 : index
    %c113 = arith.constant 113 : index
    %43 = vector.load %arg33[%c0_20, %c113] : memref<16x512xbf16, #tpu.memory_space<vmem>>, vector<16x256xbf16>
    %44 = vector.broadcast %30 : vector<1x256xbf16> to vector<16x256xbf16>
    %45 = arith.mulf %43, %44 : vector<16x256xbf16>
    %c32 = arith.constant 32 : index
    %c0_21 = arith.constant 0 : index
    %46 = vector.load %arg34[%c32, %c0_21] : memref<720x256xbf16, #tpu.memory_space<vmem>>, vector<16x256xbf16>
    tpu.vector_store %arg34[%c32, %c0_21], %45 {strides = array<i32>} : memref<720x256xbf16, #tpu.memory_space<vmem>>, vector<16x256xbf16>,
    %c0_22 = arith.constant 0 : index
    %c127 = arith.constant 127 : index
    %47 = vector.load %arg33[%c0_22, %c127] : memref<16x512xbf16, #tpu.memory_space<vmem>>, vector<16x256xbf16>
    %48 = vector.broadcast %25 : vector<1x256xbf16> to vector<16x256xbf16>
    %49 = arith.mulf %47, %48 : vector<16x256xbf16>
    %c48 = arith.constant 48 : index
    %c0_23 = arith.constant 0 : index
    %50 = vector.load %arg34[%c48, %c0_23] : memref<720x256xbf16, #tpu.memory_space<vmem>>, vector<16x256xbf16>
    tpu.vector_store %arg34[%c48, %c0_23], %49 {strides = array<i32>} : memref<720x256xbf16, #tpu.memory_space<vmem>>, vector<16x256xbf16>,
    %c0_24 = arith.constant 0 : index
    %c128_25 = arith.constant 128 : index
    %51 = vector.load %arg33[%c0_24, %c128_25] : memref<16x512xbf16, #tpu.memory_space<vmem>>, vector<16x256xbf16>
    %c64 = arith.constant 64 : index
    %c0_26 = arith.constant 0 : index
    %52 = vector.load %arg34[%c64, %c0_26] : memref<720x256xbf16, #tpu.memory_space<vmem>>, vector<16x256xbf16>
    tpu.vector_store %arg34[%c64, %c0_26], %51 {strides = array<i32>} : memref<720x256xbf16, #tpu.memory_space<vmem>>, vector<16x256xbf16>,
    %c0_27 = arith.constant 0 : index
    %c129 = arith.constant 129 : index
    %53 = vector.load %arg33[%c0_27, %c129] : memref<16x512xbf16, #tpu.memory_space<vmem>>, vector<16x256xbf16>
    %54 = vector.broadcast %30 : vector<1x256xbf16> to vector<16x256xbf16>
    %55 = arith.mulf %53, %54 : vector<16x256xbf16>
    %c80 = arith.constant 80 : index
    %c0_28 = arith.constant 0 : index
    %56 = vector.load %arg34[%c80, %c0_28] : memref<720x256xbf16, #tpu.memory_space<vmem>>, vector<16x256xbf16>
    tpu.vector_store %arg34[%c80, %c0_28], %55 {strides = array<i32>} : memref<720x256xbf16, #tpu.memory_space<vmem>>, vector<16x256xbf16>,
    %c0_29 = arith.constant 0 : index
    %c143 = arith.constant 143 : index
    %57 = vector.load %arg33[%c0_29, %c143] : memref<16x512xbf16, #tpu.memory_space<vmem>>, vector<16x256xbf16>
    %58 = vector.broadcast %25 : vector<1x256xbf16> to vector<16x256xbf16>
    %59 = arith.mulf %57, %58 : vector<16x256xbf16>
    %c96 = arith.constant 96 : index
    %c0_30 = arith.constant 0 : index
    %60 = vector.load %arg34[%c96, %c0_30] : memref<720x256xbf16, #tpu.memory_space<vmem>>, vector<16x256xbf16>
    tpu.vector_store %arg34[%c96, %c0_30], %59 {strides = array<i32>} : memref<720x256xbf16, #tpu.memory_space<vmem>>, vector<16x256xbf16>,
    %c0_31 = arith.constant 0 : index
    %c144 = arith.constant 144 : index
    %61 = vector.load %arg33[%c0_31, %c144] : memref<16x512xbf16, #tpu.memory_space<vmem>>, vector<16x256xbf16>
    %c112_32 = arith.constant 112 : index
    %c0_33 = arith.constant 0 : index
    %62 = vector.load %arg34[%c112_32, %c0_33] : memref<720x256xbf16, #tpu.memory_space<vmem>>, vector<16x256xbf16>
    tpu.vector_store %arg34[%c112_32, %c0_33], %61 {strides = array<i32>} : memref<720x256xbf16, #tpu.memory_space<vmem>>, vector<16x256xbf16>,
    %c0_34 = arith.constant 0 : index
    %c145 = arith.constant 145 : index
    %63 = vector.load %arg33[%c0_34, %c145] : memref<16x512xbf16, #tpu.memory_space<vmem>>, vector<16x256xbf16>
    %64 = vector.broadcast %30 : vector<1x256xbf16> to vector<16x256xbf16>
    %65 = arith.mulf %63, %64 : vector<16x256xbf16>
    %c128_35 = arith.constant 128 : index
    %c0_36 = arith.constant 0 : index
    %66 = vector.load %arg34[%c128_35, %c0_36] : memref<720x256xbf16, #tpu.memory_space<vmem>>, vector<16x256xbf16>
    tpu.vector_store %arg34[%c128_35, %c0_36], %65 {strides = array<i32>} : memref<720x256xbf16, #tpu.memory_space<vmem>>, vector<16x256xbf16>,
    %c0_37 = arith.constant 0 : index
    %c0_38 = arith.constant 0 : index
    %67 = vector.load %arg2[%c0_37, %c0_38] : memref<8x144xbf16, #tpu.memory_space<vmem>>, vector<8x144xbf16>
    %c0_39 = arith.constant 0 : index
    %c0_40 = arith.constant 0 : index
    %68 = vector.load %arg34[%c0_39, %c0_40] : memref<720x256xbf16, #tpu.memory_space<vmem>>, vector<144x256xbf16>
    %cst_41 = arith.constant dense<0.000000e+00> : vector<8x256xf32>
    %69 = tpu.matmul %67, %68, %cst_41 {dimension_numbers = #tpu.dot_dimension_numbers<[1], [0], [0], [1], [0, 0, 1, 1], [], []>} : vector<8x144xbf16>, vector<144x256xbf16>, vector<8x256xf32> -> vector<8x256xf32>
    %c0_42 = arith.constant 0 : index
    %c0_43 = arith.constant 0 : index
    %70 = vector.load %arg3[%c0_42, %c0_43] : memref<8x1xf32, #tpu.memory_space<vmem>>, vector<8x1xf32>
    %71 = vector.broadcast %70 : vector<8x1xf32> to vector<8x256xf32>
    %72 = arith.addf %69, %71 : vector<8x256xf32>
    %cst_44 = arith.constant 0.000000e+00 : f32
    %73 = vector.broadcast %cst_44 : f32 to vector<8x256xf32>
    %74 = arith.cmpf oge, %72, %73 : vector<8x256xf32>
    %cst_45 = arith.constant 2.000000e-01 : f32
    %75 = vector.broadcast %cst_45 : f32 to vector<8x256xf32>
    %76 = arith.mulf %75, %72 : vector<8x256xf32>
    %77 = arith.select %74, %72, %76 : vector<8x256xi1>, vector<8x256xf32>
    %78 = arith.truncf %77 : vector<8x256xf32> to vector<8x256xbf16>
    %c0_46 = arith.constant 0 : index
    %c128_47 = arith.constant 128 : index
    %79 = vector.load %arg33[%c0_46, %c128_47] : memref<16x512xbf16, #tpu.memory_space<vmem>>, vector<8x256xbf16>
    tpu.vector_store %arg33[%c0_46, %c128_47], %78 {strides = array<i32>} : memref<16x512xbf16, #tpu.memory_space<vmem>>, vector<8x256xbf16>,
    %c0_48 = arith.constant 0 : index
    %c111_49 = arith.constant 111 : index
    %80 = vector.load %arg33[%c0_48, %c111_49] : memref<16x512xbf16, #tpu.memory_space<vmem>>, vector<16x256xbf16>
    %81 = vector.broadcast %25 : vector<1x256xbf16> to vector<16x256xbf16>
    %82 = arith.mulf %80, %81 : vector<16x256xbf16>
    %c144_50 = arith.constant 144 : index
    %c0_51 = arith.constant 0 : index
    %83 = vector.load %arg34[%c144_50, %c0_51] : memref<720x256xbf16, #tpu.memory_space<vmem>>, vector<16x256xbf16>
    tpu.vector_store %arg34[%c144_50, %c0_51], %82 {strides = array<i32>} : memref<720x256xbf16, #tpu.memory_space<vmem>>, vector<16x256xbf16>,
    %c0_52 = arith.constant 0 : index
    %c112_53 = arith.constant 112 : index
    %84 = vector.load %arg33[%c0_52, %c112_53] : memref<16x512xbf16, #tpu.memory_space<vmem>>, vector<16x256xbf16>
    %c160 = arith.constant 160 : index
    %c0_54 = arith.constant 0 : index
    %85 = vector.load %arg34[%c160, %c0_54] : memref<720x256xbf16, #tpu.memory_space<vmem>>, vector<16x256xbf16>
    tpu.vector_store %arg34[%c160, %c0_54], %84 {strides = array<i32>} : memref<720x256xbf16, #tpu.memory_space<vmem>>, vector<16x256xbf16>,
    %c0_55 = arith.constant 0 : index
    %c113_56 = arith.constant 113 : index
    %86 = vector.load %arg33[%c0_55, %c113_56] : memref<16x512xbf16, #tpu.memory_space<vmem>>, vector<16x256xbf16>
    %87 = vector.broadcast %30 : vector<1x256xbf16> to vector<16x256xbf16>
    %88 = arith.mulf %86, %87 : vector<16x256xbf16>
    %c176 = arith.constant 176 : index
    %c0_57 = arith.constant 0 : index
    %89 = vector.load %arg34[%c176, %c0_57] : memref<720x256xbf16, #tpu.memory_space<vmem>>, vector<16x256xbf16>
    tpu.vector_store %arg34[%c176, %c0_57], %88 {strides = array<i32>} : memref<720x256xbf16, #tpu.memory_space<vmem>>, vector<16x256xbf16>,
    %c0_58 = arith.constant 0 : index
    %c127_59 = arith.constant 127 : index
    %90 = vector.load %arg33[%c0_58, %c127_59] : memref<16x512xbf16, #tpu.memory_space<vmem>>, vector<16x256xbf16>
    %91 = vector.broadcast %25 : vector<1x256xbf16> to vector<16x256xbf16>
    %92 = arith.mulf %90, %91 : vector<16x256xbf16>
    %c192 = arith.constant 192 : index
    %c0_60 = arith.constant 0 : index
    %93 = vector.load %arg34[%c192, %c0_60] : memref<720x256xbf16, #tpu.memory_space<vmem>>, vector<16x256xbf16>
    tpu.vector_store %arg34[%c192, %c0_60], %92 {strides = array<i32>} : memref<720x256xbf16, #tpu.memory_space<vmem>>, vector<16x256xbf16>,
    %c0_61 = arith.constant 0 : index
    %c128_62 = arith.constant 128 : index
    %94 = vector.load %arg33[%c0_61, %c128_62] : memref<16x512xbf16, #tpu.memory_space<vmem>>, vector<16x256xbf16>
    %c208 = arith.constant 208 : index
    %c0_63 = arith.constant 0 : index
    %95 = vector.load %arg34[%c208, %c0_63] : memref<720x256xbf16, #tpu.memory_space<vmem>>, vector<16x256xbf16>
    tpu.vector_store %arg34[%c208, %c0_63], %94 {strides = array<i32>} : memref<720x256xbf16, #tpu.memory_space<vmem>>, vector<16x256xbf16>,
    %c0_64 = arith.constant 0 : index
    %c129_65 = arith.constant 129 : index
    %96 = vector.load %arg33[%c0_64, %c129_65] : memref<16x512xbf16, #tpu.memory_space<vmem>>, vector<16x256xbf16>
    %97 = vector.broadcast %30 : vector<1x256xbf16> to vector<16x256xbf16>
    %98 = arith.mulf %96, %97 : vector<16x256xbf16>
    %c224 = arith.constant 224 : index
    %c0_66 = arith.constant 0 : index
    %99 = vector.load %arg34[%c224, %c0_66] : memref<720x256xbf16, #tpu.memory_space<vmem>>, vector<16x256xbf16>
    tpu.vector_store %arg34[%c224, %c0_66], %98 {strides = array<i32>} : memref<720x256xbf16, #tpu.memory_space<vmem>>, vector<16x256xbf16>,
    %c0_67 = arith.constant 0 : index
    %c143_68 = arith.constant 143 : index
    %100 = vector.load %arg33[%c0_67, %c143_68] : memref<16x512xbf16, #tpu.memory_space<vmem>>, vector<16x256xbf16>
    %101 = vector.broadcast %25 : vector<1x256xbf16> to vector<16x256xbf16>
    %102 = arith.mulf %100, %101 : vector<16x256xbf16>
    %c240 = arith.constant 240 : index
    %c0_69 = arith.constant 0 : index
    %103 = vector.load %arg34[%c240, %c0_69] : memref<720x256xbf16, #tpu.memory_space<vmem>>, vector<16x256xbf16>
    tpu.vector_store %arg34[%c240, %c0_69], %102 {strides = array<i32>} : memref<720x256xbf16, #tpu.memory_space<vmem>>, vector<16x256xbf16>,
    %c0_70 = arith.constant 0 : index
    %c144_71 = arith.constant 144 : index
    %104 = vector.load %arg33[%c0_70, %c144_71] : memref<16x512xbf16, #tpu.memory_space<vmem>>, vector<16x256xbf16>
    %c256 = arith.constant 256 : index
    %c0_72 = arith.constant 0 : index
    %105 = vector.load %arg34[%c256, %c0_72] : memref<720x256xbf16, #tpu.memory_space<vmem>>, vector<16x256xbf16>
    tpu.vector_store %arg34[%c256, %c0_72], %104 {strides = array<i32>} : memref<720x256xbf16, #tpu.memory_space<vmem>>, vector<16x256xbf16>,
    %c0_73 = arith.constant 0 : index
    %c145_74 = arith.constant 145 : index
    %106 = vector.load %arg33[%c0_73, %c145_74] : memref<16x512xbf16, #tpu.memory_space<vmem>>, vector<16x256xbf16>
    %107 = vector.broadcast %30 : vector<1x256xbf16> to vector<16x256xbf16>
    %108 = arith.mulf %106, %107 : vector<16x256xbf16>
    %c272 = arith.constant 272 : index
    %c0_75 = arith.constant 0 : index
    %109 = vector.load %arg34[%c272, %c0_75] : memref<720x256xbf16, #tpu.memory_space<vmem>>, vector<16x256xbf16>
    tpu.vector_store %arg34[%c272, %c0_75], %108 {strides = array<i32>} : memref<720x256xbf16, #tpu.memory_space<vmem>>, vector<16x256xbf16>,
    %c0_76 = arith.constant 0 : index
    %c0_77 = arith.constant 0 : index
    %110 = vector.load %arg4[%c0_76, %c0_77] : memref<8x288xbf16, #tpu.memory_space<vmem>>, vector<8x288xbf16>
    %c0_78 = arith.constant 0 : index
    %c0_79 = arith.constant 0 : index
    %111 = vector.load %arg34[%c0_78, %c0_79] : memref<720x256xbf16, #tpu.memory_space<vmem>>, vector<288x256xbf16>
    %cst_80 = arith.constant dense<0.000000e+00> : vector<8x256xf32>
    %112 = tpu.matmul %110, %111, %cst_80 {dimension_numbers = #tpu.dot_dimension_numbers<[1], [0], [0], [1], [0, 0, 1, 1], [], []>} : vector<8x288xbf16>, vector<288x256xbf16>, vector<8x256xf32> -> vector<8x256xf32>
    %c0_81 = arith.constant 0 : index
    %c0_82 = arith.constant 0 : index
    %113 = vector.load %arg5[%c0_81, %c0_82] : memref<8x1xf32, #tpu.memory_space<vmem>>, vector<8x1xf32>
    %114 = vector.broadcast %113 : vector<8x1xf32> to vector<8x256xf32>
    %115 = arith.addf %112, %114 : vector<8x256xf32>
    %cst_83 = arith.constant 0.000000e+00 : f32
    %116 = vector.broadcast %cst_83 : f32 to vector<8x256xf32>
    %117 = arith.cmpf oge, %115, %116 : vector<8x256xf32>
    %cst_84 = arith.constant 2.000000e-01 : f32
    %118 = vector.broadcast %cst_84 : f32 to vector<8x256xf32>
    %119 = arith.mulf %118, %115 : vector<8x256xf32>
    %120 = arith.select %117, %115, %119 : vector<8x256xi1>, vector<8x256xf32>
    %121 = arith.truncf %120 : vector<8x256xf32> to vector<8x256xbf16>
    %c0_85 = arith.constant 0 : index
    %c128_86 = arith.constant 128 : index
    %122 = vector.load %arg33[%c0_85, %c128_86] : memref<16x512xbf16, #tpu.memory_space<vmem>>, vector<8x256xbf16>
    tpu.vector_store %arg33[%c0_85, %c128_86], %121 {strides = array<i32>} : memref<16x512xbf16, #tpu.memory_space<vmem>>, vector<8x256xbf16>,
    %c0_87 = arith.constant 0 : index
    %c111_88 = arith.constant 111 : index
    %123 = vector.load %arg33[%c0_87, %c111_88] : memref<16x512xbf16, #tpu.memory_space<vmem>>, vector<16x256xbf16>
    %124 = vector.broadcast %25 : vector<1x256xbf16> to vector<16x256xbf16>
    %125 = arith.mulf %123, %124 : vector<16x256xbf16>
    %c288 = arith.constant 288 : index
    %c0_89 = arith.constant 0 : index
    %126 = vector.load %arg34[%c288, %c0_89] : memref<720x256xbf16, #tpu.memory_space<vmem>>, vector<16x256xbf16>
    tpu.vector_store %arg34[%c288, %c0_89], %125 {strides = array<i32>} : memref<720x256xbf16, #tpu.memory_space<vmem>>, vector<16x256xbf16>,
    %c0_90 = arith.constant 0 : index
    %c112_91 = arith.constant 112 : index
    %127 = vector.load %arg33[%c0_90, %c112_91] : memref<16x512xbf16, #tpu.memory_space<vmem>>, vector<16x256xbf16>
    %c304 = arith.constant 304 : index
    %c0_92 = arith.constant 0 : index
    %128 = vector.load %arg34[%c304, %c0_92] : memref<720x256xbf16, #tpu.memory_space<vmem>>, vector<16x256xbf16>
    tpu.vector_store %arg34[%c304, %c0_92], %127 {strides = array<i32>} : memref<720x256xbf16, #tpu.memory_space<vmem>>, vector<16x256xbf16>,
    %c0_93 = arith.constant 0 : index
    %c113_94 = arith.constant 113 : index
    %129 = vector.load %arg33[%c0_93, %c113_94] : memref<16x512xbf16, #tpu.memory_space<vmem>>, vector<16x256xbf16>
    %130 = vector.broadcast %30 : vector<1x256xbf16> to vector<16x256xbf16>
    %131 = arith.mulf %129, %130 : vector<16x256xbf16>
    %c320 = arith.constant 320 : index
    %c0_95 = arith.constant 0 : index
    %132 = vector.load %arg34[%c320, %c0_95] : memref<720x256xbf16, #tpu.memory_space<vmem>>, vector<16x256xbf16>
    tpu.vector_store %arg34[%c320, %c0_95], %131 {strides = array<i32>} : memref<720x256xbf16, #tpu.memory_space<vmem>>, vector<16x256xbf16>,
    %c0_96 = arith.constant 0 : index
    %c127_97 = arith.constant 127 : index
    %133 = vector.load %arg33[%c0_96, %c127_97] : memref<16x512xbf16, #tpu.memory_space<vmem>>, vector<16x256xbf16>
    %134 = vector.broadcast %25 : vector<1x256xbf16> to vector<16x256xbf16>
    %135 = arith.mulf %133, %134 : vector<16x256xbf16>
    %c336 = arith.constant 336 : index
    %c0_98 = arith.constant 0 : index
    %136 = vector.load %arg34[%c336, %c0_98] : memref<720x256xbf16, #tpu.memory_space<vmem>>, vector<16x256xbf16>
    tpu.vector_store %arg34[%c336, %c0_98], %135 {strides = array<i32>} : memref<720x256xbf16, #tpu.memory_space<vmem>>, vector<16x256xbf16>,
    %c0_99 = arith.constant 0 : index
    %c128_100 = arith.constant 128 : index
    %137 = vector.load %arg33[%c0_99, %c128_100] : memref<16x512xbf16, #tpu.memory_space<vmem>>, vector<16x256xbf16>
    %c352 = arith.constant 352 : index
    %c0_101 = arith.constant 0 : index
    %138 = vector.load %arg34[%c352, %c0_101] : memref<720x256xbf16, #tpu.memory_space<vmem>>, vector<16x256xbf16>
    tpu.vector_store %arg34[%c352, %c0_101], %137 {strides = array<i32>} : memref<720x256xbf16, #tpu.memory_space<vmem>>, vector<16x256xbf16>,
    %c0_102 = arith.constant 0 : index
    %c129_103 = arith.constant 129 : index
    %139 = vector.load %arg33[%c0_102, %c129_103] : memref<16x512xbf16, #tpu.memory_space<vmem>>, vector<16x256xbf16>
    %140 = vector.broadcast %30 : vector<1x256xbf16> to vector<16x256xbf16>
    %141 = arith.mulf %139, %140 : vector<16x256xbf16>
    %c368 = arith.constant 368 : index
    %c0_104 = arith.constant 0 : index
    %142 = vector.load %arg34[%c368, %c0_104] : memref<720x256xbf16, #tpu.memory_space<vmem>>, vector<16x256xbf16>
    tpu.vector_store %arg34[%c368, %c0_104], %141 {strides = array<i32>} : memref<720x256xbf16, #tpu.memory_space<vmem>>, vector<16x256xbf16>,
    %c0_105 = arith.constant 0 : index
    %c143_106 = arith.constant 143 : index
    %143 = vector.load %arg33[%c0_105, %c143_106] : memref<16x512xbf16, #tpu.memory_space<vmem>>, vector<16x256xbf16>
    %144 = vector.broadcast %25 : vector<1x256xbf16> to vector<16x256xbf16>
    %145 = arith.mulf %143, %144 : vector<16x256xbf16>
    %c384_107 = arith.constant 384 : index
    %c0_108 = arith.constant 0 : index
    %146 = vector.load %arg34[%c384_107, %c0_108] : memref<720x256xbf16, #tpu.memory_space<vmem>>, vector<16x256xbf16>
    tpu.vector_store %arg34[%c384_107, %c0_108], %145 {strides = array<i32>} : memref<720x256xbf16, #tpu.memory_space<vmem>>, vector<16x256xbf16>,
    %c0_109 = arith.constant 0 : index
    %c144_110 = arith.constant 144 : index
    %147 = vector.load %arg33[%c0_109, %c144_110] : memref<16x512xbf16, #tpu.memory_space<vmem>>, vector<16x256xbf16>
    %c400 = arith.constant 400 : index
    %c0_111 = arith.constant 0 : index
    %148 = vector.load %arg34[%c400, %c0_111] : memref<720x256xbf16, #tpu.memory_space<vmem>>, vector<16x256xbf16>
    tpu.vector_store %arg34[%c400, %c0_111], %147 {strides = array<i32>} : memref<720x256xbf16, #tpu.memory_space<vmem>>, vector<16x256xbf16>,
    %c0_112 = arith.constant 0 : index
    %c145_113 = arith.constant 145 : index
    %149 = vector.load %arg33[%c0_112, %c145_113] : memref<16x512xbf16, #tpu.memory_space<vmem>>, vector<16x256xbf16>
    %150 = vector.broadcast %30 : vector<1x256xbf16> to vector<16x256xbf16>
    %151 = arith.mulf %149, %150 : vector<16x256xbf16>
    %c416 = arith.constant 416 : index
    %c0_114 = arith.constant 0 : index
    %152 = vector.load %arg34[%c416, %c0_114] : memref<720x256xbf16, #tpu.memory_space<vmem>>, vector<16x256xbf16>
    tpu.vector_store %arg34[%c416, %c0_114], %151 {strides = array<i32>} : memref<720x256xbf16, #tpu.memory_space<vmem>>, vector<16x256xbf16>,
    %c0_115 = arith.constant 0 : index
    %c0_116 = arith.constant 0 : index
    %153 = vector.load %arg6[%c0_115, %c0_116] : memref<8x432xbf16, #tpu.memory_space<vmem>>, vector<8x432xbf16>
    %c0_117 = arith.constant 0 : index
    %c0_118 = arith.constant 0 : index
    %154 = vector.load %arg34[%c0_117, %c0_118] : memref<720x256xbf16, #tpu.memory_space<vmem>>, vector<432x256xbf16>
    %cst_119 = arith.constant dense<0.000000e+00> : vector<8x256xf32>
    %155 = tpu.matmul %153, %154, %cst_119 {dimension_numbers = #tpu.dot_dimension_numbers<[1], [0], [0], [1], [0, 0, 1, 1], [], []>} : vector<8x432xbf16>, vector<432x256xbf16>, vector<8x256xf32> -> vector<8x256xf32>
    %c0_120 = arith.constant 0 : index
    %c0_121 = arith.constant 0 : index
    %156 = vector.load %arg7[%c0_120, %c0_121] : memref<8x1xf32, #tpu.memory_space<vmem>>, vector<8x1xf32>
    %157 = vector.broadcast %156 : vector<8x1xf32> to vector<8x256xf32>
    %158 = arith.addf %155, %157 : vector<8x256xf32>
    %cst_122 = arith.constant 0.000000e+00 : f32
    %159 = vector.broadcast %cst_122 : f32 to vector<8x256xf32>
    %160 = arith.cmpf oge, %158, %159 : vector<8x256xf32>
    %cst_123 = arith.constant 2.000000e-01 : f32
    %161 = vector.broadcast %cst_123 : f32 to vector<8x256xf32>
    %162 = arith.mulf %161, %158 : vector<8x256xf32>
    %163 = arith.select %160, %158, %162 : vector<8x256xi1>, vector<8x256xf32>
    %164 = arith.truncf %163 : vector<8x256xf32> to vector<8x256xbf16>
    %c0_124 = arith.constant 0 : index
    %c128_125 = arith.constant 128 : index
    %165 = vector.load %arg33[%c0_124, %c128_125] : memref<16x512xbf16, #tpu.memory_space<vmem>>, vector<8x256xbf16>
    tpu.vector_store %arg33[%c0_124, %c128_125], %164 {strides = array<i32>} : memref<16x512xbf16, #tpu.memory_space<vmem>>, vector<8x256xbf16>,
    %c0_126 = arith.constant 0 : index
    %c111_127 = arith.constant 111 : index
    %166 = vector.load %arg33[%c0_126, %c111_127] : memref<16x512xbf16, #tpu.memory_space<vmem>>, vector<16x256xbf16>
    %167 = vector.broadcast %25 : vector<1x256xbf16> to vector<16x256xbf16>
    %168 = arith.mulf %166, %167 : vector<16x256xbf16>
    %c432 = arith.constant 432 : index
    %c0_128 = arith.constant 0 : index
    %169 = vector.load %arg34[%c432, %c0_128] : memref<720x256xbf16, #tpu.memory_space<vmem>>, vector<16x256xbf16>
    tpu.vector_store %arg34[%c432, %c0_128], %168 {strides = array<i32>} : memref<720x256xbf16, #tpu.memory_space<vmem>>, vector<16x256xbf16>,
    %c0_129 = arith.constant 0 : index
    %c112_130 = arith.constant 112 : index
    %170 = vector.load %arg33[%c0_129, %c112_130] : memref<16x512xbf16, #tpu.memory_space<vmem>>, vector<16x256xbf16>
    %c448 = arith.constant 448 : index
    %c0_131 = arith.constant 0 : index
    %171 = vector.load %arg34[%c448, %c0_131] : memref<720x256xbf16, #tpu.memory_space<vmem>>, vector<16x256xbf16>
    tpu.vector_store %arg34[%c448, %c0_131], %170 {strides = array<i32>} : memref<720x256xbf16, #tpu.memory_space<vmem>>, vector<16x256xbf16>,
    %c0_132 = arith.constant 0 : index
    %c113_133 = arith.constant 113 : index
    %172 = vector.load %arg33[%c0_132, %c113_133] : memref<16x512xbf16, #tpu.memory_space<vmem>>, vector<16x256xbf16>
    %173 = vector.broadcast %30 : vector<1x256xbf16> to vector<16x256xbf16>
    %174 = arith.mulf %172, %173 : vector<16x256xbf16>
    %c464 = arith.constant 464 : index
    %c0_134 = arith.constant 0 : index
    %175 = vector.load %arg34[%c464, %c0_134] : memref<720x256xbf16, #tpu.memory_space<vmem>>, vector<16x256xbf16>
    tpu.vector_store %arg34[%c464, %c0_134], %174 {strides = array<i32>} : memref<720x256xbf16, #tpu.memory_space<vmem>>, vector<16x256xbf16>,
    %c0_135 = arith.constant 0 : index
    %c127_136 = arith.constant 127 : index
    %176 = vector.load %arg33[%c0_135, %c127_136] : memref<16x512xbf16, #tpu.memory_space<vmem>>, vector<16x256xbf16>
    %177 = vector.broadcast %25 : vector<1x256xbf16> to vector<16x256xbf16>
    %178 = arith.mulf %176, %177 : vector<16x256xbf16>
    %c480 = arith.constant 480 : index
    %c0_137 = arith.constant 0 : index
    %179 = vector.load %arg34[%c480, %c0_137] : memref<720x256xbf16, #tpu.memory_space<vmem>>, vector<16x256xbf16>
    tpu.vector_store %arg34[%c480, %c0_137], %178 {strides = array<i32>} : memref<720x256xbf16, #tpu.memory_space<vmem>>, vector<16x256xbf16>,
    %c0_138 = arith.constant 0 : index
    %c128_139 = arith.constant 128 : index
    %180 = vector.load %arg33[%c0_138, %c128_139] : memref<16x512xbf16, #tpu.memory_space<vmem>>, vector<16x256xbf16>
    %c496 = arith.constant 496 : index
    %c0_140 = arith.constant 0 : index
    %181 = vector.load %arg34[%c496, %c0_140] : memref<720x256xbf16, #tpu.memory_space<vmem>>, vector<16x256xbf16>
    tpu.vector_store %arg34[%c496, %c0_140], %180 {strides = array<i32>} : memref<720x256xbf16, #tpu.memory_space<vmem>>, vector<16x256xbf16>,
    %c0_141 = arith.constant 0 : index
    %c129_142 = arith.constant 129 : index
    %182 = vector.load %arg33[%c0_141, %c129_142] : memref<16x512xbf16, #tpu.memory_space<vmem>>, vector<16x256xbf16>
    %183 = vector.broadcast %30 : vector<1x256xbf16> to vector<16x256xbf16>
    %184 = arith.mulf %182, %183 : vector<16x256xbf16>
    %c512 = arith.constant 512 : index
    %c0_143 = arith.constant 0 : index
    %185 = vector.load %arg34[%c512, %c0_143] : memref<720x256xbf16, #tpu.memory_space<vmem>>, vector<16x256xbf16>
    tpu.vector_store %arg34[%c512, %c0_143], %184 {strides = array<i32>} : memref<720x256xbf16, #tpu.memory_space<vmem>>, vector<16x256xbf16>,
    %c0_144 = arith.constant 0 : index
    %c143_145 = arith.constant 143 : index
    %186 = vector.load %arg33[%c0_144, %c143_145] : memref<16x512xbf16, #tpu.memory_space<vmem>>, vector<16x256xbf16>
    %187 = vector.broadcast %25 : vector<1x256xbf16> to vector<16x256xbf16>
    %188 = arith.mulf %186, %187 : vector<16x256xbf16>
    %c528 = arith.constant 528 : index
    %c0_146 = arith.constant 0 : index
    %189 = vector.load %arg34[%c528, %c0_146] : memref<720x256xbf16, #tpu.memory_space<vmem>>, vector<16x256xbf16>
    tpu.vector_store %arg34[%c528, %c0_146], %188 {strides = array<i32>} : memref<720x256xbf16, #tpu.memory_space<vmem>>, vector<16x256xbf16>,
    %c0_147 = arith.constant 0 : index
    %c144_148 = arith.constant 144 : index
    %190 = vector.load %arg33[%c0_147, %c144_148] : memref<16x512xbf16, #tpu.memory_space<vmem>>, vector<16x256xbf16>
    %c544 = arith.constant 544 : index
    %c0_149 = arith.constant 0 : index
    %191 = vector.load %arg34[%c544, %c0_149] : memref<720x256xbf16, #tpu.memory_space<vmem>>, vector<16x256xbf16>
    tpu.vector_store %arg34[%c544, %c0_149], %190 {strides = array<i32>} : memref<720x256xbf16, #tpu.memory_space<vmem>>, vector<16x256xbf16>,
    %c0_150 = arith.constant 0 : index
    %c145_151 = arith.constant 145 : index
    %192 = vector.load %arg33[%c0_150, %c145_151] : memref<16x512xbf16, #tpu.memory_space<vmem>>, vector<16x256xbf16>
    %193 = vector.broadcast %30 : vector<1x256xbf16> to vector<16x256xbf16>
    %194 = arith.mulf %192, %193 : vector<16x256xbf16>
    %c560 = arith.constant 560 : index
    %c0_152 = arith.constant 0 : index
    %195 = vector.load %arg34[%c560, %c0_152] : memref<720x256xbf16, #tpu.memory_space<vmem>>, vector<16x256xbf16>
    tpu.vector_store %arg34[%c560, %c0_152], %194 {strides = array<i32>} : memref<720x256xbf16, #tpu.memory_space<vmem>>, vector<16x256xbf16>,
    %c0_153 = arith.constant 0 : index
    %c0_154 = arith.constant 0 : index
    %196 = vector.load %arg8[%c0_153, %c0_154] : memref<8x576xbf16, #tpu.memory_space<vmem>>, vector<8x576xbf16>
    %c0_155 = arith.constant 0 : index
    %c0_156 = arith.constant 0 : index
    %197 = vector.load %arg34[%c0_155, %c0_156] : memref<720x256xbf16, #tpu.memory_space<vmem>>, vector<576x256xbf16>
    %cst_157 = arith.constant dense<0.000000e+00> : vector<8x256xf32>
    %198 = tpu.matmul %196, %197, %cst_157 {dimension_numbers = #tpu.dot_dimension_numbers<[1], [0], [0], [1], [0, 0, 1, 1], [], []>} : vector<8x576xbf16>, vector<576x256xbf16>, vector<8x256xf32> -> vector<8x256xf32>
    %c0_158 = arith.constant 0 : index
    %c0_159 = arith.constant 0 : index
    %199 = vector.load %arg9[%c0_158, %c0_159] : memref<8x1xf32, #tpu.memory_space<vmem>>, vector<8x1xf32>
    %200 = vector.broadcast %199 : vector<8x1xf32> to vector<8x256xf32>
    %201 = arith.addf %198, %200 : vector<8x256xf32>
    %cst_160 = arith.constant 0.000000e+00 : f32
    %202 = vector.broadcast %cst_160 : f32 to vector<8x256xf32>
    %203 = arith.cmpf oge, %201, %202 : vector<8x256xf32>
    %cst_161 = arith.constant 2.000000e-01 : f32
    %204 = vector.broadcast %cst_161 : f32 to vector<8x256xf32>
    %205 = arith.mulf %204, %201 : vector<8x256xf32>
    %206 = arith.select %203, %201, %205 : vector<8x256xi1>, vector<8x256xf32>
    %207 = arith.truncf %206 : vector<8x256xf32> to vector<8x256xbf16>
    %c0_162 = arith.constant 0 : index
    %c128_163 = arith.constant 128 : index
    %208 = vector.load %arg33[%c0_162, %c128_163] : memref<16x512xbf16, #tpu.memory_space<vmem>>, vector<8x256xbf16>
    tpu.vector_store %arg33[%c0_162, %c128_163], %207 {strides = array<i32>} : memref<16x512xbf16, #tpu.memory_space<vmem>>, vector<8x256xbf16>,
    %c0_164 = arith.constant 0 : index
    %c111_165 = arith.constant 111 : index
    %209 = vector.load %arg33[%c0_164, %c111_165] : memref<16x512xbf16, #tpu.memory_space<vmem>>, vector<16x256xbf16>
    %210 = vector.broadcast %25 : vector<1x256xbf16> to vector<16x256xbf16>
    %211 = arith.mulf %209, %210 : vector<16x256xbf16>
    %c576 = arith.constant 576 : index
    %c0_166 = arith.constant 0 : index
    %212 = vector.load %arg34[%c576, %c0_166] : memref<720x256xbf16, #tpu.memory_space<vmem>>, vector<16x256xbf16>
    tpu.vector_store %arg34[%c576, %c0_166], %211 {strides = array<i32>} : memref<720x256xbf16, #tpu.memory_space<vmem>>, vector<16x256xbf16>,
    %c0_167 = arith.constant 0 : index
    %c112_168 = arith.constant 112 : index
    %213 = vector.load %arg33[%c0_167, %c112_168] : memref<16x512xbf16, #tpu.memory_space<vmem>>, vector<16x256xbf16>
    %c592 = arith.constant 592 : index
    %c0_169 = arith.constant 0 : index
    %214 = vector.load %arg34[%c592, %c0_169] : memref<720x256xbf16, #tpu.memory_space<vmem>>, vector<16x256xbf16>
    tpu.vector_store %arg34[%c592, %c0_169], %213 {strides = array<i32>} : memref<720x256xbf16, #tpu.memory_space<vmem>>, vector<16x256xbf16>,
    %c0_170 = arith.constant 0 : index
    %c113_171 = arith.constant 113 : index
    %215 = vector.load %arg33[%c0_170, %c113_171] : memref<16x512xbf16, #tpu.memory_space<vmem>>, vector<16x256xbf16>
    %216 = vector.broadcast %30 : vector<1x256xbf16> to vector<16x256xbf16>
    %217 = arith.mulf %215, %216 : vector<16x256xbf16>
    %c608 = arith.constant 608 : index
    %c0_172 = arith.constant 0 : index
    %218 = vector.load %arg34[%c608, %c0_172] : memref<720x256xbf16, #tpu.memory_space<vmem>>, vector<16x256xbf16>
    tpu.vector_store %arg34[%c608, %c0_172], %217 {strides = array<i32>} : memref<720x256xbf16, #tpu.memory_space<vmem>>, vector<16x256xbf16>,
    %c0_173 = arith.constant 0 : index
    %c127_174 = arith.constant 127 : index
    %219 = vector.load %arg33[%c0_173, %c127_174] : memref<16x512xbf16, #tpu.memory_space<vmem>>, vector<16x256xbf16>
    %220 = vector.broadcast %25 : vector<1x256xbf16> to vector<16x256xbf16>
    %221 = arith.mulf %219, %220 : vector<16x256xbf16>
    %c624 = arith.constant 624 : index
    %c0_175 = arith.constant 0 : index
    %222 = vector.load %arg34[%c624, %c0_175] : memref<720x256xbf16, #tpu.memory_space<vmem>>, vector<16x256xbf16>
    tpu.vector_store %arg34[%c624, %c0_175], %221 {strides = array<i32>} : memref<720x256xbf16, #tpu.memory_space<vmem>>, vector<16x256xbf16>,
    %c0_176 = arith.constant 0 : index
    %c128_177 = arith.constant 128 : index
    %223 = vector.load %arg33[%c0_176, %c128_177] : memref<16x512xbf16, #tpu.memory_space<vmem>>, vector<16x256xbf16>
    %c640 = arith.constant 640 : index
    %c0_178 = arith.constant 0 : index
    %224 = vector.load %arg34[%c640, %c0_178] : memref<720x256xbf16, #tpu.memory_space<vmem>>, vector<16x256xbf16>
    tpu.vector_store %arg34[%c640, %c0_178], %223 {strides = array<i32>} : memref<720x256xbf16, #tpu.memory_space<vmem>>, vector<16x256xbf16>,
    %c0_179 = arith.constant 0 : index
    %c129_180 = arith.constant 129 : index
    %225 = vector.load %arg33[%c0_179, %c129_180] : memref<16x512xbf16, #tpu.memory_space<vmem>>, vector<16x256xbf16>
    %226 = vector.broadcast %30 : vector<1x256xbf16> to vector<16x256xbf16>
    %227 = arith.mulf %225, %226 : vector<16x256xbf16>
    %c656 = arith.constant 656 : index
    %c0_181 = arith.constant 0 : index
    %228 = vector.load %arg34[%c656, %c0_181] : memref<720x256xbf16, #tpu.memory_space<vmem>>, vector<16x256xbf16>
    tpu.vector_store %arg34[%c656, %c0_181], %227 {strides = array<i32>} : memref<720x256xbf16, #tpu.memory_space<vmem>>, vector<16x256xbf16>,
    %c0_182 = arith.constant 0 : index
    %c143_183 = arith.constant 143 : index
    %229 = vector.load %arg33[%c0_182, %c143_183] : memref<16x512xbf16, #tpu.memory_space<vmem>>, vector<16x256xbf16>
    %230 = vector.broadcast %25 : vector<1x256xbf16> to vector<16x256xbf16>
    %231 = arith.mulf %229, %230 : vector<16x256xbf16>
    %c672 = arith.constant 672 : index
    %c0_184 = arith.constant 0 : index
    %232 = vector.load %arg34[%c672, %c0_184] : memref<720x256xbf16, #tpu.memory_space<vmem>>, vector<16x256xbf16>
    tpu.vector_store %arg34[%c672, %c0_184], %231 {strides = array<i32>} : memref<720x256xbf16, #tpu.memory_space<vmem>>, vector<16x256xbf16>,
    %c0_185 = arith.constant 0 : index
    %c144_186 = arith.constant 144 : index
    %233 = vector.load %arg33[%c0_185, %c144_186] : memref<16x512xbf16, #tpu.memory_space<vmem>>, vector<16x256xbf16>
    %c688 = arith.constant 688 : index
    %c0_187 = arith.constant 0 : index
    %234 = vector.load %arg34[%c688, %c0_187] : memref<720x256xbf16, #tpu.memory_space<vmem>>, vector<16x256xbf16>
    tpu.vector_store %arg34[%c688, %c0_187], %233 {strides = array<i32>} : memref<720x256xbf16, #tpu.memory_space<vmem>>, vector<16x256xbf16>,
    %c0_188 = arith.constant 0 : index
    %c145_189 = arith.constant 145 : index
    %235 = vector.load %arg33[%c0_188, %c145_189] : memref<16x512xbf16, #tpu.memory_space<vmem>>, vector<16x256xbf16>
    %236 = vector.broadcast %30 : vector<1x256xbf16> to vector<16x256xbf16>
    %237 = arith.mulf %235, %236 : vector<16x256xbf16>
    %c704 = arith.constant 704 : index
    %c0_190 = arith.constant 0 : index
    %238 = vector.load %arg34[%c704, %c0_190] : memref<720x256xbf16, #tpu.memory_space<vmem>>, vector<16x256xbf16>
    tpu.vector_store %arg34[%c704, %c0_190], %237 {strides = array<i32>} : memref<720x256xbf16, #tpu.memory_space<vmem>>, vector<16x256xbf16>,
    %c0_191 = arith.constant 0 : index
    %c0_192 = arith.constant 0 : index
    %239 = vector.load %arg10[%c0_191, %c0_192] : memref<16x720xbf16, #tpu.memory_space<vmem>>, vector<16x720xbf16>
    %c0_193 = arith.constant 0 : index
    %c0_194 = arith.constant 0 : index
    %240 = vector.load %arg34[%c0_193, %c0_194] : memref<720x256xbf16, #tpu.memory_space<vmem>>, vector<720x256xbf16>
    %cst_195 = arith.constant dense<0.000000e+00> : vector<16x256xf32>
    %241 = tpu.matmul %239, %240, %cst_195 {dimension_numbers = #tpu.dot_dimension_numbers<[1], [0], [0], [1], [0, 0, 1, 1], [], []>} : vector<16x720xbf16>, vector<720x256xbf16>, vector<16x256xf32> -> vector<16x256xf32>
    %c0_196 = arith.constant 0 : index
    %c0_197 = arith.constant 0 : index
    %242 = vector.load %arg11[%c0_196, %c0_197] : memref<16x1xf32, #tpu.memory_space<vmem>>, vector<16x1xf32>
    %243 = vector.broadcast %242 : vector<16x1xf32> to vector<16x256xf32>
    %244 = arith.addf %241, %243 : vector<16x256xf32>
    %cst_198 = arith.constant 2.000000e-01 : f32
    %245 = vector.broadcast %cst_198 : f32 to vector<16x256xf32>
    %246 = arith.mulf %245, %244 : vector<16x256xf32>
    %c0_199 = arith.constant 0 : index
    %c0_200 = arith.constant 0 : index
    %247 = vector.load %arg35[%c0_199, %c0_200] : memref<16x256xf32, #tpu.memory_space<vmem>>, vector<16x256xf32>
    %248 = arith.addf %246, %247 : vector<16x256xf32>
    %c0_201 = arith.constant 0 : index
    %c0_202 = arith.constant 0 : index
    %249 = vector.load %arg35[%c0_201, %c0_202] : memref<16x256xf32, #tpu.memory_space<vmem>>, vector<16x256xf32>
    tpu.vector_store %arg35[%c0_201, %c0_202], %248 {strides = array<i32>} : memref<16x256xf32, #tpu.memory_space<vmem>>, vector<16x256xf32>,
    %c0_203 = arith.constant 0 : index
    %c0_204 = arith.constant 0 : index
    %250 = vector.load %arg35[%c0_203, %c0_204] : memref<16x256xf32, #tpu.memory_space<vmem>>, vector<16x256xf32>
    %251 = arith.truncf %250 : vector<16x256xf32> to vector<16x256xbf16>
    %c0_205 = arith.constant 0 : index
    %c128_206 = arith.constant 128 : index
    %252 = vector.load %arg33[%c0_205, %c128_206] : memref<16x512xbf16, #tpu.memory_space<vmem>>, vector<16x256xbf16>
    tpu.vector_store %arg33[%c0_205, %c128_206], %251 {strides = array<i32>} : memref<16x512xbf16, #tpu.memory_space<vmem>>, vector<16x256xbf16>,
    %c0_207 = arith.constant 0 : index
    %c111_208 = arith.constant 111 : index
    %253 = vector.load %arg33[%c0_207, %c111_208] : memref<16x512xbf16, #tpu.memory_space<vmem>>, vector<16x256xbf16>
    %254 = vector.broadcast %25 : vector<1x256xbf16> to vector<16x256xbf16>
    %255 = arith.mulf %253, %254 : vector<16x256xbf16>
    %c0_209 = arith.constant 0 : index
    %c0_210 = arith.constant 0 : index
    %256 = vector.load %arg34[%c0_209, %c0_210] : memref<720x256xbf16, #tpu.memory_space<vmem>>, vector<16x256xbf16>
    tpu.vector_store %arg34[%c0_209, %c0_210], %255 {strides = array<i32>} : memref<720x256xbf16, #tpu.memory_space<vmem>>, vector<16x256xbf16>,
    %c0_211 = arith.constant 0 : index
    %c112_212 = arith.constant 112 : index
    %257 = vector.load %arg33[%c0_211, %c112_212] : memref<16x512xbf16, #tpu.memory_space<vmem>>, vector<16x256xbf16>
    %c16_213 = arith.constant 16 : index
    %c0_214 = arith.constant 0 : index
    %258 = vector.load %arg34[%c16_213, %c0_214] : memref<720x256xbf16, #tpu.memory_space<vmem>>, vector<16x256xbf16>
    tpu.vector_store %arg34[%c16_213, %c0_214], %257 {strides = array<i32>} : memref<720x256xbf16, #tpu.memory_space<vmem>>, vector<16x256xbf16>,
    %c0_215 = arith.constant 0 : index
    %c113_216 = arith.constant 113 : index
    %259 = vector.load %arg33[%c0_215, %c113_216] : memref<16x512xbf16, #tpu.memory_space<vmem>>, vector<16x256xbf16>
    %260 = vector.broadcast %30 : vector<1x256xbf16> to vector<16x256xbf16>
    %261 = arith.mulf %259, %260 : vector<16x256xbf16>
    %c32_217 = arith.constant 32 : index
    %c0_218 = arith.constant 0 : index
    %262 = vector.load %arg34[%c32_217, %c0_218] : memref<720x256xbf16, #tpu.memory_space<vmem>>, vector<16x256xbf16>
    tpu.vector_store %arg34[%c32_217, %c0_218], %261 {strides = array<i32>} : memref<720x256xbf16, #tpu.memory_space<vmem>>, vector<16x256xbf16>,
    %c0_219 = arith.constant 0 : index
    %c127_220 = arith.constant 127 : index
    %263 = vector.load %arg33[%c0_219, %c127_220] : memref<16x512xbf16, #tpu.memory_space<vmem>>, vector<16x256xbf16>
    %264 = vector.broadcast %25 : vector<1x256xbf16> to vector<16x256xbf16>
    %265 = arith.mulf %263, %264 : vector<16x256xbf16>
    %c48_221 = arith.constant 48 : index
    %c0_222 = arith.constant 0 : index
    %266 = vector.load %arg34[%c48_221, %c0_222] : memref<720x256xbf16, #tpu.memory_space<vmem>>, vector<16x256xbf16>
    tpu.vector_store %arg34[%c48_221, %c0_222], %265 {strides = array<i32>} : memref<720x256xbf16, #tpu.memory_space<vmem>>, vector<16x256xbf16>,
    %c0_223 = arith.constant 0 : index
    %c128_224 = arith.constant 128 : index
    %267 = vector.load %arg33[%c0_223, %c128_224] : memref<16x512xbf16, #tpu.memory_space<vmem>>, vector<16x256xbf16>
    %c64_225 = arith.constant 64 : index
    %c0_226 = arith.constant 0 : index
    %268 = vector.load %arg34[%c64_225, %c0_226] : memref<720x256xbf16, #tpu.memory_space<vmem>>, vector<16x256xbf16>
    tpu.vector_store %arg34[%c64_225, %c0_226], %267 {strides = array<i32>} : memref<720x256xbf16, #tpu.memory_space<vmem>>, vector<16x256xbf16>,
    %c0_227 = arith.constant 0 : index
    %c129_228 = arith.constant 129 : index
    %269 = vector.load %arg33[%c0_227, %c129_228] : memref<16x512xbf16, #tpu.memory_space<vmem>>, vector<16x256xbf16>
    %270 = vector.broadcast %30 : vector<1x256xbf16> to vector<16x256xbf16>
    %271 = arith.mulf %269, %270 : vector<16x256xbf16>
    %c80_229 = arith.constant 80 : index
    %c0_230 = arith.constant 0 : index
    %272 = vector.load %arg34[%c80_229, %c0_230] : memref<720x256xbf16, #tpu.memory_space<vmem>>, vector<16x256xbf16>
    tpu.vector_store %arg34[%c80_229, %c0_230], %271 {strides = array<i32>} : memref<720x256xbf16, #tpu.memory_space<vmem>>, vector<16x256xbf16>,
    %c0_231 = arith.constant 0 : index
    %c143_232 = arith.constant 143 : index
    %273 = vector.load %arg33[%c0_231, %c143_232] : memref<16x512xbf16, #tpu.memory_space<vmem>>, vector<16x256xbf16>
    %274 = vector.broadcast %25 : vector<1x256xbf16> to vector<16x256xbf16>
    %275 = arith.mulf %273, %274 : vector<16x256xbf16>
    %c96_233 = arith.constant 96 : index
    %c0_234 = arith.constant 0 : index
    %276 = vector.load %arg34[%c96_233, %c0_234] : memref<720x256xbf16, #tpu.memory_space<vmem>>, vector<16x256xbf16>
    tpu.vector_store %arg34[%c96_233, %c0_234], %275 {strides = array<i32>} : memref<720x256xbf16, #tpu.memory_space<vmem>>, vector<16x256xbf16>,
    %c0_235 = arith.constant 0 : index
    %c144_236 = arith.constant 144 : index
    %277 = vector.load %arg33[%c0_235, %c144_236] : memref<16x512xbf16, #tpu.memory_space<vmem>>, vector<16x256xbf16>
    %c112_237 = arith.constant 112 : index
    %c0_238 = arith.constant 0 : index
    %278 = vector.load %arg34[%c112_237, %c0_238] : memref<720x256xbf16, #tpu.memory_space<vmem>>, vector<16x256xbf16>
    tpu.vector_store %arg34[%c112_237, %c0_238], %277 {strides = array<i32>} : memref<720x256xbf16, #tpu.memory_space<vmem>>, vector<16x256xbf16>,
    %c0_239 = arith.constant 0 : index
    %c145_240 = arith.constant 145 : index
    %279 = vector.load %arg33[%c0_239, %c145_240] : memref<16x512xbf16, #tpu.memory_space<vmem>>, vector<16x256xbf16>
    %280 = vector.broadcast %30 : vector<1x256xbf16> to vector<16x256xbf16>
    %281 = arith.mulf %279, %280 : vector<16x256xbf16>
    %c128_241 = arith.constant 128 : index
    %c0_242 = arith.constant 0 : index
    %282 = vector.load %arg34[%c128_241, %c0_242] : memref<720x256xbf16, #tpu.memory_space<vmem>>, vector<16x256xbf16>
    tpu.vector_store %arg34[%c128_241, %c0_242], %281 {strides = array<i32>} : memref<720x256xbf16, #tpu.memory_space<vmem>>, vector<16x256xbf16>,
    %c0_243 = arith.constant 0 : index
    %c0_244 = arith.constant 0 : index
    %283 = vector.load %arg12[%c0_243, %c0_244] : memref<8x144xbf16, #tpu.memory_space<vmem>>, vector<8x144xbf16>
    %c0_245 = arith.constant 0 : index
    %c0_246 = arith.constant 0 : index
    %284 = vector.load %arg34[%c0_245, %c0_246] : memref<720x256xbf16, #tpu.memory_space<vmem>>, vector<144x256xbf16>
    %cst_247 = arith.constant dense<0.000000e+00> : vector<8x256xf32>
    %285 = tpu.matmul %283, %284, %cst_247 {dimension_numbers = #tpu.dot_dimension_numbers<[1], [0], [0], [1], [0, 0, 1, 1], [], []>} : vector<8x144xbf16>, vector<144x256xbf16>, vector<8x256xf32> -> vector<8x256xf32>
    %c0_248 = arith.constant 0 : index
    %c0_249 = arith.constant 0 : index
    %286 = vector.load %arg13[%c0_248, %c0_249] : memref<8x1xf32, #tpu.memory_space<vmem>>, vector<8x1xf32>
    %287 = vector.broadcast %286 : vector<8x1xf32> to vector<8x256xf32>
    %288 = arith.addf %285, %287 : vector<8x256xf32>
    %cst_250 = arith.constant 0.000000e+00 : f32
    %289 = vector.broadcast %cst_250 : f32 to vector<8x256xf32>
    %290 = arith.cmpf oge, %288, %289 : vector<8x256xf32>
    %cst_251 = arith.constant 2.000000e-01 : f32
    %291 = vector.broadcast %cst_251 : f32 to vector<8x256xf32>
    %292 = arith.mulf %291, %288 : vector<8x256xf32>
    %293 = arith.select %290, %288, %292 : vector<8x256xi1>, vector<8x256xf32>
    %294 = arith.truncf %293 : vector<8x256xf32> to vector<8x256xbf16>
    %c0_252 = arith.constant 0 : index
    %c128_253 = arith.constant 128 : index
    %295 = vector.load %arg33[%c0_252, %c128_253] : memref<16x512xbf16, #tpu.memory_space<vmem>>, vector<8x256xbf16>
    tpu.vector_store %arg33[%c0_252, %c128_253], %294 {strides = array<i32>} : memref<16x512xbf16, #tpu.memory_space<vmem>>, vector<8x256xbf16>,
    %c0_254 = arith.constant 0 : index
    %c111_255 = arith.constant 111 : index
    %296 = vector.load %arg33[%c0_254, %c111_255] : memref<16x512xbf16, #tpu.memory_space<vmem>>, vector<16x256xbf16>
    %297 = vector.broadcast %25 : vector<1x256xbf16> to vector<16x256xbf16>
    %298 = arith.mulf %296, %297 : vector<16x256xbf16>
    %c144_256 = arith.constant 144 : index
    %c0_257 = arith.constant 0 : index
    %299 = vector.load %arg34[%c144_256, %c0_257] : memref<720x256xbf16, #tpu.memory_space<vmem>>, vector<16x256xbf16>
    tpu.vector_store %arg34[%c144_256, %c0_257], %298 {strides = array<i32>} : memref<720x256xbf16, #tpu.memory_space<vmem>>, vector<16x256xbf16>,
    %c0_258 = arith.constant 0 : index
    %c112_259 = arith.constant 112 : index
    %300 = vector.load %arg33[%c0_258, %c112_259] : memref<16x512xbf16, #tpu.memory_space<vmem>>, vector<16x256xbf16>
    %c160_260 = arith.constant 160 : index
    %c0_261 = arith.constant 0 : index
    %301 = vector.load %arg34[%c160_260, %c0_261] : memref<720x256xbf16, #tpu.memory_space<vmem>>, vector<16x256xbf16>
    tpu.vector_store %arg34[%c160_260, %c0_261], %300 {strides = array<i32>} : memref<720x256xbf16, #tpu.memory_space<vmem>>, vector<16x256xbf16>,
    %c0_262 = arith.constant 0 : index
    %c113_263 = arith.constant 113 : index
    %302 = vector.load %arg33[%c0_262, %c113_263] : memref<16x512xbf16, #tpu.memory_space<vmem>>, vector<16x256xbf16>
    %303 = vector.broadcast %30 : vector<1x256xbf16> to vector<16x256xbf16>
    %304 = arith.mulf %302, %303 : vector<16x256xbf16>
    %c176_264 = arith.constant 176 : index
    %c0_265 = arith.constant 0 : index
    %305 = vector.load %arg34[%c176_264, %c0_265] : memref<720x256xbf16, #tpu.memory_space<vmem>>, vector<16x256xbf16>
    tpu.vector_store %arg34[%c176_264, %c0_265], %304 {strides = array<i32>} : memref<720x256xbf16, #tpu.memory_space<vmem>>, vector<16x256xbf16>,
    %c0_266 = arith.constant 0 : index
    %c127_267 = arith.constant 127 : index
    %306 = vector.load %arg33[%c0_266, %c127_267] : memref<16x512xbf16, #tpu.memory_space<vmem>>, vector<16x256xbf16>
    %307 = vector.broadcast %25 : vector<1x256xbf16> to vector<16x256xbf16>
    %308 = arith.mulf %306, %307 : vector<16x256xbf16>
    %c192_268 = arith.constant 192 : index
    %c0_269 = arith.constant 0 : index
    %309 = vector.load %arg34[%c192_268, %c0_269] : memref<720x256xbf16, #tpu.memory_space<vmem>>, vector<16x256xbf16>
    tpu.vector_store %arg34[%c192_268, %c0_269], %308 {strides = array<i32>} : memref<720x256xbf16, #tpu.memory_space<vmem>>, vector<16x256xbf16>,
    %c0_270 = arith.constant 0 : index
    %c128_271 = arith.constant 128 : index
    %310 = vector.load %arg33[%c0_270, %c128_271] : memref<16x512xbf16, #tpu.memory_space<vmem>>, vector<16x256xbf16>
    %c208_272 = arith.constant 208 : index
    %c0_273 = arith.constant 0 : index
    %311 = vector.load %arg34[%c208_272, %c0_273] : memref<720x256xbf16, #tpu.memory_space<vmem>>, vector<16x256xbf16>
    tpu.vector_store %arg34[%c208_272, %c0_273], %310 {strides = array<i32>} : memref<720x256xbf16, #tpu.memory_space<vmem>>, vector<16x256xbf16>,
    %c0_274 = arith.constant 0 : index
    %c129_275 = arith.constant 129 : index
    %312 = vector.load %arg33[%c0_274, %c129_275] : memref<16x512xbf16, #tpu.memory_space<vmem>>, vector<16x256xbf16>
    %313 = vector.broadcast %30 : vector<1x256xbf16> to vector<16x256xbf16>
    %314 = arith.mulf %312, %313 : vector<16x256xbf16>
    %c224_276 = arith.constant 224 : index
    %c0_277 = arith.constant 0 : index
    %315 = vector.load %arg34[%c224_276, %c0_277] : memref<720x256xbf16, #tpu.memory_space<vmem>>, vector<16x256xbf16>
    tpu.vector_store %arg34[%c224_276, %c0_277], %314 {strides = array<i32>} : memref<720x256xbf16, #tpu.memory_space<vmem>>, vector<16x256xbf16>,
    %c0_278 = arith.constant 0 : index
    %c143_279 = arith.constant 143 : index
    %316 = vector.load %arg33[%c0_278, %c143_279] : memref<16x512xbf16, #tpu.memory_space<vmem>>, vector<16x256xbf16>
    %317 = vector.broadcast %25 : vector<1x256xbf16> to vector<16x256xbf16>
    %318 = arith.mulf %316, %317 : vector<16x256xbf16>
    %c240_280 = arith.constant 240 : index
    %c0_281 = arith.constant 0 : index
    %319 = vector.load %arg34[%c240_280, %c0_281] : memref<720x256xbf16, #tpu.memory_space<vmem>>, vector<16x256xbf16>
    tpu.vector_store %arg34[%c240_280, %c0_281], %318 {strides = array<i32>} : memref<720x256xbf16, #tpu.memory_space<vmem>>, vector<16x256xbf16>,
    %c0_282 = arith.constant 0 : index
    %c144_283 = arith.constant 144 : index
    %320 = vector.load %arg33[%c0_282, %c144_283] : memref<16x512xbf16, #tpu.memory_space<vmem>>, vector<16x256xbf16>
    %c256_284 = arith.constant 256 : index
    %c0_285 = arith.constant 0 : index
    %321 = vector.load %arg34[%c256_284, %c0_285] : memref<720x256xbf16, #tpu.memory_space<vmem>>, vector<16x256xbf16>
    tpu.vector_store %arg34[%c256_284, %c0_285], %320 {strides = array<i32>} : memref<720x256xbf16, #tpu.memory_space<vmem>>, vector<16x256xbf16>,
    %c0_286 = arith.constant 0 : index
    %c145_287 = arith.constant 145 : index
    %322 = vector.load %arg33[%c0_286, %c145_287] : memref<16x512xbf16, #tpu.memory_space<vmem>>, vector<16x256xbf16>
    %323 = vector.broadcast %30 : vector<1x256xbf16> to vector<16x256xbf16>
    %324 = arith.mulf %322, %323 : vector<16x256xbf16>
    %c272_288 = arith.constant 272 : index
    %c0_289 = arith.constant 0 : index
    %325 = vector.load %arg34[%c272_288, %c0_289] : memref<720x256xbf16, #tpu.memory_space<vmem>>, vector<16x256xbf16>
    tpu.vector_store %arg34[%c272_288, %c0_289], %324 {strides = array<i32>} : memref<720x256xbf16, #tpu.memory_space<vmem>>, vector<16x256xbf16>,
    %c0_290 = arith.constant 0 : index
    %c0_291 = arith.constant 0 : index
    %326 = vector.load %arg14[%c0_290, %c0_291] : memref<8x288xbf16, #tpu.memory_space<vmem>>, vector<8x288xbf16>
    %c0_292 = arith.constant 0 : index
    %c0_293 = arith.constant 0 : index
    %327 = vector.load %arg34[%c0_292, %c0_293] : memref<720x256xbf16, #tpu.memory_space<vmem>>, vector<288x256xbf16>
    %cst_294 = arith.constant dense<0.000000e+00> : vector<8x256xf32>
    %328 = tpu.matmul %326, %327, %cst_294 {dimension_numbers = #tpu.dot_dimension_numbers<[1], [0], [0], [1], [0, 0, 1, 1], [], []>} : vector<8x288xbf16>, vector<288x256xbf16>, vector<8x256xf32> -> vector<8x256xf32>
    %c0_295 = arith.constant 0 : index
    %c0_296 = arith.constant 0 : index
    %329 = vector.load %arg15[%c0_295, %c0_296] : memref<8x1xf32, #tpu.memory_space<vmem>>, vector<8x1xf32>
    %330 = vector.broadcast %329 : vector<8x1xf32> to vector<8x256xf32>
    %331 = arith.addf %328, %330 : vector<8x256xf32>
    %cst_297 = arith.constant 0.000000e+00 : f32
    %332 = vector.broadcast %cst_297 : f32 to vector<8x256xf32>
    %333 = arith.cmpf oge, %331, %332 : vector<8x256xf32>
    %cst_298 = arith.constant 2.000000e-01 : f32
    %334 = vector.broadcast %cst_298 : f32 to vector<8x256xf32>
    %335 = arith.mulf %334, %331 : vector<8x256xf32>
    %336 = arith.select %333, %331, %335 : vector<8x256xi1>, vector<8x256xf32>
    %337 = arith.truncf %336 : vector<8x256xf32> to vector<8x256xbf16>
    %c0_299 = arith.constant 0 : index
    %c128_300 = arith.constant 128 : index
    %338 = vector.load %arg33[%c0_299, %c128_300] : memref<16x512xbf16, #tpu.memory_space<vmem>>, vector<8x256xbf16>
    tpu.vector_store %arg33[%c0_299, %c128_300], %337 {strides = array<i32>} : memref<16x512xbf16, #tpu.memory_space<vmem>>, vector<8x256xbf16>,
    %c0_301 = arith.constant 0 : index
    %c111_302 = arith.constant 111 : index
    %339 = vector.load %arg33[%c0_301, %c111_302] : memref<16x512xbf16, #tpu.memory_space<vmem>>, vector<16x256xbf16>
    %340 = vector.broadcast %25 : vector<1x256xbf16> to vector<16x256xbf16>
    %341 = arith.mulf %339, %340 : vector<16x256xbf16>
    %c288_303 = arith.constant 288 : index
    %c0_304 = arith.constant 0 : index
    %342 = vector.load %arg34[%c288_303, %c0_304] : memref<720x256xbf16, #tpu.memory_space<vmem>>, vector<16x256xbf16>
    tpu.vector_store %arg34[%c288_303, %c0_304], %341 {strides = array<i32>} : memref<720x256xbf16, #tpu.memory_space<vmem>>, vector<16x256xbf16>,
    %c0_305 = arith.constant 0 : index
    %c112_306 = arith.constant 112 : index
    %343 = vector.load %arg33[%c0_305, %c112_306] : memref<16x512xbf16, #tpu.memory_space<vmem>>, vector<16x256xbf16>
    %c304_307 = arith.constant 304 : index
    %c0_308 = arith.constant 0 : index
    %344 = vector.load %arg34[%c304_307, %c0_308] : memref<720x256xbf16, #tpu.memory_space<vmem>>, vector<16x256xbf16>
    tpu.vector_store %arg34[%c304_307, %c0_308], %343 {strides = array<i32>} : memref<720x256xbf16, #tpu.memory_space<vmem>>, vector<16x256xbf16>,
    %c0_309 = arith.constant 0 : index
    %c113_310 = arith.constant 113 : index
    %345 = vector.load %arg33[%c0_309, %c113_310] : memref<16x512xbf16, #tpu.memory_space<vmem>>, vector<16x256xbf16>
    %346 = vector.broadcast %30 : vector<1x256xbf16> to vector<16x256xbf16>
    %347 = arith.mulf %345, %346 : vector<16x256xbf16>
    %c320_311 = arith.constant 320 : index
    %c0_312 = arith.constant 0 : index
    %348 = vector.load %arg34[%c320_311, %c0_312] : memref<720x256xbf16, #tpu.memory_space<vmem>>, vector<16x256xbf16>
    tpu.vector_store %arg34[%c320_311, %c0_312], %347 {strides = array<i32>} : memref<720x256xbf16, #tpu.memory_space<vmem>>, vector<16x256xbf16>,
    %c0_313 = arith.constant 0 : index
    %c127_314 = arith.constant 127 : index
    %349 = vector.load %arg33[%c0_313, %c127_314] : memref<16x512xbf16, #tpu.memory_space<vmem>>, vector<16x256xbf16>
    %350 = vector.broadcast %25 : vector<1x256xbf16> to vector<16x256xbf16>
    %351 = arith.mulf %349, %350 : vector<16x256xbf16>
    %c336_315 = arith.constant 336 : index
    %c0_316 = arith.constant 0 : index
    %352 = vector.load %arg34[%c336_315, %c0_316] : memref<720x256xbf16, #tpu.memory_space<vmem>>, vector<16x256xbf16>
    tpu.vector_store %arg34[%c336_315, %c0_316], %351 {strides = array<i32>} : memref<720x256xbf16, #tpu.memory_space<vmem>>, vector<16x256xbf16>,
    %c0_317 = arith.constant 0 : index
    %c128_318 = arith.constant 128 : index
    %353 = vector.load %arg33[%c0_317, %c128_318] : memref<16x512xbf16, #tpu.memory_space<vmem>>, vector<16x256xbf16>
    %c352_319 = arith.constant 352 : index
    %c0_320 = arith.constant 0 : index
    %354 = vector.load %arg34[%c352_319, %c0_320] : memref<720x256xbf16, #tpu.memory_space<vmem>>, vector<16x256xbf16>
    tpu.vector_store %arg34[%c352_319, %c0_320], %353 {strides = array<i32>} : memref<720x256xbf16, #tpu.memory_space<vmem>>, vector<16x256xbf16>,
    %c0_321 = arith.constant 0 : index
    %c129_322 = arith.constant 129 : index
    %355 = vector.load %arg33[%c0_321, %c129_322] : memref<16x512xbf16, #tpu.memory_space<vmem>>, vector<16x256xbf16>
    %356 = vector.broadcast %30 : vector<1x256xbf16> to vector<16x256xbf16>
    %357 = arith.mulf %355, %356 : vector<16x256xbf16>
    %c368_323 = arith.constant 368 : index
    %c0_324 = arith.constant 0 : index
    %358 = vector.load %arg34[%c368_323, %c0_324] : memref<720x256xbf16, #tpu.memory_space<vmem>>, vector<16x256xbf16>
    tpu.vector_store %arg34[%c368_323, %c0_324], %357 {strides = array<i32>} : memref<720x256xbf16, #tpu.memory_space<vmem>>, vector<16x256xbf16>,
    %c0_325 = arith.constant 0 : index
    %c143_326 = arith.constant 143 : index
    %359 = vector.load %arg33[%c0_325, %c143_326] : memref<16x512xbf16, #tpu.memory_space<vmem>>, vector<16x256xbf16>
    %360 = vector.broadcast %25 : vector<1x256xbf16> to vector<16x256xbf16>
    %361 = arith.mulf %359, %360 : vector<16x256xbf16>
    %c384_327 = arith.constant 384 : index
    %c0_328 = arith.constant 0 : index
    %362 = vector.load %arg34[%c384_327, %c0_328] : memref<720x256xbf16, #tpu.memory_space<vmem>>, vector<16x256xbf16>
    tpu.vector_store %arg34[%c384_327, %c0_328], %361 {strides = array<i32>} : memref<720x256xbf16, #tpu.memory_space<vmem>>, vector<16x256xbf16>,
    %c0_329 = arith.constant 0 : index
    %c144_330 = arith.constant 144 : index
    %363 = vector.load %arg33[%c0_329, %c144_330] : memref<16x512xbf16, #tpu.memory_space<vmem>>, vector<16x256xbf16>
    %c400_331 = arith.constant 400 : index
    %c0_332 = arith.constant 0 : index
    %364 = vector.load %arg34[%c400_331, %c0_332] : memref<720x256xbf16, #tpu.memory_space<vmem>>, vector<16x256xbf16>
    tpu.vector_store %arg34[%c400_331, %c0_332], %363 {strides = array<i32>} : memref<720x256xbf16, #tpu.memory_space<vmem>>, vector<16x256xbf16>,
    %c0_333 = arith.constant 0 : index
    %c145_334 = arith.constant 145 : index
    %365 = vector.load %arg33[%c0_333, %c145_334] : memref<16x512xbf16, #tpu.memory_space<vmem>>, vector<16x256xbf16>
    %366 = vector.broadcast %30 : vector<1x256xbf16> to vector<16x256xbf16>
    %367 = arith.mulf %365, %366 : vector<16x256xbf16>
    %c416_335 = arith.constant 416 : index
    %c0_336 = arith.constant 0 : index
    %368 = vector.load %arg34[%c416_335, %c0_336] : memref<720x256xbf16, #tpu.memory_space<vmem>>, vector<16x256xbf16>
    tpu.vector_store %arg34[%c416_335, %c0_336], %367 {strides = array<i32>} : memref<720x256xbf16, #tpu.memory_space<vmem>>, vector<16x256xbf16>,
    %c0_337 = arith.constant 0 : index
    %c0_338 = arith.constant 0 : index
    %369 = vector.load %arg16[%c0_337, %c0_338] : memref<8x432xbf16, #tpu.memory_space<vmem>>, vector<8x432xbf16>
    %c0_339 = arith.constant 0 : index
    %c0_340 = arith.constant 0 : index
    %370 = vector.load %arg34[%c0_339, %c0_340] : memref<720x256xbf16, #tpu.memory_space<vmem>>, vector<432x256xbf16>
    %cst_341 = arith.constant dense<0.000000e+00> : vector<8x256xf32>
    %371 = tpu.matmul %369, %370, %cst_341 {dimension_numbers = #tpu.dot_dimension_numbers<[1], [0], [0], [1], [0, 0, 1, 1], [], []>} : vector<8x432xbf16>, vector<432x256xbf16>, vector<8x256xf32> -> vector<8x256xf32>
    %c0_342 = arith.constant 0 : index
    %c0_343 = arith.constant 0 : index
    %372 = vector.load %arg17[%c0_342, %c0_343] : memref<8x1xf32, #tpu.memory_space<vmem>>, vector<8x1xf32>
    %373 = vector.broadcast %372 : vector<8x1xf32> to vector<8x256xf32>
    %374 = arith.addf %371, %373 : vector<8x256xf32>
    %cst_344 = arith.constant 0.000000e+00 : f32
    %375 = vector.broadcast %cst_344 : f32 to vector<8x256xf32>
    %376 = arith.cmpf oge, %374, %375 : vector<8x256xf32>
    %cst_345 = arith.constant 2.000000e-01 : f32
    %377 = vector.broadcast %cst_345 : f32 to vector<8x256xf32>
    %378 = arith.mulf %377, %374 : vector<8x256xf32>
    %379 = arith.select %376, %374, %378 : vector<8x256xi1>, vector<8x256xf32>
    %380 = arith.truncf %379 : vector<8x256xf32> to vector<8x256xbf16>
    %c0_346 = arith.constant 0 : index
    %c128_347 = arith.constant 128 : index
    %381 = vector.load %arg33[%c0_346, %c128_347] : memref<16x512xbf16, #tpu.memory_space<vmem>>, vector<8x256xbf16>
    tpu.vector_store %arg33[%c0_346, %c128_347], %380 {strides = array<i32>} : memref<16x512xbf16, #tpu.memory_space<vmem>>, vector<8x256xbf16>,
    %c0_348 = arith.constant 0 : index
    %c111_349 = arith.constant 111 : index
    %382 = vector.load %arg33[%c0_348, %c111_349] : memref<16x512xbf16, #tpu.memory_space<vmem>>, vector<16x256xbf16>
    %383 = vector.broadcast %25 : vector<1x256xbf16> to vector<16x256xbf16>
    %384 = arith.mulf %382, %383 : vector<16x256xbf16>
    %c432_350 = arith.constant 432 : index
    %c0_351 = arith.constant 0 : index
    %385 = vector.load %arg34[%c432_350, %c0_351] : memref<720x256xbf16, #tpu.memory_space<vmem>>, vector<16x256xbf16>
    tpu.vector_store %arg34[%c432_350, %c0_351], %384 {strides = array<i32>} : memref<720x256xbf16, #tpu.memory_space<vmem>>, vector<16x256xbf16>,
    %c0_352 = arith.constant 0 : index
    %c112_353 = arith.constant 112 : index
    %386 = vector.load %arg33[%c0_352, %c112_353] : memref<16x512xbf16, #tpu.memory_space<vmem>>, vector<16x256xbf16>
    %c448_354 = arith.constant 448 : index
    %c0_355 = arith.constant 0 : index
    %387 = vector.load %arg34[%c448_354, %c0_355] : memref<720x256xbf16, #tpu.memory_space<vmem>>, vector<16x256xbf16>
    tpu.vector_store %arg34[%c448_354, %c0_355], %386 {strides = array<i32>} : memref<720x256xbf16, #tpu.memory_space<vmem>>, vector<16x256xbf16>,
    %c0_356 = arith.constant 0 : index
    %c113_357 = arith.constant 113 : index
    %388 = vector.load %arg33[%c0_356, %c113_357] : memref<16x512xbf16, #tpu.memory_space<vmem>>, vector<16x256xbf16>
    %389 = vector.broadcast %30 : vector<1x256xbf16> to vector<16x256xbf16>
    %390 = arith.mulf %388, %389 : vector<16x256xbf16>
    %c464_358 = arith.constant 464 : index
    %c0_359 = arith.constant 0 : index
    %391 = vector.load %arg34[%c464_358, %c0_359] : memref<720x256xbf16, #tpu.memory_space<vmem>>, vector<16x256xbf16>
    tpu.vector_store %arg34[%c464_358, %c0_359], %390 {strides = array<i32>} : memref<720x256xbf16, #tpu.memory_space<vmem>>, vector<16x256xbf16>,
    %c0_360 = arith.constant 0 : index
    %c127_361 = arith.constant 127 : index
    %392 = vector.load %arg33[%c0_360, %c127_361] : memref<16x512xbf16, #tpu.memory_space<vmem>>, vector<16x256xbf16>
    %393 = vector.broadcast %25 : vector<1x256xbf16> to vector<16x256xbf16>
    %394 = arith.mulf %392, %393 : vector<16x256xbf16>
    %c480_362 = arith.constant 480 : index
    %c0_363 = arith.constant 0 : index
    %395 = vector.load %arg34[%c480_362, %c0_363] : memref<720x256xbf16, #tpu.memory_space<vmem>>, vector<16x256xbf16>
    tpu.vector_store %arg34[%c480_362, %c0_363], %394 {strides = array<i32>} : memref<720x256xbf16, #tpu.memory_space<vmem>>, vector<16x256xbf16>,
    %c0_364 = arith.constant 0 : index
    %c128_365 = arith.constant 128 : index
    %396 = vector.load %arg33[%c0_364, %c128_365] : memref<16x512xbf16, #tpu.memory_space<vmem>>, vector<16x256xbf16>
    %c496_366 = arith.constant 496 : index
    %c0_367 = arith.constant 0 : index
    %397 = vector.load %arg34[%c496_366, %c0_367] : memref<720x256xbf16, #tpu.memory_space<vmem>>, vector<16x256xbf16>
    tpu.vector_store %arg34[%c496_366, %c0_367], %396 {strides = array<i32>} : memref<720x256xbf16, #tpu.memory_space<vmem>>, vector<16x256xbf16>,
    %c0_368 = arith.constant 0 : index
    %c129_369 = arith.constant 129 : index
    %398 = vector.load %arg33[%c0_368, %c129_369] : memref<16x512xbf16, #tpu.memory_space<vmem>>, vector<16x256xbf16>
    %399 = vector.broadcast %30 : vector<1x256xbf16> to vector<16x256xbf16>
    %400 = arith.mulf %398, %399 : vector<16x256xbf16>
    %c512_370 = arith.constant 512 : index
    %c0_371 = arith.constant 0 : index
    %401 = vector.load %arg34[%c512_370, %c0_371] : memref<720x256xbf16, #tpu.memory_space<vmem>>, vector<16x256xbf16>
    tpu.vector_store %arg34[%c512_370, %c0_371], %400 {strides = array<i32>} : memref<720x256xbf16, #tpu.memory_space<vmem>>, vector<16x256xbf16>,
    %c0_372 = arith.constant 0 : index
    %c143_373 = arith.constant 143 : index
    %402 = vector.load %arg33[%c0_372, %c143_373] : memref<16x512xbf16, #tpu.memory_space<vmem>>, vector<16x256xbf16>
    %403 = vector.broadcast %25 : vector<1x256xbf16> to vector<16x256xbf16>
    %404 = arith.mulf %402, %403 : vector<16x256xbf16>
    %c528_374 = arith.constant 528 : index
    %c0_375 = arith.constant 0 : index
    %405 = vector.load %arg34[%c528_374, %c0_375] : memref<720x256xbf16, #tpu.memory_space<vmem>>, vector<16x256xbf16>
    tpu.vector_store %arg34[%c528_374, %c0_375], %404 {strides = array<i32>} : memref<720x256xbf16, #tpu.memory_space<vmem>>, vector<16x256xbf16>,
    %c0_376 = arith.constant 0 : index
    %c144_377 = arith.constant 144 : index
    %406 = vector.load %arg33[%c0_376, %c144_377] : memref<16x512xbf16, #tpu.memory_space<vmem>>, vector<16x256xbf16>
    %c544_378 = arith.constant 544 : index
    %c0_379 = arith.constant 0 : index
    %407 = vector.load %arg34[%c544_378, %c0_379] : memref<720x256xbf16, #tpu.memory_space<vmem>>, vector<16x256xbf16>
    tpu.vector_store %arg34[%c544_378, %c0_379], %406 {strides = array<i32>} : memref<720x256xbf16, #tpu.memory_space<vmem>>, vector<16x256xbf16>,
    %c0_380 = arith.constant 0 : index
    %c145_381 = arith.constant 145 : index
    %408 = vector.load %arg33[%c0_380, %c145_381] : memref<16x512xbf16, #tpu.memory_space<vmem>>, vector<16x256xbf16>
    %409 = vector.broadcast %30 : vector<1x256xbf16> to vector<16x256xbf16>
    %410 = arith.mulf %408, %409 : vector<16x256xbf16>
    %c560_382 = arith.constant 560 : index
    %c0_383 = arith.constant 0 : index
    %411 = vector.load %arg34[%c560_382, %c0_383] : memref<720x256xbf16, #tpu.memory_space<vmem>>, vector<16x256xbf16>
    tpu.vector_store %arg34[%c560_382, %c0_383], %410 {strides = array<i32>} : memref<720x256xbf16, #tpu.memory_space<vmem>>, vector<16x256xbf16>,
    %c0_384 = arith.constant 0 : index
    %c0_385 = arith.constant 0 : index
    %412 = vector.load %arg18[%c0_384, %c0_385] : memref<8x576xbf16, #tpu.memory_space<vmem>>, vector<8x576xbf16>
    %c0_386 = arith.constant 0 : index
    %c0_387 = arith.constant 0 : index
    %413 = vector.load %arg34[%c0_386, %c0_387] : memref<720x256xbf16, #tpu.memory_space<vmem>>, vector<576x256xbf16>
    %cst_388 = arith.constant dense<0.000000e+00> : vector<8x256xf32>
    %414 = tpu.matmul %412, %413, %cst_388 {dimension_numbers = #tpu.dot_dimension_numbers<[1], [0], [0], [1], [0, 0, 1, 1], [], []>} : vector<8x576xbf16>, vector<576x256xbf16>, vector<8x256xf32> -> vector<8x256xf32>
    %c0_389 = arith.constant 0 : index
    %c0_390 = arith.constant 0 : index
    %415 = vector.load %arg19[%c0_389, %c0_390] : memref<8x1xf32, #tpu.memory_space<vmem>>, vector<8x1xf32>
    %416 = vector.broadcast %415 : vector<8x1xf32> to vector<8x256xf32>
    %417 = arith.addf %414, %416 : vector<8x256xf32>
    %cst_391 = arith.constant 0.000000e+00 : f32
    %418 = vector.broadcast %cst_391 : f32 to vector<8x256xf32>
    %419 = arith.cmpf oge, %417, %418 : vector<8x256xf32>
    %cst_392 = arith.constant 2.000000e-01 : f32
    %420 = vector.broadcast %cst_392 : f32 to vector<8x256xf32>
    %421 = arith.mulf %420, %417 : vector<8x256xf32>
    %422 = arith.select %419, %417, %421 : vector<8x256xi1>, vector<8x256xf32>
    %423 = arith.truncf %422 : vector<8x256xf32> to vector<8x256xbf16>
    %c0_393 = arith.constant 0 : index
    %c128_394 = arith.constant 128 : index
    %424 = vector.load %arg33[%c0_393, %c128_394] : memref<16x512xbf16, #tpu.memory_space<vmem>>, vector<8x256xbf16>
    tpu.vector_store %arg33[%c0_393, %c128_394], %423 {strides = array<i32>} : memref<16x512xbf16, #tpu.memory_space<vmem>>, vector<8x256xbf16>,
    %c0_395 = arith.constant 0 : index
    %c111_396 = arith.constant 111 : index
    %425 = vector.load %arg33[%c0_395, %c111_396] : memref<16x512xbf16, #tpu.memory_space<vmem>>, vector<16x256xbf16>
    %426 = vector.broadcast %25 : vector<1x256xbf16> to vector<16x256xbf16>
    %427 = arith.mulf %425, %426 : vector<16x256xbf16>
    %c576_397 = arith.constant 576 : index
    %c0_398 = arith.constant 0 : index
    %428 = vector.load %arg34[%c576_397, %c0_398] : memref<720x256xbf16, #tpu.memory_space<vmem>>, vector<16x256xbf16>
    tpu.vector_store %arg34[%c576_397, %c0_398], %427 {strides = array<i32>} : memref<720x256xbf16, #tpu.memory_space<vmem>>, vector<16x256xbf16>,
    %c0_399 = arith.constant 0 : index
    %c112_400 = arith.constant 112 : index
    %429 = vector.load %arg33[%c0_399, %c112_400] : memref<16x512xbf16, #tpu.memory_space<vmem>>, vector<16x256xbf16>
    %c592_401 = arith.constant 592 : index
    %c0_402 = arith.constant 0 : index
    %430 = vector.load %arg34[%c592_401, %c0_402] : memref<720x256xbf16, #tpu.memory_space<vmem>>, vector<16x256xbf16>
    tpu.vector_store %arg34[%c592_401, %c0_402], %429 {strides = array<i32>} : memref<720x256xbf16, #tpu.memory_space<vmem>>, vector<16x256xbf16>,
    %c0_403 = arith.constant 0 : index
    %c113_404 = arith.constant 113 : index
    %431 = vector.load %arg33[%c0_403, %c113_404] : memref<16x512xbf16, #tpu.memory_space<vmem>>, vector<16x256xbf16>
    %432 = vector.broadcast %30 : vector<1x256xbf16> to vector<16x256xbf16>
    %433 = arith.mulf %431, %432 : vector<16x256xbf16>
    %c608_405 = arith.constant 608 : index
    %c0_406 = arith.constant 0 : index
    %434 = vector.load %arg34[%c608_405, %c0_406] : memref<720x256xbf16, #tpu.memory_space<vmem>>, vector<16x256xbf16>
    tpu.vector_store %arg34[%c608_405, %c0_406], %433 {strides = array<i32>} : memref<720x256xbf16, #tpu.memory_space<vmem>>, vector<16x256xbf16>,
    %c0_407 = arith.constant 0 : index
    %c127_408 = arith.constant 127 : index
    %435 = vector.load %arg33[%c0_407, %c127_408] : memref<16x512xbf16, #tpu.memory_space<vmem>>, vector<16x256xbf16>
    %436 = vector.broadcast %25 : vector<1x256xbf16> to vector<16x256xbf16>
    %437 = arith.mulf %435, %436 : vector<16x256xbf16>
    %c624_409 = arith.constant 624 : index
    %c0_410 = arith.constant 0 : index
    %438 = vector.load %arg34[%c624_409, %c0_410] : memref<720x256xbf16, #tpu.memory_space<vmem>>, vector<16x256xbf16>
    tpu.vector_store %arg34[%c624_409, %c0_410], %437 {strides = array<i32>} : memref<720x256xbf16, #tpu.memory_space<vmem>>, vector<16x256xbf16>,
    %c0_411 = arith.constant 0 : index
    %c128_412 = arith.constant 128 : index
    %439 = vector.load %arg33[%c0_411, %c128_412] : memref<16x512xbf16, #tpu.memory_space<vmem>>, vector<16x256xbf16>
    %c640_413 = arith.constant 640 : index
    %c0_414 = arith.constant 0 : index
    %440 = vector.load %arg34[%c640_413, %c0_414] : memref<720x256xbf16, #tpu.memory_space<vmem>>, vector<16x256xbf16>
    tpu.vector_store %arg34[%c640_413, %c0_414], %439 {strides = array<i32>} : memref<720x256xbf16, #tpu.memory_space<vmem>>, vector<16x256xbf16>,
    %c0_415 = arith.constant 0 : index
    %c129_416 = arith.constant 129 : index
    %441 = vector.load %arg33[%c0_415, %c129_416] : memref<16x512xbf16, #tpu.memory_space<vmem>>, vector<16x256xbf16>
    %442 = vector.broadcast %30 : vector<1x256xbf16> to vector<16x256xbf16>
    %443 = arith.mulf %441, %442 : vector<16x256xbf16>
    %c656_417 = arith.constant 656 : index
    %c0_418 = arith.constant 0 : index
    %444 = vector.load %arg34[%c656_417, %c0_418] : memref<720x256xbf16, #tpu.memory_space<vmem>>, vector<16x256xbf16>
    tpu.vector_store %arg34[%c656_417, %c0_418], %443 {strides = array<i32>} : memref<720x256xbf16, #tpu.memory_space<vmem>>, vector<16x256xbf16>,
    %c0_419 = arith.constant 0 : index
    %c143_420 = arith.constant 143 : index
    %445 = vector.load %arg33[%c0_419, %c143_420] : memref<16x512xbf16, #tpu.memory_space<vmem>>, vector<16x256xbf16>
    %446 = vector.broadcast %25 : vector<1x256xbf16> to vector<16x256xbf16>
    %447 = arith.mulf %445, %446 : vector<16x256xbf16>
    %c672_421 = arith.constant 672 : index
    %c0_422 = arith.constant 0 : index
    %448 = vector.load %arg34[%c672_421, %c0_422] : memref<720x256xbf16, #tpu.memory_space<vmem>>, vector<16x256xbf16>
    tpu.vector_store %arg34[%c672_421, %c0_422], %447 {strides = array<i32>} : memref<720x256xbf16, #tpu.memory_space<vmem>>, vector<16x256xbf16>,
    %c0_423 = arith.constant 0 : index
    %c144_424 = arith.constant 144 : index
    %449 = vector.load %arg33[%c0_423, %c144_424] : memref<16x512xbf16, #tpu.memory_space<vmem>>, vector<16x256xbf16>
    %c688_425 = arith.constant 688 : index
    %c0_426 = arith.constant 0 : index
    %450 = vector.load %arg34[%c688_425, %c0_426] : memref<720x256xbf16, #tpu.memory_space<vmem>>, vector<16x256xbf16>
    tpu.vector_store %arg34[%c688_425, %c0_426], %449 {strides = array<i32>} : memref<720x256xbf16, #tpu.memory_space<vmem>>, vector<16x256xbf16>,
    %c0_427 = arith.constant 0 : index
    %c145_428 = arith.constant 145 : index
    %451 = vector.load %arg33[%c0_427, %c145_428] : memref<16x512xbf16, #tpu.memory_space<vmem>>, vector<16x256xbf16>
    %452 = vector.broadcast %30 : vector<1x256xbf16> to vector<16x256xbf16>
    %453 = arith.mulf %451, %452 : vector<16x256xbf16>
    %c704_429 = arith.constant 704 : index
    %c0_430 = arith.constant 0 : index
    %454 = vector.load %arg34[%c704_429, %c0_430] : memref<720x256xbf16, #tpu.memory_space<vmem>>, vector<16x256xbf16>
    tpu.vector_store %arg34[%c704_429, %c0_430], %453 {strides = array<i32>} : memref<720x256xbf16, #tpu.memory_space<vmem>>, vector<16x256xbf16>,
    %c0_431 = arith.constant 0 : index
    %c0_432 = arith.constant 0 : index
    %455 = vector.load %arg20[%c0_431, %c0_432] : memref<16x720xbf16, #tpu.memory_space<vmem>>, vector<16x720xbf16>
    %c0_433 = arith.constant 0 : index
    %c0_434 = arith.constant 0 : index
    %456 = vector.load %arg34[%c0_433, %c0_434] : memref<720x256xbf16, #tpu.memory_space<vmem>>, vector<720x256xbf16>
    %cst_435 = arith.constant dense<0.000000e+00> : vector<16x256xf32>
    %457 = tpu.matmul %455, %456, %cst_435 {dimension_numbers = #tpu.dot_dimension_numbers<[1], [0], [0], [1], [0, 0, 1, 1], [], []>} : vector<16x720xbf16>, vector<720x256xbf16>, vector<16x256xf32> -> vector<16x256xf32>
    %c0_436 = arith.constant 0 : index
    %c0_437 = arith.constant 0 : index
    %458 = vector.load %arg21[%c0_436, %c0_437] : memref<16x1xf32, #tpu.memory_space<vmem>>, vector<16x1xf32>
    %459 = vector.broadcast %458 : vector<16x1xf32> to vector<16x256xf32>
    %460 = arith.addf %457, %459 : vector<16x256xf32>
    %cst_438 = arith.constant 2.000000e-01 : f32
    %461 = vector.broadcast %cst_438 : f32 to vector<16x256xf32>
    %462 = arith.mulf %461, %460 : vector<16x256xf32>
    %c0_439 = arith.constant 0 : index
    %c0_440 = arith.constant 0 : index
    %463 = vector.load %arg35[%c0_439, %c0_440] : memref<16x256xf32, #tpu.memory_space<vmem>>, vector<16x256xf32>
    %464 = arith.addf %462, %463 : vector<16x256xf32>
    %c0_441 = arith.constant 0 : index
    %c0_442 = arith.constant 0 : index
    %465 = vector.load %arg35[%c0_441, %c0_442] : memref<16x256xf32, #tpu.memory_space<vmem>>, vector<16x256xf32>
    tpu.vector_store %arg35[%c0_441, %c0_442], %464 {strides = array<i32>} : memref<16x256xf32, #tpu.memory_space<vmem>>, vector<16x256xf32>,
    %c0_443 = arith.constant 0 : index
    %c0_444 = arith.constant 0 : index
    %466 = vector.load %arg35[%c0_443, %c0_444] : memref<16x256xf32, #tpu.memory_space<vmem>>, vector<16x256xf32>
    %467 = arith.truncf %466 : vector<16x256xf32> to vector<16x256xbf16>
    %c0_445 = arith.constant 0 : index
    %c128_446 = arith.constant 128 : index
    %468 = vector.load %arg33[%c0_445, %c128_446] : memref<16x512xbf16, #tpu.memory_space<vmem>>, vector<16x256xbf16>
    tpu.vector_store %arg33[%c0_445, %c128_446], %467 {strides = array<i32>} : memref<16x512xbf16, #tpu.memory_space<vmem>>, vector<16x256xbf16>,
    %c0_447 = arith.constant 0 : index
    %c111_448 = arith.constant 111 : index
    %469 = vector.load %arg33[%c0_447, %c111_448] : memref<16x512xbf16, #tpu.memory_space<vmem>>, vector<16x256xbf16>
    %470 = vector.broadcast %25 : vector<1x256xbf16> to vector<16x256xbf16>
    %471 = arith.mulf %469, %470 : vector<16x256xbf16>
    %c0_449 = arith.constant 0 : index
    %c0_450 = arith.constant 0 : index
    %472 = vector.load %arg34[%c0_449, %c0_450] : memref<720x256xbf16, #tpu.memory_space<vmem>>, vector<16x256xbf16>
    tpu.vector_store %arg34[%c0_449, %c0_450], %471 {strides = array<i32>} : memref<720x256xbf16, #tpu.memory_space<vmem>>, vector<16x256xbf16>,
    %c0_451 = arith.constant 0 : index
    %c112_452 = arith.constant 112 : index
    %473 = vector.load %arg33[%c0_451, %c112_452] : memref<16x512xbf16, #tpu.memory_space<vmem>>, vector<16x256xbf16>
    %c16_453 = arith.constant 16 : index
    %c0_454 = arith.constant 0 : index
    %474 = vector.load %arg34[%c16_453, %c0_454] : memref<720x256xbf16, #tpu.memory_space<vmem>>, vector<16x256xbf16>
    tpu.vector_store %arg34[%c16_453, %c0_454], %473 {strides = array<i32>} : memref<720x256xbf16, #tpu.memory_space<vmem>>, vector<16x256xbf16>,
    %c0_455 = arith.constant 0 : index
    %c113_456 = arith.constant 113 : index
    %475 = vector.load %arg33[%c0_455, %c113_456] : memref<16x512xbf16, #tpu.memory_space<vmem>>, vector<16x256xbf16>
    %476 = vector.broadcast %30 : vector<1x256xbf16> to vector<16x256xbf16>
    %477 = arith.mulf %475, %476 : vector<16x256xbf16>
    %c32_457 = arith.constant 32 : index
    %c0_458 = arith.constant 0 : index
    %478 = vector.load %arg34[%c32_457, %c0_458] : memref<720x256xbf16, #tpu.memory_space<vmem>>, vector<16x256xbf16>
    tpu.vector_store %arg34[%c32_457, %c0_458], %477 {strides = array<i32>} : memref<720x256xbf16, #tpu.memory_space<vmem>>, vector<16x256xbf16>,
    %c0_459 = arith.constant 0 : index
    %c127_460 = arith.constant 127 : index
    %479 = vector.load %arg33[%c0_459, %c127_460] : memref<16x512xbf16, #tpu.memory_space<vmem>>, vector<16x256xbf16>
    %480 = vector.broadcast %25 : vector<1x256xbf16> to vector<16x256xbf16>
    %481 = arith.mulf %479, %480 : vector<16x256xbf16>
    %c48_461 = arith.constant 48 : index
    %c0_462 = arith.constant 0 : index
    %482 = vector.load %arg34[%c48_461, %c0_462] : memref<720x256xbf16, #tpu.memory_space<vmem>>, vector<16x256xbf16>
    tpu.vector_store %arg34[%c48_461, %c0_462], %481 {strides = array<i32>} : memref<720x256xbf16, #tpu.memory_space<vmem>>, vector<16x256xbf16>,
    %c0_463 = arith.constant 0 : index
    %c128_464 = arith.constant 128 : index
    %483 = vector.load %arg33[%c0_463, %c128_464] : memref<16x512xbf16, #tpu.memory_space<vmem>>, vector<16x256xbf16>
    %c64_465 = arith.constant 64 : index
    %c0_466 = arith.constant 0 : index
    %484 = vector.load %arg34[%c64_465, %c0_466] : memref<720x256xbf16, #tpu.memory_space<vmem>>, vector<16x256xbf16>
    tpu.vector_store %arg34[%c64_465, %c0_466], %483 {strides = array<i32>} : memref<720x256xbf16, #tpu.memory_space<vmem>>, vector<16x256xbf16>,
    %c0_467 = arith.constant 0 : index
    %c129_468 = arith.constant 129 : index
    %485 = vector.load %arg33[%c0_467, %c129_468] : memref<16x512xbf16, #tpu.memory_space<vmem>>, vector<16x256xbf16>
    %486 = vector.broadcast %30 : vector<1x256xbf16> to vector<16x256xbf16>
    %487 = arith.mulf %485, %486 : vector<16x256xbf16>
    %c80_469 = arith.constant 80 : index
    %c0_470 = arith.constant 0 : index
    %488 = vector.load %arg34[%c80_469, %c0_470] : memref<720x256xbf16, #tpu.memory_space<vmem>>, vector<16x256xbf16>
    tpu.vector_store %arg34[%c80_469, %c0_470], %487 {strides = array<i32>} : memref<720x256xbf16, #tpu.memory_space<vmem>>, vector<16x256xbf16>,
    %c0_471 = arith.constant 0 : index
    %c143_472 = arith.constant 143 : index
    %489 = vector.load %arg33[%c0_471, %c143_472] : memref<16x512xbf16, #tpu.memory_space<vmem>>, vector<16x256xbf16>
    %490 = vector.broadcast %25 : vector<1x256xbf16> to vector<16x256xbf16>
    %491 = arith.mulf %489, %490 : vector<16x256xbf16>
    %c96_473 = arith.constant 96 : index
    %c0_474 = arith.constant 0 : index
    %492 = vector.load %arg34[%c96_473, %c0_474] : memref<720x256xbf16, #tpu.memory_space<vmem>>, vector<16x256xbf16>
    tpu.vector_store %arg34[%c96_473, %c0_474], %491 {strides = array<i32>} : memref<720x256xbf16, #tpu.memory_space<vmem>>, vector<16x256xbf16>,
    %c0_475 = arith.constant 0 : index
    %c144_476 = arith.constant 144 : index
    %493 = vector.load %arg33[%c0_475, %c144_476] : memref<16x512xbf16, #tpu.memory_space<vmem>>, vector<16x256xbf16>
    %c112_477 = arith.constant 112 : index
    %c0_478 = arith.constant 0 : index
    %494 = vector.load %arg34[%c112_477, %c0_478] : memref<720x256xbf16, #tpu.memory_space<vmem>>, vector<16x256xbf16>
    tpu.vector_store %arg34[%c112_477, %c0_478], %493 {strides = array<i32>} : memref<720x256xbf16, #tpu.memory_space<vmem>>, vector<16x256xbf16>,
    %c0_479 = arith.constant 0 : index
    %c145_480 = arith.constant 145 : index
    %495 = vector.load %arg33[%c0_479, %c145_480] : memref<16x512xbf16, #tpu.memory_space<vmem>>, vector<16x256xbf16>
    %496 = vector.broadcast %30 : vector<1x256xbf16> to vector<16x256xbf16>
    %497 = arith.mulf %495, %496 : vector<16x256xbf16>
    %c128_481 = arith.constant 128 : index
    %c0_482 = arith.constant 0 : index
    %498 = vector.load %arg34[%c128_481, %c0_482] : memref<720x256xbf16, #tpu.memory_space<vmem>>, vector<16x256xbf16>
    tpu.vector_store %arg34[%c128_481, %c0_482], %497 {strides = array<i32>} : memref<720x256xbf16, #tpu.memory_space<vmem>>, vector<16x256xbf16>,
    %c0_483 = arith.constant 0 : index
    %c0_484 = arith.constant 0 : index
    %499 = vector.load %arg22[%c0_483, %c0_484] : memref<8x144xbf16, #tpu.memory_space<vmem>>, vector<8x144xbf16>
    %c0_485 = arith.constant 0 : index
    %c0_486 = arith.constant 0 : index
    %500 = vector.load %arg34[%c0_485, %c0_486] : memref<720x256xbf16, #tpu.memory_space<vmem>>, vector<144x256xbf16>
    %cst_487 = arith.constant dense<0.000000e+00> : vector<8x256xf32>
    %501 = tpu.matmul %499, %500, %cst_487 {dimension_numbers = #tpu.dot_dimension_numbers<[1], [0], [0], [1], [0, 0, 1, 1], [], []>} : vector<8x144xbf16>, vector<144x256xbf16>, vector<8x256xf32> -> vector<8x256xf32>
    %c0_488 = arith.constant 0 : index
    %c0_489 = arith.constant 0 : index
    %502 = vector.load %arg23[%c0_488, %c0_489] : memref<8x1xf32, #tpu.memory_space<vmem>>, vector<8x1xf32>
    %503 = vector.broadcast %502 : vector<8x1xf32> to vector<8x256xf32>
    %504 = arith.addf %501, %503 : vector<8x256xf32>
    %cst_490 = arith.constant 0.000000e+00 : f32
    %505 = vector.broadcast %cst_490 : f32 to vector<8x256xf32>
    %506 = arith.cmpf oge, %504, %505 : vector<8x256xf32>
    %cst_491 = arith.constant 2.000000e-01 : f32
    %507 = vector.broadcast %cst_491 : f32 to vector<8x256xf32>
    %508 = arith.mulf %507, %504 : vector<8x256xf32>
    %509 = arith.select %506, %504, %508 : vector<8x256xi1>, vector<8x256xf32>
    %510 = arith.truncf %509 : vector<8x256xf32> to vector<8x256xbf16>
    %c0_492 = arith.constant 0 : index
    %c128_493 = arith.constant 128 : index
    %511 = vector.load %arg33[%c0_492, %c128_493] : memref<16x512xbf16, #tpu.memory_space<vmem>>, vector<8x256xbf16>
    tpu.vector_store %arg33[%c0_492, %c128_493], %510 {strides = array<i32>} : memref<16x512xbf16, #tpu.memory_space<vmem>>, vector<8x256xbf16>,
    %c0_494 = arith.constant 0 : index
    %c111_495 = arith.constant 111 : index
    %512 = vector.load %arg33[%c0_494, %c111_495] : memref<16x512xbf16, #tpu.memory_space<vmem>>, vector<16x256xbf16>
    %513 = vector.broadcast %25 : vector<1x256xbf16> to vector<16x256xbf16>
    %514 = arith.mulf %512, %513 : vector<16x256xbf16>
    %c144_496 = arith.constant 144 : index
    %c0_497 = arith.constant 0 : index
    %515 = vector.load %arg34[%c144_496, %c0_497] : memref<720x256xbf16, #tpu.memory_space<vmem>>, vector<16x256xbf16>
    tpu.vector_store %arg34[%c144_496, %c0_497], %514 {strides = array<i32>} : memref<720x256xbf16, #tpu.memory_space<vmem>>, vector<16x256xbf16>,
    %c0_498 = arith.constant 0 : index
    %c112_499 = arith.constant 112 : index
    %516 = vector.load %arg33[%c0_498, %c112_499] : memref<16x512xbf16, #tpu.memory_space<vmem>>, vector<16x256xbf16>
    %c160_500 = arith.constant 160 : index
    %c0_501 = arith.constant 0 : index
    %517 = vector.load %arg34[%c160_500, %c0_501] : memref<720x256xbf16, #tpu.memory_space<vmem>>, vector<16x256xbf16>
    tpu.vector_store %arg34[%c160_500, %c0_501], %516 {strides = array<i32>} : memref<720x256xbf16, #tpu.memory_space<vmem>>, vector<16x256xbf16>,
    %c0_502 = arith.constant 0 : index
    %c113_503 = arith.constant 113 : index
    %518 = vector.load %arg33[%c0_502, %c113_503] : memref<16x512xbf16, #tpu.memory_space<vmem>>, vector<16x256xbf16>
    %519 = vector.broadcast %30 : vector<1x256xbf16> to vector<16x256xbf16>
    %520 = arith.mulf %518, %519 : vector<16x256xbf16>
    %c176_504 = arith.constant 176 : index
    %c0_505 = arith.constant 0 : index
    %521 = vector.load %arg34[%c176_504, %c0_505] : memref<720x256xbf16, #tpu.memory_space<vmem>>, vector<16x256xbf16>
    tpu.vector_store %arg34[%c176_504, %c0_505], %520 {strides = array<i32>} : memref<720x256xbf16, #tpu.memory_space<vmem>>, vector<16x256xbf16>,
    %c0_506 = arith.constant 0 : index
    %c127_507 = arith.constant 127 : index
    %522 = vector.load %arg33[%c0_506, %c127_507] : memref<16x512xbf16, #tpu.memory_space<vmem>>, vector<16x256xbf16>
    %523 = vector.broadcast %25 : vector<1x256xbf16> to vector<16x256xbf16>
    %524 = arith.mulf %522, %523 : vector<16x256xbf16>
    %c192_508 = arith.constant 192 : index
    %c0_509 = arith.constant 0 : index
    %525 = vector.load %arg34[%c192_508, %c0_509] : memref<720x256xbf16, #tpu.memory_space<vmem>>, vector<16x256xbf16>
    tpu.vector_store %arg34[%c192_508, %c0_509], %524 {strides = array<i32>} : memref<720x256xbf16, #tpu.memory_space<vmem>>, vector<16x256xbf16>,
    %c0_510 = arith.constant 0 : index
    %c128_511 = arith.constant 128 : index
    %526 = vector.load %arg33[%c0_510, %c128_511] : memref<16x512xbf16, #tpu.memory_space<vmem>>, vector<16x256xbf16>
    %c208_512 = arith.constant 208 : index
    %c0_513 = arith.constant 0 : index
    %527 = vector.load %arg34[%c208_512, %c0_513] : memref<720x256xbf16, #tpu.memory_space<vmem>>, vector<16x256xbf16>
    tpu.vector_store %arg34[%c208_512, %c0_513], %526 {strides = array<i32>} : memref<720x256xbf16, #tpu.memory_space<vmem>>, vector<16x256xbf16>,
    %c0_514 = arith.constant 0 : index
    %c129_515 = arith.constant 129 : index
    %528 = vector.load %arg33[%c0_514, %c129_515] : memref<16x512xbf16, #tpu.memory_space<vmem>>, vector<16x256xbf16>
    %529 = vector.broadcast %30 : vector<1x256xbf16> to vector<16x256xbf16>
    %530 = arith.mulf %528, %529 : vector<16x256xbf16>
    %c224_516 = arith.constant 224 : index
    %c0_517 = arith.constant 0 : index
    %531 = vector.load %arg34[%c224_516, %c0_517] : memref<720x256xbf16, #tpu.memory_space<vmem>>, vector<16x256xbf16>
    tpu.vector_store %arg34[%c224_516, %c0_517], %530 {strides = array<i32>} : memref<720x256xbf16, #tpu.memory_space<vmem>>, vector<16x256xbf16>,
    %c0_518 = arith.constant 0 : index
    %c143_519 = arith.constant 143 : index
    %532 = vector.load %arg33[%c0_518, %c143_519] : memref<16x512xbf16, #tpu.memory_space<vmem>>, vector<16x256xbf16>
    %533 = vector.broadcast %25 : vector<1x256xbf16> to vector<16x256xbf16>
    %534 = arith.mulf %532, %533 : vector<16x256xbf16>
    %c240_520 = arith.constant 240 : index
    %c0_521 = arith.constant 0 : index
    %535 = vector.load %arg34[%c240_520, %c0_521] : memref<720x256xbf16, #tpu.memory_space<vmem>>, vector<16x256xbf16>
    tpu.vector_store %arg34[%c240_520, %c0_521], %534 {strides = array<i32>} : memref<720x256xbf16, #tpu.memory_space<vmem>>, vector<16x256xbf16>,
    %c0_522 = arith.constant 0 : index
    %c144_523 = arith.constant 144 : index
    %536 = vector.load %arg33[%c0_522, %c144_523] : memref<16x512xbf16, #tpu.memory_space<vmem>>, vector<16x256xbf16>
    %c256_524 = arith.constant 256 : index
    %c0_525 = arith.constant 0 : index
    %537 = vector.load %arg34[%c256_524, %c0_525] : memref<720x256xbf16, #tpu.memory_space<vmem>>, vector<16x256xbf16>
    tpu.vector_store %arg34[%c256_524, %c0_525], %536 {strides = array<i32>} : memref<720x256xbf16, #tpu.memory_space<vmem>>, vector<16x256xbf16>,
    %c0_526 = arith.constant 0 : index
    %c145_527 = arith.constant 145 : index
    %538 = vector.load %arg33[%c0_526, %c145_527] : memref<16x512xbf16, #tpu.memory_space<vmem>>, vector<16x256xbf16>
    %539 = vector.broadcast %30 : vector<1x256xbf16> to vector<16x256xbf16>
    %540 = arith.mulf %538, %539 : vector<16x256xbf16>
    %c272_528 = arith.constant 272 : index
    %c0_529 = arith.constant 0 : index
    %541 = vector.load %arg34[%c272_528, %c0_529] : memref<720x256xbf16, #tpu.memory_space<vmem>>, vector<16x256xbf16>
    tpu.vector_store %arg34[%c272_528, %c0_529], %540 {strides = array<i32>} : memref<720x256xbf16, #tpu.memory_space<vmem>>, vector<16x256xbf16>,
    %c0_530 = arith.constant 0 : index
    %c0_531 = arith.constant 0 : index
    %542 = vector.load %arg24[%c0_530, %c0_531] : memref<8x288xbf16, #tpu.memory_space<vmem>>, vector<8x288xbf16>
    %c0_532 = arith.constant 0 : index
    %c0_533 = arith.constant 0 : index
    %543 = vector.load %arg34[%c0_532, %c0_533] : memref<720x256xbf16, #tpu.memory_space<vmem>>, vector<288x256xbf16>
    %cst_534 = arith.constant dense<0.000000e+00> : vector<8x256xf32>
    %544 = tpu.matmul %542, %543, %cst_534 {dimension_numbers = #tpu.dot_dimension_numbers<[1], [0], [0], [1], [0, 0, 1, 1], [], []>} : vector<8x288xbf16>, vector<288x256xbf16>, vector<8x256xf32> -> vector<8x256xf32>
    %c0_535 = arith.constant 0 : index
    %c0_536 = arith.constant 0 : index
    %545 = vector.load %arg25[%c0_535, %c0_536] : memref<8x1xf32, #tpu.memory_space<vmem>>, vector<8x1xf32>
    %546 = vector.broadcast %545 : vector<8x1xf32> to vector<8x256xf32>
    %547 = arith.addf %544, %546 : vector<8x256xf32>
    %cst_537 = arith.constant 0.000000e+00 : f32
    %548 = vector.broadcast %cst_537 : f32 to vector<8x256xf32>
    %549 = arith.cmpf oge, %547, %548 : vector<8x256xf32>
    %cst_538 = arith.constant 2.000000e-01 : f32
    %550 = vector.broadcast %cst_538 : f32 to vector<8x256xf32>
    %551 = arith.mulf %550, %547 : vector<8x256xf32>
    %552 = arith.select %549, %547, %551 : vector<8x256xi1>, vector<8x256xf32>
    %553 = arith.truncf %552 : vector<8x256xf32> to vector<8x256xbf16>
    %c0_539 = arith.constant 0 : index
    %c128_540 = arith.constant 128 : index
    %554 = vector.load %arg33[%c0_539, %c128_540] : memref<16x512xbf16, #tpu.memory_space<vmem>>, vector<8x256xbf16>
    tpu.vector_store %arg33[%c0_539, %c128_540], %553 {strides = array<i32>} : memref<16x512xbf16, #tpu.memory_space<vmem>>, vector<8x256xbf16>,
    %c0_541 = arith.constant 0 : index
    %c111_542 = arith.constant 111 : index
    %555 = vector.load %arg33[%c0_541, %c111_542] : memref<16x512xbf16, #tpu.memory_space<vmem>>, vector<16x256xbf16>
    %556 = vector.broadcast %25 : vector<1x256xbf16> to vector<16x256xbf16>
    %557 = arith.mulf %555, %556 : vector<16x256xbf16>
    %c288_543 = arith.constant 288 : index
    %c0_544 = arith.constant 0 : index
    %558 = vector.load %arg34[%c288_543, %c0_544] : memref<720x256xbf16, #tpu.memory_space<vmem>>, vector<16x256xbf16>
    tpu.vector_store %arg34[%c288_543, %c0_544], %557 {strides = array<i32>} : memref<720x256xbf16, #tpu.memory_space<vmem>>, vector<16x256xbf16>,
    %c0_545 = arith.constant 0 : index
    %c112_546 = arith.constant 112 : index
    %559 = vector.load %arg33[%c0_545, %c112_546] : memref<16x512xbf16, #tpu.memory_space<vmem>>, vector<16x256xbf16>
    %c304_547 = arith.constant 304 : index
    %c0_548 = arith.constant 0 : index
    %560 = vector.load %arg34[%c304_547, %c0_548] : memref<720x256xbf16, #tpu.memory_space<vmem>>, vector<16x256xbf16>
    tpu.vector_store %arg34[%c304_547, %c0_548], %559 {strides = array<i32>} : memref<720x256xbf16, #tpu.memory_space<vmem>>, vector<16x256xbf16>,
    %c0_549 = arith.constant 0 : index
    %c113_550 = arith.constant 113 : index
    %561 = vector.load %arg33[%c0_549, %c113_550] : memref<16x512xbf16, #tpu.memory_space<vmem>>, vector<16x256xbf16>
    %562 = vector.broadcast %30 : vector<1x256xbf16> to vector<16x256xbf16>
    %563 = arith.mulf %561, %562 : vector<16x256xbf16>
    %c320_551 = arith.constant 320 : index
    %c0_552 = arith.constant 0 : index
    %564 = vector.load %arg34[%c320_551, %c0_552] : memref<720x256xbf16, #tpu.memory_space<vmem>>, vector<16x256xbf16>
    tpu.vector_store %arg34[%c320_551, %c0_552], %563 {strides = array<i32>} : memref<720x256xbf16, #tpu.memory_space<vmem>>, vector<16x256xbf16>,
    %c0_553 = arith.constant 0 : index
    %c127_554 = arith.constant 127 : index
    %565 = vector.load %arg33[%c0_553, %c127_554] : memref<16x512xbf16, #tpu.memory_space<vmem>>, vector<16x256xbf16>
    %566 = vector.broadcast %25 : vector<1x256xbf16> to vector<16x256xbf16>
    %567 = arith.mulf %565, %566 : vector<16x256xbf16>
    %c336_555 = arith.constant 336 : index
    %c0_556 = arith.constant 0 : index
    %568 = vector.load %arg34[%c336_555, %c0_556] : memref<720x256xbf16, #tpu.memory_space<vmem>>, vector<16x256xbf16>
    tpu.vector_store %arg34[%c336_555, %c0_556], %567 {strides = array<i32>} : memref<720x256xbf16, #tpu.memory_space<vmem>>, vector<16x256xbf16>,
    %c0_557 = arith.constant 0 : index
    %c128_558 = arith.constant 128 : index
    %569 = vector.load %arg33[%c0_557, %c128_558] : memref<16x512xbf16, #tpu.memory_space<vmem>>, vector<16x256xbf16>
    %c352_559 = arith.constant 352 : index
    %c0_560 = arith.constant 0 : index
    %570 = vector.load %arg34[%c352_559, %c0_560] : memref<720x256xbf16, #tpu.memory_space<vmem>>, vector<16x256xbf16>
    tpu.vector_store %arg34[%c352_559, %c0_560], %569 {strides = array<i32>} : memref<720x256xbf16, #tpu.memory_space<vmem>>, vector<16x256xbf16>,
    %c0_561 = arith.constant 0 : index
    %c129_562 = arith.constant 129 : index
    %571 = vector.load %arg33[%c0_561, %c129_562] : memref<16x512xbf16, #tpu.memory_space<vmem>>, vector<16x256xbf16>
    %572 = vector.broadcast %30 : vector<1x256xbf16> to vector<16x256xbf16>
    %573 = arith.mulf %571, %572 : vector<16x256xbf16>
    %c368_563 = arith.constant 368 : index
    %c0_564 = arith.constant 0 : index
    %574 = vector.load %arg34[%c368_563, %c0_564] : memref<720x256xbf16, #tpu.memory_space<vmem>>, vector<16x256xbf16>
    tpu.vector_store %arg34[%c368_563, %c0_564], %573 {strides = array<i32>} : memref<720x256xbf16, #tpu.memory_space<vmem>>, vector<16x256xbf16>,
    %c0_565 = arith.constant 0 : index
    %c143_566 = arith.constant 143 : index
    %575 = vector.load %arg33[%c0_565, %c143_566] : memref<16x512xbf16, #tpu.memory_space<vmem>>, vector<16x256xbf16>
    %576 = vector.broadcast %25 : vector<1x256xbf16> to vector<16x256xbf16>
    %577 = arith.mulf %575, %576 : vector<16x256xbf16>
    %c384_567 = arith.constant 384 : index
    %c0_568 = arith.constant 0 : index
    %578 = vector.load %arg34[%c384_567, %c0_568] : memref<720x256xbf16, #tpu.memory_space<vmem>>, vector<16x256xbf16>
    tpu.vector_store %arg34[%c384_567, %c0_568], %577 {strides = array<i32>} : memref<720x256xbf16, #tpu.memory_space<vmem>>, vector<16x256xbf16>,
    %c0_569 = arith.constant 0 : index
    %c144_570 = arith.constant 144 : index
    %579 = vector.load %arg33[%c0_569, %c144_570] : memref<16x512xbf16, #tpu.memory_space<vmem>>, vector<16x256xbf16>
    %c400_571 = arith.constant 400 : index
    %c0_572 = arith.constant 0 : index
    %580 = vector.load %arg34[%c400_571, %c0_572] : memref<720x256xbf16, #tpu.memory_space<vmem>>, vector<16x256xbf16>
    tpu.vector_store %arg34[%c400_571, %c0_572], %579 {strides = array<i32>} : memref<720x256xbf16, #tpu.memory_space<vmem>>, vector<16x256xbf16>,
    %c0_573 = arith.constant 0 : index
    %c145_574 = arith.constant 145 : index
    %581 = vector.load %arg33[%c0_573, %c145_574] : memref<16x512xbf16, #tpu.memory_space<vmem>>, vector<16x256xbf16>
    %582 = vector.broadcast %30 : vector<1x256xbf16> to vector<16x256xbf16>
    %583 = arith.mulf %581, %582 : vector<16x256xbf16>
    %c416_575 = arith.constant 416 : index
    %c0_576 = arith.constant 0 : index
    %584 = vector.load %arg34[%c416_575, %c0_576] : memref<720x256xbf16, #tpu.memory_space<vmem>>, vector<16x256xbf16>
    tpu.vector_store %arg34[%c416_575, %c0_576], %583 {strides = array<i32>} : memref<720x256xbf16, #tpu.memory_space<vmem>>, vector<16x256xbf16>,
    %c0_577 = arith.constant 0 : index
    %c0_578 = arith.constant 0 : index
    %585 = vector.load %arg26[%c0_577, %c0_578] : memref<8x432xbf16, #tpu.memory_space<vmem>>, vector<8x432xbf16>
    %c0_579 = arith.constant 0 : index
    %c0_580 = arith.constant 0 : index
    %586 = vector.load %arg34[%c0_579, %c0_580] : memref<720x256xbf16, #tpu.memory_space<vmem>>, vector<432x256xbf16>
    %cst_581 = arith.constant dense<0.000000e+00> : vector<8x256xf32>
    %587 = tpu.matmul %585, %586, %cst_581 {dimension_numbers = #tpu.dot_dimension_numbers<[1], [0], [0], [1], [0, 0, 1, 1], [], []>} : vector<8x432xbf16>, vector<432x256xbf16>, vector<8x256xf32> -> vector<8x256xf32>
    %c0_582 = arith.constant 0 : index
    %c0_583 = arith.constant 0 : index
    %588 = vector.load %arg27[%c0_582, %c0_583] : memref<8x1xf32, #tpu.memory_space<vmem>>, vector<8x1xf32>
    %589 = vector.broadcast %588 : vector<8x1xf32> to vector<8x256xf32>
    %590 = arith.addf %587, %589 : vector<8x256xf32>
    %cst_584 = arith.constant 0.000000e+00 : f32
    %591 = vector.broadcast %cst_584 : f32 to vector<8x256xf32>
    %592 = arith.cmpf oge, %590, %591 : vector<8x256xf32>
    %cst_585 = arith.constant 2.000000e-01 : f32
    %593 = vector.broadcast %cst_585 : f32 to vector<8x256xf32>
    %594 = arith.mulf %593, %590 : vector<8x256xf32>
    %595 = arith.select %592, %590, %594 : vector<8x256xi1>, vector<8x256xf32>
    %596 = arith.truncf %595 : vector<8x256xf32> to vector<8x256xbf16>
    %c0_586 = arith.constant 0 : index
    %c128_587 = arith.constant 128 : index
    %597 = vector.load %arg33[%c0_586, %c128_587] : memref<16x512xbf16, #tpu.memory_space<vmem>>, vector<8x256xbf16>
    tpu.vector_store %arg33[%c0_586, %c128_587], %596 {strides = array<i32>} : memref<16x512xbf16, #tpu.memory_space<vmem>>, vector<8x256xbf16>,
    %c0_588 = arith.constant 0 : index
    %c111_589 = arith.constant 111 : index
    %598 = vector.load %arg33[%c0_588, %c111_589] : memref<16x512xbf16, #tpu.memory_space<vmem>>, vector<16x256xbf16>
    %599 = vector.broadcast %25 : vector<1x256xbf16> to vector<16x256xbf16>
    %600 = arith.mulf %598, %599 : vector<16x256xbf16>
    %c432_590 = arith.constant 432 : index
    %c0_591 = arith.constant 0 : index
    %601 = vector.load %arg34[%c432_590, %c0_591] : memref<720x256xbf16, #tpu.memory_space<vmem>>, vector<16x256xbf16>
    tpu.vector_store %arg34[%c432_590, %c0_591], %600 {strides = array<i32>} : memref<720x256xbf16, #tpu.memory_space<vmem>>, vector<16x256xbf16>,
    %c0_592 = arith.constant 0 : index
    %c112_593 = arith.constant 112 : index
    %602 = vector.load %arg33[%c0_592, %c112_593] : memref<16x512xbf16, #tpu.memory_space<vmem>>, vector<16x256xbf16>
    %c448_594 = arith.constant 448 : index
    %c0_595 = arith.constant 0 : index
    %603 = vector.load %arg34[%c448_594, %c0_595] : memref<720x256xbf16, #tpu.memory_space<vmem>>, vector<16x256xbf16>
    tpu.vector_store %arg34[%c448_594, %c0_595], %602 {strides = array<i32>} : memref<720x256xbf16, #tpu.memory_space<vmem>>, vector<16x256xbf16>,
    %c0_596 = arith.constant 0 : index
    %c113_597 = arith.constant 113 : index
    %604 = vector.load %arg33[%c0_596, %c113_597] : memref<16x512xbf16, #tpu.memory_space<vmem>>, vector<16x256xbf16>
    %605 = vector.broadcast %30 : vector<1x256xbf16> to vector<16x256xbf16>
    %606 = arith.mulf %604, %605 : vector<16x256xbf16>
    %c464_598 = arith.constant 464 : index
    %c0_599 = arith.constant 0 : index
    %607 = vector.load %arg34[%c464_598, %c0_599] : memref<720x256xbf16, #tpu.memory_space<vmem>>, vector<16x256xbf16>
    tpu.vector_store %arg34[%c464_598, %c0_599], %606 {strides = array<i32>} : memref<720x256xbf16, #tpu.memory_space<vmem>>, vector<16x256xbf16>,
    %c0_600 = arith.constant 0 : index
    %c127_601 = arith.constant 127 : index
    %608 = vector.load %arg33[%c0_600, %c127_601] : memref<16x512xbf16, #tpu.memory_space<vmem>>, vector<16x256xbf16>
    %609 = vector.broadcast %25 : vector<1x256xbf16> to vector<16x256xbf16>
    %610 = arith.mulf %608, %609 : vector<16x256xbf16>
    %c480_602 = arith.constant 480 : index
    %c0_603 = arith.constant 0 : index
    %611 = vector.load %arg34[%c480_602, %c0_603] : memref<720x256xbf16, #tpu.memory_space<vmem>>, vector<16x256xbf16>
    tpu.vector_store %arg34[%c480_602, %c0_603], %610 {strides = array<i32>} : memref<720x256xbf16, #tpu.memory_space<vmem>>, vector<16x256xbf16>,
    %c0_604 = arith.constant 0 : index
    %c128_605 = arith.constant 128 : index
    %612 = vector.load %arg33[%c0_604, %c128_605] : memref<16x512xbf16, #tpu.memory_space<vmem>>, vector<16x256xbf16>
    %c496_606 = arith.constant 496 : index
    %c0_607 = arith.constant 0 : index
    %613 = vector.load %arg34[%c496_606, %c0_607] : memref<720x256xbf16, #tpu.memory_space<vmem>>, vector<16x256xbf16>
    tpu.vector_store %arg34[%c496_606, %c0_607], %612 {strides = array<i32>} : memref<720x256xbf16, #tpu.memory_space<vmem>>, vector<16x256xbf16>,
    %c0_608 = arith.constant 0 : index
    %c129_609 = arith.constant 129 : index
    %614 = vector.load %arg33[%c0_608, %c129_609] : memref<16x512xbf16, #tpu.memory_space<vmem>>, vector<16x256xbf16>
    %615 = vector.broadcast %30 : vector<1x256xbf16> to vector<16x256xbf16>
    %616 = arith.mulf %614, %615 : vector<16x256xbf16>
    %c512_610 = arith.constant 512 : index
    %c0_611 = arith.constant 0 : index
    %617 = vector.load %arg34[%c512_610, %c0_611] : memref<720x256xbf16, #tpu.memory_space<vmem>>, vector<16x256xbf16>
    tpu.vector_store %arg34[%c512_610, %c0_611], %616 {strides = array<i32>} : memref<720x256xbf16, #tpu.memory_space<vmem>>, vector<16x256xbf16>,
    %c0_612 = arith.constant 0 : index
    %c143_613 = arith.constant 143 : index
    %618 = vector.load %arg33[%c0_612, %c143_613] : memref<16x512xbf16, #tpu.memory_space<vmem>>, vector<16x256xbf16>
    %619 = vector.broadcast %25 : vector<1x256xbf16> to vector<16x256xbf16>
    %620 = arith.mulf %618, %619 : vector<16x256xbf16>
    %c528_614 = arith.constant 528 : index
    %c0_615 = arith.constant 0 : index
    %621 = vector.load %arg34[%c528_614, %c0_615] : memref<720x256xbf16, #tpu.memory_space<vmem>>, vector<16x256xbf16>
    tpu.vector_store %arg34[%c528_614, %c0_615], %620 {strides = array<i32>} : memref<720x256xbf16, #tpu.memory_space<vmem>>, vector<16x256xbf16>,
    %c0_616 = arith.constant 0 : index
    %c144_617 = arith.constant 144 : index
    %622 = vector.load %arg33[%c0_616, %c144_617] : memref<16x512xbf16, #tpu.memory_space<vmem>>, vector<16x256xbf16>
    %c544_618 = arith.constant 544 : index
    %c0_619 = arith.constant 0 : index
    %623 = vector.load %arg34[%c544_618, %c0_619] : memref<720x256xbf16, #tpu.memory_space<vmem>>, vector<16x256xbf16>
    tpu.vector_store %arg34[%c544_618, %c0_619], %622 {strides = array<i32>} : memref<720x256xbf16, #tpu.memory_space<vmem>>, vector<16x256xbf16>,
    %c0_620 = arith.constant 0 : index
    %c145_621 = arith.constant 145 : index
    %624 = vector.load %arg33[%c0_620, %c145_621] : memref<16x512xbf16, #tpu.memory_space<vmem>>, vector<16x256xbf16>
    %625 = vector.broadcast %30 : vector<1x256xbf16> to vector<16x256xbf16>
    %626 = arith.mulf %624, %625 : vector<16x256xbf16>
    %c560_622 = arith.constant 560 : index
    %c0_623 = arith.constant 0 : index
    %627 = vector.load %arg34[%c560_622, %c0_623] : memref<720x256xbf16, #tpu.memory_space<vmem>>, vector<16x256xbf16>
    tpu.vector_store %arg34[%c560_622, %c0_623], %626 {strides = array<i32>} : memref<720x256xbf16, #tpu.memory_space<vmem>>, vector<16x256xbf16>,
    %c0_624 = arith.constant 0 : index
    %c0_625 = arith.constant 0 : index
    %628 = vector.load %arg28[%c0_624, %c0_625] : memref<8x576xbf16, #tpu.memory_space<vmem>>, vector<8x576xbf16>
    %c0_626 = arith.constant 0 : index
    %c0_627 = arith.constant 0 : index
    %629 = vector.load %arg34[%c0_626, %c0_627] : memref<720x256xbf16, #tpu.memory_space<vmem>>, vector<576x256xbf16>
    %cst_628 = arith.constant dense<0.000000e+00> : vector<8x256xf32>
    %630 = tpu.matmul %628, %629, %cst_628 {dimension_numbers = #tpu.dot_dimension_numbers<[1], [0], [0], [1], [0, 0, 1, 1], [], []>} : vector<8x576xbf16>, vector<576x256xbf16>, vector<8x256xf32> -> vector<8x256xf32>
    %c0_629 = arith.constant 0 : index
    %c0_630 = arith.constant 0 : index
    %631 = vector.load %arg29[%c0_629, %c0_630] : memref<8x1xf32, #tpu.memory_space<vmem>>, vector<8x1xf32>
    %632 = vector.broadcast %631 : vector<8x1xf32> to vector<8x256xf32>
    %633 = arith.addf %630, %632 : vector<8x256xf32>
    %cst_631 = arith.constant 0.000000e+00 : f32
    %634 = vector.broadcast %cst_631 : f32 to vector<8x256xf32>
    %635 = arith.cmpf oge, %633, %634 : vector<8x256xf32>
    %cst_632 = arith.constant 2.000000e-01 : f32
    %636 = vector.broadcast %cst_632 : f32 to vector<8x256xf32>
    %637 = arith.mulf %636, %633 : vector<8x256xf32>
    %638 = arith.select %635, %633, %637 : vector<8x256xi1>, vector<8x256xf32>
    %639 = arith.truncf %638 : vector<8x256xf32> to vector<8x256xbf16>
    %c0_633 = arith.constant 0 : index
    %c128_634 = arith.constant 128 : index
    %640 = vector.load %arg33[%c0_633, %c128_634] : memref<16x512xbf16, #tpu.memory_space<vmem>>, vector<8x256xbf16>
    tpu.vector_store %arg33[%c0_633, %c128_634], %639 {strides = array<i32>} : memref<16x512xbf16, #tpu.memory_space<vmem>>, vector<8x256xbf16>,
    %c0_635 = arith.constant 0 : index
    %c111_636 = arith.constant 111 : index
    %641 = vector.load %arg33[%c0_635, %c111_636] : memref<16x512xbf16, #tpu.memory_space<vmem>>, vector<16x256xbf16>
    %642 = vector.broadcast %25 : vector<1x256xbf16> to vector<16x256xbf16>
    %643 = arith.mulf %641, %642 : vector<16x256xbf16>
    %c576_637 = arith.constant 576 : index
    %c0_638 = arith.constant 0 : index
    %644 = vector.load %arg34[%c576_637, %c0_638] : memref<720x256xbf16, #tpu.memory_space<vmem>>, vector<16x256xbf16>
    tpu.vector_store %arg34[%c576_637, %c0_638], %643 {strides = array<i32>} : memref<720x256xbf16, #tpu.memory_space<vmem>>, vector<16x256xbf16>,
    %c0_639 = arith.constant 0 : index
    %c112_640 = arith.constant 112 : index
    %645 = vector.load %arg33[%c0_639, %c112_640] : memref<16x512xbf16, #tpu.memory_space<vmem>>, vector<16x256xbf16>
    %c592_641 = arith.constant 592 : index
    %c0_642 = arith.constant 0 : index
    %646 = vector.load %arg34[%c592_641, %c0_642] : memref<720x256xbf16, #tpu.memory_space<vmem>>, vector<16x256xbf16>
    tpu.vector_store %arg34[%c592_641, %c0_642], %645 {strides = array<i32>} : memref<720x256xbf16, #tpu.memory_space<vmem>>, vector<16x256xbf16>,
    %c0_643 = arith.constant 0 : index
    %c113_644 = arith.constant 113 : index
    %647 = vector.load %arg33[%c0_643, %c113_644] : memref<16x512xbf16, #tpu.memory_space<vmem>>, vector<16x256xbf16>
    %648 = vector.broadcast %30 : vector<1x256xbf16> to vector<16x256xbf16>
    %649 = arith.mulf %647, %648 : vector<16x256xbf16>
    %c608_645 = arith.constant 608 : index
    %c0_646 = arith.constant 0 : index
    %650 = vector.load %arg34[%c608_645, %c0_646] : memref<720x256xbf16, #tpu.memory_space<vmem>>, vector<16x256xbf16>
    tpu.vector_store %arg34[%c608_645, %c0_646], %649 {strides = array<i32>} : memref<720x256xbf16, #tpu.memory_space<vmem>>, vector<16x256xbf16>,
    %c0_647 = arith.constant 0 : index
    %c127_648 = arith.constant 127 : index
    %651 = vector.load %arg33[%c0_647, %c127_648] : memref<16x512xbf16, #tpu.memory_space<vmem>>, vector<16x256xbf16>
    %652 = vector.broadcast %25 : vector<1x256xbf16> to vector<16x256xbf16>
    %653 = arith.mulf %651, %652 : vector<16x256xbf16>
    %c624_649 = arith.constant 624 : index
    %c0_650 = arith.constant 0 : index
    %654 = vector.load %arg34[%c624_649, %c0_650] : memref<720x256xbf16, #tpu.memory_space<vmem>>, vector<16x256xbf16>
    tpu.vector_store %arg34[%c624_649, %c0_650], %653 {strides = array<i32>} : memref<720x256xbf16, #tpu.memory_space<vmem>>, vector<16x256xbf16>,
    %c0_651 = arith.constant 0 : index
    %c128_652 = arith.constant 128 : index
    %655 = vector.load %arg33[%c0_651, %c128_652] : memref<16x512xbf16, #tpu.memory_space<vmem>>, vector<16x256xbf16>
    %c640_653 = arith.constant 640 : index
    %c0_654 = arith.constant 0 : index
    %656 = vector.load %arg34[%c640_653, %c0_654] : memref<720x256xbf16, #tpu.memory_space<vmem>>, vector<16x256xbf16>
    tpu.vector_store %arg34[%c640_653, %c0_654], %655 {strides = array<i32>} : memref<720x256xbf16, #tpu.memory_space<vmem>>, vector<16x256xbf16>,
    %c0_655 = arith.constant 0 : index
    %c129_656 = arith.constant 129 : index
    %657 = vector.load %arg33[%c0_655, %c129_656] : memref<16x512xbf16, #tpu.memory_space<vmem>>, vector<16x256xbf16>
    %658 = vector.broadcast %30 : vector<1x256xbf16> to vector<16x256xbf16>
    %659 = arith.mulf %657, %658 : vector<16x256xbf16>
    %c656_657 = arith.constant 656 : index
    %c0_658 = arith.constant 0 : index
    %660 = vector.load %arg34[%c656_657, %c0_658] : memref<720x256xbf16, #tpu.memory_space<vmem>>, vector<16x256xbf16>
    tpu.vector_store %arg34[%c656_657, %c0_658], %659 {strides = array<i32>} : memref<720x256xbf16, #tpu.memory_space<vmem>>, vector<16x256xbf16>,
    %c0_659 = arith.constant 0 : index
    %c143_660 = arith.constant 143 : index
    %661 = vector.load %arg33[%c0_659, %c143_660] : memref<16x512xbf16, #tpu.memory_space<vmem>>, vector<16x256xbf16>
    %662 = vector.broadcast %25 : vector<1x256xbf16> to vector<16x256xbf16>
    %663 = arith.mulf %661, %662 : vector<16x256xbf16>
    %c672_661 = arith.constant 672 : index
    %c0_662 = arith.constant 0 : index
    %664 = vector.load %arg34[%c672_661, %c0_662] : memref<720x256xbf16, #tpu.memory_space<vmem>>, vector<16x256xbf16>
    tpu.vector_store %arg34[%c672_661, %c0_662], %663 {strides = array<i32>} : memref<720x256xbf16, #tpu.memory_space<vmem>>, vector<16x256xbf16>,
    %c0_663 = arith.constant 0 : index
    %c144_664 = arith.constant 144 : index
    %665 = vector.load %arg33[%c0_663, %c144_664] : memref<16x512xbf16, #tpu.memory_space<vmem>>, vector<16x256xbf16>
    %c688_665 = arith.constant 688 : index
    %c0_666 = arith.constant 0 : index
    %666 = vector.load %arg34[%c688_665, %c0_666] : memref<720x256xbf16, #tpu.memory_space<vmem>>, vector<16x256xbf16>
    tpu.vector_store %arg34[%c688_665, %c0_666], %665 {strides = array<i32>} : memref<720x256xbf16, #tpu.memory_space<vmem>>, vector<16x256xbf16>,
    %c0_667 = arith.constant 0 : index
    %c145_668 = arith.constant 145 : index
    %667 = vector.load %arg33[%c0_667, %c145_668] : memref<16x512xbf16, #tpu.memory_space<vmem>>, vector<16x256xbf16>
    %668 = vector.broadcast %30 : vector<1x256xbf16> to vector<16x256xbf16>
    %669 = arith.mulf %667, %668 : vector<16x256xbf16>
    %c704_669 = arith.constant 704 : index
    %c0_670 = arith.constant 0 : index
    %670 = vector.load %arg34[%c704_669, %c0_670] : memref<720x256xbf16, #tpu.memory_space<vmem>>, vector<16x256xbf16>
    tpu.vector_store %arg34[%c704_669, %c0_670], %669 {strides = array<i32>} : memref<720x256xbf16, #tpu.memory_space<vmem>>, vector<16x256xbf16>,
    %c0_671 = arith.constant 0 : index
    %c0_672 = arith.constant 0 : index
    %671 = vector.load %arg30[%c0_671, %c0_672] : memref<16x720xbf16, #tpu.memory_space<vmem>>, vector<16x720xbf16>
    %c0_673 = arith.constant 0 : index
    %c0_674 = arith.constant 0 : index
    %672 = vector.load %arg34[%c0_673, %c0_674] : memref<720x256xbf16, #tpu.memory_space<vmem>>, vector<720x256xbf16>
    %cst_675 = arith.constant dense<0.000000e+00> : vector<16x256xf32>
    %673 = tpu.matmul %671, %672, %cst_675 {dimension_numbers = #tpu.dot_dimension_numbers<[1], [0], [0], [1], [0, 0, 1, 1], [], []>} : vector<16x720xbf16>, vector<720x256xbf16>, vector<16x256xf32> -> vector<16x256xf32>
    %c0_676 = arith.constant 0 : index
    %c0_677 = arith.constant 0 : index
    %674 = vector.load %arg31[%c0_676, %c0_677] : memref<16x1xf32, #tpu.memory_space<vmem>>, vector<16x1xf32>
    %675 = vector.broadcast %674 : vector<16x1xf32> to vector<16x256xf32>
    %676 = arith.addf %673, %675 : vector<16x256xf32>
    %cst_678 = arith.constant 2.000000e-01 : f32
    %677 = vector.broadcast %cst_678 : f32 to vector<16x256xf32>
    %678 = arith.mulf %677, %676 : vector<16x256xf32>
    %c0_679 = arith.constant 0 : index
    %c0_680 = arith.constant 0 : index
    %679 = vector.load %arg35[%c0_679, %c0_680] : memref<16x256xf32, #tpu.memory_space<vmem>>, vector<16x256xf32>
    %680 = arith.addf %678, %679 : vector<16x256xf32>
    %c0_681 = arith.constant 0 : index
    %c0_682 = arith.constant 0 : index
    %681 = vector.load %arg35[%c0_681, %c0_682] : memref<16x256xf32, #tpu.memory_space<vmem>>, vector<16x256xf32>
    tpu.vector_store %arg35[%c0_681, %c0_682], %680 {strides = array<i32>} : memref<16x256xf32, #tpu.memory_space<vmem>>, vector<16x256xf32>,
    %c0_683 = arith.constant 0 : index
    %c0_684 = arith.constant 0 : index
    %682 = vector.load %arg35[%c0_683, %c0_684] : memref<16x256xf32, #tpu.memory_space<vmem>>, vector<16x256xf32>
    %cst_685 = arith.constant 2.000000e-01 : f32
    %683 = vector.broadcast %cst_685 : f32 to vector<16x256xf32>
    %684 = arith.mulf %683, %682 : vector<16x256xf32>
    %c0_686 = arith.constant 0 : index
    %c0_687 = arith.constant 0 : index
    %c0_688 = arith.constant 0 : index
    %685 = vector.load %arg1[%c0_686, %c0_687, %c0_688] : memref<1x16x256xf32, #tpu.memory_space<vmem>>, vector<1x16x256xf32>
    %686 = vector.shape_cast %685 : vector<1x16x256xf32> to vector<16x256xf32>
    %687 = arith.addf %684, %686 : vector<16x256xf32>
    %c0_689 = arith.constant 0 : index
    %c0_690 = arith.constant 0 : index
    %c0_691 = arith.constant 0 : index
    %688 = vector.load %arg32[%c0_689, %c0_690, %c0_691] : memref<1x16x256xf32, #tpu.memory_space<vmem>>, vector<1x16x256xf32>
    %689 = vector.shape_cast %688 : vector<1x16x256xf32> to vector<16x256xf32>
    %690 = vector.shape_cast %687 : vector<16x256xf32> to vector<1x16x256xf32>
    tpu.vector_store %arg32[%c0_689, %c0_690, %c0_691], %690 {strides = array<i32>} : memref<1x16x256xf32, #tpu.memory_space<vmem>>, vector<1x16x256xf32>,
    return
  }
  func.func @transform_0(%arg0: i32) -> (i32, i32, i32) {
    %c0_i32 = arith.constant 0 : i32
    %c0_i32_0 = arith.constant 0 : i32
    %c0_i32_1 = arith.constant 0 : i32
    return %arg0, %c0_i32, %c0_i32_0 : i32, i32, i32
  }
  func.func @transform_1(%arg0: i32) -> (i32, i32) {
    %c0_i32 = arith.constant 0 : i32
    %c0_i32_0 = arith.constant 0 : i32
    %c0_i32_1 = arith.constant 0 : i32
    return %c0_i32, %c0_i32_0 : i32, i32
  }
  func.func @transform_2(%arg0: i32) -> (i32, i32) {
    %c0_i32 = arith.constant 0 : i32
    %c0_i32_0 = arith.constant 0 : i32
    %c0_i32_1 = arith.constant 0 : i32
    return %c0_i32, %c0_i32_0 : i32, i32
  }
  func.func @transform_3(%arg0: i32) -> (i32, i32) {
    %c0_i32 = arith.constant 0 : i32
    %c0_i32_0 = arith.constant 0 : i32
    %c0_i32_1 = arith.constant 0 : i32
    return %c0_i32, %c0_i32_0 : i32, i32
  }
  func.func @transform_4(%arg0: i32) -> (i32, i32) {
    %c0_i32 = arith.constant 0 : i32
    %c0_i32_0 = arith.constant 0 : i32
    %c0_i32_1 = arith.constant 0 : i32
    return %c0_i32, %c0_i32_0 : i32, i32
  }
  func.func @transform_5(%arg0: i32) -> (i32, i32) {
    %c0_i32 = arith.constant 0 : i32
    %c0_i32_0 = arith.constant 0 : i32
    %c0_i32_1 = arith.constant 0 : i32
    return %c0_i32, %c0_i32_0 : i32, i32
  }
  func.func @transform_6(%arg0: i32) -> (i32, i32) {
    %c0_i32 = arith.constant 0 : i32
    %c0_i32_0 = arith.constant 0 : i32
    %c0_i32_1 = arith.constant 0 : i32
    return %c0_i32, %c0_i32_0 : i32, i32
  }
  func.func @transform_7(%arg0: i32) -> (i32, i32) {
    %c0_i32 = arith.constant 0 : i32
    %c0_i32_0 = arith.constant 0 : i32
    %c0_i32_1 = arith.constant 0 : i32
    return %c0_i32, %c0_i32_0 : i32, i32
  }
  func.func @transform_8(%arg0: i32) -> (i32, i32) {
    %c0_i32 = arith.constant 0 : i32
    %c0_i32_0 = arith.constant 0 : i32
    %c0_i32_1 = arith.constant 0 : i32
    return %c0_i32, %c0_i32_0 : i32, i32
  }
  func.func @transform_9(%arg0: i32) -> (i32, i32) {
    %c0_i32 = arith.constant 0 : i32
    %c0_i32_0 = arith.constant 0 : i32
    %c0_i32_1 = arith.constant 0 : i32
    return %c0_i32, %c0_i32_0 : i32, i32
  }
  func.func @transform_10(%arg0: i32) -> (i32, i32) {
    %c0_i32 = arith.constant 0 : i32
    %c0_i32_0 = arith.constant 0 : i32
    %c0_i32_1 = arith.constant 0 : i32
    return %c0_i32, %c0_i32_0 : i32, i32
  }
  func.func @transform_11(%arg0: i32) -> (i32, i32) {
    %c0_i32 = arith.constant 0 : i32
    %c0_i32_0 = arith.constant 0 : i32
    %c0_i32_1 = arith.constant 0 : i32
    return %c0_i32, %c0_i32_0 : i32, i32
  }
  func.func @transform_12(%arg0: i32) -> (i32, i32) {
    %c0_i32 = arith.constant 0 : i32
    %c0_i32_0 = arith.constant 0 : i32
    %c0_i32_1 = arith.constant 0 : i32
    return %c0_i32, %c0_i32_0 : i32, i32
  }
  func.func @transform_13(%arg0: i32) -> (i32, i32) {
    %c0_i32 = arith.constant 0 : i32
    %c0_i32_0 = arith.constant 0 : i32
    %c0_i32_1 = arith.constant 0 : i32
    return %c0_i32, %c0_i32_0 : i32, i32
  }
  func.func @transform_14(%arg0: i32) -> (i32, i32) {
    %c0_i32 = arith.constant 0 : i32
    %c0_i32_0 = arith.constant 0 : i32
    %c0_i32_1 = arith.constant 0 : i32
    return %c0_i32, %c0_i32_0 : i32, i32
  }
  func.func @transform_15(%arg0: i32) -> (i32, i32) {
    %c0_i32 = arith.constant 0 : i32
    %c0_i32_0 = arith.constant 0 : i32
    %c0_i32_1 = arith.constant 0 : i32
    return %c0_i32, %c0_i32_0 : i32, i32
  }
  func.func @transform_16(%arg0: i32) -> (i32, i32) {
    %c0_i32 = arith.constant 0 : i32
    %c0_i32_0 = arith.constant 0 : i32
    %c0_i32_1 = arith.constant 0 : i32
    return %c0_i32, %c0_i32_0 : i32, i32
  }
  func.func @transform_17(%arg0: i32) -> (i32, i32) {
    %c0_i32 = arith.constant 0 : i32
    %c0_i32_0 = arith.constant 0 : i32
    %c0_i32_1 = arith.constant 0 : i32
    return %c0_i32, %c0_i32_0 : i32, i32
  }
  func.func @transform_18(%arg0: i32) -> (i32, i32) {
    %c0_i32 = arith.constant 0 : i32
    %c0_i32_0 = arith.constant 0 : i32
    %c0_i32_1 = arith.constant 0 : i32
    return %c0_i32, %c0_i32_0 : i32, i32
  }
  func.func @transform_19(%arg0: i32) -> (i32, i32) {
    %c0_i32 = arith.constant 0 : i32
    %c0_i32_0 = arith.constant 0 : i32
    %c0_i32_1 = arith.constant 0 : i32
    return %c0_i32, %c0_i32_0 : i32, i32
  }
  func.func @transform_20(%arg0: i32) -> (i32, i32) {
    %c0_i32 = arith.constant 0 : i32
    %c0_i32_0 = arith.constant 0 : i32
    %c0_i32_1 = arith.constant 0 : i32
    return %c0_i32, %c0_i32_0 : i32, i32
  }
  func.func @transform_21(%arg0: i32) -> (i32, i32) {
    %c0_i32 = arith.constant 0 : i32
    %c0_i32_0 = arith.constant 0 : i32
    %c0_i32_1 = arith.constant 0 : i32
    return %c0_i32, %c0_i32_0 : i32, i32
  }
  func.func @transform_22(%arg0: i32) -> (i32, i32) {
    %c0_i32 = arith.constant 0 : i32
    %c0_i32_0 = arith.constant 0 : i32
    %c0_i32_1 = arith.constant 0 : i32
    return %c0_i32, %c0_i32_0 : i32, i32
  }
  func.func @transform_23(%arg0: i32) -> (i32, i32) {
    %c0_i32 = arith.constant 0 : i32
    %c0_i32_0 = arith.constant 0 : i32
    %c0_i32_1 = arith.constant 0 : i32
    return %c0_i32, %c0_i32_0 : i32, i32
  }
  func.func @transform_24(%arg0: i32) -> (i32, i32) {
    %c0_i32 = arith.constant 0 : i32
    %c0_i32_0 = arith.constant 0 : i32
    %c0_i32_1 = arith.constant 0 : i32
    return %c0_i32, %c0_i32_0 : i32, i32
  }
  func.func @transform_25(%arg0: i32) -> (i32, i32) {
    %c0_i32 = arith.constant 0 : i32
    %c0_i32_0 = arith.constant 0 : i32
    %c0_i32_1 = arith.constant 0 : i32
    return %c0_i32, %c0_i32_0 : i32, i32
  }
  func.func @transform_26(%arg0: i32) -> (i32, i32) {
    %c0_i32 = arith.constant 0 : i32
    %c0_i32_0 = arith.constant 0 : i32
    %c0_i32_1 = arith.constant 0 : i32
    return %c0_i32, %c0_i32_0 : i32, i32
  }
  func.func @transform_27(%arg0: i32) -> (i32, i32) {
    %c0_i32 = arith.constant 0 : i32
    %c0_i32_0 = arith.constant 0 : i32
    %c0_i32_1 = arith.constant 0 : i32
    return %c0_i32, %c0_i32_0 : i32, i32
  }
  func.func @transform_28(%arg0: i32) -> (i32, i32) {
    %c0_i32 = arith.constant 0 : i32
    %c0_i32_0 = arith.constant 0 : i32
    %c0_i32_1 = arith.constant 0 : i32
    return %c0_i32, %c0_i32_0 : i32, i32
  }
  func.func @transform_29(%arg0: i32) -> (i32, i32) {
    %c0_i32 = arith.constant 0 : i32
    %c0_i32_0 = arith.constant 0 : i32
    %c0_i32_1 = arith.constant 0 : i32
    return %c0_i32, %c0_i32_0 : i32, i32
  }
  func.func @transform_30(%arg0: i32) -> (i32, i32) {
    %c0_i32 = arith.constant 0 : i32
    %c0_i32_0 = arith.constant 0 : i32
    %c0_i32_1 = arith.constant 0 : i32
    return %c0_i32, %c0_i32_0 : i32, i32
  }
  func.func @transform_31(%arg0: i32) -> (i32, i32, i32) {
    %c0_i32 = arith.constant 0 : i32
    %c0_i32_0 = arith.constant 0 : i32
    %c0_i32_1 = arith.constant 0 : i32
    return %arg0, %c0_i32, %c0_i32_0 : i32, i32, i32
  }
}

</mosaic_0001>

<bundles_post_ra>
// kernel: rrdb_forward.1
= control target key start
LH: loop header
LB: loop body
LE: loop exit
PB: predicated region body
PF: predicated region fallthrough
CT: control target
= control target key end

     0   :  { %s6797_s6 = smov 1   ;;  %s6798_s10 = smov 2   ;;  %s9580_s0 = inlined_call_operand.smem [shape: u32[32], index: -1, kind: input, shape index: {}] }
   0x1   :  { %s6846_s5 = sld [smem:[%s9580_s0]]   ;;  %s6799_s14 = smov 3  }
   0x2   :  { %s6851_s9 = sld [smem:[%s9580_s0 + %s6797_s6]]   ;;  %s6800_s18 = smov 4  }
   0x3   :  { %s6856_s13 = sld [smem:[%s9580_s0 + %s6798_s10]]   ;;  %s6801_s22 = smov 5  }
   0x4   :  { %s6861_s17 = sld [smem:[%s9580_s0 + %s6799_s14]]   ;;  %s6802_s26 = smov 6  }
   0x5   :  { %s6866_s21 = sld [smem:[%s9580_s0 + %s6800_s18]]   ;;  %s6803_s30 = smov 7  }
   0x6   :  { %s6871_s25 = sld [smem:[%s9580_s0 + %s6801_s22]]   ;;  %s6804_s4 = smov 8  }
   0x7   :  { %9684 = sst [smem:[#allocation5_spill]] %s6846_s5  ;;  %s6805_s10 = smov 9  }
   0x8   :  { %s6876_s29 = sld [smem:[%s9580_s0 + %s6802_s26]]   ;;  %s6806_s15 = smov 10  }
   0x9   :  { %s6881_s3 = sld [smem:[%s9580_s0 + %s6803_s30]]   ;;  %s6807_s20 = smov 11  }
   0xa   :  { %s6886_s8 = sld [smem:[%s9580_s0 + %s6804_s4]]   ;;  %s6808_s26 = smov 12  }
   0xb   :  { %s6891_s14 = sld [smem:[%s9580_s0 + %s6805_s10]]   ;;  %s6809_s1 = smov 13  }
   0xc   :  { %s6896_s19 = sld [smem:[%s9580_s0 + %s6806_s15]]   ;;  %s6810_s7 = smov 14  }
   0xd   :  { %s6901_s24 = sld [smem:[%s9580_s0 + %s6807_s20]]   ;;  %s6811_s15 = smov 15  }
   0xe   :  { %s6906_s30 = sld [smem:[%s9580_s0 + %s6808_s26]]   ;;  %s6812_s22 = smov 16  }
   0xf   :  { %9685 = sst [smem:[#allocation6_spill]] %s6881_s3  ;;  %s6813_s28 = smov 17  }
  0x10   :  { %s6911_s6 = sld [smem:[%s9580_s0 + %s6809_s1]]  }
  0x11   :  { %s6916_s12 = sld [smem:[%s9580_s0 + %s6810_s7]]   ;;  %s6814_s7 = smov 18  }
  0x12   :  { %s6921_s20 = sld [smem:[%s9580_s0 + %s6811_s15]]   ;;  %s6815_s15 = smov 19  }
  0x13   :  { %s6926_s27 = sld [smem:[%s9580_s0 + %s6812_s22]]   ;;  %s6816_s22 = smov 20  }
  0x14   :  { %s6931_s4 = sld [smem:[%s9580_s0 + %s6813_s28]]   ;;  %s6817_s28 = smov 21  }
  0x16   :  { %9686 = sst [smem:[#allocation7_spill]] %s6911_s6 }
  0x17   :  { %9687 = sst [smem:[#allocation8_spill]] %s6916_s12 }
  0x18   :  { %9688 = sst [smem:[#allocation9_spill]] %s6921_s20 }
  0x19   :  { %9689 = sst [smem:[#allocation10_spill]] %s6926_s27 }
  0x1a   :  { %9690 = sst [smem:[#allocation11_spill]] %s6931_s4 }
  0x1b   :  { %s6936_s12 = sld [smem:[%s9580_s0 + %s6814_s7]]   ;;  %s6818_s7 = smov 22  }
  0x1c   :  { %s6941_s20 = sld [smem:[%s9580_s0 + %s6815_s15]]   ;;  %s6819_s15 = smov 23  }
  0x1d   :  { %s6946_s27 = sld [smem:[%s9580_s0 + %s6816_s22]]   ;;  %s6820_s22 = smov 24  }
  0x1e   :  { %s6951_s4 = sld [smem:[%s9580_s0 + %s6817_s28]]   ;;  %s6821_s28 = smov 25  }
  0x21   :  { %9691 = sst [smem:[#allocation12_spill]] %s6936_s12 }
  0x22   :  { %9692 = sst [smem:[#allocation13_spill]] %s6941_s20 }
  0x23   :  { %9693 = sst [smem:[#allocation14_spill]] %s6946_s27 }
  0x24   :  { %9694 = sst [smem:[#allocation15_spill]] %s6951_s4 }
  0x25   :  { %s6956_s12 = sld [smem:[%s9580_s0 + %s6818_s7]]   ;;  %s6822_s7 = smov 26  }
  0x26   :  { %s6961_s20 = sld [smem:[%s9580_s0 + %s6819_s15]]   ;;  %s6823_s15 = smov 27  }
  0x27   :  { %s6966_s27 = sld [smem:[%s9580_s0 + %s6820_s22]]   ;;  %s6824_s22 = smov 28  }
  0x28   :  { %s6971_s4 = sld [smem:[%s9580_s0 + %s6821_s28]]   ;;  %s6825_s28 = smov 29  }
  0x2b   :  { %9695 = sst [smem:[#allocation16_spill]] %s6956_s12 }
  0x2c   :  { %9696 = sst [smem:[#allocation17_spill]] %s6961_s20 }
  0x2d   :  { %9697 = sst [smem:[#allocation18_spill]] %s6966_s27 }
  0x2e   :  { %9698 = sst [smem:[#allocation19_spill]] %s6971_s4 }
  0x2f   :  { %s6976_s12 = sld [smem:[%s9580_s0 + %s6822_s7]]   ;;  %s6826_s7 = smov 30  }
  0x30   :  { %s6981_s20 = sld [smem:[%s9580_s0 + %s6823_s15]]   ;;  %s6827_s15 = smov 31  }
  0x31   :  { %s6986_s27 = sld [smem:[%s9580_s0 + %s6824_s22]]   ;;  %s7003_s22 = smov 0  }
  0x32   :  { %s6991_s4 = sld [smem:[%s9580_s0 + %s6825_s28]]  }
  0x35   :  { %9699 = sst [smem:[#allocation20_spill]] %s6976_s12 }
  0x36   :  { %9700 = sst [smem:[#allocation21_spill]] %s6981_s20 }
  0x37   :  { %s6996_s12 = sld [smem:[%s9580_s0 + %s6826_s7]]  }
  0x38   :  { %s7001_s20 = sld [smem:[%s9580_s0 + %s6827_s15]]  }
  0x39 LB: > { %s9701_s6 = sld [smem:[#allocation7_spill]]  ;;  %s9702_s3 = sld [smem:[#allocation6_spill]]  ;;  %s6795_s22 = sphi %s7003_s22, %s73_s22  }
  0x3a   : > { %s6467_s23 = sadd.s32 4294967295, %s6795_s22   ;;  %p6471_p0 = scmp.ge.s32.totalorder %s6795_s22, 1 }
  0x3b   : > { %p869_p1 = scmp.lt.s32.totalorder %s6795_s22, 3 }
  0x3d   : > { %p870_p2 = pnand %p6471_p0, %p869_p1 }
  0x3f   : > { %873 = sbr.rel (%p870_p2) target bundleno = 5993 (0x1769), region = 144 }
  0x46   : > { %v962_v0 = vlaneseq  ;;  %v9588_v1 = vmov 0   ;;  %s9703_s5 = sld [smem:[#allocation5_spill]]  ;;  %p949_p3 = scmp.lt.s32.totalorder %s6467_s23, 1  ;;  %v6829_v6 = vmov 0.0   ;;  %vm1030_vm4 = vcmask 908288   ;;  %v7155_v53 = vld [vmem:[%s6851_s9] sm:$0xff] }
  0x47   : > { %960 = vst [vmem:[#allocation2] sm:$0xff] %v9588_v1  ;;  %6710 = vset.pattern.permute.xlu0 %v9588_v1  ;;  %6711 = vset.pattern.permute.xlu1 %v9588_v1  ;;  %s9657_s28 = smov 113   ;;  %s9651_s1 = smov 111   ;;  %vm1113_vm5 = vcmask 1039360   ;;  %vm1082_vm6 = vcmask 924672   ;;  %vm1099_vm7 = vcmask 121856   ;;  %v6481_v55 = vcombine.high %v7155_v53, %v7155_v53 }
  0x48   : > { %v963_v2 = vand.u32 127, %v962_v0  ;;  %s9835_s23 = smov (!%p949_p3, %s6467_s23), 1  ;;  %s9664_s2 = smov 127   ;;  %vm1130_vm8 = vcmask 7168   ;;  %vm1047_vm9 = vcmask 138240   ;;  %vm1066_vm10 = vcmask 130048  }
  0x49   : > { %s9620_s0 = sshll.u32 %s9835_s23, 5  ;;  %s9630_s7 = smov 1   ;;  %6482 = vmatprep.mubr.msk.bf16.mxu0 %vm1066_vm10, %v6481_v55  ;;  %v1266_v59 = vld [vmem:[%s6856_s13] sm:$0xff]  ;;  %vm1211_vm11 = vcmask 916480   ;;  %vm1553_vm14 = vcmask 261120  }
  0x4a   : > { %v969_v3 = vand.u32 15, %v963_v2  ;;  %v964_v4 = vadd.s32 128, %v963_v2  ;;  %s9655_s10 = smov 15   ;;  %s9661_s11 = smov 17  }
  0x4b   : > { %s9653_s15 = smov 16   ;;  %s9659_s16 = smov 112  }
  0x4c   : > { %vm997_vm0 = vcmp.le.s32.totalorder %v969_v3, 14  ;;  %vm989_vm1 = vcmp.ge.s32.totalorder %v969_v3, 1  ;;  %v976_v5 = vand.u32 15, %v964_v4  ;;  %s7020_s26 = scalar_lea.vmem %s9703_s5, %s9620_s0  ;;  %s9748_s18 = sld [smem:[#allocation9_spill]] }
  0x4d   : > { %v6478_v7 = vsel %vm997_vm0, 1.0, %v6829_v6  ;;  %v6476_v8 = vsel %vm989_vm1, 1.0, %v6829_v6  ;;  %v1005_v13 = vld [vmem:[%s7020_s26] sm:$0xff]  ;;  %v1007_v14 = vld [vmem:[%s7020_s26 + $0x10] sm:$0xff]  ;;  %v1006_v15 = vld [vmem:[%s7020_s26 + $0x8] sm:$0xff]  ;;  %vm1890_vm1 = vcmask 392192  }
  0x4e   : > { %v1003_v9 = vpack.c.bf16 %v6478_v7, %v6478_v7  ;;  %v995_v10 = vpack.c.bf16 %v6476_v8, %v6476_v8  ;;  %vm998_vm2 = vcmp.le.s32.totalorder %v976_v5, 14  ;;  %vm990_vm3 = vcmp.ge.s32.totalorder %v976_v5, 1  ;;  %v1008_v19 = vld [vmem:[%s7020_s26 + $0x18] sm:$0xff]  ;;  %s9749_s0 = sld [smem:[#allocation8_spill]]  ;;  %s9797_s5 = sld [smem:[#allocation15_spill]] }
  0x4f   : > { %v6479_v11 = vsel %vm998_vm2, 1.0, %v6829_v6  ;;  %v6477_v12 = vsel %vm990_vm3, 1.0, %v6829_v6  ;;  %v7027_v18 = vpack.c.bf16 %v1007_v14, %v1005_v13  ;;  %v7030_v20 = vpack.c.bf16 %v1008_v19, %v1006_v15 }
  0x50   : > { %1078 = vrot.lane.b32.xlu1 %v1003_v9, %s9657_s28  ;;  %1026 = vrot.lane.b32.xlu0 %v995_v10, %s9651_s1  ;;  %v1004_v16 = vpack.c.bf16 %v6479_v11, %v6479_v11  ;;  %v996_v17 = vpack.c.bf16 %v6477_v12, %v6477_v12 }
  0x51   : > { %1019 = vst [vmem:[#allocation2 + $0x8] sm:$0xff] %v7027_v18  ;;  %1020 = vst [vmem:[#allocation2 + $0x10] sm:$0xff] %v7030_v20 }
  0x54   : > { %1080 = vrot.lane.b32.xlu1 %v1004_v16, %s9657_s28  ;;  %1028 = vrot.lane.b32.xlu0 %v996_v17, %s9651_s1 }
  0x58   : > { %1111 = vrot.lane.b32.xlu1 %v996_v17, %s9664_s2  ;;  %1109 = vrot.lane.b32.xlu0 %v995_v10, %s9664_s2 }
  0x5c   : > { %1146 = vrot.lane.b32.xlu1 %v1004_v16, %s9630_s7  ;;  %1144 = vrot.lane.b32.xlu0 %v1003_v9, %s9630_s7 }
  0x60   : > { %1175 = vrot.lane.b32.xlu1 %v996_v17, %s9655_s10  ;;  %1173 = vrot.lane.b32.xlu0 %v995_v10, %s9655_s10 }
  0x64   : > { %1223 = vrot.lane.b32.xlu1 %v1004_v16, %s9661_s11  ;;  %1221 = vrot.lane.b32.xlu0 %v1003_v9, %s9661_s11 }
  0x68   : > { %1062 = vrot.lane.b32.xlu1 %v7027_v18, %s9653_s15  ;;  %1064 = vrot.lane.b32.xlu0 %v7030_v20, %s9653_s15 }
  0x6c   : > { %1060 = vrot.lane.b32.xlu1 %v9588_v1, %s9653_s15 }
  0xc2   : > { %v7050_v21 = vpop.permute.xlu1 %1078  ;;  %v7052_v22 = vpop.permute.xlu0 %1026 }
  0xc3   : > { %9704 = vst [vmem:[#allocation22_spill] sm:$0xff] %v7050_v21  ;;  %9705 = vst [vmem:[#allocation23_spill] sm:$0xff] %v7052_v22  ;;  %v7055_v23 = vmul.bf16 0, %v7052_v22  ;;  %v7060_v24 = vmul.bf16 0, %v7050_v21 }
  0xc5   : > { %1041 = vrot.lane.b32.xlu0 %v7055_v23, %s9661_s11  ;;  %9706 = vst [vmem:[#allocation24_spill] sm:$0xff] %v7060_v24 }
  0xc6   : > { %v7062_v25 = vpop.permute.xlu1 %1080  ;;  %v7064_v26 = vpop.permute.xlu0 %1028 }
  0xc7   : > { %v1037_v27 = vmul.bf16 %v7064_v26, %v7030_v20  ;;  %v7071_v28 = vsel %vm1030_vm4, %v7052_v22, %v7064_v26  ;;  %v1089_v29 = vmul.bf16 %v7062_v25, %v7030_v20  ;;  %v7099_v36 = vsel %vm1082_vm6, %v7050_v21, %v7062_v25 }
  0xc8   : > { %v1036_v32 = vmul.bf16 %v7071_v28, %v7027_v18  ;;  %v1088_v40 = vmul.bf16 %v7099_v36, %v7027_v18 }
  0xc9   : > { %1093 = vrot.lane.b32.xlu0 %v7060_v24, %s9655_s10  ;;  %1045 = vrot.lane.b32.xlu1 %v1037_v27, %s9661_s11 }
  0xca   : > { %v7078_v30 = vpop.permute.xlu1 %1111  ;;  %v7080_v31 = vpop.permute.xlu0 %1109 }
  0xcb   : > { %9707 = vst [vmem:[#allocation25_spill] sm:$0xff] %v7080_v31  ;;  %v7087_v33 = vmul.bf16 0, %v7080_v31  ;;  %v1120_v34 = vmul.bf16 %v7078_v30, %v7030_v20  ;;  %v7094_v35 = vsel %vm1113_vm5, %v7080_v31, %v7078_v30 }
  0xcc   : > { %v1119_v39 = vmul.bf16 %v7094_v35, %v7027_v18 }
  0xcd   : > { %1097 = vrot.lane.b32.xlu1 %v1089_v29, %s9655_s10  ;;  %1043 = vrot.lane.b32.xlu0 %v1036_v32, %s9661_s11 }
  0xce   : > { %v7101_v37 = vpop.permute.xlu1 %1146  ;;  %v7103_v38 = vpop.permute.xlu0 %1144 }
  0xcf   : > { %9708 = vst [vmem:[#allocation26_spill] sm:$0xff] %v7101_v37  ;;  %v7115_v41 = vmul.bf16 0, %v7101_v37  ;;  %v1152_v42 = vmul.bf16 %v7103_v38, %v7027_v18  ;;  %v7139_v48 = vsel %vm1130_vm8, %v7103_v38, %v7101_v37 }
  0xd0   : > { %9713 = vst [vmem:[#allocation31_spill] sm:$0xff] %v7139_v48  ;;  %v1153_v50 = vmul.bf16 %v7139_v48, %v7030_v20 }
  0xd1   : > { %1124 = vrot.lane.b32.xlu1 %v7087_v33, %s9630_s7  ;;  %1128 = vrot.lane.b32.xlu0 %v1120_v34, %s9630_s7 }
  0xd2   : > { %v7119_v43 = vpop.permute.xlu1 %1175  ;;  %v7121_v44 = vpop.permute.xlu0 %1173 }
  0xd3   : > { %9709 = vst [vmem:[#allocation27_spill] sm:$0xff] %v7119_v43  ;;  %9710 = vst [vmem:[#allocation28_spill] sm:$0xff] %v7121_v44  ;;  %v1181_v45 = vmul.bf16 %v7121_v44, %v7027_v18  ;;  %v7129_v46 = vmul.bf16 0, %v7119_v43  ;;  %v7134_v47 = vsel %vm1099_vm7, %v7121_v44, %v7119_v43 }
  0xd4   : > { %9712 = vst [vmem:[#allocation30_spill] sm:$0xff] %v7134_v47  ;;  %v1182_v49 = vmul.bf16 %v7134_v47, %v7030_v20 }
  0xd5   : > { %1126 = vrot.lane.b32.xlu1 %v1119_v39, %s9630_s7  ;;  %1095 = vrot.lane.b32.xlu0 %v1088_v40, %s9655_s10  ;;  %9711 = vst [vmem:[#allocation29_spill] sm:$0xff] %v7129_v46 }
  0xd6   : > { %v7148_v51 = vpop.permute.xlu1 %1223  ;;  %v7150_v52 = vpop.permute.xlu0 %1221 }
  0xd7   : > { %9714 = vst [vmem:[#allocation32_spill] sm:$0xff] %v7148_v51  ;;  %9715 = vst [vmem:[#allocation33_spill] sm:$0xff] %v7150_v52  ;;  %v7160_v54 = vsel %vm1047_vm9, %v7150_v52, %v7148_v51  ;;  %v1229_v57 = vmul.bf16 %v7150_v52, %v7027_v18  ;;  %v7177_v58 = vmul.bf16 0, %v7148_v51 }
  0xd8   : > { %9716 = vst [vmem:[#allocation34_spill] sm:$0xff] %v7160_v54  ;;  %v1230_v56 = vmul.bf16 %v7160_v54, %v7030_v20 }
  0xd9   : > { %1162 = vrot.lane.b32.xlu1 %v7115_v41, %s9664_s2  ;;  %1158 = vrot.lane.b32.xlu0 %v1152_v42, %s9664_s2  ;;  %9717 = vst [vmem:[#allocation35_spill] sm:$0xff] %v7177_v58 }
  0xda   : > { %v1063_v60 = vpop.permute.xlu1 %1062  ;;  %v1065_v61 = vpop.permute.xlu0 %1064 }
  0xdb   : > { %v7194_v7 = vsel %vm1066_vm10, %v1063_v60, %v1065_v61 }
  0xdd   : > { %1187 = vrot.lane.b32.xlu1 %v1181_v45, %s9657_s28  ;;  %1191 = vrot.lane.b32.xlu0 %v7129_v46, %s9657_s28 }
  0xde   : > { %v1061_v62 = vpop.permute.xlu1 %1060 }
  0xdf   : > { %v7201_v10 = vsel %vm1066_vm10, %v1061_v62, %v1063_v60 }
  0xe1   : > { %1189 = vrot.lane.b32.xlu1 %v1182_v49, %s9657_s28  ;;  %1160 = vrot.lane.b32.xlu0 %v1153_v50, %s9664_s2 }
  0xe5   : > { %1209 = vrot.lane.b32.xlu1 %v9588_v1, %s9659_s16  ;;  %1207 = vrot.lane.b32.xlu0 %v7030_v20, %s9659_s16 }
  0xe9   : > { %1237 = vrot.lane.b32.xlu1 %v1230_v56, %s9651_s1  ;;  %1205 = vrot.lane.b32.xlu0 %v7027_v18, %s9659_s16 }
  0xed   : > { %1235 = vrot.lane.b32.xlu1 %v1229_v57, %s9651_s1  ;;  %1239 = vrot.lane.b32.xlu0 %v7177_v58, %s9651_s1 }
  0xf1   : > { %1269 = vperm.xlu0 %6710, %v1266_v59  }
  0xf5   : > { %1342 = vrot.lane.b32.xlu0 %v7055_v23, %s9661_s11 }
 0x137   : > { %v1042_v63 = vpop.permute.xlu0 %1041 }
 0x13b   : > { %v1094_v0 = vpop.permute.xlu0 %1093  ;;  %v1046_v2 = vpop.permute.xlu1 %1045 }
 0x13f   : > { %v1098_v3 = vpop.permute.xlu1 %1097  ;;  %v1044_v4 = vpop.permute.xlu0 %1043 }
 0x140   : > { %v7186_v5 = vsel %vm1047_vm9, %v1042_v63, %v1044_v4  ;;  %v7189_v6 = vsel %vm1047_vm9, %v1044_v4, %v1046_v2 }
 0x141   : > { %1282 = vmatprep.subr.bf16.mxu0 %v7189_v6  ;;  %1557 = vmatprep.subr.bf16.mxu1 %v7189_v6 }
 0x142   : > { %1283 = vmatpush1.bf16.msra.mxu0 %v7186_v5  ;;  %1558 = vmatpush1.bf16.msra.mxu1 %v7186_v5 }
 0x143   : > { %v1125_v8 = vpop.permute.xlu1 %1124  ;;  %1284 = vmatprep.subr.bf16.mxu0 %v7194_v7  ;;  %1559 = vmatprep.subr.bf16.mxu1 %v7194_v7  ;;  %v1129_v9 = vpop.permute.xlu0 %1128 }
 0x146   : > { %1285 = vmatpush1.bf16.msra.mxu0 %v7201_v10  ;;  %1560 = vmatpush1.bf16.msra.mxu1 %v7201_v10 }
 0x147   : > { %v1127_v11 = vpop.permute.xlu1 %1126  ;;  %v1096_v12 = vpop.permute.xlu0 %1095 }
 0x148   : > { %v7206_v13 = vsel %vm1099_vm7, %v1094_v0, %v1096_v12  ;;  %v7209_v14 = vsel %vm1099_vm7, %v1096_v12, %v1098_v3  ;;  %v7214_v15 = vsel %vm1130_vm8, %v1127_v11, %v1129_v9  ;;  %v7221_v19 = vsel %vm1130_vm8, %v1125_v8, %v1127_v11 }
 0x149   : > { %1286 = vmatprep.subr.bf16.mxu0 %v7209_v14  ;;  %1561 = vmatprep.subr.bf16.mxu1 %v7209_v14  ;;  %v6480_v0 = vcombine.low %v7155_v53, %v7155_v53 }
 0x14a   : > { %1287 = vmatpush1.bf16.msra.mxu0 %v7206_v13  ;;  %1562 = vmatpush1.bf16.msra.mxu1 %v7206_v13 }
 0x14b   : > { %v1163_v16 = vpop.permute.xlu1 %1162  ;;  %1288 = vmatprep.subr.bf16.mxu0 %v7214_v15  ;;  %1563 = vmatprep.subr.bf16.mxu1 %v7214_v15  ;;  %v1159_v17 = vpop.permute.xlu0 %1158 }
 0x14e   : > { %1289 = vmatpush1.bf16.msra.mxu0 %v7221_v19  ;;  %1564 = vmatpush1.bf16.msra.mxu1 %v7221_v19 }
 0x14f   : > { %v1188_v27 = vpop.permute.xlu1 %1187  ;;  %v1192_v29 = vpop.permute.xlu0 %1191  ;;  %1290 = vmatprep.subr.bf16.mxu0 %v7030_v20  ;;  %1565 = vmatprep.subr.bf16.mxu1 %v7030_v20 }
 0x152   : > { %1291 = vmatpush1.bf16.msra.mxu0 %v7027_v18  ;;  %1566 = vmatpush1.bf16.msra.mxu1 %v7027_v18 }
 0x153   : > { %v1190_v32 = vpop.permute.xlu1 %1189  ;;  %v1161_v34 = vpop.permute.xlu0 %1160 }
 0x154   : > { %v7230_v39 = vsel %vm1113_vm5, %v1159_v17, %v1161_v34  ;;  %v7233_v40 = vsel %vm1113_vm5, %v1161_v34, %v1163_v16  ;;  %v7238_v42 = vsel %vm1082_vm6, %v1190_v32, %v1192_v29  ;;  %v7245_v50 = vsel %vm1082_vm6, %v1188_v27, %v1190_v32 }
 0x155   : > { %1292 = vmatprep.subr.bf16.mxu0 %v7233_v40  ;;  %1567 = vmatprep.subr.bf16.mxu1 %v7233_v40 }
 0x156   : > { %1293 = vmatpush1.bf16.msra.mxu0 %v7230_v39  ;;  %1568 = vmatpush1.bf16.msra.mxu1 %v7230_v39 }
 0x157   : > { %v1210_v45 = vpop.permute.xlu1 %1209  ;;  %1294 = vmatprep.subr.bf16.mxu0 %v7238_v42  ;;  %1569 = vmatprep.subr.bf16.mxu1 %v7238_v42  ;;  %v1208_v49 = vpop.permute.xlu0 %1207 }
 0x158   : > { %v7248_v55 = vsel %vm1211_vm11, %v1208_v49, %v1210_v45 }
 0x15a   : > { %1295 = vmatpush1.bf16.msra.mxu0 %v7245_v50  ;;  %1570 = vmatpush1.bf16.msra.mxu1 %v7245_v50 }
 0x15b   : > { %v1238_v56 = vpop.permute.xlu1 %1237  ;;  %1296 = vmatprep.subr.bf16.mxu0 %v7248_v55  ;;  %1571 = vmatprep.subr.bf16.mxu1 %v7248_v55  ;;  %v1206_v57 = vpop.permute.xlu0 %1205 }
 0x15c   : > { %v7255_v59 = vsel %vm1211_vm11, %v1206_v57, %v1208_v49 }
 0x15e   : > { %1297 = vmatpush1.bf16.msra.mxu0 %v7255_v59  ;;  %1572 = vmatpush1.bf16.msra.mxu1 %v7255_v59 }
 0x15f   : > { %v1236_v60 = vpop.permute.xlu1 %1235  ;;  %v1240_v61 = vpop.permute.xlu0 %1239 }
 0x160   : > { %v7260_v62 = vsel %vm1030_vm4, %v1236_v60, %v1238_v56  ;;  %v7263_v63 = vsel %vm1030_vm4, %v1238_v56, %v1240_v61 }
 0x161   : > { %1298 = vmatprep.subr.bf16.mxu0 %v7263_v63  ;;  %1573 = vmatprep.subr.bf16.mxu1 %v7263_v63 }
 0x162   : > { %1299 = vmatpush1.bf16.msra.mxu0 %v7260_v62  ;;  %1574 = vmatpush1.bf16.msra.mxu1 %v7260_v62 }
 0x163   : > { %1894 = vmatprep.subr.bf16.mxu0 %v7189_v6 }
 0x165   : > { %1315 = vmatmul.mubr.bf16.vlgmr.msra.gmra.mrb[0].mxu0 %v6480_v0 }
 0x166   : > { %1895 = vmatpush1.bf16.msra.mxu0 %v7186_v5 }
 0x167   : > { %1896 = vmatprep.subr.bf16.mxu0 %v7194_v7 }
 0x16a   : > { %1897 = vmatpush1.bf16.msra.mxu0 %v7201_v10 }
 0x16b   : > { %1898 = vmatprep.subr.bf16.mxu0 %v7209_v14 }
 0x16e   : > { %1899 = vmatpush1.bf16.msra.mxu0 %v7206_v13 }
 0x16f   : > { %1900 = vmatprep.subr.bf16.mxu0 %v7214_v15 }
 0x170   : > { %v1270_v53 = vpop.permute.xlu0 %1269 }
 0x172   : > { %1901 = vmatpush1.bf16.msra.mxu0 %v7221_v19 }
 0x173   : > { %1902 = vmatprep.subr.bf16.mxu0 %v7030_v20 }
 0x176   : > { %1903 = vmatpush1.bf16.msra.mxu0 %v7027_v18 }
 0x177   : > { %1904 = vmatprep.subr.bf16.mxu0 %v7233_v40 }
 0x17a   : > { %1905 = vmatpush1.bf16.msra.mxu0 %v7230_v39 }
 0x17b   : > { %1906 = vmatprep.subr.bf16.mxu0 %v7238_v42 }
 0x17e   : > { %1907 = vmatpush1.bf16.msra.mxu0 %v7245_v50 }
 0x17f   : > { %1908 = vmatprep.subr.bf16.mxu0 %v7248_v55 }
 0x182   : > { %1909 = vmatpush1.bf16.msra.mxu0 %v7255_v59 }
 0x183   : > { %1910 = vmatprep.subr.bf16.mxu0 %v7263_v63 }
 0x186   : > { %1911 = vmatpush1.bf16.msra.mxu0 %v7260_v62 }
 0x238   : > { %v1316_v2 = vpop.f32.mrb[0].mxu0 }
 0x239   : > { %v1317_v3 = vadd.f32 %v1316_v2, %v1270_v53  ;;  %v1318_v4 = vpop.f32.mrb[1].mxu0 }
 0x23a   : > { %v1319_v8 = vadd.f32 %v1318_v4, %v1270_v53  ;;  %v1320_v9 = vpop.f32.mrb[2].mxu0 }
 0x23b   : > { %vm1323_vm12 = vcmp.ge.f32.partialorder %v1317_v3, 0.0  ;;  %v1325_v11 = vmul.f32 0.2, %v1317_v3  ;;  %v1321_v12 = vpop.f32.mrb[3].mxu0 }
 0x23c   : > { %vm1324_vm13 = vcmp.ge.f32.partialorder %v1319_v8, 0.0  ;;  %v1326_v16 = vmul.f32 0.2, %v1319_v8 }
 0x23d   : > { %v1327_v17 = vsel %vm1323_vm12, %v1317_v3, %v1325_v11  ;;  %v7328_v3 = vld [vmem:[%s6861_s17] sm:$0xff]  ;;  %vm2250_vm12 = vcmask 523264  }
 0x23e   : > { %v1329_v27 = vpack.c.bf16 %v1327_v17, %v1327_v17  ;;  %v1328_v29 = vsel %vm1324_vm13, %v1319_v8, %v1326_v16  ;;  %v6484_v4 = vcombine.high %v7328_v3, %v7328_v3  ;;  %v7335_v8 = vld [vmem:[%s6871_s25] sm:$0xff]  ;;  %v6483_v21 = vcombine.low %v7328_v3, %v7328_v3 }
 0x23f   : > { %v1330_v32 = vpack.c.bf16 %v1328_v29, %v1328_v29  ;;  %v6488_v9 = vcombine.high %v7335_v8, %v7335_v8  ;;  %v1537_v16 = vld [vmem:[%s6866_s21] sm:$0xff]  ;;  %v1343_v29 = vpop.permute.xlu0 %1342 }
 0x240   : > { %1331 = vst [vmem:[#allocation2 + $0x8] sm:$0xf] %v1329_v27  ;;  %1589 = vmatprep.mubr.bf16.mxu1 %v6484_v4 }
 0x241   : > { %1332 = vst [vmem:[#allocation2 + $0x10] sm:$0xf] %v1330_v32  ;;  %1926 = vmatprep.mubr.bf16.mxu0 %v6488_v9 }
 0x247   : > { %v7289_v34 = vld [vmem:[#allocation2 + $0x8] sm:$0xff] }
 0x248   : > { %1362 = vrot.lane.b32.xlu1 %v7289_v34, %s9653_s15  ;;  %v7293_v45 = vld [vmem:[#allocation2 + $0x10] sm:$0xff]  ;;  %v1337_v49 = vmul.bf16 %v7289_v34, %v7071_v28  ;;  %v1376_v56 = vmul.bf16 %v7289_v34, %v7099_v36  ;;  %v1421_v0 = vmul.bf16 %v7289_v34, %v7103_v38  ;;  %v1397_v53 = vmul.bf16 %v7289_v34, %v7094_v35 }
 0x249   : > { %1364 = vrot.lane.b32.xlu0 %v7293_v45, %s9653_s15  ;;  %v1338_v57 = vmul.bf16 %v7293_v45, %v7064_v26  ;;  %v1398_v60 = vmul.bf16 %v7293_v45, %v7078_v30  ;;  %v1377_v61 = vmul.bf16 %v7293_v45, %v7062_v25  ;;  %v1422_v2 = vmul.bf16 %v7293_v45, %v7139_v48 }
 0x24a   : > { %v1443_v11 = vmul.bf16 %v7293_v45, %v7134_v47  ;;  %v1442_v12 = vmul.bf16 %v7289_v34, %v7121_v44  ;;  %v1482_v17 = vmul.bf16 %v7293_v45, %v7160_v54  ;;  %v1481_v27 = vmul.bf16 %v7289_v34, %v7150_v52 }
 0x24c   : > { %1344 = vrot.lane.b32.xlu1 %v1337_v49, %s9661_s11 }
 0x24d   : > { %1383 = vrot.lane.b32.xlu0 %v1376_v56, %s9655_s10 }
 0x250   : > { %1346 = vrot.lane.b32.xlu1 %v1338_v57, %s9661_s11 }
 0x251   : > { %1381 = vrot.lane.b32.xlu0 %v7060_v24, %s9655_s10 }
 0x254   : > { %1360 = vrot.lane.b32.xlu1 %v9588_v1, %s9653_s15 }
 0x255   : > { %1406 = vrot.lane.b32.xlu0 %v1398_v60, %s9630_s7 }
 0x258   : > { %1385 = vrot.lane.b32.xlu1 %v1377_v61, %s9655_s10 }
 0x259   : > { %1427 = vrot.lane.b32.xlu0 %v1421_v0, %s9664_s2 }
 0x25c   : > { %1404 = vrot.lane.b32.xlu1 %v1397_v53, %s9630_s7 }
 0x25d   : > { %1429 = vrot.lane.b32.xlu0 %v1422_v2, %s9664_s2 }
 0x260   : > { %1402 = vrot.lane.b32.xlu1 %v7087_v33, %s9630_s7 }
 0x261   : > { %1452 = vrot.lane.b32.xlu0 %v7129_v46, %s9657_s28 }
 0x264   : > { %1431 = vrot.lane.b32.xlu1 %v7115_v41, %s9664_s2 }
 0x265   : > { %1468 = vrot.lane.b32.xlu0 %v7293_v45, %s9659_s16 }
 0x268   : > { %1450 = vrot.lane.b32.xlu1 %v1443_v11, %s9657_s28 }
 0x269   : > { %1466 = vrot.lane.b32.xlu0 %v7289_v34, %s9659_s16 }
 0x26c   : > { %1448 = vrot.lane.b32.xlu1 %v1442_v12, %s9657_s28 }
 0x26d   : > { %1491 = vrot.lane.b32.xlu0 %v7177_v58, %s9651_s1 }
 0x270   : > { %1470 = vrot.lane.b32.xlu1 %v9588_v1, %s9659_s16 }
 0x271   : > { %1540 = vperm.xlu0 %6710, %v1537_v16  }
 0x274   : > { %1489 = vrot.lane.b32.xlu1 %v1482_v17, %s9651_s1 }
 0x275   : > { %1676 = vrot.lane.b32.xlu0 %v9588_v1, %s9653_s15 }
 0x278   : > { %1487 = vrot.lane.b32.xlu1 %v1481_v27, %s9651_s1 }
 0x27c   : > { %1658 = vrot.lane.b32.xlu1 %v7055_v23, %s9661_s11 }
 0x280   : > { %1697 = vrot.lane.b32.xlu1 %v7060_v24, %s9655_s10 }
 0x2ba   : > { %v1363_v32 = vpop.permute.xlu1 %1362 }
 0x2bb   : > { %v1365_v49 = vpop.permute.xlu0 %1364 }
 0x2bc   : > { %v7377_v2 = vsel %vm1066_vm10, %v1363_v32, %v1365_v49 }
 0x2be   : > { %v1345_v56 = vpop.permute.xlu1 %1344 }
 0x2bf   : > { %v1384_v57 = vpop.permute.xlu0 %1383  ;;  %v7374_v53 = vsel %vm1047_vm9, %v1343_v29, %v1345_v56 }
 0x2c2   : > { %v1347_v60 = vpop.permute.xlu1 %1346 }
 0x2c3   : > { %v7369_v61 = vsel %vm1047_vm9, %v1345_v56, %v1347_v60  ;;  %v1382_v0 = vpop.permute.xlu0 %1381 }
 0x2c4   : > { %1575 = vmatprep.subr.bf16.mxu1 %v7369_v61  ;;  %1912 = vmatprep.subr.bf16.mxu0 %v7369_v61  ;;  %v7392_v27 = vsel %vm1099_vm7, %v1382_v0, %v1384_v57 }
 0x2c5   : > { %1576 = vmatpush1.bf16.msra.mxu1 %v7374_v53  ;;  %1913 = vmatpush1.bf16.msra.mxu0 %v7374_v53 }
 0x2c6   : > { %v1361_v4 = vpop.permute.xlu1 %1360  ;;  %1577 = vmatprep.subr.bf16.mxu1 %v7377_v2  ;;  %1914 = vmatprep.subr.bf16.mxu0 %v7377_v2 }
 0x2c7   : > { %v7384_v9 = vsel %vm1066_vm10, %v1361_v4, %v1363_v32  ;;  %v1407_v11 = vpop.permute.xlu0 %1406 }
 0x2c9   : > { %1578 = vmatpush1.bf16.msra.mxu1 %v7384_v9  ;;  %1915 = vmatpush1.bf16.msra.mxu0 %v7384_v9 }
 0x2ca   : > { %v1386_v12 = vpop.permute.xlu1 %1385 }
 0x2cb   : > { %v7389_v16 = vsel %vm1099_vm7, %v1384_v57, %v1386_v12  ;;  %v1428_v17 = vpop.permute.xlu0 %1427 }
 0x2cc   : > { %1579 = vmatprep.subr.bf16.mxu1 %v7389_v16  ;;  %1916 = vmatprep.subr.bf16.mxu0 %v7389_v16 }
 0x2cd   : > { %1580 = vmatpush1.bf16.msra.mxu1 %v7392_v27  ;;  %1917 = vmatpush1.bf16.msra.mxu0 %v7392_v27 }
 0x2ce   : > { %v1405_v29 = vpop.permute.xlu1 %1404 }
 0x2cf   : > { %v1430_v32 = vpop.permute.xlu0 %1429  ;;  %v7399_v49 = vsel %vm1130_vm8, %v1405_v29, %v1407_v11 }
 0x2d0   : > { %1581 = vmatprep.subr.bf16.mxu1 %v7399_v49  ;;  %1918 = vmatprep.subr.bf16.mxu0 %v7399_v49 }
 0x2d2   : > { %v1403_v56 = vpop.permute.xlu1 %1402 }
 0x2d3   : > { %v7404_v57 = vsel %vm1130_vm8, %v1403_v56, %v1405_v29  ;;  %v1453_v60 = vpop.permute.xlu0 %1452  ;;  %v7418_v29 = vsel %vm1113_vm5, %v1428_v17, %v1430_v32  ;;  %v6487_v17 = vcombine.low %v7335_v8, %v7335_v8 }
 0x2d4   : > { %1582 = vmatpush1.bf16.msra.mxu1 %v7404_v57  ;;  %1919 = vmatpush1.bf16.msra.mxu0 %v7404_v57  ;;  %9718 = vst [vmem:[#allocation36_spill] sm:$0xff] %v7418_v29 }
 0x2d5   : > { %1583 = vmatprep.subr.bf16.mxu1 %v7293_v45  ;;  %1920 = vmatprep.subr.bf16.mxu0 %v7293_v45 }
 0x2d6   : > { %v1432_v0 = vpop.permute.xlu1 %1431 }
 0x2d7   : > { %v7411_v4 = vsel %vm1113_vm5, %v1430_v32, %v1432_v0  ;;  %v1469_v11 = vpop.permute.xlu0 %1468 }
 0x2d8   : > { %1584 = vmatpush1.bf16.msra.mxu1 %v7289_v34  ;;  %1921 = vmatpush1.bf16.msra.mxu0 %v7289_v34 }
 0x2d9   : > { %1585 = vmatprep.subr.bf16.mxu1 %v7411_v4  ;;  %1922 = vmatprep.subr.bf16.mxu0 %v7411_v4 }
 0x2da   : > { %v1451_v12 = vpop.permute.xlu1 %1450 }
 0x2db   : > { %v7421_v56 = vsel %vm1082_vm6, %v1451_v12, %v1453_v60  ;;  %v1467_v32 = vpop.permute.xlu0 %1466 }
 0x2dc   : > { %9719 = vst [vmem:[#allocation37_spill] sm:$0xff] %v7421_v56  ;;  %1586 = vmatpush1.bf16.msra.mxu1 %v7418_v29  ;;  %1923 = vmatpush1.bf16.msra.mxu0 %v7418_v29 }
 0x2dd   : > { %1587 = vmatprep.subr.bf16.mxu1 %v7421_v56  ;;  %1924 = vmatprep.subr.bf16.mxu0 %v7421_v56 }
 0x2de   : > { %v1449_v0 = vpop.permute.xlu1 %1448 }
 0x2df   : > { %v7428_v1 = vsel %vm1082_vm6, %v1449_v0, %v1451_v12  ;;  %v7440_v12 = vsel %vm1211_vm11, %v1467_v32, %v1469_v11  ;;  %v1492_v3 = vpop.permute.xlu0 %1491  ;;  %v9722_v0 = vmov 0   ;;  %v6718_v32 = vld [vmem:[%s6861_s17 + $0x8] ss:$0 sps:$4 sm:$0xff]  }
 0x2e0   : > { %9720 = vst [vmem:[#allocation38_spill] sm:$0xff] %v7428_v1  ;;  %1588 = vmatpush1.bf16.msra.mxu1 %v7428_v1  ;;  %1925 = vmatpush1.bf16.msra.mxu0 %v7428_v1 }
 0x2e2   : > { %v1471_v60 = vpop.permute.xlu1 %1470 }
 0x2e3   : > { %v7437_v51 = vsel %vm1211_vm11, %v1469_v11, %v1471_v60  ;;  %1590 = vmatmul.mubr.bf16.vlgmr.msra.gmra.mrb[0].mxu1 %v6483_v21  ;;  %1927 = vmatmul.mubr.bf16.vlgmr.msra.gmra.mrb[4].mxu0 %v6487_v17  ;;  %v2152_v21 = vld [vmem:[%s9702_s3] sm:$0xff] }
 0x2e4   : > { %9721 = vst [vmem:[#allocation39_spill] sm:$0xff] %v7437_v51  ;;  %1598 = vmatprep.subr.bf16.mxu1 %v7437_v51  ;;  %1935 = vmatprep.subr.bf16.mxu0 %v7437_v51  ;;  %v6493_v43 = vcombine.high %v2152_v21, %v2152_v21 }
 0x2e5   : > { %1599 = vmatpush1.bf16.msra.mxu1 %v7440_v12  ;;  %1936 = vmatpush1.bf16.msra.mxu0 %v7440_v12 }
 0x2e6   : > { %v1490_v8 = vpop.permute.xlu1 %1489  ;;  %1630 = vmatprep.mubr.bf16.mxu1 %v9722_v0 }
 0x2e7   : > { %v7448_v60 = vsel %vm1030_vm4, %v1490_v8, %v1492_v3 }
 0x2e8   : > { %9723 = vst [vmem:[#allocation40_spill] sm:$0xff] %v7448_v60  ;;  %1600 = vmatprep.subr.bf16.mxu1 %v7448_v60  ;;  %1937 = vmatprep.subr.bf16.mxu0 %v7448_v60 }
 0x2ea   : > { %v1488_v11 = vpop.permute.xlu1 %1487 }
 0x2eb   : > { %v7454_v17 = vsel %vm1030_vm4, %v1488_v11, %v1490_v8 }
 0x2ec   : > { %1601 = vmatpush1.bf16.msra.mxu1 %v7454_v17  ;;  %1938 = vmatpush1.bf16.msra.mxu0 %v7454_v17 }
 0x2ed   : > { %2254 = vmatprep.subr.bf16.mxu1 %v7189_v6 }
 0x2ef   : > { %6486 = vmatmul.mubr.msk.bf16.vlgmr.msra.gmra.mrb[0].mxu1 %vm1553_vm14, %v6718_v32 }
 0x2f0   : > { %2255 = vmatpush1.bf16.msra.mxu1 %v7186_v5  ;;  %2286 = vmatprep.mubr.bf16.mxu1 %v6493_v43  ;;  %v6492_v43 = vcombine.low %v2152_v21, %v2152_v21  ;;  %v1541_v3 = vpop.permute.xlu0 %1540 }
 0x2f1   : > { %2256 = vmatprep.subr.bf16.mxu1 %v7194_v7 }
 0x2f4   : > { %2257 = vmatpush1.bf16.msra.mxu1 %v7201_v10 }
 0x2f5   : > { %2258 = vmatprep.subr.bf16.mxu1 %v7209_v14 }
 0x2f8   : > { %2259 = vmatpush1.bf16.msra.mxu1 %v7206_v13 }
 0x2f9   : > { %2260 = vmatprep.subr.bf16.mxu1 %v7214_v15 }
 0x2fc   : > { %2261 = vmatpush1.bf16.msra.mxu1 %v7221_v19 }
 0x2fd   : > { %2262 = vmatprep.subr.bf16.mxu1 %v7030_v20 }
 0x300   : > { %2263 = vmatpush1.bf16.msra.mxu1 %v7027_v18 }
 0x301   : > { %2264 = vmatprep.subr.bf16.mxu1 %v7233_v40 }
 0x304   : > { %2265 = vmatpush1.bf16.msra.mxu1 %v7230_v39 }
 0x305   : > { %2266 = vmatprep.subr.bf16.mxu1 %v7238_v42 }
 0x308   : > { %2267 = vmatpush1.bf16.msra.mxu1 %v7245_v50 }
 0x309   : > { %2268 = vmatprep.subr.bf16.mxu1 %v7248_v55 }
 0x30c   : > { %2269 = vmatpush1.bf16.msra.mxu1 %v7255_v59 }
 0x30d   : > { %2270 = vmatprep.subr.bf16.mxu1 %v7263_v63 }
 0x310   : > { %2271 = vmatpush1.bf16.msra.mxu1 %v7260_v62 }
 0x311   : > { %2272 = vmatprep.subr.bf16.mxu1 %v7369_v61 }
 0x314   : > { %2273 = vmatpush1.bf16.msra.mxu1 %v7374_v53 }
 0x315   : > { %2274 = vmatprep.subr.bf16.mxu1 %v7377_v2 }
 0x318   : > { %2275 = vmatpush1.bf16.msra.mxu1 %v7384_v9 }
 0x319   : > { %2276 = vmatprep.subr.bf16.mxu1 %v7389_v16 }
 0x31c   : > { %2277 = vmatpush1.bf16.msra.mxu1 %v7392_v27 }
 0x31d   : > { %2278 = vmatprep.subr.bf16.mxu1 %v7399_v49 }
 0x320   : > { %2279 = vmatpush1.bf16.msra.mxu1 %v7404_v57 }
 0x321   : > { %2280 = vmatprep.subr.bf16.mxu1 %v7293_v45 }
 0x324   : > { %2281 = vmatpush1.bf16.msra.mxu1 %v7289_v34 }
 0x325   : > { %2282 = vmatprep.subr.bf16.mxu1 %v7411_v4 }
 0x328   : > { %2283 = vmatpush1.bf16.msra.mxu1 %v7418_v29 }
 0x329   : > { %2284 = vmatprep.subr.bf16.mxu1 %v7421_v56 }
 0x32c   : > { %2285 = vmatpush1.bf16.msra.mxu1 %v7428_v1 }
 0x32d   : > { %2295 = vmatprep.subr.bf16.mxu1 %v7437_v51 }
 0x32f   : > { %2287 = vmatmul.mubr.bf16.vlgmr.msra.gmra.mrb[4].mxu1 %v6492_v43 }
 0x330   : > { %2296 = vmatpush1.bf16.msra.mxu1 %v7440_v12 }
 0x331   : > { %2297 = vmatprep.subr.bf16.mxu1 %v7448_v60 }
 0x334   : > { %2298 = vmatpush1.bf16.msra.mxu1 %v7454_v17 }
 0x3c2   : > { %v1632_v8 = vpop.f32.mrb[0].mxu1 }
 0x3c3   : > { %v6559_v11 = vadd.f32 %v1632_v8, %v1541_v3  ;;  %v1634_v32 = vpop.f32.mrb[1].mxu1 }
 0x3c4   : > { %v6560_v37 = vadd.f32 %v1634_v32, %v1541_v3  ;;  %v1636_v31 = vpop.f32.mrb[2].mxu1 }
 0x3c5   : > { %vm1639_vm15 = vcmp.ge.f32.partialorder %v6559_v11, 0.0  ;;  %v1641_v22 = vmul.f32 0.2, %v6559_v11  ;;  %v1637_v21 = vpop.f32.mrb[3].mxu1 }
 0x3c6   : > { %vm1640_vm0 = vcmp.ge.f32.partialorder %v6560_v37, 0.0  ;;  %v1642_v1 = vmul.f32 0.2, %v6560_v37  ;;  %v7543_v21 = vld [vmem:[%s6871_s25 + $0x8] sm:$0xff] }
 0x3c7   : > { %v1643_v56 = vsel %vm1639_vm15, %v6559_v11, %v1641_v22 }
 0x3c8   : > { %v1645_v51 = vpack.c.bf16 %v1643_v56, %v1643_v56  ;;  %v1644_v43 = vsel %vm1640_vm0, %v6560_v37, %v1642_v1  ;;  %vm2690_vm0 = vcmask 654336  }
 0x3c9   : > { %v1646_v29 = vpack.c.bf16 %v1644_v43, %v1644_v43  ;;  %v6490_v43 = vcombine.high %v7543_v21, %v7543_v21 }
 0x3ca   : > { %1647 = vst [vmem:[#allocation2 + $0x8] sm:$0xf] %v1645_v51 }
 0x3cb   : > { %1648 = vst [vmem:[#allocation2 + $0x10] sm:$0xf] %v1646_v29  ;;  %6491 = vmatprep.mubr.msk.bf16.mxu0 %vm1890_vm1, %v6490_v43 }
 0x3d1   : > { %v7496_v60 = vld [vmem:[#allocation2 + $0x8] sm:$0xff] }
 0x3d2   : > { %1678 = vrot.lane.b32.xlu0 %v7496_v60, %s9653_s15  ;;  %v7500_v8 = vld [vmem:[#allocation2 + $0x10] sm:$0xff]  ;;  %v1653_v22 = vmul.bf16 %v7496_v60, %v7071_v28  ;;  %v1713_v1 = vmul.bf16 %v7496_v60, %v7094_v35  ;;  %v1692_v37 = vmul.bf16 %v7496_v60, %v7099_v36  ;;  %v1737_v29 = vmul.bf16 %v7496_v60, %v7103_v38 }
 0x3d3   : > { %1680 = vrot.lane.b32.xlu1 %v7500_v8, %s9653_s15  ;;  %v1654_v31 = vmul.bf16 %v7500_v8, %v7064_v26  ;;  %v1693_v51 = vmul.bf16 %v7500_v8, %v7062_v25  ;;  %v1714_v56 = vmul.bf16 %v7500_v8, %v7078_v30  ;;  %v1758_v3 = vmul.bf16 %v7496_v60, %v7121_v44 }
 0x3d4   : > { %v1738_v11 = vmul.bf16 %v7500_v8, %v7139_v48  ;;  %v1759_v32 = vmul.bf16 %v7500_v8, %v7134_v47 }
 0x3d6   : > { %1662 = vrot.lane.b32.xlu0 %v1654_v31, %s9661_s11  ;;  %v1798_v31 = vmul.bf16 %v7500_v8, %v7160_v54 }
 0x3d7   : > { %1660 = vrot.lane.b32.xlu1 %v1653_v22, %s9661_s11  ;;  %v1797_v22 = vmul.bf16 %v7496_v60, %v7150_v52 }
 0x3da   : > { %1720 = vrot.lane.b32.xlu0 %v1713_v1, %s9630_s7  ;;  %v1659_v1 = vpop.permute.xlu1 %1658 }
 0x3db   : > { %1699 = vrot.lane.b32.xlu1 %v1692_v37, %s9655_s10  ;;  %v1677_v37 = vpop.permute.xlu0 %1676 }
 0x3de   : > { %1701 = vrot.lane.b32.xlu0 %v1693_v51, %s9655_s10  ;;  %v1698_v51 = vpop.permute.xlu1 %1697 }
 0x3df   : > { %1743 = vrot.lane.b32.xlu1 %v1737_v29, %s9664_s2  ;;  %v1871_v29 = vld [vmem:[%s6876_s29] sm:$0xff] }
 0x3e2   : > { %1718 = vrot.lane.b32.xlu0 %v7087_v33, %s9630_s7 }
 0x3e3   : > { %1722 = vrot.lane.b32.xlu1 %v1714_v56, %s9630_s7 }
 0x3e6   : > { %1747 = vrot.lane.b32.xlu0 %v7115_v41, %s9664_s2 }
 0x3e7   : > { %1768 = vrot.lane.b32.xlu1 %v7129_v46, %s9657_s28  ;;  %v6725_v46 = vld [vmem:[%s6891_s14 + $0x4] ss:$24 sps:$4 sm:$0xff]  }
 0x3ea   : > { %1764 = vrot.lane.b32.xlu0 %v1758_v3, %s9657_s28 }
 0x3eb   : > { %1745 = vrot.lane.b32.xlu1 %v1738_v11, %s9664_s2 }
 0x3ee   : > { %1766 = vrot.lane.b32.xlu0 %v1759_v32, %s9657_s28 }
 0x3ef   : > { %1784 = vrot.lane.b32.xlu1 %v7500_v8, %s9659_s16 }
 0x3f2   : > { %1786 = vrot.lane.b32.xlu0 %v9722_v0, %s9659_s16 }
 0x3f3   : > { %1782 = vrot.lane.b32.xlu1 %v7496_v60, %s9659_s16 }
 0x3f6   : > { %1805 = vrot.lane.b32.xlu0 %v1798_v31, %s9651_s1 }
 0x3f7   : > { %1807 = vrot.lane.b32.xlu1 %v7177_v58, %s9651_s1 }
 0x3fa   : > { %1803 = vrot.lane.b32.xlu0 %v1797_v22, %s9651_s1 }
 0x3fb   : > { %1874 = vperm.xlu1 %6711, %v1871_v29  }
 0x3fe   : > { %1995 = vrot.lane.b32.xlu0 %v7055_v23, %s9661_s11 }
 0x3ff   : > { %2013 = vrot.lane.b32.xlu1 %v9722_v0, %s9653_s15 }
 0x402   : > { %2034 = vrot.lane.b32.xlu0 %v7060_v24, %s9655_s10 }
 0x444   : > { %v1679_v56 = vpop.permute.xlu0 %1678 }
 0x445   : > { %v1681_v3 = vpop.permute.xlu1 %1680 }
 0x446   : > { %v7578_v22 = vsel %vm1066_vm10, %v1679_v56, %v1681_v3 }
 0x448   : > { %v1663_v11 = vpop.permute.xlu0 %1662 }
 0x449   : > { %v1661_v32 = vpop.permute.xlu1 %1660 }
 0x44a   : > { %v7568_v43 = vsel %vm1047_vm9, %v1661_v32, %v1663_v11  ;;  %v7571_v23 = vsel %vm1047_vm9, %v1659_v1, %v1661_v32  ;;  %v7583_v1 = vsel %vm1066_vm10, %v1677_v37, %v1679_v56 }
 0x44b   : > { %1939 = vmatprep.subr.bf16.mxu0 %v7568_v43  ;;  %2299 = vmatprep.subr.bf16.mxu1 %v7568_v43 }
 0x44c   : > { %1940 = vmatpush1.bf16.msra.mxu0 %v7571_v23  ;;  %2300 = vmatpush1.bf16.msra.mxu1 %v7571_v23  ;;  %v1721_v31 = vpop.permute.xlu0 %1720 }
 0x44d   : > { %v1700_v0 = vpop.permute.xlu1 %1699  ;;  %1941 = vmatprep.subr.bf16.mxu0 %v7578_v22  ;;  %2301 = vmatprep.subr.bf16.mxu1 %v7578_v22 }
 0x44e   : > { %v7593_v3 = vsel %vm1099_vm7, %v1698_v51, %v1700_v0 }
 0x450   : > { %1942 = vmatpush1.bf16.msra.mxu0 %v7583_v1  ;;  %2302 = vmatpush1.bf16.msra.mxu1 %v7583_v1  ;;  %v1702_v29 = vpop.permute.xlu0 %1701 }
 0x451   : > { %v1744_v11 = vpop.permute.xlu1 %1743  ;;  %v7588_v32 = vsel %vm1099_vm7, %v1700_v0, %v1702_v29 }
 0x452   : > { %1943 = vmatprep.subr.bf16.mxu0 %v7588_v32  ;;  %2303 = vmatprep.subr.bf16.mxu1 %v7588_v32 }
 0x454   : > { %1944 = vmatpush1.bf16.msra.mxu0 %v7593_v3  ;;  %2304 = vmatpush1.bf16.msra.mxu1 %v7593_v3  ;;  %v1719_v37 = vpop.permute.xlu0 %1718 }
 0x455   : > { %v1723_v56 = vpop.permute.xlu1 %1722  ;;  %v7601_v52 = vsel %vm1130_vm8, %v1719_v37, %v1721_v31 }
 0x456   : > { %v7598_v24 = vsel %vm1130_vm8, %v1721_v31, %v1723_v56 }
 0x457   : > { %1945 = vmatprep.subr.bf16.mxu0 %v7598_v24  ;;  %2305 = vmatprep.subr.bf16.mxu1 %v7598_v24 }
 0x458   : > { %1946 = vmatpush1.bf16.msra.mxu0 %v7601_v52  ;;  %2306 = vmatpush1.bf16.msra.mxu1 %v7601_v52  ;;  %v1748_v51 = vpop.permute.xlu0 %1747 }
 0x459   : > { %v1769_v0 = vpop.permute.xlu1 %1768  ;;  %1947 = vmatprep.subr.bf16.mxu0 %v7500_v8  ;;  %2307 = vmatprep.subr.bf16.mxu1 %v7500_v8 }
 0x45c   : > { %1948 = vmatpush1.bf16.msra.mxu0 %v7496_v60  ;;  %2308 = vmatpush1.bf16.msra.mxu1 %v7496_v60  ;;  %v1765_v31 = vpop.permute.xlu0 %1764 }
 0x45d   : > { %v1746_v29 = vpop.permute.xlu1 %1745 }
 0x45e   : > { %v7612_v37 = vsel %vm1113_vm5, %v1746_v29, %v1748_v51  ;;  %v7615_v56 = vsel %vm1113_vm5, %v1744_v11, %v1746_v29 }
 0x45f   : > { %1949 = vmatprep.subr.bf16.mxu0 %v7612_v37  ;;  %2309 = vmatprep.subr.bf16.mxu1 %v7612_v37 }
 0x460   : > { %1950 = vmatpush1.bf16.msra.mxu0 %v7615_v56  ;;  %2310 = vmatpush1.bf16.msra.mxu1 %v7615_v56  ;;  %v1767_v58 = vpop.permute.xlu0 %1766 }
 0x461   : > { %v1785_v54 = vpop.permute.xlu1 %1784  ;;  %v7622_v47 = vsel %vm1082_vm6, %v1767_v58, %v1769_v0  ;;  %v7627_v11 = vsel %vm1082_vm6, %v1765_v31, %v1767_v58 }
 0x462   : > { %1951 = vmatprep.subr.bf16.mxu0 %v7622_v47  ;;  %2311 = vmatprep.subr.bf16.mxu1 %v7622_v47 }
 0x464   : > { %1952 = vmatpush1.bf16.msra.mxu0 %v7627_v11  ;;  %2312 = vmatpush1.bf16.msra.mxu1 %v7627_v11  ;;  %v1787_v51 = vpop.permute.xlu0 %1786 }
 0x465   : > { %v1783_v29 = vpop.permute.xlu1 %1782  ;;  %v7632_v48 = vsel %vm1211_vm11, %v1785_v54, %v1787_v51 }
 0x466   : > { %v7635_v0 = vsel %vm1211_vm11, %v1783_v29, %v1785_v54  ;;  %1953 = vmatprep.subr.bf16.mxu0 %v7632_v48  ;;  %2313 = vmatprep.subr.bf16.mxu1 %v7632_v48  ;;  %v6489_v29 = vcombine.low %v7543_v21, %v7543_v21  ;;  %v9734_v21 = vld [vmem:[#allocation35_spill] sm:$0xff] }
 0x468   : > { %1954 = vmatpush1.bf16.msra.mxu0 %v7635_v0  ;;  %2314 = vmatpush1.bf16.msra.mxu1 %v7635_v0  ;;  %v1806_v58 = vpop.permute.xlu0 %1805 }
 0x469   : > { %v1808_v31 = vpop.permute.xlu1 %1807 }
 0x46a   : > { %v7642_v44 = vsel %vm1030_vm4, %v1806_v58, %v1808_v31 }
 0x46b   : > { %1955 = vmatprep.subr.bf16.mxu0 %v7642_v44  ;;  %2315 = vmatprep.subr.bf16.mxu1 %v7642_v44 }
 0x46c   : > { %v1804_v51 = vpop.permute.xlu0 %1803 }
 0x46d   : > { %v1809_v54 = vsel %vm1030_vm4, %v1804_v51, %v1806_v58 }
 0x46e   : > { %1956 = vmatpush1.bf16.msra.mxu0 %v1809_v54  ;;  %2316 = vmatpush1.bf16.msra.mxu1 %v1809_v54 }
 0x46f   : > { %2694 = vmatprep.subr.bf16.mxu0 %v7189_v6  ;;  %v9727_v6 = vld [vmem:[#allocation39_spill] sm:$0xff] }
 0x471   : > { %1968 = vmatmul.mubr.bf16.vlgmr.msra.gmra.mrb[4].mxu0 %v6489_v29 }
 0x472   : > { %2695 = vmatpush1.bf16.msra.mxu0 %v7186_v5  ;;  %2726 = vmatprep.mubr.bf16.mxu0 %v6725_v46  ;;  %v6723_v46 = vld [vmem:[%s6891_s14] ss:$24 sps:$4 sm:$0xff]  }
 0x473   : > { %2696 = vmatprep.subr.bf16.mxu0 %v7194_v7  ;;  %v9726_v5 = vld [vmem:[#allocation38_spill] sm:$0xff]  ;;  %v9728_v7 = vld [vmem:[#allocation40_spill] sm:$0xff] }
 0x476   : > { %2697 = vmatpush1.bf16.msra.mxu0 %v7201_v10 }
 0x477   : > { %2698 = vmatprep.subr.bf16.mxu0 %v7209_v14 }
 0x47a   : > { %2699 = vmatpush1.bf16.msra.mxu0 %v7206_v13 }
 0x47b   : > { %2700 = vmatprep.subr.bf16.mxu0 %v7214_v15 }
 0x47e   : > { %2701 = vmatpush1.bf16.msra.mxu0 %v7221_v19 }
 0x47f   : > { %2702 = vmatprep.subr.bf16.mxu0 %v7030_v20  ;;  %v9725_v20 = vld [vmem:[#allocation37_spill] sm:$0xff] }
 0x482   : > { %2703 = vmatpush1.bf16.msra.mxu0 %v7027_v18  ;;  %v9724_v18 = vld [vmem:[#allocation36_spill] sm:$0xff] }
 0x483   : > { %2704 = vmatprep.subr.bf16.mxu0 %v7233_v40 }
 0x486   : > { %2705 = vmatpush1.bf16.msra.mxu0 %v7230_v39 }
 0x487   : > { %2706 = vmatprep.subr.bf16.mxu0 %v7238_v42 }
 0x48a   : > { %2707 = vmatpush1.bf16.msra.mxu0 %v7245_v50 }
 0x48b   : > { %2708 = vmatprep.subr.bf16.mxu0 %v7248_v55 }
 0x48e   : > { %2709 = vmatpush1.bf16.msra.mxu0 %v7255_v59 }
 0x48f   : > { %2710 = vmatprep.subr.bf16.mxu0 %v7263_v63 }
 0x492   : > { %2711 = vmatpush1.bf16.msra.mxu0 %v7260_v62 }
 0x493   : > { %2712 = vmatprep.subr.bf16.mxu0 %v7369_v61 }
 0x496   : > { %2713 = vmatpush1.bf16.msra.mxu0 %v7374_v53  ;;  %v7729_v53 = vld [vmem:[%s9702_s3 + $0x8] sm:$0xff] }
 0x497   : > { %2714 = vmatprep.subr.bf16.mxu0 %v7377_v2  ;;  %v6495_v2 = vcombine.high %v7729_v53, %v7729_v53 }
 0x499   : > { %2327 = vmatprep.mubr.bf16.mxu1 %v6495_v2 }
 0x49a   : > { %2715 = vmatpush1.bf16.msra.mxu0 %v7384_v9  ;;  %v6730_v9 = vld [vmem:[%s6891_s14 + $0xc] ss:$24 sps:$4 sm:$0xff]  }
 0x49b   : > { %2716 = vmatprep.subr.bf16.mxu0 %v7389_v16 }
 0x49e   : > { %2717 = vmatpush1.bf16.msra.mxu0 %v7392_v27  ;;  %v9729_v27 = vld [vmem:[#allocation29_spill] sm:$0xff] }
 0x49f   : > { %2718 = vmatprep.subr.bf16.mxu0 %v7399_v49  ;;  %v9730_v49 = vld [vmem:[#allocation28_spill] sm:$0xff] }
 0x4a2   : > { %2719 = vmatpush1.bf16.msra.mxu0 %v7404_v57 }
 0x4a3   : > { %2720 = vmatprep.subr.bf16.mxu0 %v7293_v45 }
 0x4a6   : > { %2721 = vmatpush1.bf16.msra.mxu0 %v7289_v34 }
 0x4a7   : > { %2722 = vmatprep.subr.bf16.mxu0 %v7411_v4  ;;  %v9731_v4 = vld [vmem:[#allocation31_spill] sm:$0xff] }
 0x4aa   : > { %2723 = vmatpush1.bf16.msra.mxu0 %v9724_v18 }
 0x4ab   : > { %2724 = vmatprep.subr.bf16.mxu0 %v9725_v20 }
 0x4ae   : > { %2725 = vmatpush1.bf16.msra.mxu0 %v9726_v5 }
 0x4af   : > { %2737 = vmatprep.subr.bf16.mxu0 %v9727_v6 }
 0x4b1   : > { %2727 = vmatmul.mubr.bf16.vlgmr.msra.gmra.mrb[8].mxu0 %v6723_v46 }
 0x4b2   : > { %2738 = vmatpush1.bf16.msra.mxu0 %v7440_v12  ;;  %2769 = vmatprep.mubr.bf16.mxu0 %v6730_v9 }
 0x4b3   : > { %2739 = vmatprep.subr.bf16.mxu0 %v9728_v7 }
 0x4b6   : > { %2740 = vmatpush1.bf16.msra.mxu0 %v7454_v17  ;;  %v9733_v17 = vld [vmem:[#allocation34_spill] sm:$0xff] }
 0x4b7   : > { %2741 = vmatprep.subr.bf16.mxu0 %v7568_v43  ;;  %v9735_v43 = vld [vmem:[#allocation33_spill] sm:$0xff] }
 0x4ba   : > { %2742 = vmatpush1.bf16.msra.mxu0 %v7571_v23 }
 0x4bb   : > { %2743 = vmatprep.subr.bf16.mxu0 %v7578_v22  ;;  %v2227_v22 = vld [vmem:[%s6886_s8] sm:$0xff] }
 0x4be   : > { %2744 = vmatpush1.bf16.msra.mxu0 %v7583_v1  ;;  %v9736_v1 = vld [vmem:[#allocation23_spill] sm:$0xff] }
 0x4bf   : > { %2745 = vmatprep.subr.bf16.mxu0 %v7588_v32 }
 0x4c2   : > { %2746 = vmatpush1.bf16.msra.mxu0 %v7593_v3  ;;  %v9738_v3 = vld [vmem:[#allocation24_spill] sm:$0xff] }
 0x4c3   : > { %2747 = vmatprep.subr.bf16.mxu0 %v7598_v24  ;;  %v1875_v24 = vpop.permute.xlu1 %1874 }
 0x4c6   : > { %2748 = vmatpush1.bf16.msra.mxu0 %v7601_v52 }
 0x4c7   : > { %2749 = vmatprep.subr.bf16.mxu0 %v7500_v8 }
 0x4ca   : > { %2750 = vmatpush1.bf16.msra.mxu0 %v7496_v60 }
 0x4cb   : > { %2751 = vmatprep.subr.bf16.mxu0 %v7612_v37  ;;  %v1996_v37 = vpop.permute.xlu0 %1995 }
 0x4ce   : > { %2752 = vmatpush1.bf16.msra.mxu0 %v7615_v56  ;;  %v2014_v56 = vpop.permute.xlu1 %2013 }
 0x4cf   : > { %2753 = vmatprep.subr.bf16.mxu0 %v7622_v47 }
 0x4d2   : > { %2754 = vmatpush1.bf16.msra.mxu0 %v7627_v11  ;;  %v2035_v11 = vpop.permute.xlu0 %2034 }
 0x4d3   : > { %2755 = vmatprep.subr.bf16.mxu0 %v7632_v48 }
 0x4d6   : > { %2756 = vmatpush1.bf16.msra.mxu0 %v7635_v0 }
 0x4d7   : > { %2757 = vmatprep.subr.bf16.mxu0 %v7642_v44 }
 0x4da   : > { %2758 = vmatpush1.bf16.msra.mxu0 %v1809_v54 }
 0x544   : > { %v1969_v52 = vpop.f32.mrb[4].mxu0 }
 0x545   : > { %v6561_v10 = vadd.f32 %v1969_v52, %v1875_v24  ;;  %v1971_v13 = vpop.f32.mrb[5].mxu0 }
 0x546   : > { %v6562_v14 = vadd.f32 %v1971_v13, %v1875_v24  ;;  %v1973_v15 = vpop.f32.mrb[6].mxu0 }
 0x547   : > { %vm1976_vm2 = vcmp.ge.f32.partialorder %v6561_v10, 0.0  ;;  %v1978_v19 = vmul.f32 0.2, %v6561_v10  ;;  %v1974_v39 = vpop.f32.mrb[7].mxu0 }
 0x548   : > { %vm1977_vm3 = vcmp.ge.f32.partialorder %v6562_v14, 0.0  ;;  %v1979_v47 = vmul.f32 0.2, %v6562_v14 }
 0x549   : > { %v1980_v40 = vsel %vm1976_vm2, %v6561_v10, %v1978_v19 }
 0x54a   : > { %v1982_v42 = vpack.c.bf16 %v1980_v40, %v1980_v40  ;;  %v1981_v50 = vsel %vm1977_vm3, %v6562_v14, %v1979_v47  ;;  %v6494_v40 = vcombine.low %v7729_v53, %v7729_v53 }
 0x54b   : > { %v1983_v48 = vpack.c.bf16 %v1981_v50, %v1981_v50 }
 0x54c   : > { %1984 = vst [vmem:[#allocation2 + $0x8] sm:$0xf] %v1982_v42  ;;  %v6728_v42 = vld [vmem:[%s6891_s14 + $0x8] ss:$24 sps:$4 sm:$0xff]  }
 0x54d   : > { %1985 = vst [vmem:[#allocation2 + $0x10] sm:$0xf] %v1983_v48 }
 0x553   : > { %v7704_v44 = vld [vmem:[#allocation2 + $0x8] sm:$0xff] }
 0x554   : > { %2015 = vrot.lane.b32.xlu1 %v7704_v44, %s9653_s15  ;;  %v7708_v55 = vld [vmem:[#allocation2 + $0x10] sm:$0xff]  ;;  %v1990_v62 = vmul.bf16 %v7704_v44, %v7071_v28  ;;  %v2050_v63 = vmul.bf16 %v7704_v44, %v7094_v35  ;;  %v2029_v34 = vmul.bf16 %v7704_v44, %v7099_v36  ;;  %v2074_v61 = vmul.bf16 %v7704_v44, %v7103_v38 }
 0x555   : > { %2017 = vrot.lane.b32.xlu0 %v7708_v55, %s9653_s15  ;;  %v1991_v59 = vmul.bf16 %v7708_v55, %v7064_v26  ;;  %v2030_v45 = vmul.bf16 %v7708_v55, %v7062_v25  ;;  %v2051_v16 = vmul.bf16 %v7708_v55, %v7078_v30  ;;  %v2095_v57 = vmul.bf16 %v7704_v44, %v9730_v49 }
 0x556   : > { %v2075_v12 = vmul.bf16 %v7708_v55, %v9731_v4  ;;  %v2135_v8 = vmul.bf16 %v7708_v55, %v9733_v17  ;;  %v2134_v23 = vmul.bf16 %v7704_v44, %v9735_v43 }
 0x558   : > { %1999 = vrot.lane.b32.xlu1 %v1991_v59, %s9661_s11 }
 0x559   : > { %1997 = vrot.lane.b32.xlu0 %v1990_v62, %s9661_s11 }
 0x55c   : > { %2057 = vrot.lane.b32.xlu1 %v2050_v63, %s9630_s7 }
 0x55d   : > { %2036 = vrot.lane.b32.xlu0 %v2029_v34, %s9655_s10 }
 0x560   : > { %2038 = vrot.lane.b32.xlu1 %v2030_v45, %s9655_s10 }
 0x561   : > { %2080 = vrot.lane.b32.xlu0 %v2074_v61, %s9664_s2 }
 0x564   : > { %2055 = vrot.lane.b32.xlu1 %v7087_v33, %s9630_s7  ;;  %v9732_v33 = vld [vmem:[#allocation30_spill] sm:$0xff] }
 0x565   : > { %2059 = vrot.lane.b32.xlu0 %v2051_v16, %s9630_s7  ;;  %v2096_v60 = vmul.bf16 %v7708_v55, %v9732_v33 }
 0x568   : > { %2084 = vrot.lane.b32.xlu1 %v7115_v41, %s9664_s2  ;;  %v7756_v41 = vld [vmem:[#allocation2] sm:$0xff] }
 0x569   : > { %2105 = vrot.lane.b32.xlu0 %v9729_v27, %s9657_s28  ;;  %v7773_v32 = vmul.bf16 %v7756_v41, %v9736_v1 }
 0x56b   : > { %9737 = vst [vmem:[#allocation36_spill] sm:$0xff] %v7773_v32 }
 0x56c   : > { %2101 = vrot.lane.b32.xlu1 %v2095_v57, %s9657_s28 }
 0x56d   : > { %2082 = vrot.lane.b32.xlu0 %v2075_v12, %s9664_s2  ;;  %v6731_v12 = vld [vmem:[%s9702_s3 + $0x10] ss:$0 sps:$4 sm:$0xff]   ;;  %s9795_s3 = smov 127  }
 0x570   : > { %2103 = vrot.lane.b32.xlu1 %v2096_v60, %s9657_s28 }
 0x571   : > { %2121 = vrot.lane.b32.xlu0 %v7708_v55, %s9659_s16 }
 0x574   : > { %2123 = vrot.lane.b32.xlu1 %v7756_v41, %s9659_s16 }
 0x575   : > { %2119 = vrot.lane.b32.xlu0 %v7704_v44, %s9659_s16 }
 0x578   : > { %2142 = vrot.lane.b32.xlu1 %v2135_v8, %s9651_s1 }
 0x579   : > { %2144 = vrot.lane.b32.xlu0 %v9734_v21, %s9651_s1 }
 0x57c   : > { %2140 = vrot.lane.b32.xlu1 %v2134_v23, %s9651_s1 }
 0x57d   : > { %2230 = vperm.xlu0 %6710, %v2227_v22  }
 0x580   : > { %2396 = vrot.lane.b32.xlu1 %v7773_v32, %s9661_s11 }
 0x581   : > { %2414 = vrot.lane.b32.xlu0 %v7756_v41, %s9653_s15 }
 0x584   : > { %2435 = vrot.lane.b32.xlu1 %v9738_v3, %s9655_s10 }
 0x5c6   : > { %v2016_v0 = vpop.permute.xlu1 %2015 }
 0x5c7   : > { %v2018_v58 = vpop.permute.xlu0 %2017  ;;  %v2019_v5 = vsel %vm1066_vm10, %v2014_v56, %v2016_v0 }
 0x5c8   : > { %v2020_v20 = vsel %vm1066_vm10, %v2016_v0, %v2018_v58 }
 0x5ca   : > { %v2000_v31 = vpop.permute.xlu1 %1999 }
 0x5cb   : > { %v1998_v51 = vpop.permute.xlu0 %1997 }
 0x5cc   : > { %v2002_v54 = vsel %vm1047_vm9, %v1998_v51, %v2000_v31  ;;  %v2001_v29 = vsel %vm1047_vm9, %v1996_v37, %v1998_v51 }
 0x5cd   : > { %2317 = vmatprep.subr.bf16.mxu1 %v2002_v54  ;;  %2759 = vmatprep.subr.bf16.mxu0 %v2002_v54 }
 0x5ce   : > { %v2058_v18 = vpop.permute.xlu1 %2057  ;;  %2318 = vmatpush1.bf16.msra.mxu1 %v2001_v29  ;;  %2760 = vmatpush1.bf16.msra.mxu0 %v2001_v29 }
 0x5cf   : > { %2319 = vmatprep.subr.bf16.mxu1 %v2020_v20  ;;  %2761 = vmatprep.subr.bf16.mxu0 %v2020_v20  ;;  %v2037_v46 = vpop.permute.xlu0 %2036 }
 0x5d0   : > { %v2040_v52 = vsel %vm1099_vm7, %v2035_v11, %v2037_v46 }
 0x5d2   : > { %v2039_v6 = vpop.permute.xlu1 %2038  ;;  %2320 = vmatpush1.bf16.msra.mxu1 %v2019_v5  ;;  %2762 = vmatpush1.bf16.msra.mxu0 %v2019_v5 }
 0x5d3   : > { %v2081_v7 = vpop.permute.xlu0 %2080  ;;  %v2041_v24 = vsel %vm1099_vm7, %v2037_v46, %v2039_v6 }
 0x5d4   : > { %2321 = vmatprep.subr.bf16.mxu1 %v2041_v24  ;;  %2763 = vmatprep.subr.bf16.mxu0 %v2041_v24  ;;  %v9739_v24 = vld [vmem:[#allocation25_spill] sm:$0xff] }
 0x5d6   : > { %v2056_v10 = vpop.permute.xlu1 %2055  ;;  %2322 = vmatpush1.bf16.msra.mxu1 %v2040_v52  ;;  %2764 = vmatpush1.bf16.msra.mxu0 %v2040_v52  ;;  %v7835_v52 = vmul.bf16 %v7756_v41, %v9739_v24 }
 0x5d7   : > { %v2060_v13 = vpop.permute.xlu0 %2059  ;;  %v2061_v15 = vsel %vm1130_vm8, %v2056_v10, %v2058_v18 }
 0x5d8   : > { %v2062_v14 = vsel %vm1130_vm8, %v2058_v18, %v2060_v13  ;;  %v9740_v13 = vld [vmem:[#allocation26_spill] sm:$0xff] }
 0x5d9   : > { %2323 = vmatprep.subr.bf16.mxu1 %v2062_v14  ;;  %2765 = vmatprep.subr.bf16.mxu0 %v2062_v14  ;;  %v7844_v14 = vmul.bf16 %v7756_v41, %v9740_v13 }
 0x5da   : > { %v2085_v19 = vpop.permute.xlu1 %2084  ;;  %2324 = vmatpush1.bf16.msra.mxu1 %v2061_v15  ;;  %2766 = vmatpush1.bf16.msra.mxu0 %v2061_v15  ;;  %v9741_v15 = vld [vmem:[#allocation27_spill] sm:$0xff] }
 0x5db   : > { %2325 = vmatprep.subr.bf16.mxu1 %v7708_v55  ;;  %2767 = vmatprep.subr.bf16.mxu0 %v7708_v55  ;;  %v2106_v39 = vpop.permute.xlu0 %2105 }
 0x5de   : > { %v2102_v47 = vpop.permute.xlu1 %2101  ;;  %2326 = vmatpush1.bf16.msra.mxu1 %v7704_v44  ;;  %2768 = vmatpush1.bf16.msra.mxu0 %v7704_v44 }
 0x5df   : > { %v2083_v50 = vpop.permute.xlu0 %2082 }
 0x5e0   : > { %v2087_v48 = vsel %vm1113_vm5, %v2083_v50, %v2085_v19  ;;  %v2086_v59 = vsel %vm1113_vm5, %v2081_v7, %v2083_v50  ;;  %v7848_v19 = vmul.bf16 %v7756_v41, %v9741_v15 }
 0x5e1   : > { %2336 = vmatprep.subr.bf16.mxu1 %v2087_v48  ;;  %2780 = vmatprep.subr.bf16.mxu0 %v2087_v48  ;;  %v9742_v48 = vld [vmem:[#allocation32_spill] sm:$0xff] }
 0x5e2   : > { %v2104_v62 = vpop.permute.xlu1 %2103  ;;  %2328 = vmatmul.mubr.bf16.vlgmr.msra.gmra.mrb[4].mxu1 %v6494_v40  ;;  %2770 = vmatmul.mubr.bf16.vlgmr.msra.gmra.mrb[8].mxu0 %v6728_v42  ;;  %v6732_v42 = vld [vmem:[%s6891_s14 + $0x14] ss:$24 sps:$4 sm:$0xff]  }
 0x5e3   : > { %2337 = vmatpush1.bf16.msra.mxu1 %v2086_v59  ;;  %2781 = vmatpush1.bf16.msra.mxu0 %v2086_v59  ;;  %v2122_v55 = vpop.permute.xlu0 %2121  ;;  %v2108_v63 = vsel %vm1082_vm6, %v2104_v62, %v2106_v39  ;;  %v2107_v34 = vsel %vm1082_vm6, %v2102_v47, %v2104_v62  ;;  %v7875_v59 = vmul.bf16 %v7756_v41, %v9742_v48 }
 0x5e4   : > { %2338 = vmatprep.subr.bf16.mxu1 %v2108_v63  ;;  %2782 = vmatprep.subr.bf16.mxu0 %v2108_v63  ;;  %v2650_v63 = vld [vmem:[%s6896_s19 + $0x8] sm:$0xff] }
 0x5e5   : > { %2368 = vmatprep.mubr.bf16.mxu1 %v7756_v41  ;;  %6504 = vmatprep.mubr.msk.bf16.mxu0 %vm2690_vm0, %v6732_v42 }
 0x5e6   : > { %v2124_v44 = vpop.permute.xlu1 %2123 }
 0x5e7   : > { %2339 = vmatpush1.bf16.msra.mxu1 %v2107_v34  ;;  %2783 = vmatpush1.bf16.msra.mxu0 %v2107_v34  ;;  %v2120_v45 = vpop.permute.xlu0 %2119  ;;  %v2126_v61 = vsel %vm1211_vm11, %v2122_v55, %v2124_v44  ;;  %v9743_v44 = vld [vmem:[#allocation22_spill] sm:$0xff] }
 0x5e8   : > { %v2125_v53 = vsel %vm1211_vm11, %v2120_v45, %v2122_v55  ;;  %2340 = vmatprep.subr.bf16.mxu1 %v2126_v61  ;;  %2784 = vmatprep.subr.bf16.mxu0 %v2126_v61  ;;  %v2649_v55 = vld [vmem:[%s6896_s19] sm:$0xff]  ;;  %v7889_v34 = vmul.bf16 %v7756_v41, %v9743_v44 }
 0x5ea   : > { %v2143_v2 = vpop.permute.xlu1 %2142 }
 0x5eb   : > { %2341 = vmatpush1.bf16.msra.mxu1 %v2125_v53  ;;  %2785 = vmatpush1.bf16.msra.mxu0 %v2125_v53  ;;  %v2145_v9 = vpop.permute.xlu0 %2144 }
 0x5ec   : > { %v2147_v16 = vsel %vm1030_vm4, %v2143_v2, %v2145_v9 }
 0x5ed   : > { %2342 = vmatprep.subr.bf16.mxu1 %v2147_v16  ;;  %2786 = vmatprep.subr.bf16.mxu0 %v2147_v16 }
 0x5ee   : > { %v2141_v27 = vpop.permute.xlu1 %2140 }
 0x5ef   : > { %v2146_v57 = vsel %vm1030_vm4, %v2141_v27, %v2143_v2 }
 0x5f0   : > { %2343 = vmatpush1.bf16.msra.mxu1 %v2146_v57  ;;  %2787 = vmatpush1.bf16.msra.mxu0 %v2146_v57 }
 0x5f2   : > { %v2397_v45 = vpop.permute.xlu1 %2396 }
 0x5f3   : > { %6497 = vmatmul.mubr.msk.bf16.vlgmr.msra.gmra.mrb[4].mxu1 %vm2250_vm12, %v6731_v12 }
 0x5f6   : > { %v2436_v53 = vpop.permute.xlu1 %2435 }
 0x5fc   : > { %v2231_v60 = vpop.permute.xlu0 %2230 }
 0x600   : > { %v2415_v61 = vpop.permute.xlu0 %2414 }
 0x6c6   : > { %v2370_v8 = vpop.f32.mrb[4].mxu1 }
 0x6c7   : > { %v6563_v21 = vadd.f32 %v2370_v8, %v2231_v60  ;;  %v2372_v23 = vpop.f32.mrb[5].mxu1 }
 0x6c8   : > { %v6564_v22 = vadd.f32 %v2372_v23, %v2231_v60  ;;  %v2374_v3 = vpop.f32.mrb[6].mxu1 }
 0x6c9   : > { %vm2377_vm13 = vcmp.ge.f32.partialorder %v6563_v21, 0.0  ;;  %v2379_v37 = vmul.f32 0.2, %v6563_v21  ;;  %v2375_v56 = vpop.f32.mrb[7].mxu1 }
 0x6ca   : > { %vm2378_vm15 = vcmp.ge.f32.partialorder %v6564_v22, 0.0  ;;  %v2380_v11 = vmul.f32 0.2, %v6564_v22 }
 0x6cb   : > { %v2381_v0 = vsel %vm2377_vm13, %v6563_v21, %v2379_v37 }
 0x6cc   : > { %v2383_v58 = vpack.c.bf16 %v2381_v0, %v2381_v0  ;;  %v2382_v31 = vsel %vm2378_vm15, %v6564_v22, %v2380_v11 }
 0x6cd   : > { %v2384_v51 = vpack.c.bf16 %v2382_v31, %v2382_v31 }
 0x6ce   : > { %2385 = vst [vmem:[#allocation2 + $0x8] sm:$0xf] %v2383_v58 }
 0x6cf   : > { %2386 = vst [vmem:[#allocation2 + $0x10] sm:$0xf] %v2384_v51 }
 0x6d5   : > { %v7807_v54 = vld [vmem:[#allocation2 + $0x8] sm:$0xff] }
 0x6d6   : > { %2416 = vrot.lane.b32.xlu0 %v7807_v54, %s9653_s15  ;;  %v7811_v29 = vld [vmem:[#allocation2 + $0x10] sm:$0xff]  ;;  %v2391_v20 = vmul.bf16 %v7807_v54, %v7071_v28  ;;  %v2451_v46 = vmul.bf16 %v7807_v54, %v7094_v35  ;;  %v2430_v5 = vmul.bf16 %v7807_v54, %v7099_v36  ;;  %v2475_v7 = vmul.bf16 %v7807_v54, %v7103_v38 }
 0x6d7   : > { %2418 = vrot.lane.b32.xlu1 %v7811_v29, %s9653_s15  ;;  %v2392_v18 = vmul.bf16 %v7811_v29, %v7064_v26  ;;  %v2431_v6 = vmul.bf16 %v7811_v29, %v7062_v25  ;;  %v2452_v10 = vmul.bf16 %v7811_v29, %v7078_v30  ;;  %v2496_v39 = vmul.bf16 %v7807_v54, %v9730_v49 }
 0x6d8   : > { %v2476_v47 = vmul.bf16 %v7811_v29, %v9731_v4  ;;  %v2497_v40 = vmul.bf16 %v7811_v29, %v9732_v33  ;;  %v2536_v50 = vmul.bf16 %v7811_v29, %v9733_v17  ;;  %v2535_v62 = vmul.bf16 %v7807_v54, %v9735_v43 }
 0x6da   : > { %2400 = vrot.lane.b32.xlu0 %v2392_v18, %s9661_s11 }
 0x6db   : > { %2398 = vrot.lane.b32.xlu1 %v2391_v20, %s9661_s11 }
 0x6de   : > { %2458 = vrot.lane.b32.xlu0 %v2451_v46, %s9630_s7 }
 0x6df   : > { %2437 = vrot.lane.b32.xlu1 %v2430_v5, %s9655_s10 }
 0x6e2   : > { %2439 = vrot.lane.b32.xlu0 %v2431_v6, %s9655_s10 }
 0x6e3   : > { %2481 = vrot.lane.b32.xlu1 %v2475_v7, %s9664_s2 }
 0x6e6   : > { %2456 = vrot.lane.b32.xlu0 %v7835_v52, %s9630_s7 }
 0x6e7   : > { %2460 = vrot.lane.b32.xlu1 %v2452_v10, %s9630_s7 }
 0x6ea   : > { %2485 = vrot.lane.b32.xlu0 %v7844_v14, %s9664_s2 }
 0x6eb   : > { %2506 = vrot.lane.b32.xlu1 %v7848_v19, %s9657_s28 }
 0x6ee   : > { %2502 = vrot.lane.b32.xlu0 %v2496_v39, %s9657_s28 }
 0x6ef   : > { %2483 = vrot.lane.b32.xlu1 %v2476_v47, %s9664_s2 }
 0x6f2   : > { %2504 = vrot.lane.b32.xlu0 %v2497_v40, %s9657_s28 }
 0x6f3   : > { %2522 = vrot.lane.b32.xlu1 %v7811_v29, %s9659_s16 }
 0x6f6   : > { %2524 = vrot.lane.b32.xlu0 %v7756_v41, %s9659_s16 }
 0x6f7   : > { %2520 = vrot.lane.b32.xlu1 %v7807_v54, %s9659_s16 }
 0x6fa   : > { %2543 = vrot.lane.b32.xlu0 %v2536_v50, %s9651_s1 }
 0x6fb   : > { %2545 = vrot.lane.b32.xlu1 %v7875_v59, %s9651_s1 }
 0x6fe   : > { %2541 = vrot.lane.b32.xlu0 %v2535_v62, %s9651_s1 }
 0x6ff   : > { %2653 = vperm.xlu1 %6711, %v2649_v55  }
 0x702   : > { %2658 = vperm.xlu0 %6710, %v2650_v63  }
 0x703   : > { %2856 = vrot.lane.b32.xlu1 %v7773_v32, %s9661_s11 }
 0x706   : > { %2874 = vrot.lane.b32.xlu0 %v7756_v41, %s9653_s15 }
 0x707   : > { %2895 = vrot.lane.b32.xlu1 %v7889_v34, %s9655_s10 }
 0x748   : > { %v2417_v2 = vpop.permute.xlu0 %2416 }
 0x749   : > { %v2419_v9 = vpop.permute.xlu1 %2418  ;;  %v2420_v23 = vsel %vm1066_vm10, %v2415_v61, %v2417_v2  ;;  %v6734_v61 = vld [vmem:[%s6891_s14 + $0x10] ss:$24 sps:$4 sm:$0xff]  }
 0x74a   : > { %v2421_v8 = vsel %vm1066_vm10, %v2417_v2, %v2419_v9 }
 0x74c   : > { %v2401_v16 = vpop.permute.xlu0 %2400 }
 0x74d   : > { %v2399_v27 = vpop.permute.xlu1 %2398 }
 0x74e   : > { %v2403_v57 = vsel %vm1047_vm9, %v2399_v27, %v2401_v16  ;;  %v2402_v12 = vsel %vm1047_vm9, %v2397_v45, %v2399_v27 }
 0x74f   : > { %2788 = vmatprep.subr.bf16.mxu0 %v2403_v57 }
 0x750   : > { %2789 = vmatpush1.bf16.msra.mxu0 %v2402_v12  ;;  %v2459_v60 = vpop.permute.xlu0 %2458 }
 0x751   : > { %v2438_v21 = vpop.permute.xlu1 %2437  ;;  %2790 = vmatprep.subr.bf16.mxu0 %v2421_v8 }
 0x752   : > { %v2441_v56 = vsel %vm1099_vm7, %v2436_v53, %v2438_v21 }
 0x754   : > { %2791 = vmatpush1.bf16.msra.mxu0 %v2420_v23  ;;  %v2440_v22 = vpop.permute.xlu0 %2439 }
 0x755   : > { %v2482_v3 = vpop.permute.xlu1 %2481  ;;  %v2442_v37 = vsel %vm1099_vm7, %v2438_v21, %v2440_v22 }
 0x756   : > { %2792 = vmatprep.subr.bf16.mxu0 %v2442_v37 }
 0x758   : > { %2793 = vmatpush1.bf16.msra.mxu0 %v2441_v56  ;;  %v2457_v11 = vpop.permute.xlu0 %2456  ;;  %v6782_v56 = vld [vmem:[%s7020_s26] sm:$0xff] }
 0x759   : > { %v2461_v0 = vpop.permute.xlu1 %2460  ;;  %v2462_v31 = vsel %vm1130_vm8, %v2457_v11, %v2459_v60 }
 0x75a   : > { %v2463_v58 = vsel %vm1130_vm8, %v2459_v60, %v2461_v0  ;;  %v6783_v0 = vld [vmem:[%s7020_s26 + $0x10] sm:$0xff] }
 0x75b   : > { %2794 = vmatprep.subr.bf16.mxu0 %v2463_v58 }
 0x75c   : > { %2795 = vmatpush1.bf16.msra.mxu0 %v2462_v31  ;;  %v2486_v51 = vpop.permute.xlu0 %2485  ;;  %v6784_v31 = vld [vmem:[%s7020_s26 + $0x8] sm:$0xff] }
 0x75d   : > { %v2507_v18 = vpop.permute.xlu1 %2506  ;;  %2796 = vmatprep.subr.bf16.mxu0 %v7811_v29 }
 0x760   : > { %2797 = vmatpush1.bf16.msra.mxu0 %v7807_v54  ;;  %v2503_v20 = vpop.permute.xlu0 %2502 }
 0x761   : > { %v2484_v46 = vpop.permute.xlu1 %2483 }
 0x762   : > { %v2488_v5 = vsel %vm1113_vm5, %v2484_v46, %v2486_v51  ;;  %v2487_v6 = vsel %vm1113_vm5, %v2482_v3, %v2484_v46 }
 0x763   : > { %2798 = vmatprep.subr.bf16.mxu0 %v2488_v5 }
 0x764   : > { %2799 = vmatpush1.bf16.msra.mxu0 %v2487_v6  ;;  %v2505_v7 = vpop.permute.xlu0 %2504 }
 0x765   : > { %v2523_v10 = vpop.permute.xlu1 %2522  ;;  %v2509_v39 = vsel %vm1082_vm6, %v2505_v7, %v2507_v18  ;;  %v2508_v47 = vsel %vm1082_vm6, %v2503_v20, %v2505_v7  ;;  %v6785_v18 = vld [vmem:[%s7020_s26 + $0x18] sm:$0xff] }
 0x766   : > { %2800 = vmatprep.subr.bf16.mxu0 %v2509_v39 }
 0x768   : > { %2801 = vmatpush1.bf16.msra.mxu0 %v2508_v47  ;;  %v2525_v29 = vpop.permute.xlu0 %2524 }
 0x769   : > { %v2521_v40 = vpop.permute.xlu1 %2520  ;;  %v2527_v54 = vsel %vm1211_vm11, %v2523_v10, %v2525_v29 }
 0x76a   : > { %v2526_v42 = vsel %vm1211_vm11, %v2521_v40, %v2523_v10  ;;  %2802 = vmatprep.subr.bf16.mxu0 %v2527_v54 }
 0x76c   : > { %2803 = vmatpush1.bf16.msra.mxu0 %v2526_v42  ;;  %v2544_v50 = vpop.permute.xlu0 %2543 }
 0x76d   : > { %v2546_v62 = vpop.permute.xlu1 %2545 }
 0x76e   : > { %v2548_v55 = vsel %vm1030_vm4, %v2544_v50, %v2546_v62  ;;  %v7979_v62 = vld [vmem:[%s6901_s24] sm:$0xff] }
 0x76f   : > { %2804 = vmatprep.subr.bf16.mxu0 %v2548_v55  ;;  %v6506_v55 = vcombine.high %v7979_v62, %v7979_v62 }
 0x770   : > { %v2542_v63 = vpop.permute.xlu0 %2541 }
 0x771   : > { %v2547_v45 = vsel %vm1030_vm4, %v2542_v63, %v2544_v50  ;;  %6507 = vmatprep.mubr.msk.bf16.mxu1 %vm1066_vm10, %v6506_v55 }
 0x772   : > { %2805 = vmatpush1.bf16.msra.mxu0 %v2547_v45 }
 0x775   : > { %2813 = vmatmul.mubr.bf16.vlgmr.msra.gmra.mrb[8].mxu0 %v6734_v61  ;;  %v3032_v61 = vld [vmem:[%s6906_s30] sm:$0xff] }
 0x77e   : > { %v2654_v53 = vpop.permute.xlu1 %2653 }
 0x781   : > { %v2659_v27 = vpop.permute.xlu0 %2658 }
 0x848   : > { %v2814_v2 = vpop.f32.mrb[8].mxu0 }
 0x849   : > { %v6565_v9 = vadd.f32 %v2814_v2, %v2654_v53  ;;  %v2816_v16 = vpop.f32.mrb[9].mxu0  ;;  %v2875_v2 = vpop.permute.xlu0 %2874 }
 0x84a   : > { %v6566_v57 = vadd.f32 %v2816_v16, %v2654_v53  ;;  %v2818_v12 = vpop.f32.mrb[10].mxu0  ;;  %v2857_v53 = vpop.permute.xlu1 %2856 }
 0x84b   : > { %v2823_v60 = vmul.f32 0.2, %v6565_v9  ;;  %v6567_v8 = vadd.f32 %v2818_v12, %v2659_v27  ;;  %v2820_v21 = vpop.f32.mrb[11].mxu0 }
 0x84c   : > { %v2824_v23 = vmul.f32 0.2, %v6566_v57  ;;  %v6568_v22 = vadd.f32 %v2820_v21, %v2659_v27 }
 0x84d   : > { %v2825_v3 = vmul.f32 0.2, %v6567_v8  ;;  %v7915_v11 = vadd.f32 %v6782_v56, %v2823_v60 }
 0x84e   : > { %v2826_v37 = vmul.f32 0.2, %v6568_v22  ;;  %v7921_v51 = vadd.f32 %v6784_v31, %v2824_v23  ;;  %v2896_v9 = vpop.permute.xlu1 %2895 }
 0x84f   : > { %9744 = vst [vmem:[#allocation37_spill] sm:$0xff] %v7915_v11  ;;  %v7918_v58 = vadd.f32 %v6783_v0, %v2825_v3 }
 0x850   : > { %9746 = vst [vmem:[#allocation39_spill] sm:$0xff] %v7921_v51  ;;  %v7924_v20 = vadd.f32 %v6785_v18, %v2826_v37 }
 0x851   : > { %9745 = vst [vmem:[#allocation38_spill] sm:$0xff] %v7918_v58  ;;  %v7928_v46 = vpack.c.bf16 %v7918_v58, %v7915_v11 }
 0x852   : > { %9747 = vst [vmem:[#allocation40_spill] sm:$0xff] %v7924_v20  ;;  %v7932_v5 = vpack.c.bf16 %v7924_v20, %v7921_v51 }
 0x853   : > { %2845 = vst [vmem:[#allocation2 + $0x8] sm:$0xff] %v7928_v46  ;;  %2876 = vrot.lane.b32.xlu0 %v7928_v46, %s9653_s15  ;;  %v2851_v7 = vmul.bf16 %v7928_v46, %v7071_v28  ;;  %v2911_v10 = vmul.bf16 %v7928_v46, %v7094_v35  ;;  %v2890_v39 = vmul.bf16 %v7928_v46, %v7099_v36 }
 0x854   : > { %2846 = vst [vmem:[#allocation2 + $0x10] sm:$0xff] %v7932_v5  ;;  %2878 = vrot.lane.b32.xlu1 %v7932_v5, %s9653_s15  ;;  %v2852_v6 = vmul.bf16 %v7932_v5, %v7064_v26  ;;  %v2891_v47 = vmul.bf16 %v7932_v5, %v7062_v25  ;;  %v2935_v29 = vmul.bf16 %v7928_v46, %v7103_v38 }
 0x855   : > { %v2912_v40 = vmul.bf16 %v7932_v5, %v7078_v30  ;;  %v2956_v54 = vmul.bf16 %v7928_v46, %v9730_v49  ;;  %v2936_v42 = vmul.bf16 %v7932_v5, %v9731_v4  ;;  %v2957_v50 = vmul.bf16 %v7932_v5, %v9732_v33 }
 0x856   : > { %v2996_v63 = vmul.bf16 %v7932_v5, %v9733_v17  ;;  %v2995_v45 = vmul.bf16 %v7928_v46, %v9735_v43 }
 0x857   : > { %2860 = vrot.lane.b32.xlu0 %v2852_v6, %s9661_s11 }
 0x858   : > { %2858 = vrot.lane.b32.xlu1 %v2851_v7, %s9661_s11 }
 0x85b   : > { %2918 = vrot.lane.b32.xlu0 %v2911_v10, %s9630_s7 }
 0x85c   : > { %2897 = vrot.lane.b32.xlu1 %v2890_v39, %s9655_s10 }
 0x85f   : > { %2899 = vrot.lane.b32.xlu0 %v2891_v47, %s9655_s10 }
 0x860   : > { %2941 = vrot.lane.b32.xlu1 %v2935_v29, %s9664_s2 }
 0x863   : > { %2916 = vrot.lane.b32.xlu0 %v7835_v52, %s9630_s7 }
 0x864   : > { %2920 = vrot.lane.b32.xlu1 %v2912_v40, %s9630_s7 }
 0x867   : > { %2945 = vrot.lane.b32.xlu0 %v7844_v14, %s9664_s2 }
 0x868   : > { %2966 = vrot.lane.b32.xlu1 %v7848_v19, %s9657_s28 }
 0x86b   : > { %2962 = vrot.lane.b32.xlu0 %v2956_v54, %s9657_s28 }
 0x86c   : > { %2943 = vrot.lane.b32.xlu1 %v2936_v42, %s9664_s2 }
 0x86f   : > { %2964 = vrot.lane.b32.xlu0 %v2957_v50, %s9657_s28 }
 0x870   : > { %2982 = vrot.lane.b32.xlu1 %v7932_v5, %s9659_s16 }
 0x873   : > { %2984 = vrot.lane.b32.xlu0 %v7756_v41, %s9659_s16 }
 0x874   : > { %2980 = vrot.lane.b32.xlu1 %v7928_v46, %s9659_s16 }
 0x877   : > { %3003 = vrot.lane.b32.xlu0 %v2996_v63, %s9651_s1 }
 0x878   : > { %3005 = vrot.lane.b32.xlu1 %v7875_v59, %s9651_s1 }
 0x87b   : > { %3001 = vrot.lane.b32.xlu0 %v2995_v45, %s9651_s1 }
 0x87c   : > { %3035 = vperm.xlu1 %6711, %v3032_v61  }
 0x87f   : > { %3107 = vrot.lane.b32.xlu0 %v7773_v32, %s9661_s11 }
 0x8c5   : > { %v2877_v16 = vpop.permute.xlu0 %2876 }
 0x8c6   : > { %v2879_v27 = vpop.permute.xlu1 %2878  ;;  %v8015_v3 = vsel %vm1066_vm10, %v2875_v2, %v2877_v16 }
 0x8c7   : > { %v8008_v21 = vsel %vm1066_vm10, %v2877_v16, %v2879_v27 }
 0x8c9   : > { %v2861_v57 = vpop.permute.xlu0 %2860 }
 0x8ca   : > { %v2859_v12 = vpop.permute.xlu1 %2858 }
 0x8cb   : > { %v8000_v60 = vsel %vm1047_vm9, %v2857_v53, %v2859_v12  ;;  %v8003_v8 = vsel %vm1047_vm9, %v2859_v12, %v2861_v57 }
 0x8cc   : > { %3047 = vmatprep.subr.bf16.mxu1 %v8003_v8  ;;  %3657 = vmatprep.subr.bf16.mxu0 %v8003_v8 }
 0x8cd   : > { %3048 = vmatpush1.bf16.msra.mxu1 %v8000_v60  ;;  %3658 = vmatpush1.bf16.msra.mxu0 %v8000_v60  ;;  %v2919_v23 = vpop.permute.xlu0 %2918 }
 0x8ce   : > { %v2898_v22 = vpop.permute.xlu1 %2897  ;;  %3049 = vmatprep.subr.bf16.mxu1 %v8008_v21  ;;  %3659 = vmatprep.subr.bf16.mxu0 %v8008_v21 }
 0x8cf   : > { %v8025_v31 = vsel %vm1099_vm7, %v2896_v9, %v2898_v22 }
 0x8d1   : > { %3050 = vmatpush1.bf16.msra.mxu1 %v8015_v3  ;;  %3660 = vmatpush1.bf16.msra.mxu0 %v8015_v3  ;;  %v2900_v37 = vpop.permute.xlu0 %2899 }
 0x8d2   : > { %v8020_v56 = vsel %vm1099_vm7, %v2898_v22, %v2900_v37  ;;  %v2942_v0 = vpop.permute.xlu1 %2941  ;;  %v6505_v22 = vcombine.low %v7979_v62, %v7979_v62 }
 0x8d3   : > { %3051 = vmatprep.subr.bf16.mxu1 %v8020_v56  ;;  %3661 = vmatprep.subr.bf16.mxu0 %v8020_v56 }
 0x8d5   : > { %3052 = vmatpush1.bf16.msra.mxu1 %v8025_v31  ;;  %3662 = vmatpush1.bf16.msra.mxu0 %v8025_v31  ;;  %v2917_v18 = vpop.permute.xlu0 %2916 }
 0x8d6   : > { %v2921_v6 = vpop.permute.xlu1 %2920  ;;  %v8033_v10 = vsel %vm1130_vm8, %v2917_v18, %v2919_v23 }
 0x8d7   : > { %v8030_v7 = vsel %vm1130_vm8, %v2919_v23, %v2921_v6 }
 0x8d8   : > { %3053 = vmatprep.subr.bf16.mxu1 %v8030_v7  ;;  %3663 = vmatprep.subr.bf16.mxu0 %v8030_v7 }
 0x8d9   : > { %3054 = vmatpush1.bf16.msra.mxu1 %v8033_v10  ;;  %3664 = vmatpush1.bf16.msra.mxu0 %v8033_v10  ;;  %v2946_v39 = vpop.permute.xlu0 %2945 }
 0x8da   : > { %v2967_v47 = vpop.permute.xlu1 %2966  ;;  %3055 = vmatprep.subr.bf16.mxu1 %v7932_v5  ;;  %3665 = vmatprep.subr.bf16.mxu0 %v7932_v5 }
 0x8dd   : > { %3056 = vmatpush1.bf16.msra.mxu1 %v7928_v46  ;;  %3666 = vmatpush1.bf16.msra.mxu0 %v7928_v46  ;;  %v2963_v29 = vpop.permute.xlu0 %2962 }
 0x8de   : > { %v2944_v40 = vpop.permute.xlu1 %2943 }
 0x8df   : > { %v8044_v54 = vsel %vm1113_vm5, %v2942_v0, %v2944_v40  ;;  %v8047_v42 = vsel %vm1113_vm5, %v2944_v40, %v2946_v39 }
 0x8e0   : > { %3057 = vmatprep.subr.bf16.mxu1 %v8047_v42  ;;  %3667 = vmatprep.subr.bf16.mxu0 %v8047_v42 }
 0x8e1   : > { %3058 = vmatpush1.bf16.msra.mxu1 %v8044_v54  ;;  %3668 = vmatpush1.bf16.msra.mxu0 %v8044_v54  ;;  %v2965_v50 = vpop.permute.xlu0 %2964 }
 0x8e2   : > { %v8054_v55 = vsel %vm1082_vm6, %v2965_v50, %v2967_v47  ;;  %v2983_v63 = vpop.permute.xlu1 %2982  ;;  %v8059_v45 = vsel %vm1082_vm6, %v2963_v29, %v2965_v50 }
 0x8e3   : > { %3059 = vmatprep.subr.bf16.mxu1 %v8054_v55  ;;  %3669 = vmatprep.subr.bf16.mxu0 %v8054_v55 }
 0x8e5   : > { %3060 = vmatpush1.bf16.msra.mxu1 %v8059_v45  ;;  %3670 = vmatpush1.bf16.msra.mxu0 %v8059_v45  ;;  %v2985_v61 = vpop.permute.xlu0 %2984 }
 0x8e6   : > { %v8064_v53 = vsel %vm1211_vm11, %v2983_v63, %v2985_v61  ;;  %v2981_v2 = vpop.permute.xlu1 %2980 }
 0x8e7   : > { %v8067_v9 = vsel %vm1211_vm11, %v2981_v2, %v2983_v63  ;;  %3061 = vmatprep.subr.bf16.mxu1 %v8064_v53  ;;  %3671 = vmatprep.subr.bf16.mxu0 %v8064_v53 }
 0x8e9   : > { %3062 = vmatpush1.bf16.msra.mxu1 %v8067_v9  ;;  %3672 = vmatpush1.bf16.msra.mxu0 %v8067_v9  ;;  %v3004_v16 = vpop.permute.xlu0 %3003 }
 0x8ea   : > { %v3006_v27 = vpop.permute.xlu1 %3005 }
 0x8eb   : > { %v8074_v57 = vsel %vm1030_vm4, %v3004_v16, %v3006_v27 }
 0x8ec   : > { %3063 = vmatprep.subr.bf16.mxu1 %v8074_v57  ;;  %3673 = vmatprep.subr.bf16.mxu0 %v8074_v57 }
 0x8ed   : > { %v3002_v12 = vpop.permute.xlu0 %3001 }
 0x8ee   : > { %v8079_v23 = vsel %vm1030_vm4, %v3002_v12, %v3004_v16 }
 0x8ef   : > { %3064 = vmatpush1.bf16.msra.mxu1 %v8079_v23  ;;  %3674 = vmatpush1.bf16.msra.mxu0 %v8079_v23 }
 0x8f0   : > { %3321 = vmatprep.subr.bf16.mxu1 %v8003_v8 }
 0x8f2   : > { %3080 = vmatmul.mubr.bf16.vlgmr.msra.gmra.mrb[8].mxu1 %v6505_v22 }
 0x8f3   : > { %3322 = vmatpush1.bf16.msra.mxu1 %v8000_v60 }
 0x8f4   : > { %3323 = vmatprep.subr.bf16.mxu1 %v8008_v21 }
 0x8f7   : > { %3324 = vmatpush1.bf16.msra.mxu1 %v8015_v3 }
 0x8f8   : > { %3325 = vmatprep.subr.bf16.mxu1 %v8020_v56 }
 0x8fb   : > { %3326 = vmatpush1.bf16.msra.mxu1 %v8025_v31  ;;  %v3036_v62 = vpop.permute.xlu1 %3035 }
 0x8fc   : > { %3327 = vmatprep.subr.bf16.mxu1 %v8030_v7 }
 0x8ff   : > { %3328 = vmatpush1.bf16.msra.mxu1 %v8033_v10 }
 0x900   : > { %3329 = vmatprep.subr.bf16.mxu1 %v7932_v5 }
 0x903   : > { %3330 = vmatpush1.bf16.msra.mxu1 %v7928_v46 }
 0x904   : > { %3331 = vmatprep.subr.bf16.mxu1 %v8047_v42 }
 0x907   : > { %3332 = vmatpush1.bf16.msra.mxu1 %v8044_v54 }
 0x908   : > { %3333 = vmatprep.subr.bf16.mxu1 %v8054_v55 }
 0x90b   : > { %3334 = vmatpush1.bf16.msra.mxu1 %v8059_v45 }
 0x90c   : > { %3335 = vmatprep.subr.bf16.mxu1 %v8064_v53 }
 0x90f   : > { %3336 = vmatpush1.bf16.msra.mxu1 %v8067_v9 }
 0x910   : > { %3337 = vmatprep.subr.bf16.mxu1 %v8074_v57 }
 0x913   : > { %3338 = vmatpush1.bf16.msra.mxu1 %v8079_v23 }
 0x9c5   : > { %v3081_v37 = vpop.f32.mrb[8].mxu1 }
 0x9c6   : > { %v3082_v0 = vadd.f32 %v3081_v37, %v3036_v62  ;;  %v3083_v18 = vpop.f32.mrb[9].mxu1 }
 0x9c7   : > { %v3084_v6 = vadd.f32 %v3083_v18, %v3036_v62  ;;  %v3085_v39 = vpop.f32.mrb[10].mxu1 }
 0x9c8   : > { %vm3088_vm2 = vcmp.ge.f32.partialorder %v3082_v0, 0.0  ;;  %v3090_v47 = vmul.f32 0.2, %v3082_v0  ;;  %v3086_v29 = vpop.f32.mrb[11].mxu1  ;;  %v8138_v39 = vld [vmem:[%s9701_s6] sm:$0xff] }
 0x9c9   : > { %vm3089_vm3 = vcmp.ge.f32.partialorder %v3084_v6, 0.0  ;;  %v3091_v40 = vmul.f32 0.2, %v3084_v6 }
 0x9ca   : > { %v3092_v50 = vsel %vm3088_vm2, %v3082_v0, %v3090_v47  ;;  %v6509_v47 = vcombine.high %v8138_v39, %v8138_v39 }
 0x9cb   : > { %v3094_v63 = vpack.c.bf16 %v3092_v50, %v3092_v50  ;;  %v3093_v61 = vsel %vm3089_vm3, %v3084_v6, %v3091_v40  ;;  %v8146_v40 = vld [vmem:[%s9748_s18] sm:$0xff] }
 0x9cc   : > { %v3095_v2 = vpack.c.bf16 %v3093_v61, %v3093_v61  ;;  %3353 = vmatprep.mubr.bf16.mxu1 %v6509_v47  ;;  %v3302_v61 = vld [vmem:[%s9749_s0] sm:$0xff]  ;;  %s9754_s0 = sld [smem:[#allocation11_spill]] }
 0x9cd   : > { %3096 = vst [vmem:[#allocation2 + $0x8] sm:$0xf] %v3094_v63 }
 0x9ce   : > { %3097 = vst [vmem:[#allocation2 + $0x10] sm:$0xf] %v3095_v2  ;;  %v3108_v2 = vpop.permute.xlu0 %3107 }
 0x9d4   : > { %v8103_v16 = vld [vmem:[#allocation2 + $0x8] sm:$0xff] }
 0x9d5   : > { %3127 = vrot.lane.b32.xlu1 %v8103_v16, %s9653_s15  ;;  %v8107_v27 = vld [vmem:[#allocation2 + $0x10] sm:$0xff]  ;;  %v3102_v22 = vmul.bf16 %v8103_v16, %v7071_v28  ;;  %v3141_v62 = vmul.bf16 %v8103_v16, %v7099_v36  ;;  %v3162_v0 = vmul.bf16 %v8103_v16, %v7094_v35  ;;  %v3186_v6 = vmul.bf16 %v8103_v16, %v7103_v38 }
 0x9d6   : > { %3129 = vrot.lane.b32.xlu0 %v8107_v27, %s9653_s15  ;;  %v3103_v12 = vmul.bf16 %v8107_v27, %v7064_v26  ;;  %v3142_v37 = vmul.bf16 %v8107_v27, %v7062_v25  ;;  %v3163_v18 = vmul.bf16 %v8107_v27, %v7078_v30  ;;  %v3187_v29 = vmul.bf16 %v8107_v27, %v9731_v4 }
 0x9d7   : > { %v3208_v50 = vmul.bf16 %v8107_v27, %v9732_v33  ;;  %v3207_v63 = vmul.bf16 %v8103_v16, %v9730_v49 }
 0x9d9   : > { %3111 = vrot.lane.b32.xlu1 %v3103_v12, %s9661_s11 }
 0x9da   : > { %3109 = vrot.lane.b32.xlu0 %v3102_v22, %s9661_s11 }
 0x9dd   : > { %3125 = vrot.lane.b32.xlu1 %v7756_v41, %s9653_s15 }
 0x9de   : > { %3148 = vrot.lane.b32.xlu0 %v3141_v62, %s9655_s10 }
 0x9e1   : > { %3150 = vrot.lane.b32.xlu1 %v3142_v37, %s9655_s10 }
 0x9e2   : > { %3146 = vrot.lane.b32.xlu0 %v7889_v34, %s9655_s10 }
 0x9e5   : > { %3169 = vrot.lane.b32.xlu1 %v3162_v0, %s9630_s7 }
 0x9e6   : > { %3171 = vrot.lane.b32.xlu0 %v3163_v18, %s9630_s7 }
 0x9e9   : > { %3167 = vrot.lane.b32.xlu1 %v7835_v52, %s9630_s7  ;;  %v6513_v52 = vcombine.high %v8146_v40, %v8146_v40 }
 0x9ea   : > { %3192 = vrot.lane.b32.xlu0 %v3186_v6, %s9664_s2 }
 0x9eb   : > { %3689 = vmatprep.mubr.bf16.mxu0 %v6513_v52 }
 0x9ed   : > { %3196 = vrot.lane.b32.xlu1 %v7844_v14, %s9664_s2  ;;  %v3247_v14 = vmul.bf16 %v8107_v27, %v9733_v17 }
 0x9ee   : > { %3194 = vrot.lane.b32.xlu0 %v3187_v29, %s9664_s2 }
 0x9f1   : > { %3215 = vrot.lane.b32.xlu1 %v3208_v50, %s9657_s28 }
 0x9f2   : > { %3217 = vrot.lane.b32.xlu0 %v7848_v19, %s9657_s28  ;;  %v3246_v19 = vmul.bf16 %v8103_v16, %v9735_v43 }
 0x9f5   : > { %3213 = vrot.lane.b32.xlu1 %v3207_v63, %s9657_s28 }
 0x9f6   : > { %3233 = vrot.lane.b32.xlu0 %v8107_v27, %s9659_s16 }
 0x9f9   : > { %3235 = vrot.lane.b32.xlu1 %v7756_v41, %s9659_s16 }
 0x9fa   : > { %3231 = vrot.lane.b32.xlu0 %v8103_v16, %s9659_s16 }
 0x9fd   : > { %3254 = vrot.lane.b32.xlu1 %v3247_v14, %s9651_s1 }
 0x9fe   : > { %3256 = vrot.lane.b32.xlu0 %v7875_v59, %s9651_s1 }
 0xa01   : > { %3252 = vrot.lane.b32.xlu1 %v3246_v19, %s9651_s1 }
 0xa02   : > { %3305 = vperm.xlu0 %6710, %v3302_v61  }
 0xa05   : > { %3422 = vrot.lane.b32.xlu1 %v7773_v32, %s9661_s11 }
 0xa06   : > { %3440 = vrot.lane.b32.xlu0 %v7756_v41, %s9653_s15 }
 0xa09   : > { %3461 = vrot.lane.b32.xlu1 %v7889_v34, %s9655_s10 }
 0xa47   : > { %v3128_v12 = vpop.permute.xlu1 %3127 }
 0xa48   : > { %v3130_v22 = vpop.permute.xlu0 %3129 }
 0xa49   : > { %v8191_v41 = vsel %vm1066_vm10, %v3128_v12, %v3130_v22 }
 0xa4b   : > { %v3112_v59 = vpop.permute.xlu1 %3111 }
 0xa4c   : > { %v3110_v62 = vpop.permute.xlu0 %3109 }
 0xa4d   : > { %v8183_v37 = vsel %vm1047_vm9, %v3110_v62, %v3112_v59  ;;  %v8186_v0 = vsel %vm1047_vm9, %v3108_v2, %v3110_v62 }
 0xa4e   : > { %3339 = vmatprep.subr.bf16.mxu1 %v8183_v37  ;;  %3675 = vmatprep.subr.bf16.mxu0 %v8183_v37 }
 0xa4f   : > { %v3126_v18 = vpop.permute.xlu1 %3125  ;;  %3340 = vmatpush1.bf16.msra.mxu1 %v8186_v0  ;;  %3676 = vmatpush1.bf16.msra.mxu0 %v8186_v0 }
 0xa50   : > { %3341 = vmatprep.subr.bf16.mxu1 %v8191_v41  ;;  %3677 = vmatprep.subr.bf16.mxu0 %v8191_v41  ;;  %v3149_v34 = vpop.permute.xlu0 %3148  ;;  %v8198_v6 = vsel %vm1066_vm10, %v3126_v18, %v3128_v12 }
 0xa53   : > { %v3151_v47 = vpop.permute.xlu1 %3150  ;;  %3342 = vmatpush1.bf16.msra.mxu1 %v8198_v6  ;;  %3678 = vmatpush1.bf16.msra.mxu0 %v8198_v6 }
 0xa54   : > { %v8203_v29 = vsel %vm1099_vm7, %v3149_v34, %v3151_v47  ;;  %v3147_v52 = vpop.permute.xlu0 %3146 }
 0xa55   : > { %v8206_v50 = vsel %vm1099_vm7, %v3147_v52, %v3149_v34  ;;  %3343 = vmatprep.subr.bf16.mxu1 %v8203_v29  ;;  %3679 = vmatprep.subr.bf16.mxu0 %v8203_v29 }
 0xa57   : > { %v3170_v63 = vpop.permute.xlu1 %3169  ;;  %3344 = vmatpush1.bf16.msra.mxu1 %v8206_v50  ;;  %3680 = vmatpush1.bf16.msra.mxu0 %v8206_v50 }
 0xa58   : > { %v3172_v14 = vpop.permute.xlu0 %3171 }
 0xa59   : > { %v8213_v19 = vsel %vm1130_vm8, %v3170_v63, %v3172_v14 }
 0xa5a   : > { %3345 = vmatprep.subr.bf16.mxu1 %v8213_v19  ;;  %3681 = vmatprep.subr.bf16.mxu0 %v8213_v19 }
 0xa5b   : > { %v3168_v61 = vpop.permute.xlu1 %3167 }
 0xa5c   : > { %v8218_v2 = vsel %vm1130_vm8, %v3168_v61, %v3170_v63  ;;  %v3193_v12 = vpop.permute.xlu0 %3192 }
 0xa5d   : > { %3346 = vmatpush1.bf16.msra.mxu1 %v8218_v2  ;;  %3682 = vmatpush1.bf16.msra.mxu0 %v8218_v2 }
 0xa5e   : > { %3347 = vmatprep.subr.bf16.mxu1 %v8107_v27  ;;  %3683 = vmatprep.subr.bf16.mxu0 %v8107_v27 }
 0xa5f   : > { %v3197_v22 = vpop.permute.xlu1 %3196 }
 0xa60   : > { %v3195_v59 = vpop.permute.xlu0 %3194 }
 0xa61   : > { %3348 = vmatpush1.bf16.msra.mxu1 %v8103_v16  ;;  %3684 = vmatpush1.bf16.msra.mxu0 %v8103_v16  ;;  %v8227_v62 = vsel %vm1113_vm5, %v3195_v59, %v3197_v22  ;;  %v8232_v47 = vsel %vm1113_vm5, %v3193_v12, %v3195_v59  ;;  %v6508_v12 = vcombine.low %v8138_v39, %v8138_v39 }
 0xa62   : > { %3349 = vmatprep.subr.bf16.mxu1 %v8227_v62  ;;  %3685 = vmatprep.subr.bf16.mxu0 %v8227_v62  ;;  %9750 = vst [vmem:[#allocation29_spill] sm:$0xff] %v8232_v47  ;;  %v6512_v22 = vcombine.low %v8146_v40, %v8146_v40  ;;  %v8260_v40 = vld [vmem:[#allocation2] sm:$0xff] }
 0xa63   : > { %v3216_v18 = vpop.permute.xlu1 %3215  ;;  %9755 = vst [vmem:[#allocation42_spill] sm:$0xff] %v8260_v40 }
 0xa64   : > { %v3218_v34 = vpop.permute.xlu0 %3217 }
 0xa65   : > { %v8235_v52 = vsel %vm1082_vm6, %v3216_v18, %v3218_v34  ;;  %3350 = vmatpush1.bf16.msra.mxu1 %v8232_v47  ;;  %3686 = vmatpush1.bf16.msra.mxu0 %v8232_v47 }
 0xa66   : > { %9751 = vst [vmem:[#allocation35_spill] sm:$0xff] %v8235_v52  ;;  %3351 = vmatprep.subr.bf16.mxu1 %v8235_v52  ;;  %3687 = vmatprep.subr.bf16.mxu0 %v8235_v52 }
 0xa67   : > { %v3214_v63 = vpop.permute.xlu1 %3213 }
 0xa68   : > { %v8242_v14 = vsel %vm1082_vm6, %v3214_v63, %v3216_v18  ;;  %v3234_v61 = vpop.permute.xlu0 %3233 }
 0xa69   : > { %9752 = vst [vmem:[#allocation24_spill] sm:$0xff] %v8242_v14  ;;  %3352 = vmatpush1.bf16.msra.mxu1 %v8242_v14  ;;  %3688 = vmatpush1.bf16.msra.mxu0 %v8242_v14 }
 0xa6b   : > { %v3236_v59 = vpop.permute.xlu1 %3235 }
 0xa6c   : > { %v8251_v34 = vsel %vm1211_vm11, %v3234_v61, %v3236_v59  ;;  %3354 = vmatmul.mubr.bf16.vlgmr.msra.gmra.mrb[12].mxu1 %v6508_v12  ;;  %v3232_v20 = vpop.permute.xlu0 %3231  ;;  %3690 = vmatmul.mubr.bf16.vlgmr.msra.gmra.mrb[12].mxu0 %v6512_v22  ;;  %v6741_v59 = vld [vmem:[%s9701_s6 + $0x8] ss:$0 sps:$4 sm:$0xff]   ;;  %s9800_s6 = sld [smem:[#allocation16_spill]] }
 0xa6d   : > { %9753 = vst [vmem:[#allocation41_spill] sm:$0xff] %v8251_v34  ;;  %v8254_v18 = vsel %vm1211_vm11, %v3232_v20, %v3234_v61  ;;  %3362 = vmatprep.subr.bf16.mxu1 %v8251_v34  ;;  %3698 = vmatprep.subr.bf16.mxu0 %v8251_v34  ;;  %v3915_v20 = vld [vmem:[%s9754_s0] sm:$0xff] }
 0xa6e   : > { %3363 = vmatpush1.bf16.msra.mxu1 %v8254_v18  ;;  %3699 = vmatpush1.bf16.msra.mxu0 %v8254_v18  ;;  %v6518_v51 = vcombine.high %v3915_v20, %v3915_v20 }
 0xa6f   : > { %v3255_v39 = vpop.permute.xlu1 %3254  ;;  %3394 = vmatprep.mubr.bf16.mxu1 %v8260_v40 }
 0xa70   : > { %v3257_v63 = vpop.permute.xlu0 %3256 }
 0xa71   : > { %v8264_v12 = vsel %vm1030_vm4, %v3255_v39, %v3257_v63 }
 0xa72   : > { %9756 = vst [vmem:[#allocation43_spill] sm:$0xff] %v8264_v12  ;;  %3364 = vmatprep.subr.bf16.mxu1 %v8264_v12  ;;  %3700 = vmatprep.subr.bf16.mxu0 %v8264_v12 }
 0xa73   : > { %v3253_v61 = vpop.permute.xlu1 %3252 }
 0xa74   : > { %v8270_v22 = vsel %vm1030_vm4, %v3253_v61, %v3255_v39 }
 0xa75   : > { %3365 = vmatpush1.bf16.msra.mxu1 %v8270_v22  ;;  %3701 = vmatpush1.bf16.msra.mxu0 %v8270_v22 }
 0xa76   : > { %4016 = vmatprep.subr.bf16.mxu1 %v8003_v8 }
 0xa78   : > { %6511 = vmatmul.mubr.msk.bf16.vlgmr.msra.gmra.mrb[12].mxu1 %vm1553_vm14, %v6741_v59 }
 0xa79   : > { %4017 = vmatpush1.bf16.msra.mxu1 %v8000_v60  ;;  %4048 = vmatprep.mubr.bf16.mxu1 %v6518_v51  ;;  %v6517_v51 = vcombine.low %v3915_v20, %v3915_v20 }
 0xa7a   : > { %4018 = vmatprep.subr.bf16.mxu1 %v8008_v21 }
 0xa7d   : > { %4019 = vmatpush1.bf16.msra.mxu1 %v8015_v3 }
 0xa7e   : > { %4020 = vmatprep.subr.bf16.mxu1 %v8020_v56 }
 0xa81   : > { %4021 = vmatpush1.bf16.msra.mxu1 %v8025_v31  ;;  %v3306_v39 = vpop.permute.xlu0 %3305 }
 0xa82   : > { %4022 = vmatprep.subr.bf16.mxu1 %v8030_v7 }
 0xa85   : > { %4023 = vmatpush1.bf16.msra.mxu1 %v8033_v10 }
 0xa86   : > { %4024 = vmatprep.subr.bf16.mxu1 %v7932_v5 }
 0xa89   : > { %4025 = vmatpush1.bf16.msra.mxu1 %v7928_v46 }
 0xa8a   : > { %4026 = vmatprep.subr.bf16.mxu1 %v8047_v42 }
 0xa8d   : > { %4027 = vmatpush1.bf16.msra.mxu1 %v8044_v54 }
 0xa8e   : > { %4028 = vmatprep.subr.bf16.mxu1 %v8054_v55 }
 0xa91   : > { %4029 = vmatpush1.bf16.msra.mxu1 %v8059_v45 }
 0xa92   : > { %4030 = vmatprep.subr.bf16.mxu1 %v8064_v53 }
 0xa95   : > { %4031 = vmatpush1.bf16.msra.mxu1 %v8067_v9 }
 0xa96   : > { %4032 = vmatprep.subr.bf16.mxu1 %v8074_v57 }
 0xa99   : > { %4033 = vmatpush1.bf16.msra.mxu1 %v8079_v23 }
 0xa9a   : > { %4034 = vmatprep.subr.bf16.mxu1 %v8183_v37 }
 0xa9d   : > { %4035 = vmatpush1.bf16.msra.mxu1 %v8186_v0 }
 0xa9e   : > { %4036 = vmatprep.subr.bf16.mxu1 %v8191_v41 }
 0xaa1   : > { %4037 = vmatpush1.bf16.msra.mxu1 %v8198_v6 }
 0xaa2   : > { %4038 = vmatprep.subr.bf16.mxu1 %v8203_v29 }
 0xaa5   : > { %4039 = vmatpush1.bf16.msra.mxu1 %v8206_v50 }
 0xaa6   : > { %4040 = vmatprep.subr.bf16.mxu1 %v8213_v19 }
 0xaa9   : > { %4041 = vmatpush1.bf16.msra.mxu1 %v8218_v2 }
 0xaaa   : > { %4042 = vmatprep.subr.bf16.mxu1 %v8107_v27 }
 0xaad   : > { %4043 = vmatpush1.bf16.msra.mxu1 %v8103_v16 }
 0xaae   : > { %4044 = vmatprep.subr.bf16.mxu1 %v8227_v62 }
 0xab1   : > { %4045 = vmatpush1.bf16.msra.mxu1 %v8232_v47 }
 0xab2   : > { %4046 = vmatprep.subr.bf16.mxu1 %v8235_v52 }
 0xab5   : > { %4047 = vmatpush1.bf16.msra.mxu1 %v8242_v14 }
 0xab6   : > { %4057 = vmatprep.subr.bf16.mxu1 %v8251_v34 }
 0xab8   : > { %4049 = vmatmul.mubr.bf16.vlgmr.msra.gmra.mrb[16].mxu1 %v6517_v51 }
 0xab9   : > { %4058 = vmatpush1.bf16.msra.mxu1 %v8254_v18 }
 0xaba   : > { %4059 = vmatprep.subr.bf16.mxu1 %v8264_v12 }
 0xabd   : > { %4060 = vmatpush1.bf16.msra.mxu1 %v8270_v22 }
 0xb4b   : > { %v3396_v63 = vpop.f32.mrb[12].mxu1 }
 0xb4c   : > { %v6569_v61 = vadd.f32 %v3396_v63, %v3306_v39  ;;  %v3398_v59 = vpop.f32.mrb[13].mxu1 }
 0xb4d   : > { %v6570_v58 = vadd.f32 %v3398_v59, %v3306_v39  ;;  %v3400_v11 = vpop.f32.mrb[14].mxu1  ;;  %v8353_v59 = vmul.bf16 %v8260_v40, %v9741_v15 }
 0xb4e   : > { %vm3403_vm13 = vcmp.ge.f32.partialorder %v6569_v61, 0.0  ;;  %v3405_v1 = vmul.f32 0.2, %v6569_v61  ;;  %v3401_v20 = vpop.f32.mrb[15].mxu1 }
 0xb4f   : > { %vm3404_vm15 = vcmp.ge.f32.partialorder %v6570_v58, 0.0  ;;  %v3406_v14 = vmul.f32 0.2, %v6570_v58  ;;  %9757 = vst [vmem:[#allocation44_spill] sm:$0xff] %v8353_v59 }
 0xb50   : > { %v3407_v52 = vsel %vm3403_vm13, %v6569_v61, %v3405_v1  ;;  %v8349_v61 = vmul.bf16 %v8260_v40, %v9740_v13 }
 0xb51   : > { %v3409_v34 = vpack.c.bf16 %v3407_v52, %v3407_v52  ;;  %v3408_v51 = vsel %vm3404_vm15, %v6570_v58, %v3406_v14 }
 0xb52   : > { %v3410_v47 = vpack.c.bf16 %v3408_v51, %v3408_v51 }
 0xb53   : > { %3411 = vst [vmem:[#allocation2 + $0x8] sm:$0xf] %v3409_v34  ;;  %v8340_v34 = vmul.bf16 %v8260_v40, %v9739_v24 }
 0xb54   : > { %3412 = vst [vmem:[#allocation2 + $0x10] sm:$0xf] %v3410_v47 }
 0xb5a   : > { %v8312_v12 = vld [vmem:[#allocation2 + $0x8] sm:$0xff] }
 0xb5b   : > { %3442 = vrot.lane.b32.xlu0 %v8312_v12, %s9653_s15  ;;  %v8316_v63 = vld [vmem:[#allocation2 + $0x10] sm:$0xff]  ;;  %v3417_v1 = vmul.bf16 %v8312_v12, %v7071_v28  ;;  %v3477_v58 = vmul.bf16 %v8312_v12, %v7094_v35  ;;  %v3456_v47 = vmul.bf16 %v8312_v12, %v7099_v36  ;;  %v3501_v14 = vmul.bf16 %v8312_v12, %v7103_v38 }
 0xb5c   : > { %3444 = vrot.lane.b32.xlu1 %v8316_v63, %s9653_s15  ;;  %v3418_v11 = vmul.bf16 %v8316_v63, %v7064_v26  ;;  %v3457_v52 = vmul.bf16 %v8316_v63, %v7062_v25  ;;  %v3478_v39 = vmul.bf16 %v8316_v63, %v7078_v30  ;;  %v3522_v20 = vmul.bf16 %v8312_v12, %v9730_v49 }
 0xb5d   : > { %v3502_v51 = vmul.bf16 %v8316_v63, %v9731_v4 }
 0xb5f   : > { %3426 = vrot.lane.b32.xlu0 %v3418_v11, %s9661_s11  ;;  %v3523_v11 = vmul.bf16 %v8316_v63, %v9732_v33 }
 0xb60   : > { %3424 = vrot.lane.b32.xlu1 %v3417_v1, %s9661_s11  ;;  %v8371_v1 = vld [vmem:[%s9748_s18 + $0x8] sm:$0xff] }
 0xb63   : > { %3484 = vrot.lane.b32.xlu0 %v3477_v58, %s9630_s7  ;;  %v6515_v58 = vcombine.high %v8371_v1, %v8371_v1 }
 0xb64   : > { %3463 = vrot.lane.b32.xlu1 %v3456_v47, %s9655_s10  ;;  %v3562_v47 = vmul.bf16 %v8316_v63, %v9733_v17 }
 0xb65   : > { %6516 = vmatprep.mubr.msk.bf16.mxu0 %vm1890_vm1, %v6515_v58 }
 0xb67   : > { %3465 = vrot.lane.b32.xlu0 %v3457_v52, %s9655_s10  ;;  %v8384_v52 = vmul.bf16 %v8260_v40, %v9742_v48 }
 0xb68   : > { %3507 = vrot.lane.b32.xlu1 %v3501_v14, %s9664_s2  ;;  %v3561_v14 = vmul.bf16 %v8312_v12, %v9735_v43 }
 0xb69   : > { %9759 = vst [vmem:[#allocation45_spill] sm:$0xff] %v8384_v52 }
 0xb6b   : > { %3482 = vrot.lane.b32.xlu0 %v8340_v34, %s9630_s7 }
 0xb6c   : > { %3486 = vrot.lane.b32.xlu1 %v3478_v39, %s9630_s7  ;;  %s9758_s7 = sld [smem:[#allocation10_spill]] }
 0xb6f   : > { %3511 = vrot.lane.b32.xlu0 %v8349_v61, %s9664_s2 }
 0xb70   : > { %3532 = vrot.lane.b32.xlu1 %v8353_v59, %s9657_s28 }
 0xb72   : > { %v3635_v39 = vld [vmem:[%s9758_s7] sm:$0xff]  ;;  %s9761_s7 = sld [smem:[#allocation13_spill]] }
 0xb73   : > { %3528 = vrot.lane.b32.xlu0 %v3522_v20, %s9657_s28  ;;  %v8399_v20 = vmul.bf16 %v8260_v40, %v9743_v44 }
 0xb74   : > { %3509 = vrot.lane.b32.xlu1 %v3502_v51, %s9664_s2  ;;  %v3423_v51 = vpop.permute.xlu1 %3422 }
 0xb75   : > { %9760 = vst [vmem:[#allocation46_spill] sm:$0xff] %v8399_v20 }
 0xb77   : > { %3530 = vrot.lane.b32.xlu0 %v3523_v11, %s9657_s28  ;;  %v3441_v11 = vpop.permute.xlu0 %3440 }
 0xb78   : > { %3548 = vrot.lane.b32.xlu1 %v8316_v63, %s9659_s16  ;;  %v3462_v58 = vpop.permute.xlu1 %3461  ;;  %v6748_v59 = vld [vmem:[%s9761_s7 + $0x4] ss:$24 sps:$4 sm:$0xff]  }
 0xb7b   : > { %3550 = vrot.lane.b32.xlu0 %v8260_v40, %s9659_s16 }
 0xb7c   : > { %3546 = vrot.lane.b32.xlu1 %v8312_v12, %s9659_s16 }
 0xb7f   : > { %3569 = vrot.lane.b32.xlu0 %v3562_v47, %s9651_s1 }
 0xb80   : > { %3571 = vrot.lane.b32.xlu1 %v8384_v52, %s9651_s1 }
 0xb83   : > { %3567 = vrot.lane.b32.xlu0 %v3561_v14, %s9651_s1  ;;  %s9767_s1 = smov 1  }
 0xb84   : > { %3638 = vperm.xlu1 %6711, %v3635_v39  }
 0xb87   : > { %3758 = vrot.lane.b32.xlu0 %v7773_v32, %s9661_s11 }
 0xb88   : > { %3776 = vrot.lane.b32.xlu1 %v8260_v40, %s9653_s15 }
 0xb8b   : > { %3797 = vrot.lane.b32.xlu0 %v8399_v20, %s9655_s10 }
 0xbcd   : > { %v3443_v47 = vpop.permute.xlu0 %3442 }
 0xbce   : > { %v3445_v48 = vpop.permute.xlu1 %3444 }
 0xbcf   : > { %v8414_v24 = vsel %vm1066_vm10, %v3443_v47, %v3445_v48 }
 0xbd1   : > { %v3427_v14 = vpop.permute.xlu0 %3426 }
 0xbd2   : > { %v3425_v39 = vpop.permute.xlu1 %3424 }
 0xbd3   : > { %v8404_v15 = vsel %vm1047_vm9, %v3425_v39, %v3427_v14  ;;  %v8407_v13 = vsel %vm1047_vm9, %v3423_v51, %v3425_v39  ;;  %v8419_v51 = vsel %vm1066_vm10, %v3441_v11, %v3443_v47 }
 0xbd4   : > { %3702 = vmatprep.subr.bf16.mxu0 %v8404_v15  ;;  %4061 = vmatprep.subr.bf16.mxu1 %v8404_v15 }
 0xbd5   : > { %3703 = vmatpush1.bf16.msra.mxu0 %v8407_v13  ;;  %4062 = vmatpush1.bf16.msra.mxu1 %v8407_v13  ;;  %v3485_v44 = vpop.permute.xlu0 %3484 }
 0xbd6   : > { %v3464_v20 = vpop.permute.xlu1 %3463  ;;  %3704 = vmatprep.subr.bf16.mxu0 %v8414_v24  ;;  %4063 = vmatprep.subr.bf16.mxu1 %v8414_v24 }
 0xbd7   : > { %v8429_v48 = vsel %vm1099_vm7, %v3462_v58, %v3464_v20 }
 0xbd9   : > { %3705 = vmatpush1.bf16.msra.mxu0 %v8419_v51  ;;  %4064 = vmatpush1.bf16.msra.mxu1 %v8419_v51  ;;  %v3466_v14 = vpop.permute.xlu0 %3465 }
 0xbda   : > { %v3508_v39 = vpop.permute.xlu1 %3507  ;;  %v8424_v32 = vsel %vm1099_vm7, %v3464_v20, %v3466_v14 }
 0xbdb   : > { %3706 = vmatprep.subr.bf16.mxu0 %v8424_v32  ;;  %4065 = vmatprep.subr.bf16.mxu1 %v8424_v32 }
 0xbdd   : > { %3707 = vmatpush1.bf16.msra.mxu0 %v8429_v48  ;;  %4066 = vmatpush1.bf16.msra.mxu1 %v8429_v48  ;;  %v3483_v11 = vpop.permute.xlu0 %3482 }
 0xbde   : > { %v3487_v47 = vpop.permute.xlu1 %3486  ;;  %v8437_v52 = vsel %vm1130_vm8, %v3483_v11, %v3485_v44 }
 0xbdf   : > { %v8434_v43 = vsel %vm1130_vm8, %v3485_v44, %v3487_v47 }
 0xbe0   : > { %3708 = vmatprep.subr.bf16.mxu0 %v8434_v43  ;;  %4067 = vmatprep.subr.bf16.mxu1 %v8434_v43 }
 0xbe1   : > { %3709 = vmatpush1.bf16.msra.mxu0 %v8437_v52  ;;  %4068 = vmatpush1.bf16.msra.mxu1 %v8437_v52  ;;  %v3512_v20 = vpop.permute.xlu0 %3511 }
 0xbe2   : > { %v3533_v58 = vpop.permute.xlu1 %3532  ;;  %3710 = vmatprep.subr.bf16.mxu0 %v8316_v63  ;;  %4069 = vmatprep.subr.bf16.mxu1 %v8316_v63 }
 0xbe5   : > { %3711 = vmatpush1.bf16.msra.mxu0 %v8312_v12  ;;  %4070 = vmatpush1.bf16.msra.mxu1 %v8312_v12  ;;  %v3529_v44 = vpop.permute.xlu0 %3528 }
 0xbe6   : > { %v3510_v14 = vpop.permute.xlu1 %3509 }
 0xbe7   : > { %v8448_v11 = vsel %vm1113_vm5, %v3510_v14, %v3512_v20  ;;  %v8451_v47 = vsel %vm1113_vm5, %v3508_v39, %v3510_v14 }
 0xbe8   : > { %3712 = vmatprep.subr.bf16.mxu0 %v8448_v11  ;;  %4071 = vmatprep.subr.bf16.mxu1 %v8448_v11 }
 0xbe9   : > { %3713 = vmatpush1.bf16.msra.mxu0 %v8451_v47  ;;  %4072 = vmatpush1.bf16.msra.mxu1 %v8451_v47  ;;  %v3531_v17 = vpop.permute.xlu0 %3530 }
 0xbea   : > { %v3549_v40 = vpop.permute.xlu1 %3548  ;;  %v8458_v33 = vsel %vm1082_vm6, %v3531_v17, %v3533_v58  ;;  %v8463_v39 = vsel %vm1082_vm6, %v3529_v44, %v3531_v17 }
 0xbeb   : > { %3714 = vmatprep.subr.bf16.mxu0 %v8458_v33  ;;  %4073 = vmatprep.subr.bf16.mxu1 %v8458_v33 }
 0xbed   : > { %3715 = vmatpush1.bf16.msra.mxu0 %v8463_v39  ;;  %4074 = vmatpush1.bf16.msra.mxu1 %v8463_v39  ;;  %v3551_v20 = vpop.permute.xlu0 %3550 }
 0xbee   : > { %v3547_v14 = vpop.permute.xlu1 %3546  ;;  %v8468_v4 = vsel %vm1211_vm11, %v3549_v40, %v3551_v20 }
 0xbef   : > { %v8471_v58 = vsel %vm1211_vm11, %v3547_v14, %v3549_v40  ;;  %3716 = vmatprep.subr.bf16.mxu0 %v8468_v4  ;;  %4075 = vmatprep.subr.bf16.mxu1 %v8468_v4  ;;  %v6514_v14 = vcombine.low %v8371_v1, %v8371_v1  ;;  %v9777_v1 = vld [vmem:[#allocation33_spill] sm:$0xff] }
 0xbf1   : > { %3717 = vmatpush1.bf16.msra.mxu0 %v8471_v58  ;;  %4076 = vmatpush1.bf16.msra.mxu1 %v8471_v58  ;;  %v3570_v17 = vpop.permute.xlu0 %3569 }
 0xbf2   : > { %v3572_v44 = vpop.permute.xlu1 %3571 }
 0xbf3   : > { %v8478_v49 = vsel %vm1030_vm4, %v3570_v17, %v3572_v44 }
 0xbf4   : > { %3718 = vmatprep.subr.bf16.mxu0 %v8478_v49  ;;  %4077 = vmatprep.subr.bf16.mxu1 %v8478_v49 }
 0xbf5   : > { %v3568_v20 = vpop.permute.xlu0 %3567 }
 0xbf6   : > { %v3573_v40 = vsel %vm1030_vm4, %v3568_v20, %v3570_v17 }
 0xbf7   : > { %3719 = vmatpush1.bf16.msra.mxu0 %v3573_v40  ;;  %4078 = vmatpush1.bf16.msra.mxu1 %v3573_v40 }
 0xbf8   : > { %4455 = vmatprep.subr.bf16.mxu0 %v8003_v8  ;;  %v9764_v8 = vld [vmem:[#allocation24_spill] sm:$0xff] }
 0xbfa   : > { %3731 = vmatmul.mubr.bf16.vlgmr.msra.gmra.mrb[12].mxu0 %v6514_v14 }
 0xbfb   : > { %4456 = vmatpush1.bf16.msra.mxu0 %v8000_v60  ;;  %4487 = vmatprep.mubr.bf16.mxu0 %v6748_v59  ;;  %v6746_v60 = vld [vmem:[%s9761_s7] ss:$24 sps:$4 sm:$0xff]  }
 0xbfc   : > { %4457 = vmatprep.subr.bf16.mxu0 %v8008_v21  ;;  %v9765_v21 = vld [vmem:[#allocation41_spill] sm:$0xff] }
 0xbfd   : > { %v9776_v59 = vld [vmem:[#allocation45_spill] sm:$0xff] }
 0xbff   : > { %4458 = vmatpush1.bf16.msra.mxu0 %v8015_v3  ;;  %v9766_v3 = vld [vmem:[#allocation43_spill] sm:$0xff] }
 0xc00   : > { %4459 = vmatprep.subr.bf16.mxu0 %v8020_v56 }
 0xc03   : > { %4460 = vmatpush1.bf16.msra.mxu0 %v8025_v31 }
 0xc04   : > { %4461 = vmatprep.subr.bf16.mxu0 %v8030_v7 }
 0xc07   : > { %4462 = vmatpush1.bf16.msra.mxu0 %v8033_v10 }
 0xc08   : > { %4463 = vmatprep.subr.bf16.mxu0 %v7932_v5  ;;  %v9763_v5 = vld [vmem:[#allocation35_spill] sm:$0xff] }
 0xc0b   : > { %4464 = vmatpush1.bf16.msra.mxu0 %v7928_v46  ;;  %v9762_v46 = vld [vmem:[#allocation29_spill] sm:$0xff] }
 0xc0c   : > { %4465 = vmatprep.subr.bf16.mxu0 %v8047_v42 }
 0xc0f   : > { %4466 = vmatpush1.bf16.msra.mxu0 %v8044_v54 }
 0xc10   : > { %4467 = vmatprep.subr.bf16.mxu0 %v8054_v55 }
 0xc13   : > { %4468 = vmatpush1.bf16.msra.mxu0 %v8059_v45 }
 0xc14   : > { %4469 = vmatprep.subr.bf16.mxu0 %v8064_v53 }
 0xc17   : > { %4470 = vmatpush1.bf16.msra.mxu0 %v8067_v9 }
 0xc18   : > { %4471 = vmatprep.subr.bf16.mxu0 %v8074_v57 }
 0xc1b   : > { %4472 = vmatpush1.bf16.msra.mxu0 %v8079_v23 }
 0xc1c   : > { %4473 = vmatprep.subr.bf16.mxu0 %v8183_v37 }
 0xc1f   : > { %4474 = vmatpush1.bf16.msra.mxu0 %v8186_v0  ;;  %v6753_v0 = vld [vmem:[%s9761_s7 + $0xc] ss:$24 sps:$4 sm:$0xff]  }
 0xc20   : > { %4475 = vmatprep.subr.bf16.mxu0 %v8191_v41 }
 0xc23   : > { %4476 = vmatpush1.bf16.msra.mxu0 %v8198_v6  ;;  %v9769_v6 = vld [vmem:[#allocation44_spill] sm:$0xff] }
 0xc24   : > { %4477 = vmatprep.subr.bf16.mxu0 %v8203_v29  ;;  %v9770_v29 = vld [vmem:[#allocation28_spill] sm:$0xff] }
 0xc27   : > { %4478 = vmatpush1.bf16.msra.mxu0 %v8206_v50 }
 0xc28   : > { %4479 = vmatprep.subr.bf16.mxu0 %v8213_v19  ;;  %v9771_v19 = vld [vmem:[#allocation31_spill] sm:$0xff] }
 0xc2b   : > { %4480 = vmatpush1.bf16.msra.mxu0 %v8218_v2 }
 0xc2c   : > { %4481 = vmatprep.subr.bf16.mxu0 %v8107_v27  ;;  %v8565_v27 = vld [vmem:[%s9754_s0 + $0x8] sm:$0xff] }
 0xc2d   : > { %v6520_v37 = vcombine.high %v8565_v27, %v8565_v27 }
 0xc2f   : > { %4482 = vmatpush1.bf16.msra.mxu0 %v8103_v16  ;;  %4089 = vmatprep.mubr.bf16.mxu1 %v6520_v37 }
 0xc30   : > { %4483 = vmatprep.subr.bf16.mxu0 %v8227_v62  ;;  %v9772_v62 = vld [vmem:[#allocation30_spill] sm:$0xff] }
 0xc33   : > { %4484 = vmatpush1.bf16.msra.mxu0 %v9762_v46 }
 0xc34   : > { %4485 = vmatprep.subr.bf16.mxu0 %v9763_v5 }
 0xc37   : > { %4486 = vmatpush1.bf16.msra.mxu0 %v9764_v8 }
 0xc38   : > { %4498 = vmatprep.subr.bf16.mxu0 %v9765_v21 }
 0xc3a   : > { %4488 = vmatmul.mubr.bf16.vlgmr.msra.gmra.mrb[16].mxu0 %v6746_v60 }
 0xc3b   : > { %4499 = vmatpush1.bf16.msra.mxu0 %v8254_v18  ;;  %4530 = vmatprep.mubr.bf16.mxu0 %v6753_v0 }
 0xc3c   : > { %4500 = vmatprep.subr.bf16.mxu0 %v9766_v3 }
 0xc3f   : > { %4501 = vmatpush1.bf16.msra.mxu0 %v8270_v22  ;;  %v9774_v22 = vld [vmem:[#allocation34_spill] sm:$0xff] }
 0xc40   : > { %4502 = vmatprep.subr.bf16.mxu0 %v8404_v15 }
 0xc43   : > { %4503 = vmatpush1.bf16.msra.mxu0 %v8407_v13 }
 0xc44   : > { %4504 = vmatprep.subr.bf16.mxu0 %v8414_v24 }
 0xc47   : > { %4505 = vmatpush1.bf16.msra.mxu0 %v8419_v51 }
 0xc48   : > { %4506 = vmatprep.subr.bf16.mxu0 %v8424_v32 }
 0xc4b   : > { %4507 = vmatpush1.bf16.msra.mxu0 %v8429_v48  ;;  %v9778_v48 = vld [vmem:[#allocation36_spill] sm:$0xff] }
 0xc4c   : > { %4508 = vmatprep.subr.bf16.mxu0 %v8434_v43  ;;  %v3639_v43 = vpop.permute.xlu1 %3638 }
 0xc4f   : > { %4509 = vmatpush1.bf16.msra.mxu0 %v8437_v52 }
 0xc50   : > { %4510 = vmatprep.subr.bf16.mxu0 %v8316_v63 }
 0xc53   : > { %4511 = vmatpush1.bf16.msra.mxu0 %v8312_v12  ;;  %v9773_v12 = vld [vmem:[#allocation42_spill] sm:$0xff] }
 0xc54   : > { %4512 = vmatprep.subr.bf16.mxu0 %v8448_v11  ;;  %v9781_v11 = vld [vmem:[#allocation46_spill] sm:$0xff] }
 0xc57   : > { %4513 = vmatpush1.bf16.msra.mxu0 %v8451_v47  ;;  %v3759_v47 = vpop.permute.xlu0 %3758 }
 0xc58   : > { %4514 = vmatprep.subr.bf16.mxu0 %v8458_v33 }
 0xc5b   : > { %4515 = vmatpush1.bf16.msra.mxu0 %v8463_v39  ;;  %v3777_v39 = vpop.permute.xlu1 %3776 }
 0xc5c   : > { %4516 = vmatprep.subr.bf16.mxu0 %v8468_v4 }
 0xc5f   : > { %4517 = vmatpush1.bf16.msra.mxu0 %v8471_v58  ;;  %v3798_v58 = vpop.permute.xlu0 %3797 }
 0xc60   : > { %4518 = vmatprep.subr.bf16.mxu0 %v8478_v49 }
 0xc63   : > { %4519 = vmatpush1.bf16.msra.mxu0 %v3573_v40 }
 0xccd   : > { %v3732_v32 = vpop.f32.mrb[12].mxu0 }
 0xcce   : > { %v6571_v24 = vadd.f32 %v3732_v32, %v3639_v43  ;;  %v3734_v13 = vpop.f32.mrb[13].mxu0 }
 0xccf   : > { %v6572_v15 = vadd.f32 %v3734_v13, %v3639_v43  ;;  %v3736_v56 = vpop.f32.mrb[14].mxu0 }
 0xcd0   : > { %vm3739_vm2 = vcmp.ge.f32.partialorder %v6571_v24, 0.0  ;;  %v3741_v31 = vmul.f32 0.2, %v6571_v24  ;;  %v3737_v7 = vpop.f32.mrb[15].mxu0 }
 0xcd1   : > { %vm3740_vm3 = vcmp.ge.f32.partialorder %v6572_v15, 0.0  ;;  %v3742_v33 = vmul.f32 0.2, %v6572_v15 }
 0xcd2   : > { %v3743_v10 = vsel %vm3739_vm2, %v6571_v24, %v3741_v31 }
 0xcd3   : > { %v3745_v54 = vpack.c.bf16 %v3743_v10, %v3743_v10  ;;  %v3744_v42 = vsel %vm3740_vm3, %v6572_v15, %v3742_v33 }
 0xcd4   : > { %v3746_v4 = vpack.c.bf16 %v3744_v42, %v3744_v42  ;;  %v6751_v42 = vld [vmem:[%s9761_s7 + $0x8] ss:$24 sps:$4 sm:$0xff]  }
 0xcd5   : > { %3747 = vst [vmem:[#allocation2 + $0x8] sm:$0xf] %v3745_v54  ;;  %v6519_v54 = vcombine.low %v8565_v27, %v8565_v27 }
 0xcd6   : > { %3748 = vst [vmem:[#allocation2 + $0x10] sm:$0xf] %v3746_v4 }
 0xcdc   : > { %v8540_v49 = vld [vmem:[#allocation2 + $0x8] sm:$0xff] }
 0xcdd   : > { %3778 = vrot.lane.b32.xlu1 %v8540_v49, %s9653_s15  ;;  %v8544_v55 = vld [vmem:[#allocation2 + $0x10] sm:$0xff]  ;;  %v3753_v53 = vmul.bf16 %v8540_v49, %v7071_v28  ;;  %v3813_v9 = vmul.bf16 %v8540_v49, %v7094_v35  ;;  %v3792_v57 = vmul.bf16 %v8540_v49, %v7099_v36  ;;  %v3837_v16 = vmul.bf16 %v8540_v49, %v7103_v38 }
 0xcde   : > { %3780 = vrot.lane.b32.xlu0 %v8544_v55, %s9653_s15  ;;  %v3754_v45 = vmul.bf16 %v8544_v55, %v7064_v26  ;;  %v3793_v23 = vmul.bf16 %v8544_v55, %v7062_v25  ;;  %v3814_v41 = vmul.bf16 %v8544_v55, %v7078_v30  ;;  %s9768_s15 = sld [smem:[#allocation12_spill]]  ;;  %v3858_v50 = vmul.bf16 %v8540_v49, %v9770_v29 }
 0xcdf   : > { %v3838_v2 = vmul.bf16 %v8544_v55, %v9771_v19  ;;  %v3859_v18 = vmul.bf16 %v8544_v55, %v9772_v62  ;;  %v3898_v63 = vmul.bf16 %v8544_v55, %v9774_v22  ;;  %v3897_v52 = vmul.bf16 %v8540_v49, %v9777_v1 }
 0xce1   : > { %3762 = vrot.lane.b32.xlu1 %v3754_v45, %s9661_s11 }
 0xce2   : > { %3760 = vrot.lane.b32.xlu0 %v3753_v53, %s9661_s11 }
 0xce4   : > { %v3990_v51 = vld [vmem:[%s9768_s15] sm:$0xff]  ;;  %s9782_s15 = smov 113  }
 0xce5   : > { %3820 = vrot.lane.b32.xlu1 %v3813_v9, %s9767_s1 }
 0xce6   : > { %3799 = vrot.lane.b32.xlu0 %v3792_v57, %s9655_s10 }
 0xce9   : > { %3801 = vrot.lane.b32.xlu1 %v3793_v23, %s9655_s10  ;;  %s9775_s10 = smov 111  }
 0xcea   : > { %3843 = vrot.lane.b32.xlu0 %v3837_v16, %s9664_s2 }
 0xced   : > { %3818 = vrot.lane.b32.xlu1 %v8340_v34, %s9767_s1 }
 0xcee   : > { %3822 = vrot.lane.b32.xlu0 %v3814_v41, %s9767_s1 }
 0xcf1   : > { %3847 = vrot.lane.b32.xlu1 %v8349_v61, %s9664_s2 }
 0xcf2   : > { %3868 = vrot.lane.b32.xlu0 %v9769_v6, %s9657_s28 }
 0xcf5   : > { %3864 = vrot.lane.b32.xlu1 %v3858_v50, %s9657_s28 }
 0xcf6   : > { %3845 = vrot.lane.b32.xlu0 %v3838_v2, %s9664_s2 }
 0xcf9   : > { %3866 = vrot.lane.b32.xlu1 %v3859_v18, %s9657_s28  ;;  %s9779_s28 = smov 16  }
 0xcfa   : > { %3884 = vrot.lane.b32.xlu0 %v8544_v55, %s9659_s16 }
 0xcfd   : > { %3886 = vrot.lane.b32.xlu1 %v9773_v12, %s9659_s16 }
 0xcfe   : > { %3882 = vrot.lane.b32.xlu0 %v8540_v49, %s9659_s16  ;;  %s9780_s16 = smov 15  }
 0xd01   : > { %3905 = vrot.lane.b32.xlu1 %v3898_v63, %s9775_s10  ;;  %v6754_v63 = vld [vmem:[%s9754_s0 + $0x10] ss:$0 sps:$4 sm:$0xff]   ;;  %s9784_s0 = smov 112  }
 0xd02   : > { %3907 = vrot.lane.b32.xlu0 %v9776_v59, %s9775_s10 }
 0xd05   : > { %3903 = vrot.lane.b32.xlu1 %v3897_v52, %s9775_s10 }
 0xd06   : > { %3993 = vperm.xlu0 %6710, %v3990_v51  }
 0xd09   : > { %4158 = vrot.lane.b32.xlu1 %v9778_v48, %s9661_s11 }
 0xd0a   : > { %4176 = vrot.lane.b32.xlu0 %v9773_v12, %s9779_s28 }
 0xd0d   : > { %4197 = vrot.lane.b32.xlu1 %v9781_v11, %s9780_s16 }
 0xd4f   : > { %v3779_v17 = vpop.permute.xlu1 %3778 }
 0xd50   : > { %v3781_v44 = vpop.permute.xlu0 %3780  ;;  %v3782_v21 = vsel %vm1066_vm10, %v3777_v39, %v3779_v17 }
 0xd51   : > { %v3783_v60 = vsel %vm1066_vm10, %v3779_v17, %v3781_v44 }
 0xd53   : > { %v3763_v20 = vpop.permute.xlu1 %3762 }
 0xd54   : > { %v3761_v40 = vpop.permute.xlu0 %3760 }
 0xd55   : > { %v3765_v14 = vsel %vm1047_vm9, %v3761_v40, %v3763_v20  ;;  %v3764_v46 = vsel %vm1047_vm9, %v3759_v47, %v3761_v40 }
 0xd56   : > { %4079 = vmatprep.subr.bf16.mxu1 %v3765_v14  ;;  %4520 = vmatprep.subr.bf16.mxu0 %v3765_v14 }
 0xd57   : > { %v3821_v5 = vpop.permute.xlu1 %3820  ;;  %4080 = vmatpush1.bf16.msra.mxu1 %v3764_v46  ;;  %4521 = vmatpush1.bf16.msra.mxu0 %v3764_v46 }
 0xd58   : > { %4081 = vmatprep.subr.bf16.mxu1 %v3783_v60  ;;  %4522 = vmatprep.subr.bf16.mxu0 %v3783_v60  ;;  %v3800_v8 = vpop.permute.xlu0 %3799 }
 0xd59   : > { %v3803_v24 = vsel %vm1099_vm7, %v3798_v58, %v3800_v8 }
 0xd5b   : > { %v3802_v3 = vpop.permute.xlu1 %3801  ;;  %4082 = vmatpush1.bf16.msra.mxu1 %v3782_v21  ;;  %4523 = vmatpush1.bf16.msra.mxu0 %v3782_v21 }
 0xd5c   : > { %v3844_v43 = vpop.permute.xlu0 %3843  ;;  %v3804_v32 = vsel %vm1099_vm7, %v3800_v8, %v3802_v3 }
 0xd5d   : > { %4083 = vmatprep.subr.bf16.mxu1 %v3804_v32  ;;  %4524 = vmatprep.subr.bf16.mxu0 %v3804_v32 }
 0xd5f   : > { %v3819_v13 = vpop.permute.xlu1 %3818  ;;  %4084 = vmatpush1.bf16.msra.mxu1 %v3803_v24  ;;  %4525 = vmatpush1.bf16.msra.mxu0 %v3803_v24 }
 0xd60   : > { %v3823_v15 = vpop.permute.xlu0 %3822  ;;  %v3824_v31 = vsel %vm1130_vm8, %v3819_v13, %v3821_v5 }
 0xd61   : > { %v3825_v56 = vsel %vm1130_vm8, %v3821_v5, %v3823_v15 }
 0xd62   : > { %4085 = vmatprep.subr.bf16.mxu1 %v3825_v56  ;;  %4526 = vmatprep.subr.bf16.mxu0 %v3825_v56 }
 0xd63   : > { %v3848_v7 = vpop.permute.xlu1 %3847  ;;  %4086 = vmatpush1.bf16.msra.mxu1 %v3824_v31  ;;  %4527 = vmatpush1.bf16.msra.mxu0 %v3824_v31 }
 0xd64   : > { %4087 = vmatprep.subr.bf16.mxu1 %v8544_v55  ;;  %4528 = vmatprep.subr.bf16.mxu0 %v8544_v55  ;;  %v3869_v33 = vpop.permute.xlu0 %3868 }
 0xd67   : > { %v3865_v10 = vpop.permute.xlu1 %3864  ;;  %4088 = vmatpush1.bf16.msra.mxu1 %v8540_v49  ;;  %4529 = vmatpush1.bf16.msra.mxu0 %v8540_v49 }
 0xd68   : > { %v3846_v4 = vpop.permute.xlu0 %3845 }
 0xd69   : > { %v3850_v45 = vsel %vm1113_vm5, %v3846_v4, %v3848_v7  ;;  %v3849_v53 = vsel %vm1113_vm5, %v3844_v43, %v3846_v4 }
 0xd6a   : > { %4098 = vmatprep.subr.bf16.mxu1 %v3850_v45  ;;  %4541 = vmatprep.subr.bf16.mxu0 %v3850_v45 }
 0xd6b   : > { %v3867_v9 = vpop.permute.xlu1 %3866  ;;  %4090 = vmatmul.mubr.bf16.vlgmr.msra.gmra.mrb[16].mxu1 %v6519_v54  ;;  %4531 = vmatmul.mubr.bf16.vlgmr.msra.gmra.mrb[16].mxu0 %v6751_v42  ;;  %v9785_v54 = vld [vmem:[#allocation23_spill] sm:$0xff] }
 0xd6c   : > { %4099 = vmatpush1.bf16.msra.mxu1 %v3849_v53  ;;  %4542 = vmatpush1.bf16.msra.mxu0 %v3849_v53  ;;  %v3885_v55 = vpop.permute.xlu0 %3884  ;;  %v3871_v57 = vsel %vm1082_vm6, %v3867_v9, %v3869_v33  ;;  %v3870_v23 = vsel %vm1082_vm6, %v3865_v10, %v3867_v9  ;;  %v8701_v42 = vmul.bf16 %v9773_v12, %v9785_v54 }
 0xd6d   : > { %4100 = vmatprep.subr.bf16.mxu1 %v3871_v57  ;;  %4543 = vmatprep.subr.bf16.mxu0 %v3871_v57 }
 0xd6e   : > { %4130 = vmatprep.mubr.bf16.mxu1 %v9773_v12 }
 0xd6f   : > { %v3887_v49 = vpop.permute.xlu1 %3886 }
 0xd70   : > { %4101 = vmatpush1.bf16.msra.mxu1 %v3870_v23  ;;  %4544 = vmatpush1.bf16.msra.mxu0 %v3870_v23  ;;  %v3883_v16 = vpop.permute.xlu0 %3882  ;;  %v3889_v27 = vsel %vm1211_vm11, %v3885_v55, %v3887_v49 }
 0xd71   : > { %v3888_v37 = vsel %vm1211_vm11, %v3883_v16, %v3885_v55  ;;  %4102 = vmatprep.subr.bf16.mxu1 %v3889_v27  ;;  %4545 = vmatprep.subr.bf16.mxu0 %v3889_v27 }
 0xd73   : > { %v3906_v0 = vpop.permute.xlu1 %3905 }
 0xd74   : > { %4103 = vmatpush1.bf16.msra.mxu1 %v3888_v37  ;;  %4546 = vmatpush1.bf16.msra.mxu0 %v3888_v37  ;;  %v3908_v41 = vpop.permute.xlu0 %3907 }
 0xd75   : > { %v3910_v50 = vsel %vm1030_vm4, %v3906_v0, %v3908_v41 }
 0xd76   : > { %4104 = vmatprep.subr.bf16.mxu1 %v3910_v50  ;;  %4547 = vmatprep.subr.bf16.mxu0 %v3910_v50 }
 0xd77   : > { %v3904_v2 = vpop.permute.xlu1 %3903 }
 0xd78   : > { %v3909_v18 = vsel %vm1030_vm4, %v3904_v2, %v3906_v0 }
 0xd79   : > { %4105 = vmatpush1.bf16.msra.mxu1 %v3909_v18  ;;  %4548 = vmatpush1.bf16.msra.mxu0 %v3909_v18 }
 0xd7c   : > { %6522 = vmatmul.mubr.msk.bf16.vlgmr.msra.gmra.mrb[16].mxu1 %vm2250_vm12, %v6754_v63 }
 0xd85   : > { %v3994_v52 = vpop.permute.xlu0 %3993 }
 0xd89   : > { %v4177_v4 = vpop.permute.xlu0 %4176 }
 0xe4f   : > { %v4132_v51 = vpop.f32.mrb[16].mxu1 }
 0xe50   : > { %v6573_v48 = vadd.f32 %v4132_v51, %v3994_v52  ;;  %v4134_v47 = vpop.f32.mrb[17].mxu1 }
 0xe51   : > { %v6574_v39 = vadd.f32 %v4134_v47, %v3994_v52  ;;  %v4136_v58 = vpop.f32.mrb[18].mxu1 }
 0xe52   : > { %vm4139_vm13 = vcmp.ge.f32.partialorder %v6573_v48, 0.0  ;;  %v4141_v17 = vmul.f32 0.2, %v6573_v48  ;;  %v4137_v44 = vpop.f32.mrb[19].mxu1 }
 0xe53   : > { %vm4140_vm15 = vcmp.ge.f32.partialorder %v6574_v39, 0.0  ;;  %v4142_v20 = vmul.f32 0.2, %v6574_v39 }
 0xe54   : > { %v4143_v40 = vsel %vm4139_vm13, %v6573_v48, %v4141_v17 }
 0xe55   : > { %v4145_v14 = vpack.c.bf16 %v4143_v40, %v4143_v40  ;;  %v4144_v46 = vsel %vm4140_vm15, %v6574_v39, %v4142_v20 }
 0xe56   : > { %v4146_v5 = vpack.c.bf16 %v4144_v46, %v4144_v46 }
 0xe57   : > { %4147 = vst [vmem:[#allocation2 + $0x8] sm:$0xf] %v4145_v14 }
 0xe58   : > { %4148 = vst [vmem:[#allocation2 + $0x10] sm:$0xf] %v4146_v5 }
 0xe5e   : > { %v8637_v60 = vld [vmem:[#allocation2 + $0x8] sm:$0xff] }
 0xe5f   : > { %4178 = vrot.lane.b32.xlu0 %v8637_v60, %s9779_s28  ;;  %v8641_v8 = vld [vmem:[#allocation2 + $0x10] sm:$0xff]  ;;  %v4153_v3 = vmul.bf16 %v8637_v60, %v7071_v28  ;;  %v4213_v43 = vmul.bf16 %v8637_v60, %v7094_v35  ;;  %v4192_v32 = vmul.bf16 %v8637_v60, %v7099_v36  ;;  %v4237_v13 = vmul.bf16 %v8637_v60, %v7103_v38 }
 0xe60   : > { %4180 = vrot.lane.b32.xlu1 %v8641_v8, %s9779_s28  ;;  %v4154_v21 = vmul.bf16 %v8641_v8, %v7064_v26  ;;  %v4193_v24 = vmul.bf16 %v8641_v8, %v7062_v25  ;;  %v4214_v15 = vmul.bf16 %v8641_v8, %v7078_v30  ;;  %v4258_v56 = vmul.bf16 %v8637_v60, %v9770_v29 }
 0xe61   : > { %v4238_v31 = vmul.bf16 %v8641_v8, %v9771_v19  ;;  %v4297_v7 = vmul.bf16 %v8637_v60, %v9777_v1 }
 0xe63   : > { %4162 = vrot.lane.b32.xlu0 %v4154_v21, %s9661_s11 }
 0xe64   : > { %4160 = vrot.lane.b32.xlu1 %v4153_v3, %s9661_s11  ;;  %s9783_s11 = sld [smem:[#allocation14_spill]] }
 0xe67   : > { %4220 = vrot.lane.b32.xlu0 %v4213_v43, %s9767_s1 }
 0xe68   : > { %4199 = vrot.lane.b32.xlu1 %v4192_v32, %s9780_s16 }
 0xe6a   : > { %v4411_v33 = vld [vmem:[%s9783_s11] sm:$0xff]  ;;  %v4412_v10 = vld [vmem:[%s9783_s11 + $0x8] sm:$0xff] }
 0xe6b   : > { %4201 = vrot.lane.b32.xlu0 %v4193_v24, %s9780_s16 }
 0xe6c   : > { %4243 = vrot.lane.b32.xlu1 %v4237_v13, %s9664_s2  ;;  %v6757_v13 = vld [vmem:[%s9761_s7 + $0x10] ss:$24 sps:$4 sm:$0xff]  }
 0xe6f   : > { %4218 = vrot.lane.b32.xlu0 %v8340_v34, %s9767_s1  ;;  %v4259_v34 = vmul.bf16 %v8641_v8, %v9772_v62 }
 0xe70   : > { %4222 = vrot.lane.b32.xlu1 %v4214_v15, %s9767_s1 }
 0xe73   : > { %4247 = vrot.lane.b32.xlu0 %v8349_v61, %s9664_s2  ;;  %v6755_v61 = vld [vmem:[%s9761_s7 + $0x14] ss:$24 sps:$4 sm:$0xff]   ;;  %s9806_s7 = sld [smem:[#allocation18_spill]] }
 0xe74   : > { %4268 = vrot.lane.b32.xlu1 %v9769_v6, %s9782_s15  ;;  %6529 = vmatprep.mubr.msk.bf16.mxu0 %vm2690_vm0, %v6755_v61  ;;  %v4298_v6 = vmul.bf16 %v8641_v8, %v9774_v22 }
 0xe77   : > { %4264 = vrot.lane.b32.xlu0 %v4258_v56, %s9782_s15 }
 0xe78   : > { %4245 = vrot.lane.b32.xlu1 %v4238_v31, %s9664_s2  ;;  %s9786_s2 = smov 17  }
 0xe7b   : > { %4266 = vrot.lane.b32.xlu0 %v4259_v34, %s9782_s15 }
 0xe7c   : > { %4284 = vrot.lane.b32.xlu1 %v8641_v8, %s9784_s0 }
 0xe7f   : > { %4286 = vrot.lane.b32.xlu0 %v9773_v12, %s9784_s0 }
 0xe80   : > { %4282 = vrot.lane.b32.xlu1 %v8637_v60, %s9784_s0 }
 0xe83   : > { %4305 = vrot.lane.b32.xlu0 %v4298_v6, %s9775_s10 }
 0xe84   : > { %4307 = vrot.lane.b32.xlu1 %v9776_v59, %s9775_s10  ;;  %v4159_v59 = vpop.permute.xlu1 %4158 }
 0xe87   : > { %4303 = vrot.lane.b32.xlu0 %v4297_v7, %s9775_s10 }
 0xe88   : > { %4415 = vperm.xlu1 %6711, %v4411_v33   ;;  %v4198_v45 = vpop.permute.xlu1 %4197 }
 0xe8b   : > { %4420 = vperm.xlu0 %6710, %v4412_v10  }
 0xe8c   : > { %4617 = vrot.lane.b32.xlu1 %v8701_v42, %s9786_s2 }
 0xe8f   : > { %4635 = vrot.lane.b32.xlu0 %v9773_v12, %s9779_s28 }
 0xe90   : > { %4656 = vrot.lane.b32.xlu1 %v9781_v11, %s9780_s16 }
 0xed1   : > { %v4179_v53 = vpop.permute.xlu0 %4178 }
 0xed2   : > { %v4181_v9 = vpop.permute.xlu1 %4180  ;;  %v4182_v11 = vsel %vm1066_vm10, %v4177_v4, %v4179_v53 }
 0xed3   : > { %v4183_v27 = vsel %vm1066_vm10, %v4179_v53, %v4181_v9 }
 0xed5   : > { %v4163_v55 = vpop.permute.xlu0 %4162 }
 0xed6   : > { %v4161_v57 = vpop.permute.xlu1 %4160 }
 0xed7   : > { %v4165_v49 = vsel %vm1047_vm9, %v4161_v57, %v4163_v55  ;;  %v4164_v23 = vsel %vm1047_vm9, %v4159_v59, %v4161_v57  ;;  %v9787_v55 = vld [vmem:[#allocation37_spill] sm:$0xff] }
 0xed8   : > { %4549 = vmatprep.subr.bf16.mxu0 %v4165_v49  ;;  %v9789_v49 = vld [vmem:[#allocation38_spill] sm:$0xff] }
 0xed9   : > { %4550 = vmatpush1.bf16.msra.mxu0 %v4164_v23  ;;  %v4221_v16 = vpop.permute.xlu0 %4220 }
 0xeda   : > { %v4200_v12 = vpop.permute.xlu1 %4199  ;;  %4551 = vmatprep.subr.bf16.mxu0 %v4183_v27 }
 0xedb   : > { %v4203_v50 = vsel %vm1099_vm7, %v4198_v45, %v4200_v12 }
 0xedd   : > { %4552 = vmatpush1.bf16.msra.mxu0 %v4182_v11  ;;  %v4202_v37 = vpop.permute.xlu0 %4201 }
 0xede   : > { %v4244_v0 = vpop.permute.xlu1 %4243  ;;  %v4204_v41 = vsel %vm1099_vm7, %v4200_v12, %v4202_v37  ;;  %v9793_v12 = vld [vmem:[#allocation40_spill] sm:$0xff] }
 0xedf   : > { %4553 = vmatprep.subr.bf16.mxu0 %v4204_v41 }
 0xee1   : > { %4554 = vmatpush1.bf16.msra.mxu0 %v4203_v50  ;;  %v4219_v2 = vpop.permute.xlu0 %4218 }
 0xee2   : > { %v4223_v18 = vpop.permute.xlu1 %4222  ;;  %v4224_v52 = vsel %vm1130_vm8, %v4219_v2, %v4221_v16 }
 0xee3   : > { %v4225_v63 = vsel %vm1130_vm8, %v4221_v16, %v4223_v18  ;;  %v9791_v16 = vld [vmem:[#allocation39_spill] sm:$0xff] }
 0xee4   : > { %4555 = vmatprep.subr.bf16.mxu0 %v4225_v63 }
 0xee5   : > { %4556 = vmatpush1.bf16.msra.mxu0 %v4224_v52  ;;  %v4248_v51 = vpop.permute.xlu0 %4247 }
 0xee6   : > { %v4269_v48 = vpop.permute.xlu1 %4268  ;;  %4557 = vmatprep.subr.bf16.mxu0 %v8641_v8 }
 0xee9   : > { %4558 = vmatpush1.bf16.msra.mxu0 %v8637_v60  ;;  %v4265_v47 = vpop.permute.xlu0 %4264 }
 0xeea   : > { %v4246_v39 = vpop.permute.xlu1 %4245 }
 0xeeb   : > { %v4250_v58 = vsel %vm1113_vm5, %v4246_v39, %v4248_v51  ;;  %v4249_v17 = vsel %vm1113_vm5, %v4244_v0, %v4246_v39  ;;  %v8772_v51 = vld [vmem:[#allocation2] sm:$0xff] }
 0xeec   : > { %4559 = vmatprep.subr.bf16.mxu0 %v4250_v58  ;;  %v9798_v58 = vld [vmem:[#allocation26_spill] sm:$0xff] }
 0xeed   : > { %4560 = vmatpush1.bf16.msra.mxu0 %v4249_v17  ;;  %v4267_v44 = vpop.permute.xlu0 %4266  ;;  %v8785_v17 = vmul.bf16 %v8772_v51, %v9798_v58 }
 0xeee   : > { %v4285_v20 = vpop.permute.xlu1 %4284  ;;  %v4271_v40 = vsel %vm1082_vm6, %v4267_v44, %v4269_v48  ;;  %v4270_v14 = vsel %vm1082_vm6, %v4265_v47, %v4267_v44  ;;  %v9796_v48 = vld [vmem:[#allocation25_spill] sm:$0xff]  ;;  %v9799_v44 = vld [vmem:[#allocation27_spill] sm:$0xff] }
 0xeef   : > { %4561 = vmatprep.subr.bf16.mxu0 %v4271_v40  ;;  %v8776_v47 = vmul.bf16 %v8772_v51, %v9796_v48 }
 0xef1   : > { %4562 = vmatpush1.bf16.msra.mxu0 %v4270_v14  ;;  %v4287_v46 = vpop.permute.xlu0 %4286 }
 0xef2   : > { %v4283_v5 = vpop.permute.xlu1 %4282  ;;  %v4289_v60 = vsel %vm1211_vm11, %v4285_v20, %v4287_v46 }
 0xef3   : > { %v4288_v8 = vsel %vm1211_vm11, %v4283_v5, %v4285_v20  ;;  %4563 = vmatprep.subr.bf16.mxu0 %v4289_v60  ;;  %v8789_v20 = vmul.bf16 %v8772_v51, %v9799_v44  ;;  %v8807_v5 = vld [vmem:[%s9797_s5] sm:$0xff]  ;;  %s9802_s5 = sld [smem:[#allocation17_spill]] }
 0xef4   : > { %v6531_v60 = vcombine.high %v8807_v5, %v8807_v5 }
 0xef5   : > { %4564 = vmatpush1.bf16.msra.mxu0 %v4288_v8  ;;  %v4306_v21 = vpop.permute.xlu0 %4305 }
 0xef6   : > { %v4308_v3 = vpop.permute.xlu1 %4307  ;;  %6532 = vmatprep.mubr.msk.bf16.mxu1 %vm1066_vm10, %v6531_v60 }
 0xef7   : > { %v4310_v43 = vsel %vm1030_vm4, %v4306_v21, %v4308_v3 }
 0xef8   : > { %4565 = vmatprep.subr.bf16.mxu0 %v4310_v43 }
 0xef9   : > { %v4304_v32 = vpop.permute.xlu0 %4303 }
 0xefa   : > { %v4309_v24 = vsel %vm1030_vm4, %v4304_v32, %v4306_v21  ;;  %v9801_v21 = vld [vmem:[#allocation32_spill] sm:$0xff]  ;;  %v4793_v32 = vld [vmem:[%s9800_s6] sm:$0xff]  ;;  %s9803_s6 = sld [smem:[#allocation21_spill]] }
 0xefb   : > { %4566 = vmatpush1.bf16.msra.mxu0 %v4309_v24  ;;  %v8820_v3 = vmul.bf16 %v8772_v51, %v9801_v21 }
 0xefe   : > { %4574 = vmatmul.mubr.bf16.vlgmr.msra.gmra.mrb[16].mxu0 %v6757_v13 }
 0xf07   : > { %v4416_v15 = vpop.permute.xlu1 %4415 }
 0xf0a   : > { %v4421_v61 = vpop.permute.xlu0 %4420 }
 0xf0b   : > { %v4618_v24 = vpop.permute.xlu1 %4617 }
 0xf0e   : > { %v4636_v13 = vpop.permute.xlu0 %4635 }
 0xfd1   : > { %v4575_v56 = vpop.f32.mrb[16].mxu0 }
 0xfd2   : > { %v6575_v31 = vadd.f32 %v4575_v56, %v4416_v15  ;;  %v4577_v34 = vpop.f32.mrb[17].mxu0 }
 0xfd3   : > { %v6576_v6 = vadd.f32 %v4577_v34, %v4416_v15  ;;  %v4579_v7 = vpop.f32.mrb[18].mxu0  ;;  %v4657_v15 = vpop.permute.xlu1 %4656 }
 0xfd4   : > { %v4584_v33 = vmul.f32 0.2, %v6575_v31  ;;  %v6577_v10 = vadd.f32 %v4579_v7, %v4421_v61  ;;  %v4581_v59 = vpop.f32.mrb[19].mxu0 }
 0xfd5   : > { %v4585_v4 = vmul.f32 0.2, %v6576_v6  ;;  %v6578_v45 = vadd.f32 %v4581_v59, %v4421_v61 }
 0xfd6   : > { %v4586_v53 = vmul.f32 0.2, %v6577_v10  ;;  %v8729_v57 = vadd.f32 %v4584_v33, %v9787_v55 }
 0xfd7   : > { %v4587_v9 = vmul.f32 0.2, %v6578_v45  ;;  %v8735_v27 = vadd.f32 %v4585_v4, %v9791_v16 }
 0xfd8   : > { %9788 = vst [vmem:[#allocation29_spill] sm:$0xff] %v8729_v57  ;;  %v8732_v23 = vadd.f32 %v4586_v53, %v9789_v49 }
 0xfd9   : > { %9792 = vst [vmem:[#allocation24_spill] sm:$0xff] %v8735_v27  ;;  %v8738_v11 = vadd.f32 %v4587_v9, %v9793_v12 }
 0xfda   : > { %9790 = vst [vmem:[#allocation35_spill] sm:$0xff] %v8732_v23  ;;  %v8742_v37 = vpack.c.bf16 %v8732_v23, %v8729_v57 }
 0xfdb   : > { %9794 = vst [vmem:[#allocation41_spill] sm:$0xff] %v8738_v11  ;;  %v8746_v0 = vpack.c.bf16 %v8738_v11, %v8735_v27 }
 0xfdc   : > { %4606 = vst [vmem:[#allocation2 + $0x8] sm:$0xff] %v8742_v37  ;;  %4637 = vrot.lane.b32.xlu0 %v8742_v37, %s9779_s28  ;;  %v4612_v50 = vmul.bf16 %v8742_v37, %v7071_v28  ;;  %v4672_v2 = vmul.bf16 %v8742_v37, %v7094_v35  ;;  %v4651_v18 = vmul.bf16 %v8742_v37, %v7099_v36 }
 0xfdd   : > { %4607 = vst [vmem:[#allocation2 + $0x10] sm:$0xff] %v8746_v0  ;;  %4639 = vrot.lane.b32.xlu1 %v8746_v0, %s9779_s28  ;;  %v4613_v41 = vmul.bf16 %v8746_v0, %v7064_v26  ;;  %v4652_v63 = vmul.bf16 %v8746_v0, %v7062_v25  ;;  %v4696_v52 = vmul.bf16 %v8742_v37, %v7103_v38 }
 0xfde   : > { %v4673_v39 = vmul.bf16 %v8746_v0, %v7078_v30  ;;  %v4717_v40 = vmul.bf16 %v8742_v37, %v9770_v29  ;;  %v4697_v14 = vmul.bf16 %v8746_v0, %v9771_v19  ;;  %v4718_v46 = vmul.bf16 %v8746_v0, %v9772_v62 }
 0xfdf   : > { %v4757_v8 = vmul.bf16 %v8746_v0, %v9774_v22  ;;  %v4756_v43 = vmul.bf16 %v8742_v37, %v9777_v1 }
 0xfe0   : > { %4621 = vrot.lane.b32.xlu0 %v4613_v41, %s9786_s2 }
 0xfe1   : > { %4619 = vrot.lane.b32.xlu1 %v4612_v50, %s9786_s2 }
 0xfe4   : > { %4679 = vrot.lane.b32.xlu0 %v4672_v2, %s9767_s1 }
 0xfe5   : > { %4658 = vrot.lane.b32.xlu1 %v4651_v18, %s9780_s16 }
 0xfe8   : > { %4660 = vrot.lane.b32.xlu0 %v4652_v63, %s9780_s16 }
 0xfe9   : > { %4702 = vrot.lane.b32.xlu1 %v4696_v52, %s9795_s3 }
 0xfec   : > { %4677 = vrot.lane.b32.xlu0 %v8776_v47, %s9767_s1 }
 0xfed   : > { %4681 = vrot.lane.b32.xlu1 %v4673_v39, %s9767_s1 }
 0xff0   : > { %4706 = vrot.lane.b32.xlu0 %v8785_v17, %s9795_s3 }
 0xff1   : > { %4727 = vrot.lane.b32.xlu1 %v8789_v20, %s9782_s15 }
 0xff4   : > { %4723 = vrot.lane.b32.xlu0 %v4717_v40, %s9782_s15 }
 0xff5   : > { %4704 = vrot.lane.b32.xlu1 %v4697_v14, %s9795_s3 }
 0xff8   : > { %4725 = vrot.lane.b32.xlu0 %v4718_v46, %s9782_s15 }
 0xff9   : > { %4743 = vrot.lane.b32.xlu1 %v8746_v0, %s9784_s0 }
 0xffc   : > { %4745 = vrot.lane.b32.xlu0 %v8772_v51, %s9784_s0 }
 0xffd   : > { %4741 = vrot.lane.b32.xlu1 %v8742_v37, %s9784_s0 }
0x1000   : > { %4764 = vrot.lane.b32.xlu0 %v4757_v8, %s9775_s10 }
0x1001   : > { %4766 = vrot.lane.b32.xlu1 %v8820_v3, %s9775_s10 }
0x1004   : > { %4762 = vrot.lane.b32.xlu0 %v4756_v43, %s9775_s10 }
0x1005   : > { %4796 = vperm.xlu1 %6711, %v4793_v32  }
0x1008   : > { %4868 = vrot.lane.b32.xlu0 %v8701_v42, %s9786_s2 }
0x104e   : > { %v4638_v56 = vpop.permute.xlu0 %4637 }
0x104f   : > { %v4640_v31 = vpop.permute.xlu1 %4639  ;;  %v8847_v4 = vsel %vm1066_vm10, %v4636_v13, %v4638_v56 }
0x1050   : > { %v8840_v33 = vsel %vm1066_vm10, %v4638_v56, %v4640_v31 }
0x1052   : > { %v4622_v34 = vpop.permute.xlu0 %4621 }
0x1053   : > { %v4620_v61 = vpop.permute.xlu1 %4619 }
0x1054   : > { %v8832_v6 = vsel %vm1047_vm9, %v4618_v24, %v4620_v61  ;;  %v8835_v7 = vsel %vm1047_vm9, %v4620_v61, %v4622_v34  ;;  %v6530_v61 = vcombine.low %v8807_v5, %v8807_v5 }
0x1055   : > { %4808 = vmatprep.subr.bf16.mxu1 %v8835_v7  ;;  %5777 = vmatprep.subr.bf16.mxu0 %v8835_v7 }
0x1056   : > { %4809 = vmatpush1.bf16.msra.mxu1 %v8832_v6  ;;  %5778 = vmatpush1.bf16.msra.mxu0 %v8832_v6  ;;  %v4680_v10 = vpop.permute.xlu0 %4679 }
0x1057   : > { %v4659_v59 = vpop.permute.xlu1 %4658  ;;  %4810 = vmatprep.subr.bf16.mxu1 %v8840_v33  ;;  %5779 = vmatprep.subr.bf16.mxu0 %v8840_v33 }
0x1058   : > { %v8857_v55 = vsel %vm1099_vm7, %v4657_v15, %v4659_v59 }
0x105a   : > { %4811 = vmatpush1.bf16.msra.mxu1 %v8847_v4  ;;  %5780 = vmatpush1.bf16.msra.mxu0 %v8847_v4  ;;  %v4661_v45 = vpop.permute.xlu0 %4660 }
0x105b   : > { %v8852_v53 = vsel %vm1099_vm7, %v4659_v59, %v4661_v45  ;;  %v4703_v9 = vpop.permute.xlu1 %4702 }
0x105c   : > { %4812 = vmatprep.subr.bf16.mxu1 %v8852_v53  ;;  %5781 = vmatprep.subr.bf16.mxu0 %v8852_v53 }
0x105e   : > { %4813 = vmatpush1.bf16.msra.mxu1 %v8857_v55  ;;  %5782 = vmatpush1.bf16.msra.mxu0 %v8857_v55  ;;  %v4678_v49 = vpop.permute.xlu0 %4677 }
0x105f   : > { %v4682_v16 = vpop.permute.xlu1 %4681  ;;  %v8865_v41 = vsel %vm1130_vm8, %v4678_v49, %v4680_v10 }
0x1060   : > { %v8862_v12 = vsel %vm1130_vm8, %v4680_v10, %v4682_v16 }
0x1061   : > { %4814 = vmatprep.subr.bf16.mxu1 %v8862_v12  ;;  %5783 = vmatprep.subr.bf16.mxu0 %v8862_v12 }
0x1062   : > { %4815 = vmatpush1.bf16.msra.mxu1 %v8865_v41  ;;  %5784 = vmatpush1.bf16.msra.mxu0 %v8865_v41  ;;  %v4707_v50 = vpop.permute.xlu0 %4706 }
0x1063   : > { %v4728_v2 = vpop.permute.xlu1 %4727  ;;  %4816 = vmatprep.subr.bf16.mxu1 %v8746_v0  ;;  %5785 = vmatprep.subr.bf16.mxu0 %v8746_v0 }
0x1066   : > { %4817 = vmatpush1.bf16.msra.mxu1 %v8742_v37  ;;  %5786 = vmatpush1.bf16.msra.mxu0 %v8742_v37  ;;  %v4724_v18 = vpop.permute.xlu0 %4723 }
0x1067   : > { %v4705_v63 = vpop.permute.xlu1 %4704 }
0x1068   : > { %v8876_v52 = vsel %vm1113_vm5, %v4703_v9, %v4705_v63  ;;  %v8879_v39 = vsel %vm1113_vm5, %v4705_v63, %v4707_v50 }
0x1069   : > { %4818 = vmatprep.subr.bf16.mxu1 %v8879_v39  ;;  %5787 = vmatprep.subr.bf16.mxu0 %v8879_v39 }
0x106a   : > { %4819 = vmatpush1.bf16.msra.mxu1 %v8876_v52  ;;  %5788 = vmatpush1.bf16.msra.mxu0 %v8876_v52  ;;  %v4726_v40 = vpop.permute.xlu0 %4725 }
0x106b   : > { %v8886_v14 = vsel %vm1082_vm6, %v4726_v40, %v4728_v2  ;;  %v4744_v46 = vpop.permute.xlu1 %4743  ;;  %v8891_v60 = vsel %vm1082_vm6, %v4724_v18, %v4726_v40 }
0x106c   : > { %4820 = vmatprep.subr.bf16.mxu1 %v8886_v14  ;;  %5789 = vmatprep.subr.bf16.mxu0 %v8886_v14 }
0x106e   : > { %4821 = vmatpush1.bf16.msra.mxu1 %v8891_v60  ;;  %5790 = vmatpush1.bf16.msra.mxu0 %v8891_v60  ;;  %v4746_v8 = vpop.permute.xlu0 %4745 }
0x106f   : > { %v8896_v43 = vsel %vm1211_vm11, %v4744_v46, %v4746_v8  ;;  %v4742_v32 = vpop.permute.xlu1 %4741 }
0x1070   : > { %v8899_v24 = vsel %vm1211_vm11, %v4742_v32, %v4744_v46  ;;  %4822 = vmatprep.subr.bf16.mxu1 %v8896_v43  ;;  %5791 = vmatprep.subr.bf16.mxu0 %v8896_v43 }
0x1072   : > { %4823 = vmatpush1.bf16.msra.mxu1 %v8899_v24  ;;  %5792 = vmatpush1.bf16.msra.mxu0 %v8899_v24  ;;  %v4765_v13 = vpop.permute.xlu0 %4764 }
0x1073   : > { %v4767_v15 = vpop.permute.xlu1 %4766 }
0x1074   : > { %v8906_v56 = vsel %vm1030_vm4, %v4765_v13, %v4767_v15 }
0x1075   : > { %4824 = vmatprep.subr.bf16.mxu1 %v8906_v56  ;;  %5793 = vmatprep.subr.bf16.mxu0 %v8906_v56 }
0x1076   : > { %v4763_v31 = vpop.permute.xlu0 %4762 }
0x1077   : > { %v8911_v34 = vsel %vm1030_vm4, %v4763_v31, %v4765_v13 }
0x1078   : > { %4825 = vmatpush1.bf16.msra.mxu1 %v8911_v34  ;;  %5794 = vmatpush1.bf16.msra.mxu0 %v8911_v34 }
0x1079   : > { %5082 = vmatprep.subr.bf16.mxu1 %v8835_v7 }
0x107b   : > { %4841 = vmatmul.mubr.bf16.vlgmr.msra.gmra.mrb[20].mxu1 %v6530_v61 }
0x107c   : > { %5083 = vmatpush1.bf16.msra.mxu1 %v8832_v6 }
0x107d   : > { %5084 = vmatprep.subr.bf16.mxu1 %v8840_v33 }
0x1080   : > { %5085 = vmatpush1.bf16.msra.mxu1 %v8847_v4 }
0x1081   : > { %5086 = vmatprep.subr.bf16.mxu1 %v8852_v53 }
0x1084   : > { %5087 = vmatpush1.bf16.msra.mxu1 %v8857_v55  ;;  %v4797_v5 = vpop.permute.xlu1 %4796 }
0x1085   : > { %5088 = vmatprep.subr.bf16.mxu1 %v8862_v12 }
0x1088   : > { %5089 = vmatpush1.bf16.msra.mxu1 %v8865_v41 }
0x1089   : > { %5090 = vmatprep.subr.bf16.mxu1 %v8746_v0 }
0x108c   : > { %5091 = vmatpush1.bf16.msra.mxu1 %v8742_v37 }
0x108d   : > { %5092 = vmatprep.subr.bf16.mxu1 %v8879_v39 }
0x1090   : > { %5093 = vmatpush1.bf16.msra.mxu1 %v8876_v52 }
0x1091   : > { %5094 = vmatprep.subr.bf16.mxu1 %v8886_v14 }
0x1094   : > { %5095 = vmatpush1.bf16.msra.mxu1 %v8891_v60 }
0x1095   : > { %5096 = vmatprep.subr.bf16.mxu1 %v8896_v43 }
0x1098   : > { %5097 = vmatpush1.bf16.msra.mxu1 %v8899_v24 }
0x1099   : > { %5098 = vmatprep.subr.bf16.mxu1 %v8906_v56 }
0x109c   : > { %5099 = vmatpush1.bf16.msra.mxu1 %v8911_v34 }
0x114e   : > { %v4842_v10 = vpop.f32.mrb[20].mxu1 }
0x114f   : > { %v4843_v59 = vadd.f32 %v4842_v10, %v4797_v5  ;;  %v4844_v45 = vpop.f32.mrb[21].mxu1 }
0x1150   : > { %v4845_v9 = vadd.f32 %v4844_v45, %v4797_v5  ;;  %v4846_v49 = vpop.f32.mrb[22].mxu1  ;;  %v9804_v5 = vld [vmem:[#allocation22_spill] sm:$0xff] }
0x1151   : > { %vm4849_vm2 = vcmp.ge.f32.partialorder %v4843_v59, 0.0  ;;  %v4851_v16 = vmul.f32 0.2, %v4843_v59  ;;  %v4847_v50 = vpop.f32.mrb[23].mxu1  ;;  %v8958_v10 = vmul.bf16 %v8772_v51, %v9804_v5  ;;  %v8974_v49 = vld [vmem:[%s9802_s5] sm:$0xff] }
0x1152   : > { %vm4850_vm3 = vcmp.ge.f32.partialorder %v4845_v9, 0.0  ;;  %v4852_v2 = vmul.f32 0.2, %v4845_v9 }
0x1153   : > { %v4853_v18 = vsel %vm4849_vm2, %v4843_v59, %v4851_v16  ;;  %9805 = vst [vmem:[#allocation43_spill] sm:$0xff] %v8958_v10  ;;  %v6534_v16 = vcombine.high %v8974_v49, %v8974_v49 }
0x1154   : > { %v4855_v63 = vpack.c.bf16 %v4853_v18, %v4853_v18  ;;  %v4854_v40 = vsel %vm4850_vm3, %v4845_v9, %v4852_v2  ;;  %v8982_v2 = vld [vmem:[%s9803_s6] sm:$0xff] }
0x1155   : > { %v4856_v46 = vpack.c.bf16 %v4854_v40, %v4854_v40  ;;  %5114 = vmatprep.mubr.bf16.mxu1 %v6534_v16  ;;  %v6543_v18 = vcombine.high %v8982_v2, %v8982_v2 }
0x1156   : > { %4857 = vst [vmem:[#allocation2 + $0x8] sm:$0xf] %v4855_v63 }
0x1157   : > { %4858 = vst [vmem:[#allocation2 + $0x10] sm:$0xf] %v4856_v46  ;;  %5809 = vmatprep.mubr.bf16.mxu0 %v6543_v18 }
0x115d   : > { %v8935_v8 = vld [vmem:[#allocation2 + $0x8] sm:$0xff] }
0x115e   : > { %4888 = vrot.lane.b32.xlu1 %v8935_v8, %s9779_s28  ;;  %v8939_v32 = vld [vmem:[#allocation2 + $0x10] sm:$0xff]  ;;  %v4863_v15 = vmul.bf16 %v8935_v8, %v7071_v28  ;;  %v4902_v31 = vmul.bf16 %v8935_v8, %v7099_v36  ;;  %v4923_v59 = vmul.bf16 %v8935_v8, %v7094_v35  ;;  %v4947_v9 = vmul.bf16 %v8935_v8, %v7103_v38 }
0x115f   : > { %4890 = vrot.lane.b32.xlu0 %v8939_v32, %s9779_s28  ;;  %v4864_v13 = vmul.bf16 %v8939_v32, %v7064_v26  ;;  %v4903_v61 = vmul.bf16 %v8939_v32, %v7062_v25  ;;  %v4924_v45 = vmul.bf16 %v8939_v32, %v7078_v30  ;;  %v4948_v50 = vmul.bf16 %v8939_v32, %v9771_v19 }
0x1160   : > { %v4969_v63 = vmul.bf16 %v8939_v32, %v9772_v62  ;;  %v4968_v40 = vmul.bf16 %v8935_v8, %v9770_v29  ;;  %v5008_v46 = vmul.bf16 %v8939_v32, %v9774_v22 }
0x1162   : > { %4872 = vrot.lane.b32.xlu1 %v4864_v13, %s9786_s2  ;;  %v5007_v13 = vmul.bf16 %v8935_v8, %v9777_v1 }
0x1163   : > { %4870 = vrot.lane.b32.xlu0 %v4863_v15, %s9786_s2  ;;  %v5063_v15 = vld [vmem:[%s9806_s7] sm:$0xff]  ;;  %s9810_s7 = sld [smem:[#allocation19_spill]] }
0x1166   : > { %4886 = vrot.lane.b32.xlu1 %v8772_v51, %s9779_s28 }
0x1167   : > { %4909 = vrot.lane.b32.xlu0 %v4902_v31, %s9780_s16  ;;  %v4869_v31 = vpop.permute.xlu0 %4868 }
0x116a   : > { %4911 = vrot.lane.b32.xlu1 %v4903_v61, %s9780_s16 }
0x116b   : > { %4907 = vrot.lane.b32.xlu0 %v8958_v10, %s9780_s16 }
0x116e   : > { %4930 = vrot.lane.b32.xlu1 %v4923_v59, %s9767_s1 }
0x116f   : > { %4932 = vrot.lane.b32.xlu0 %v4924_v45, %s9767_s1 }
0x1172   : > { %4928 = vrot.lane.b32.xlu1 %v8776_v47, %s9767_s1 }
0x1173   : > { %4953 = vrot.lane.b32.xlu0 %v4947_v9, %s9795_s3 }
0x1176   : > { %4957 = vrot.lane.b32.xlu1 %v8785_v17, %s9795_s3 }
0x1177   : > { %4955 = vrot.lane.b32.xlu0 %v4948_v50, %s9795_s3 }
0x117a   : > { %4976 = vrot.lane.b32.xlu1 %v4969_v63, %s9782_s15 }
0x117b   : > { %4978 = vrot.lane.b32.xlu0 %v8789_v20, %s9782_s15 }
0x117e   : > { %4974 = vrot.lane.b32.xlu1 %v4968_v40, %s9782_s15 }
0x117f   : > { %4994 = vrot.lane.b32.xlu0 %v8939_v32, %s9784_s0 }
0x1182   : > { %4996 = vrot.lane.b32.xlu1 %v8772_v51, %s9784_s0 }
0x1183   : > { %4992 = vrot.lane.b32.xlu0 %v8935_v8, %s9784_s0 }
0x1186   : > { %5015 = vrot.lane.b32.xlu1 %v5008_v46, %s9775_s10 }
0x1187   : > { %5017 = vrot.lane.b32.xlu0 %v8820_v3, %s9775_s10 }
0x118a   : > { %5013 = vrot.lane.b32.xlu1 %v5007_v13, %s9775_s10 }
0x118b   : > { %5066 = vperm.xlu0 %6710, %v5063_v15  }
0x118e   : > { %5183 = vrot.lane.b32.xlu1 %v8701_v42, %s9786_s2 }
0x118f   : > { %5201 = vrot.lane.b32.xlu0 %v8772_v51, %s9779_s28 }
0x1192   : > { %5222 = vrot.lane.b32.xlu1 %v8958_v10, %s9780_s16 }
0x11d0   : > { %v4889_v61 = vpop.permute.xlu1 %4888 }
0x11d1   : > { %v4891_v5 = vpop.permute.xlu0 %4890 }
0x11d2   : > { %v9027_v42 = vsel %vm1066_vm10, %v4889_v61, %v4891_v5 }
0x11d4   : > { %v4873_v59 = vpop.permute.xlu1 %4872 }
0x11d5   : > { %v4871_v45 = vpop.permute.xlu0 %4870 }
0x11d6   : > { %v9019_v9 = vsel %vm1047_vm9, %v4869_v31, %v4871_v45  ;;  %v9022_v16 = vsel %vm1047_vm9, %v4871_v45, %v4873_v59 }
0x11d7   : > { %5100 = vmatprep.subr.bf16.mxu1 %v9022_v16  ;;  %5795 = vmatprep.subr.bf16.mxu0 %v9022_v16 }
0x11d8   : > { %v4887_v50 = vpop.permute.xlu1 %4886  ;;  %5101 = vmatpush1.bf16.msra.mxu1 %v9019_v9  ;;  %5796 = vmatpush1.bf16.msra.mxu0 %v9019_v9 }
0x11d9   : > { %5102 = vmatprep.subr.bf16.mxu1 %v9027_v42  ;;  %5797 = vmatprep.subr.bf16.mxu0 %v9027_v42  ;;  %v4910_v18 = vpop.permute.xlu0 %4909  ;;  %v9034_v63 = vsel %vm1066_vm10, %v4887_v50, %v4889_v61 }
0x11dc   : > { %v4912_v40 = vpop.permute.xlu1 %4911  ;;  %5103 = vmatpush1.bf16.msra.mxu1 %v9034_v63  ;;  %5798 = vmatpush1.bf16.msra.mxu0 %v9034_v63 }
0x11dd   : > { %v9039_v46 = vsel %vm1099_vm7, %v4910_v18, %v4912_v40  ;;  %v4908_v13 = vpop.permute.xlu0 %4907 }
0x11de   : > { %v9042_v15 = vsel %vm1099_vm7, %v4908_v13, %v4910_v18  ;;  %5104 = vmatprep.subr.bf16.mxu1 %v9039_v46  ;;  %5799 = vmatprep.subr.bf16.mxu0 %v9039_v46 }
0x11e0   : > { %v4931_v31 = vpop.permute.xlu1 %4930  ;;  %5105 = vmatpush1.bf16.msra.mxu1 %v9042_v15  ;;  %5800 = vmatpush1.bf16.msra.mxu0 %v9042_v15 }
0x11e1   : > { %v4933_v61 = vpop.permute.xlu0 %4932 }
0x11e2   : > { %v9049_v5 = vsel %vm1130_vm8, %v4931_v31, %v4933_v61 }
0x11e3   : > { %5106 = vmatprep.subr.bf16.mxu1 %v9049_v5  ;;  %5801 = vmatprep.subr.bf16.mxu0 %v9049_v5 }
0x11e4   : > { %v4929_v59 = vpop.permute.xlu1 %4928 }
0x11e5   : > { %v9054_v45 = vsel %vm1130_vm8, %v4929_v59, %v4931_v31  ;;  %v4954_v50 = vpop.permute.xlu0 %4953 }
0x11e6   : > { %5107 = vmatpush1.bf16.msra.mxu1 %v9054_v45  ;;  %5802 = vmatpush1.bf16.msra.mxu0 %v9054_v45 }
0x11e7   : > { %5108 = vmatprep.subr.bf16.mxu1 %v8939_v32  ;;  %5803 = vmatprep.subr.bf16.mxu0 %v8939_v32 }
0x11e8   : > { %v4958_v18 = vpop.permute.xlu1 %4957 }
0x11e9   : > { %v4956_v40 = vpop.permute.xlu0 %4955 }
0x11ea   : > { %v9061_v13 = vsel %vm1113_vm5, %v4956_v40, %v4958_v18  ;;  %5109 = vmatpush1.bf16.msra.mxu1 %v8935_v8  ;;  %5804 = vmatpush1.bf16.msra.mxu0 %v8935_v8  ;;  %v9068_v61 = vsel %vm1113_vm5, %v4954_v50, %v4956_v40  ;;  %v6533_v50 = vcombine.low %v8974_v49, %v8974_v49 }
0x11eb   : > { %5110 = vmatprep.subr.bf16.mxu1 %v9061_v13  ;;  %5805 = vmatprep.subr.bf16.mxu0 %v9061_v13  ;;  %9807 = vst [vmem:[#allocation44_spill] sm:$0xff] %v9068_v61  ;;  %v6542_v40 = vcombine.low %v8982_v2, %v8982_v2 }
0x11ec   : > { %v4977_v31 = vpop.permute.xlu1 %4976 }
0x11ed   : > { %v4979_v59 = vpop.permute.xlu0 %4978 }
0x11ee   : > { %v9071_v11 = vsel %vm1082_vm6, %v4977_v31, %v4979_v59  ;;  %5111 = vmatpush1.bf16.msra.mxu1 %v9068_v61  ;;  %5806 = vmatpush1.bf16.msra.mxu0 %v9068_v61 }
0x11ef   : > { %9808 = vst [vmem:[#allocation28_spill] sm:$0xff] %v9071_v11  ;;  %5112 = vmatprep.subr.bf16.mxu1 %v9071_v11  ;;  %5807 = vmatprep.subr.bf16.mxu0 %v9071_v11 }
0x11f0   : > { %v4975_v18 = vpop.permute.xlu1 %4974 }
0x11f1   : > { %v9078_v23 = vsel %vm1082_vm6, %v4975_v18, %v4977_v31  ;;  %v4995_v27 = vpop.permute.xlu0 %4994 }
0x11f2   : > { %9809 = vst [vmem:[#allocation31_spill] sm:$0xff] %v9078_v23  ;;  %5113 = vmatpush1.bf16.msra.mxu1 %v9078_v23  ;;  %5808 = vmatpush1.bf16.msra.mxu0 %v9078_v23 }
0x11f4   : > { %v4997_v59 = vpop.permute.xlu1 %4996 }
0x11f5   : > { %v9087_v57 = vsel %vm1211_vm11, %v4995_v27, %v4997_v59  ;;  %5115 = vmatmul.mubr.bf16.vlgmr.msra.gmra.mrb[24].mxu1 %v6533_v50  ;;  %v4993_v21 = vpop.permute.xlu0 %4992  ;;  %5810 = vmatmul.mubr.bf16.vlgmr.msra.gmra.mrb[20].mxu0 %v6542_v40  ;;  %v6764_v40 = vld [vmem:[%s9802_s5 + $0x8] ss:$0 sps:$4 sm:$0xff]   ;;  %s9813_s5 = sld [smem:[#allocation20_spill]] }
0x11f6   : > { %9811 = vst [vmem:[#allocation42_spill] sm:$0xff] %v9087_v57  ;;  %v9090_v31 = vsel %vm1211_vm11, %v4993_v21, %v4995_v27  ;;  %5123 = vmatprep.subr.bf16.mxu1 %v9087_v57  ;;  %5818 = vmatprep.subr.bf16.mxu0 %v9087_v57  ;;  %v5340_v27 = vld [vmem:[%s9810_s7] sm:$0xff] }
0x11f7   : > { %5124 = vmatpush1.bf16.msra.mxu1 %v9090_v31  ;;  %5819 = vmatpush1.bf16.msra.mxu0 %v9090_v31  ;;  %v6538_v59 = vcombine.high %v5340_v27, %v5340_v27 }
0x11f8   : > { %v5016_v49 = vpop.permute.xlu1 %5015  ;;  %5155 = vmatprep.mubr.bf16.mxu1 %v8772_v51 }
0x11f9   : > { %v5018_v2 = vpop.permute.xlu0 %5017 }
0x11fa   : > { %v9098_v18 = vsel %vm1030_vm4, %v5016_v49, %v5018_v2 }
0x11fb   : > { %9812 = vst [vmem:[#allocation45_spill] sm:$0xff] %v9098_v18  ;;  %5125 = vmatprep.subr.bf16.mxu1 %v9098_v18  ;;  %5820 = vmatprep.subr.bf16.mxu0 %v9098_v18 }
0x11fc   : > { %v5014_v21 = vpop.permute.xlu1 %5013 }
0x11fd   : > { %v9104_v50 = vsel %vm1030_vm4, %v5014_v21, %v5016_v49  ;;  %v6537_v49 = vcombine.low %v5340_v27, %v5340_v27 }
0x11fe   : > { %5126 = vmatpush1.bf16.msra.mxu1 %v9104_v50  ;;  %5821 = vmatpush1.bf16.msra.mxu0 %v9104_v50 }
0x11ff   : > { %5418 = vmatprep.subr.bf16.mxu1 %v8835_v7 }
0x1201   : > { %6536 = vmatmul.mubr.msk.bf16.vlgmr.msra.gmra.mrb[24].mxu1 %vm1553_vm14, %v6764_v40 }
0x1202   : > { %5419 = vmatpush1.bf16.msra.mxu1 %v8832_v6  ;;  %5450 = vmatprep.mubr.bf16.mxu1 %v6538_v59 }
0x1203   : > { %5420 = vmatprep.subr.bf16.mxu1 %v8840_v33 }
0x1206   : > { %5421 = vmatpush1.bf16.msra.mxu1 %v8847_v4 }
0x1207   : > { %5422 = vmatprep.subr.bf16.mxu1 %v8852_v53 }
0x120a   : > { %5423 = vmatpush1.bf16.msra.mxu1 %v8857_v55  ;;  %v5067_v2 = vpop.permute.xlu0 %5066 }
0x120b   : > { %5424 = vmatprep.subr.bf16.mxu1 %v8862_v12 }
0x120e   : > { %5425 = vmatpush1.bf16.msra.mxu1 %v8865_v41 }
0x120f   : > { %5426 = vmatprep.subr.bf16.mxu1 %v8746_v0 }
0x1212   : > { %5427 = vmatpush1.bf16.msra.mxu1 %v8742_v37 }
0x1213   : > { %5428 = vmatprep.subr.bf16.mxu1 %v8879_v39 }
0x1216   : > { %5429 = vmatpush1.bf16.msra.mxu1 %v8876_v52 }
0x1217   : > { %5430 = vmatprep.subr.bf16.mxu1 %v8886_v14 }
0x121a   : > { %5431 = vmatpush1.bf16.msra.mxu1 %v8891_v60 }
0x121b   : > { %5432 = vmatprep.subr.bf16.mxu1 %v8896_v43 }
0x121e   : > { %5433 = vmatpush1.bf16.msra.mxu1 %v8899_v24 }
0x121f   : > { %5434 = vmatprep.subr.bf16.mxu1 %v8906_v56 }
0x1222   : > { %5435 = vmatpush1.bf16.msra.mxu1 %v8911_v34 }
0x1223   : > { %5436 = vmatprep.subr.bf16.mxu1 %v9022_v16 }
0x1226   : > { %5437 = vmatpush1.bf16.msra.mxu1 %v9019_v9 }
0x1227   : > { %5438 = vmatprep.subr.bf16.mxu1 %v9027_v42 }
0x122a   : > { %5439 = vmatpush1.bf16.msra.mxu1 %v9034_v63 }
0x122b   : > { %5440 = vmatprep.subr.bf16.mxu1 %v9039_v46 }
0x122e   : > { %5441 = vmatpush1.bf16.msra.mxu1 %v9042_v15 }
0x122f   : > { %5442 = vmatprep.subr.bf16.mxu1 %v9049_v5 }
0x1232   : > { %5443 = vmatpush1.bf16.msra.mxu1 %v9054_v45 }
0x1233   : > { %5444 = vmatprep.subr.bf16.mxu1 %v8939_v32 }
0x1236   : > { %5445 = vmatpush1.bf16.msra.mxu1 %v8935_v8 }
0x1237   : > { %5446 = vmatprep.subr.bf16.mxu1 %v9061_v13 }
0x123a   : > { %5447 = vmatpush1.bf16.msra.mxu1 %v9068_v61 }
0x123b   : > { %5448 = vmatprep.subr.bf16.mxu1 %v9071_v11 }
0x123e   : > { %5449 = vmatpush1.bf16.msra.mxu1 %v9078_v23 }
0x123f   : > { %5459 = vmatprep.subr.bf16.mxu1 %v9087_v57 }
0x1241   : > { %5451 = vmatmul.mubr.bf16.vlgmr.msra.gmra.mrb[28].mxu1 %v6537_v49 }
0x1242   : > { %5460 = vmatpush1.bf16.msra.mxu1 %v9090_v31 }
0x1243   : > { %5461 = vmatprep.subr.bf16.mxu1 %v9098_v18 }
0x1246   : > { %5462 = vmatpush1.bf16.msra.mxu1 %v9104_v50 }
0x12d4   : > { %v5157_v21 = vpop.f32.mrb[24].mxu1 }
0x12d5   : > { %v6579_v40 = vadd.f32 %v5157_v21, %v5067_v2  ;;  %v5159_v59 = vpop.f32.mrb[25].mxu1 }
0x12d6   : > { %v6580_v44 = vadd.f32 %v5159_v59, %v5067_v2  ;;  %v5161_v58 = vpop.f32.mrb[26].mxu1 }
0x12d7   : > { %vm5164_vm14 = vcmp.ge.f32.partialorder %v6579_v40, 0.0  ;;  %v5166_v48 = vmul.f32 0.2, %v6579_v40  ;;  %v5162_v27 = vpop.f32.mrb[27].mxu1 }
0x12d8   : > { %vm5165_vm13 = vcmp.ge.f32.partialorder %v6580_v44, 0.0  ;;  %v5167_v23 = vmul.f32 0.2, %v6580_v44 }
0x12d9   : > { %v5168_v11 = vsel %vm5164_vm14, %v6579_v40, %v5166_v48 }
0x12da   : > { %v5170_v57 = vpack.c.bf16 %v5168_v11, %v5168_v11  ;;  %v5169_v49 = vsel %vm5165_vm13, %v6580_v44, %v5167_v23 }
0x12db   : > { %v5171_v61 = vpack.c.bf16 %v5169_v49, %v5169_v49  ;;  %v5396_v49 = vld [vmem:[%s9813_s5] sm:$0xff] }
0x12dc   : > { %5172 = vst [vmem:[#allocation2 + $0x8] sm:$0xf] %v5170_v57 }
0x12dd   : > { %5173 = vst [vmem:[#allocation2 + $0x10] sm:$0xf] %v5171_v61 }
0x12e3   : > { %v9146_v18 = vld [vmem:[#allocation2 + $0x8] sm:$0xff] }
0x12e4   : > { %5203 = vrot.lane.b32.xlu0 %v9146_v18, %s9779_s28  ;;  %v9150_v21 = vld [vmem:[#allocation2 + $0x10] sm:$0xff]  ;;  %v5178_v11 = vmul.bf16 %v9146_v18, %v7071_v28  ;;  %v5238_v57 = vmul.bf16 %v9146_v18, %v7094_v35  ;;  %v5217_v23 = vmul.bf16 %v9146_v18, %v7099_v36  ;;  %v5262_v44 = vmul.bf16 %v9146_v18, %v7103_v38 }
0x12e5   : > { %5205 = vrot.lane.b32.xlu1 %v9150_v21, %s9779_s28  ;;  %v5179_v58 = vmul.bf16 %v9150_v21, %v7064_v26  ;;  %v5218_v48 = vmul.bf16 %v9150_v21, %v7062_v25  ;;  %v5239_v61 = vmul.bf16 %v9150_v21, %v7078_v30  ;;  %v5283_v2 = vmul.bf16 %v9146_v18, %v9770_v29 }
0x12e6   : > { %v5263_v40 = vmul.bf16 %v9150_v21, %v9771_v19  ;;  %v5323_v59 = vmul.bf16 %v9150_v21, %v9774_v22  ;;  %v5322_v27 = vmul.bf16 %v9146_v18, %v9777_v1 }
0x12e8   : > { %5187 = vrot.lane.b32.xlu0 %v5179_v58, %s9786_s2  ;;  %v9213_v58 = vmul.bf16 %v8772_v51, %v9785_v54 }
0x12e9   : > { %5185 = vrot.lane.b32.xlu1 %v5178_v11, %s9786_s2  ;;  %v5202_v11 = vpop.permute.xlu0 %5201 }
0x12ea   : > { %9814 = vst [vmem:[#allocation36_spill] sm:$0xff] %v9213_v58 }
0x12ec   : > { %5245 = vrot.lane.b32.xlu0 %v5238_v57, %s9767_s1 }
0x12ed   : > { %5224 = vrot.lane.b32.xlu1 %v5217_v23, %s9780_s16 }
0x12f0   : > { %5226 = vrot.lane.b32.xlu0 %v5218_v48, %s9780_s16 }
0x12f1   : > { %5268 = vrot.lane.b32.xlu1 %v5262_v44, %s9795_s3 }
0x12f4   : > { %5243 = vrot.lane.b32.xlu0 %v8776_v47, %s9767_s1  ;;  %v5284_v47 = vmul.bf16 %v9150_v21, %v9772_v62  ;;  %v6771_v62 = vld [vmem:[%s6991_s4 + $0x4] ss:$24 sps:$4 sm:$0xff]  }
0x12f5   : > { %5247 = vrot.lane.b32.xlu1 %v5239_v61, %s9767_s1 }
0x12f8   : > { %5272 = vrot.lane.b32.xlu0 %v8785_v17, %s9795_s3  ;;  %v9193_v17 = vld [vmem:[%s9810_s7 + $0x8] sm:$0xff] }
0x12f9   : > { %5293 = vrot.lane.b32.xlu1 %v8789_v20, %s9782_s15  ;;  %v6540_v20 = vcombine.high %v9193_v17, %v9193_v17 }
0x12fb   : > { %6541 = vmatprep.mubr.msk.bf16.mxu1 %vm1890_vm1, %v6540_v20 }
0x12fc   : > { %5289 = vrot.lane.b32.xlu0 %v5283_v2, %s9782_s15 }
0x12fd   : > { %5270 = vrot.lane.b32.xlu1 %v5263_v40, %s9795_s3 }
0x1300   : > { %5291 = vrot.lane.b32.xlu0 %v5284_v47, %s9782_s15 }
0x1301   : > { %5309 = vrot.lane.b32.xlu1 %v9150_v21, %s9784_s0 }
0x1304   : > { %5311 = vrot.lane.b32.xlu0 %v8772_v51, %s9784_s0 }
0x1305   : > { %5307 = vrot.lane.b32.xlu1 %v9146_v18, %s9784_s0 }
0x1308   : > { %5330 = vrot.lane.b32.xlu0 %v5323_v59, %s9775_s10 }
0x1309   : > { %5332 = vrot.lane.b32.xlu1 %v8820_v3, %s9775_s10  ;;  %v5184_v3 = vpop.permute.xlu1 %5183 }
0x130c   : > { %5328 = vrot.lane.b32.xlu0 %v5322_v27, %s9775_s10 }
0x130d   : > { %5399 = vperm.xlu1 %6711, %v5396_v49   ;;  %v5223_v57 = vpop.permute.xlu1 %5222 }
0x1310   : > { %5519 = vrot.lane.b32.xlu0 %v9213_v58, %s9786_s2 }
0x1311   : > { %5537 = vrot.lane.b32.xlu1 %v8772_v51, %s9779_s28 }
0x1314   : > { %5558 = vrot.lane.b32.xlu0 %v8958_v10, %s9780_s16 }
0x1356   : > { %v5204_v23 = vpop.permute.xlu0 %5203 }
0x1357   : > { %v5206_v48 = vpop.permute.xlu1 %5205  ;;  %v9237_v20 = vsel %vm1066_vm10, %v5202_v11, %v5204_v23 }
0x1358   : > { %v9232_v40 = vsel %vm1066_vm10, %v5204_v23, %v5206_v48 }
0x135a   : > { %v5188_v44 = vpop.permute.xlu0 %5187 }
0x135b   : > { %v5186_v61 = vpop.permute.xlu1 %5185 }
0x135c   : > { %v9222_v2 = vsel %vm1047_vm9, %v5184_v3, %v5186_v61  ;;  %v9225_v54 = vsel %vm1047_vm9, %v5186_v61, %v5188_v44 }
0x135d   : > { %5463 = vmatprep.subr.bf16.mxu1 %v9225_v54  ;;  %5822 = vmatprep.subr.bf16.mxu0 %v9225_v54 }
0x135e   : > { %5464 = vmatpush1.bf16.msra.mxu1 %v9222_v2  ;;  %5823 = vmatpush1.bf16.msra.mxu0 %v9222_v2  ;;  %v5246_v51 = vpop.permute.xlu0 %5245 }
0x135f   : > { %v5225_v47 = vpop.permute.xlu1 %5224  ;;  %5465 = vmatprep.subr.bf16.mxu1 %v9232_v40  ;;  %5824 = vmatprep.subr.bf16.mxu0 %v9232_v40 }
0x1360   : > { %v9247_v3 = vsel %vm1099_vm7, %v5223_v57, %v5225_v47 }
0x1362   : > { %5466 = vmatpush1.bf16.msra.mxu1 %v9237_v20  ;;  %5825 = vmatpush1.bf16.msra.mxu0 %v9237_v20  ;;  %v5227_v59 = vpop.permute.xlu0 %5226 }
0x1363   : > { %v5269_v27 = vpop.permute.xlu1 %5268  ;;  %v9242_v49 = vsel %vm1099_vm7, %v5225_v47, %v5227_v59 }
0x1364   : > { %5467 = vmatprep.subr.bf16.mxu1 %v9242_v49  ;;  %5826 = vmatprep.subr.bf16.mxu0 %v9242_v49 }
0x1366   : > { %5468 = vmatpush1.bf16.msra.mxu1 %v9247_v3  ;;  %5827 = vmatpush1.bf16.msra.mxu0 %v9247_v3  ;;  %v5244_v11 = vpop.permute.xlu0 %5243 }
0x1367   : > { %v5248_v23 = vpop.permute.xlu1 %5247  ;;  %v9255_v44 = vsel %vm1130_vm8, %v5244_v11, %v5246_v51 }
0x1368   : > { %v9252_v48 = vsel %vm1130_vm8, %v5246_v51, %v5248_v23 }
0x1369   : > { %5469 = vmatprep.subr.bf16.mxu1 %v9252_v48  ;;  %5828 = vmatprep.subr.bf16.mxu0 %v9252_v48 }
0x136a   : > { %5470 = vmatpush1.bf16.msra.mxu1 %v9255_v44  ;;  %5829 = vmatpush1.bf16.msra.mxu0 %v9255_v44  ;;  %v5273_v57 = vpop.permute.xlu0 %5272 }
0x136b   : > { %v5294_v61 = vpop.permute.xlu1 %5293  ;;  %5471 = vmatprep.subr.bf16.mxu1 %v9150_v21  ;;  %5830 = vmatprep.subr.bf16.mxu0 %v9150_v21 }
0x136e   : > { %5472 = vmatpush1.bf16.msra.mxu1 %v9146_v18  ;;  %5831 = vmatpush1.bf16.msra.mxu0 %v9146_v18  ;;  %v5290_v51 = vpop.permute.xlu0 %5289 }
0x136f   : > { %v5271_v47 = vpop.permute.xlu1 %5270 }
0x1370   : > { %v9266_v59 = vsel %vm1113_vm5, %v5269_v27, %v5271_v47  ;;  %v9269_v11 = vsel %vm1113_vm5, %v5271_v47, %v5273_v57 }
0x1371   : > { %5473 = vmatprep.subr.bf16.mxu1 %v9269_v11  ;;  %5832 = vmatprep.subr.bf16.mxu0 %v9269_v11 }
0x1372   : > { %5474 = vmatpush1.bf16.msra.mxu1 %v9266_v59  ;;  %5833 = vmatpush1.bf16.msra.mxu0 %v9266_v59  ;;  %v5292_v23 = vpop.permute.xlu0 %5291 }
0x1373   : > { %v5310_v10 = vpop.permute.xlu1 %5309  ;;  %v9276_v58 = vsel %vm1082_vm6, %v5292_v23, %v5294_v61  ;;  %v9281_v27 = vsel %vm1082_vm6, %v5290_v51, %v5292_v23 }
0x1374   : > { %5475 = vmatprep.subr.bf16.mxu1 %v9276_v58  ;;  %5834 = vmatprep.subr.bf16.mxu0 %v9276_v58 }
0x1376   : > { %5476 = vmatpush1.bf16.msra.mxu1 %v9281_v27  ;;  %5835 = vmatpush1.bf16.msra.mxu0 %v9281_v27  ;;  %v5312_v57 = vpop.permute.xlu0 %5311 }
0x1377   : > { %v5308_v47 = vpop.permute.xlu1 %5307  ;;  %v9286_v1 = vsel %vm1211_vm11, %v5310_v10, %v5312_v57 }
0x1378   : > { %v9289_v61 = vsel %vm1211_vm11, %v5308_v47, %v5310_v10  ;;  %5477 = vmatprep.subr.bf16.mxu1 %v9286_v1  ;;  %5836 = vmatprep.subr.bf16.mxu0 %v9286_v1  ;;  %v6539_v47 = vcombine.low %v9193_v17, %v9193_v17 }
0x137a   : > { %5478 = vmatpush1.bf16.msra.mxu1 %v9289_v61  ;;  %5837 = vmatpush1.bf16.msra.mxu0 %v9289_v61  ;;  %v5331_v51 = vpop.permute.xlu0 %5330 }
0x137b   : > { %v5333_v23 = vpop.permute.xlu1 %5332 }
0x137c   : > { %v9296_v22 = vsel %vm1030_vm4, %v5331_v51, %v5333_v23 }
0x137d   : > { %5479 = vmatprep.subr.bf16.mxu1 %v9296_v22  ;;  %5838 = vmatprep.subr.bf16.mxu0 %v9296_v22 }
0x137e   : > { %v5329_v57 = vpop.permute.xlu0 %5328 }
0x137f   : > { %v5334_v10 = vsel %vm1030_vm4, %v5329_v57, %v5331_v51  ;;  %v9828_v51 = vld [vmem:[#allocation43_spill] sm:$0xff] }
0x1380   : > { %5480 = vmatpush1.bf16.msra.mxu1 %v5334_v10  ;;  %5839 = vmatpush1.bf16.msra.mxu0 %v5334_v10 }
0x1381   : > { %6216 = vmatprep.subr.bf16.mxu1 %v8835_v7  ;;  %v9818_v7 = vld [vmem:[#allocation42_spill] sm:$0xff] }
0x1382   : > { %v5520_v23 = vpop.permute.xlu0 %5519 }
0x1383   : > { %5492 = vmatmul.mubr.bf16.vlgmr.msra.gmra.mrb[28].mxu1 %v6539_v47 }
0x1384   : > { %6217 = vmatpush1.bf16.msra.mxu1 %v8832_v6  ;;  %6248 = vmatprep.mubr.bf16.mxu1 %v6771_v62  ;;  %v9815_v62 = vld [vmem:[#allocation44_spill] sm:$0xff]  ;;  %v9817_v6 = vld [vmem:[#allocation31_spill] sm:$0xff] }
0x1385   : > { %6218 = vmatprep.subr.bf16.mxu1 %v8840_v33  ;;  %v9819_v33 = vld [vmem:[#allocation45_spill] sm:$0xff] }
0x1388   : > { %6219 = vmatpush1.bf16.msra.mxu1 %v8847_v4 }
0x1389   : > { %6220 = vmatprep.subr.bf16.mxu1 %v8852_v53 }
0x138c   : > { %6221 = vmatpush1.bf16.msra.mxu1 %v8857_v55  ;;  %v5400_v4 = vpop.permute.xlu1 %5399 }
0x138d   : > { %6222 = vmatprep.subr.bf16.mxu1 %v8862_v12 }
0x1390   : > { %6223 = vmatpush1.bf16.msra.mxu1 %v8865_v41  ;;  %v5538_v57 = vpop.permute.xlu1 %5537 }
0x1391   : > { %6224 = vmatprep.subr.bf16.mxu1 %v8746_v0  ;;  %v6769_v0 = vld [vmem:[%s6991_s4] ss:$24 sps:$4 sm:$0xff]  }
0x1394   : > { %6225 = vmatpush1.bf16.msra.mxu1 %v8742_v37  ;;  %v9816_v37 = vld [vmem:[#allocation28_spill] sm:$0xff] }
0x1395   : > { %6226 = vmatprep.subr.bf16.mxu1 %v8879_v39 }
0x1398   : > { %6227 = vmatpush1.bf16.msra.mxu1 %v8876_v52 }
0x1399   : > { %6228 = vmatprep.subr.bf16.mxu1 %v8886_v14 }
0x139c   : > { %6229 = vmatpush1.bf16.msra.mxu1 %v8891_v60 }
0x139d   : > { %6230 = vmatprep.subr.bf16.mxu1 %v8896_v43 }
0x13a0   : > { %6231 = vmatpush1.bf16.msra.mxu1 %v8899_v24 }
0x13a1   : > { %6232 = vmatprep.subr.bf16.mxu1 %v8906_v56 }
0x13a4   : > { %6233 = vmatpush1.bf16.msra.mxu1 %v8911_v34 }
0x13a5   : > { %6234 = vmatprep.subr.bf16.mxu1 %v9022_v16 }
0x13a8   : > { %6235 = vmatpush1.bf16.msra.mxu1 %v9019_v9 }
0x13a9   : > { %6236 = vmatprep.subr.bf16.mxu1 %v9027_v42 }
0x13ac   : > { %6237 = vmatpush1.bf16.msra.mxu1 %v9034_v63 }
0x13ad   : > { %6238 = vmatprep.subr.bf16.mxu1 %v9039_v46  ;;  %v9384_v46 = vld [vmem:[%s9803_s6 + $0x8] sm:$0xff] }
0x13b0   : > { %6239 = vmatpush1.bf16.msra.mxu1 %v9042_v15  ;;  %v6545_v15 = vcombine.high %v9384_v46, %v9384_v46 }
0x13b1   : > { %6240 = vmatprep.subr.bf16.mxu1 %v9049_v5  ;;  %v9389_v5 = vld [vmem:[#allocation2] sm:$0xff] }
0x13b2   : > { %5850 = vmatprep.mubr.bf16.mxu0 %v6545_v15 }
0x13b4   : > { %6241 = vmatpush1.bf16.msra.mxu1 %v9054_v45  ;;  %v9820_v45 = vld [vmem:[#allocation25_spill] sm:$0xff] }
0x13b5   : > { %6242 = vmatprep.subr.bf16.mxu1 %v8939_v32 }
0x13b8   : > { %6243 = vmatpush1.bf16.msra.mxu1 %v8935_v8 }
0x13b9   : > { %6244 = vmatprep.subr.bf16.mxu1 %v9061_v13  ;;  %v9393_v13 = vmul.bf16 %v9389_v5, %v9820_v45 }
0x13bc   : > { %6245 = vmatpush1.bf16.msra.mxu1 %v9815_v62 }
0x13bd   : > { %6246 = vmatprep.subr.bf16.mxu1 %v9816_v37 }
0x13c0   : > { %6247 = vmatpush1.bf16.msra.mxu1 %v9817_v6 }
0x13c1   : > { %6259 = vmatprep.subr.bf16.mxu1 %v9818_v7 }
0x13c3   : > { %6249 = vmatmul.mubr.bf16.vlgmr.msra.gmra.mrb[32].mxu1 %v6769_v0 }
0x13c4   : > { %6260 = vmatpush1.bf16.msra.mxu1 %v9090_v31 }
0x13c5   : > { %6261 = vmatprep.subr.bf16.mxu1 %v9819_v33 }
0x13c8   : > { %6262 = vmatpush1.bf16.msra.mxu1 %v9104_v50 }
0x13c9   : > { %6263 = vmatprep.subr.bf16.mxu1 %v9225_v54  ;;  %v9823_v54 = vld [vmem:[#allocation30_spill] sm:$0xff] }
0x13cc   : > { %6264 = vmatpush1.bf16.msra.mxu1 %v9222_v2 }
0x13cd   : > { %6265 = vmatprep.subr.bf16.mxu1 %v9232_v40 }
0x13d0   : > { %6266 = vmatpush1.bf16.msra.mxu1 %v9237_v20  ;;  %v9824_v20 = vld [vmem:[#allocation34_spill] sm:$0xff] }
0x13d1   : > { %6267 = vmatprep.subr.bf16.mxu1 %v9242_v49 }
0x13d4   : > { %6268 = vmatpush1.bf16.msra.mxu1 %v9247_v3  ;;  %v9825_v3 = vld [vmem:[#allocation32_spill] sm:$0xff] }
0x13d5   : > { %6269 = vmatprep.subr.bf16.mxu1 %v9252_v48  ;;  %v9431_v48 = vmul.bf16 %v9389_v5, %v9825_v3 }
0x13d8   : > { %6270 = vmatpush1.bf16.msra.mxu1 %v9255_v44  ;;  %v9826_v44 = vld [vmem:[#allocation33_spill] sm:$0xff] }
0x13d9   : > { %6271 = vmatprep.subr.bf16.mxu1 %v9150_v21  ;;  %v9822_v21 = vld [vmem:[#allocation27_spill] sm:$0xff] }
0x13da   : > { %v9406_v17 = vmul.bf16 %v9389_v5, %v9822_v21 }
0x13dc   : > { %6272 = vmatpush1.bf16.msra.mxu1 %v9146_v18  ;;  %v9821_v18 = vld [vmem:[#allocation26_spill] sm:$0xff] }
0x13dd   : > { %6273 = vmatprep.subr.bf16.mxu1 %v9269_v11  ;;  %v9402_v50 = vmul.bf16 %v9389_v5, %v9821_v18  ;;  %v5751_v11 = vld [vmem:[%s6986_s27] sm:$0xff] }
0x13e0   : > { %6274 = vmatpush1.bf16.msra.mxu1 %v9266_v59 }
0x13e1   : > { %6275 = vmatprep.subr.bf16.mxu1 %v9276_v58 }
0x13e4   : > { %6276 = vmatpush1.bf16.msra.mxu1 %v9281_v27  ;;  %v9827_v27 = vld [vmem:[#allocation36_spill] sm:$0xff] }
0x13e5   : > { %6277 = vmatprep.subr.bf16.mxu1 %v9286_v1 }
0x13e8   : > { %6278 = vmatpush1.bf16.msra.mxu1 %v9289_v61  ;;  %v6777_v61 = vld [vmem:[%s6991_s4 + $0xc] ss:$24 sps:$4 sm:$0xff]  }
0x13e9   : > { %6279 = vmatprep.subr.bf16.mxu1 %v9296_v22  ;;  %6291 = vmatprep.mubr.bf16.mxu1 %v6777_v61 }
0x13ec   : > { %6280 = vmatpush1.bf16.msra.mxu1 %v5334_v10  ;;  %v5559_v10 = vpop.permute.xlu0 %5558 }
0x1456   : > { %v5493_v53 = vpop.f32.mrb[28].mxu1 }
0x1457   : > { %v6581_v55 = vadd.f32 %v5493_v53, %v5400_v4  ;;  %v5495_v12 = vpop.f32.mrb[29].mxu1 }
0x1458   : > { %v6582_v41 = vadd.f32 %v5495_v12, %v5400_v4  ;;  %v5497_v52 = vpop.f32.mrb[30].mxu1 }
0x1459   : > { %vm5500_vm1 = vcmp.ge.f32.partialorder %v6581_v55, 0.0  ;;  %v5502_v39 = vmul.f32 0.2, %v6581_v55  ;;  %v5498_v14 = vpop.f32.mrb[31].mxu1 }
0x145a   : > { %vm5501_vm15 = vcmp.ge.f32.partialorder %v6582_v41, 0.0  ;;  %v5503_v60 = vmul.f32 0.2, %v6582_v41 }
0x145b   : > { %v5504_v43 = vsel %vm5500_vm1, %v6581_v55, %v5502_v39 }
0x145c   : > { %v5506_v24 = vpack.c.bf16 %v5504_v43, %v5504_v43  ;;  %v5505_v56 = vsel %vm5501_vm15, %v6582_v41, %v5503_v60 }
0x145d   : > { %v5507_v1 = vpack.c.bf16 %v5505_v56, %v5505_v56 }
0x145e   : > { %5508 = vst [vmem:[#allocation2 + $0x8] sm:$0xf] %v5506_v24 }
0x145f   : > { %5509 = vst [vmem:[#allocation2 + $0x10] sm:$0xf] %v5507_v1 }
0x1465   : > { %v9358_v22 = vld [vmem:[#allocation2 + $0x8] sm:$0xff] }
0x1466   : > { %5539 = vrot.lane.b32.xlu1 %v9358_v22, %s9779_s28  ;;  %v9362_v34 = vld [vmem:[#allocation2 + $0x10] sm:$0xff]  ;;  %v5514_v32 = vmul.bf16 %v9358_v22, %v7071_v28  ;;  %v5574_v9 = vmul.bf16 %v9358_v22, %v7094_v35  ;;  %v5553_v16 = vmul.bf16 %v9358_v22, %v7099_v36  ;;  %v5598_v63 = vmul.bf16 %v9358_v22, %v7103_v38 }
0x1467   : > { %5541 = vrot.lane.b32.xlu0 %v9362_v34, %s9779_s28  ;;  %v5515_v8 = vmul.bf16 %v9362_v34, %v7064_v26  ;;  %v5554_v42 = vmul.bf16 %v9362_v34, %v7062_v25  ;;  %v5575_v31 = vmul.bf16 %v9362_v34, %v7078_v30  ;;  %v5619_v58 = vmul.bf16 %v9358_v22, %v9770_v29 }
0x1468   : > { %v5599_v2 = vmul.bf16 %v9362_v34, %v9771_v19  ;;  %v5620_v40 = vmul.bf16 %v9362_v34, %v9823_v54  ;;  %v5659_v49 = vmul.bf16 %v9362_v34, %v9824_v20  ;;  %v5658_v59 = vmul.bf16 %v9358_v22, %v9826_v44 }
0x146a   : > { %5523 = vrot.lane.b32.xlu1 %v5515_v8, %s9786_s2  ;;  %v6544_v8 = vcombine.low %v9384_v46, %v9384_v46 }
0x146b   : > { %5521 = vrot.lane.b32.xlu0 %v5514_v32, %s9786_s2 }
0x146e   : > { %5581 = vrot.lane.b32.xlu1 %v5574_v9, %s9767_s1 }
0x146f   : > { %5560 = vrot.lane.b32.xlu0 %v5553_v16, %s9780_s16  ;;  %v6775_v16 = vld [vmem:[%s6991_s4 + $0x8] ss:$24 sps:$4 sm:$0xff]  }
0x1472   : > { %5562 = vrot.lane.b32.xlu1 %v5554_v42, %s9780_s16 }
0x1473   : > { %5604 = vrot.lane.b32.xlu0 %v5598_v63, %s9795_s3 }
0x1476   : > { %5579 = vrot.lane.b32.xlu1 %v9393_v13, %s9767_s1 }
0x1477   : > { %5583 = vrot.lane.b32.xlu0 %v5575_v31, %s9767_s1 }
0x147a   : > { %5608 = vrot.lane.b32.xlu1 %v9402_v50, %s9795_s3 }
0x147b   : > { %5629 = vrot.lane.b32.xlu0 %v9406_v17, %s9782_s15 }
0x147e   : > { %5625 = vrot.lane.b32.xlu1 %v5619_v58, %s9782_s15 }
0x147f   : > { %5606 = vrot.lane.b32.xlu0 %v5599_v2, %s9795_s3 }
0x1482   : > { %5627 = vrot.lane.b32.xlu1 %v5620_v40, %s9782_s15 }
0x1483   : > { %5645 = vrot.lane.b32.xlu0 %v9362_v34, %s9784_s0 }
0x1486   : > { %5647 = vrot.lane.b32.xlu1 %v9389_v5, %s9784_s0 }
0x1487   : > { %5643 = vrot.lane.b32.xlu0 %v9358_v22, %s9784_s0 }
0x148a   : > { %5666 = vrot.lane.b32.xlu1 %v5659_v49, %s9775_s10 }
0x148b   : > { %5668 = vrot.lane.b32.xlu0 %v9431_v48, %s9775_s10 }
0x148e   : > { %5664 = vrot.lane.b32.xlu1 %v5658_v59, %s9775_s10  ;;  %v6774_v59 = vld [vmem:[%s9803_s6 + $0x10] ss:$0 sps:$4 sm:$0xff]  }
0x148f   : > { %5754 = vperm.xlu0 %6710, %v5751_v11  }
0x1492   : > { %5919 = vrot.lane.b32.xlu1 %v9827_v27, %s9786_s2 }
0x1493   : > { %5937 = vrot.lane.b32.xlu0 %v9389_v5, %s9779_s28 }
0x1496   : > { %5958 = vrot.lane.b32.xlu1 %v9828_v51, %s9780_s16 }
0x14d8   : > { %v5540_v47 = vpop.permute.xlu1 %5539 }
0x14d9   : > { %v5542_v62 = vpop.permute.xlu0 %5541  ;;  %v5543_v55 = vsel %vm1066_vm10, %v5538_v57, %v5540_v47 }
0x14da   : > { %v5544_v4 = vsel %vm1066_vm10, %v5540_v47, %v5542_v62 }
0x14dc   : > { %v5524_v37 = vpop.permute.xlu1 %5523 }
0x14dd   : > { %v5522_v0 = vpop.permute.xlu0 %5521 }
0x14de   : > { %v5525_v6 = vsel %vm1047_vm9, %v5520_v23, %v5522_v0  ;;  %v5526_v7 = vsel %vm1047_vm9, %v5522_v0, %v5524_v37 }
0x14df   : > { %5840 = vmatprep.subr.bf16.mxu0 %v5526_v7  ;;  %6281 = vmatprep.subr.bf16.mxu1 %v5526_v7 }
0x14e0   : > { %v5582_v33 = vpop.permute.xlu1 %5581  ;;  %5841 = vmatpush1.bf16.msra.mxu0 %v5525_v6  ;;  %6282 = vmatpush1.bf16.msra.mxu1 %v5525_v6 }
0x14e1   : > { %5842 = vmatprep.subr.bf16.mxu0 %v5544_v4  ;;  %6283 = vmatprep.subr.bf16.mxu1 %v5544_v4  ;;  %v5561_v53 = vpop.permute.xlu0 %5560 }
0x14e2   : > { %v5564_v39 = vsel %vm1099_vm7, %v5559_v10, %v5561_v53 }
0x14e4   : > { %v5563_v12 = vpop.permute.xlu1 %5562  ;;  %5843 = vmatpush1.bf16.msra.mxu0 %v5543_v55  ;;  %6284 = vmatpush1.bf16.msra.mxu1 %v5543_v55 }
0x14e5   : > { %v5605_v41 = vpop.permute.xlu0 %5604  ;;  %v5565_v52 = vsel %vm1099_vm7, %v5561_v53, %v5563_v12 }
0x14e6   : > { %5844 = vmatprep.subr.bf16.mxu0 %v5565_v52  ;;  %6285 = vmatprep.subr.bf16.mxu1 %v5565_v52 }
0x14e8   : > { %v5580_v14 = vpop.permute.xlu1 %5579  ;;  %5845 = vmatpush1.bf16.msra.mxu0 %v5564_v39  ;;  %6286 = vmatpush1.bf16.msra.mxu1 %v5564_v39 }
0x14e9   : > { %v5584_v60 = vpop.permute.xlu0 %5583  ;;  %v5585_v24 = vsel %vm1130_vm8, %v5580_v14, %v5582_v33 }
0x14ea   : > { %v5586_v43 = vsel %vm1130_vm8, %v5582_v33, %v5584_v60 }
0x14eb   : > { %5846 = vmatprep.subr.bf16.mxu0 %v5586_v43  ;;  %6287 = vmatprep.subr.bf16.mxu1 %v5586_v43 }
0x14ec   : > { %v5609_v56 = vpop.permute.xlu1 %5608  ;;  %5847 = vmatpush1.bf16.msra.mxu0 %v5585_v24  ;;  %6288 = vmatpush1.bf16.msra.mxu1 %v5585_v24 }
0x14ed   : > { %5848 = vmatprep.subr.bf16.mxu0 %v9362_v34  ;;  %6289 = vmatprep.subr.bf16.mxu1 %v9362_v34  ;;  %v5630_v1 = vpop.permute.xlu0 %5629 }
0x14f0   : > { %v5626_v32 = vpop.permute.xlu1 %5625  ;;  %5849 = vmatpush1.bf16.msra.mxu0 %v9358_v22  ;;  %6290 = vmatpush1.bf16.msra.mxu1 %v9358_v22 }
0x14f1   : > { %v5607_v9 = vpop.permute.xlu0 %5606 }
0x14f2   : > { %v5610_v42 = vsel %vm1113_vm5, %v5605_v41, %v5607_v9  ;;  %v5611_v63 = vsel %vm1113_vm5, %v5607_v9, %v5609_v56 }
0x14f3   : > { %5859 = vmatprep.subr.bf16.mxu0 %v5611_v63  ;;  %5851 = vmatmul.mubr.bf16.vlgmr.msra.gmra.mrb[20].mxu0 %v6544_v8 }
0x14f4   : > { %v5628_v15 = vpop.permute.xlu1 %5627  ;;  %5860 = vmatpush1.bf16.msra.mxu0 %v5610_v42  ;;  %5891 = vmatprep.mubr.bf16.mxu0 %v9389_v5 }
0x14f5   : > { %v5646_v34 = vpop.permute.xlu0 %5645  ;;  %v5632_v46 = vsel %vm1082_vm6, %v5628_v15, %v5630_v1  ;;  %6292 = vmatmul.mubr.bf16.vlgmr.msra.gmra.mrb[32].mxu1 %v6775_v16  ;;  %v5631_v22 = vsel %vm1082_vm6, %v5626_v32, %v5628_v15 }
0x14f6   : > { %5861 = vmatprep.subr.bf16.mxu0 %v5632_v46 }
0x14f8   : > { %v5648_v45 = vpop.permute.xlu1 %5647  ;;  %5862 = vmatpush1.bf16.msra.mxu0 %v5631_v22 }
0x14f9   : > { %v5644_v31 = vpop.permute.xlu0 %5643  ;;  %v5650_v18 = vsel %vm1211_vm11, %v5646_v34, %v5648_v45 }
0x14fa   : > { %v5649_v21 = vsel %vm1211_vm11, %v5644_v31, %v5646_v34  ;;  %5863 = vmatprep.subr.bf16.mxu0 %v5650_v18 }
0x14fc   : > { %v5667_v58 = vpop.permute.xlu1 %5666  ;;  %5864 = vmatpush1.bf16.msra.mxu0 %v5649_v21 }
0x14fd   : > { %v5669_v2 = vpop.permute.xlu0 %5668 }
0x14fe   : > { %v5671_v40 = vsel %vm1030_vm4, %v5667_v58, %v5669_v2 }
0x14ff   : > { %5865 = vmatprep.subr.bf16.mxu0 %v5671_v40 }
0x1500   : > { %v5665_v49 = vpop.permute.xlu1 %5664 }
0x1501   : > { %v5670_v3 = vsel %vm1030_vm4, %v5665_v49, %v5667_v58 }
0x1502   : > { %5866 = vmatpush1.bf16.msra.mxu0 %v5670_v3 }
0x1503   : > { %6302 = vmatprep.subr.bf16.mxu0 %v5611_v63 }
0x1504   : > { %v5920_v39 = vpop.permute.xlu1 %5919 }
0x1505   : > { %6547 = vmatmul.mubr.msk.bf16.vlgmr.msra.gmra.mrb[20].mxu0 %vm2250_vm12, %v6774_v59 }
0x1506   : > { %6303 = vmatpush1.bf16.msra.mxu0 %v5610_v42 }
0x1507   : > { %6304 = vmatprep.subr.bf16.mxu0 %v5632_v46 }
0x1508   : > { %v5959_v14 = vpop.permute.xlu1 %5958 }
0x150a   : > { %6305 = vmatpush1.bf16.msra.mxu0 %v5631_v22 }
0x150b   : > { %6306 = vmatprep.subr.bf16.mxu0 %v5650_v18 }
0x150e   : > { %6307 = vmatpush1.bf16.msra.mxu0 %v5649_v21  ;;  %v5755_v11 = vpop.permute.xlu0 %5754 }
0x150f   : > { %6308 = vmatprep.subr.bf16.mxu0 %v5671_v40 }
0x1512   : > { %6309 = vmatpush1.bf16.msra.mxu0 %v5670_v3 }
0x15d8   : > { %v5893_v27 = vpop.f32.mrb[20].mxu0 }
0x15d9   : > { %v6583_v61 = vadd.f32 %v5893_v27, %v5755_v11  ;;  %v5895_v51 = vpop.f32.mrb[21].mxu0 }
0x15da   : > { %v6584_v23 = vadd.f32 %v5895_v51, %v5755_v11  ;;  %v5897_v57 = vpop.f32.mrb[22].mxu0 }
0x15db   : > { %vm5900_vm2 = vcmp.ge.f32.partialorder %v6583_v61, 0.0  ;;  %v5902_v10 = vmul.f32 0.2, %v6583_v61  ;;  %v5898_v47 = vpop.f32.mrb[23].mxu0 }
0x15dc   : > { %vm5901_vm3 = vcmp.ge.f32.partialorder %v6584_v23, 0.0  ;;  %v5903_v62 = vmul.f32 0.2, %v6584_v23 }
0x15dd   : > { %v5904_v37 = vsel %vm5900_vm2, %v6583_v61, %v5902_v10 }
0x15de   : > { %v5906_v0 = vpack.c.bf16 %v5904_v37, %v5904_v37  ;;  %v5905_v6 = vsel %vm5901_vm3, %v6584_v23, %v5903_v62 }
0x15df   : > { %v5907_v7 = vpack.c.bf16 %v5905_v6, %v5905_v6 }
0x15e0   : > { %5908 = vst [vmem:[#allocation2 + $0x8] sm:$0xf] %v5906_v0  ;;  %v6780_v0 = vld [vmem:[%s6991_s4 + $0x10] ss:$24 sps:$4 sm:$0xff]  }
0x15e1   : > { %5909 = vst [vmem:[#allocation2 + $0x10] sm:$0xf] %v5907_v7 }
0x15e7   : > { %v9473_v33 = vld [vmem:[#allocation2 + $0x8] sm:$0xff] }
0x15e8   : > { %5939 = vrot.lane.b32.xlu0 %v9473_v33, %s9779_s28  ;;  %v9477_v4 = vld [vmem:[#allocation2 + $0x10] sm:$0xff]  ;;  %v5914_v55 = vmul.bf16 %v9473_v33, %v7071_v28  ;;  %v5974_v12 = vmul.bf16 %v9473_v33, %v7094_v35  ;;  %v5953_v41 = vmul.bf16 %v9473_v33, %v7099_v36  ;;  %v5998_v28 = vmul.bf16 %v9473_v33, %v7103_v38 }
0x15e9   : > { %5941 = vrot.lane.b32.xlu1 %v9477_v4, %s9779_s28  ;;  %v5915_v53 = vmul.bf16 %v9477_v4, %v7064_v26  ;;  %v5954_v26 = vmul.bf16 %v9477_v4, %v7062_v25  ;;  %v5975_v35 = vmul.bf16 %v9477_v4, %v7078_v30  ;;  %v6019_v25 = vmul.bf16 %v9473_v33, %v9770_v29  ;;  %v6778_v38 = vld [vmem:[%s6991_s4 + $0x14] ss:$24 sps:$4 sm:$0xff]   ;;  %v9521_v29 = vpop.f32.mrb[32].mxu1 }
0x15ea   : > { %v5999_v36 = vmul.bf16 %v9477_v4, %v9771_v19  ;;  %v6020_v30 = vmul.bf16 %v9477_v4, %v9823_v54  ;;  %6554 = vmatprep.mubr.msk.bf16.mxu0 %vm2690_vm0, %v6778_v38  ;;  %v9525_v19 = vpop.f32.mrb[33].mxu1 }
0x15eb   : > { %v9539_v54 = vpop.f32.mrb[34].mxu1 }
0x15ec   : > { %5923 = vrot.lane.b32.xlu0 %v5915_v53, %s9786_s2  ;;  %v9541_v52 = vpop.f32.mrb[35].mxu1 }
0x15ed   : > { %5921 = vrot.lane.b32.xlu1 %v5914_v55, %s9786_s2 }
0x15f0   : > { %5981 = vrot.lane.b32.xlu0 %v5974_v12, %s9767_s1 }
0x15f1   : > { %5960 = vrot.lane.b32.xlu1 %v5953_v41, %s9780_s16 }
0x15f4   : > { %5962 = vrot.lane.b32.xlu0 %v5954_v26, %s9780_s16 }
0x15f5   : > { %6004 = vrot.lane.b32.xlu1 %v5998_v28, %s9795_s3 }
0x15f8   : > { %5979 = vrot.lane.b32.xlu0 %v9393_v13, %s9767_s1  ;;  %v6059_v13 = vmul.bf16 %v9477_v4, %v9824_v20  ;;  %v5938_v20 = vpop.permute.xlu0 %5937 }
0x15f9   : > { %5983 = vrot.lane.b32.xlu1 %v5975_v35, %s9767_s1 }
0x15fc   : > { %6008 = vrot.lane.b32.xlu0 %v9402_v50, %s9795_s3  ;;  %v6058_v50 = vmul.bf16 %v9473_v33, %v9826_v44 }
0x15fd   : > { %6029 = vrot.lane.b32.xlu1 %v9406_v17, %s9782_s15  ;;  %v6172_v17 = vld [vmem:[%s6996_s12] sm:$0xff] }
0x1600   : > { %6025 = vrot.lane.b32.xlu0 %v6019_v25, %s9782_s15 }
0x1601   : > { %6006 = vrot.lane.b32.xlu1 %v5999_v36, %s9795_s3  ;;  %s9832_s3 = sshll.u32 %s9835_s23, 5 }
0x1602   : > { %s958_s28 = scalar_lea.vmem %s7001_s20, %s9832_s3 }
0x1604   : > { %6027 = vrot.lane.b32.xlu0 %v6020_v30, %s9782_s15 }
0x1605   : > { %6045 = vrot.lane.b32.xlu1 %v9477_v4, %s9784_s0 }
0x1608   : > { %6047 = vrot.lane.b32.xlu0 %v9389_v5, %s9784_s0  ;;  %v6173_v5 = vld [vmem:[%s6996_s12 + $0x8] sm:$0xff] }
0x1609   : > { %6043 = vrot.lane.b32.xlu1 %v9473_v33, %s9784_s0 }
0x160c   : > { %6066 = vrot.lane.b32.xlu0 %v6059_v13, %s9775_s10 }
0x160d   : > { %6068 = vrot.lane.b32.xlu1 %v9431_v48, %s9775_s10 }
0x1610   : > { %6064 = vrot.lane.b32.xlu0 %v6058_v50, %s9775_s10 }
0x1611   : > { %6176 = vperm.xlu1 %6711, %v6172_v17   ;;  %v6369_v17 = vld [vmem:[%s7020_s26] sm:$0xff] }
0x1614   : > { %6181 = vperm.xlu0 %6710, %v6173_v5   ;;  %v9830_v5 = vld [vmem:[#allocation24_spill] sm:$0xff] }
0x165a   : > { %v5940_v60 = vpop.permute.xlu0 %5939 }
0x165b   : > { %v5942_v43 = vpop.permute.xlu1 %5941  ;;  %v5943_v9 = vsel %vm1066_vm10, %v5938_v20, %v5940_v60 }
0x165c   : > { %v5944_v8 = vsel %vm1066_vm10, %v5940_v60, %v5942_v43 }
0x165e   : > { %v5924_v24 = vpop.permute.xlu0 %5923 }
0x165f   : > { %v5922_v48 = vpop.permute.xlu1 %5921 }
0x1660   : > { %v5925_v56 = vsel %vm1047_vm9, %v5920_v39, %v5922_v48  ;;  %v5926_v44 = vsel %vm1047_vm9, %v5922_v48, %v5924_v24  ;;  %v6371_v24 = vld [vmem:[%s7020_s26 + $0x10] sm:$0xff]  ;;  %v9833_v48 = vld [vmem:[#allocation41_spill] sm:$0xff] }
0x1661   : > { %6310 = vmatprep.subr.bf16.mxu0 %v5926_v44 }
0x1662   : > { %6311 = vmatpush1.bf16.msra.mxu0 %v5925_v56  ;;  %v5982_v1 = vpop.permute.xlu0 %5981 }
0x1663   : > { %v5961_v32 = vpop.permute.xlu1 %5960  ;;  %6312 = vmatprep.subr.bf16.mxu0 %v5944_v8  ;;  %v6372_v8 = vld [vmem:[%s7020_s26 + $0x18] sm:$0xff] }
0x1664   : > { %v5964_v15 = vsel %vm1099_vm7, %v5959_v14, %v5961_v32  ;;  %v9831_v14 = vld [vmem:[#allocation35_spill] sm:$0xff] }
0x1666   : > { %6313 = vmatpush1.bf16.msra.mxu0 %v5943_v9  ;;  %v5963_v16 = vpop.permute.xlu0 %5962 }
0x1667   : > { %v6005_v42 = vpop.permute.xlu1 %6004  ;;  %v5965_v63 = vsel %vm1099_vm7, %v5961_v32, %v5963_v16 }
0x1668   : > { %6314 = vmatprep.subr.bf16.mxu0 %v5965_v63 }
0x166a   : > { %6315 = vmatpush1.bf16.msra.mxu0 %v5964_v15  ;;  %v5980_v34 = vpop.permute.xlu0 %5979 }
0x166b   : > { %v5984_v46 = vpop.permute.xlu1 %5983  ;;  %v5985_v45 = vsel %vm1130_vm8, %v5980_v34, %v5982_v1 }
0x166c   : > { %v5986_v22 = vsel %vm1130_vm8, %v5982_v1, %v5984_v46 }
0x166d   : > { %6316 = vmatprep.subr.bf16.mxu0 %v5986_v22 }
0x166e   : > { %6317 = vmatpush1.bf16.msra.mxu0 %v5985_v45  ;;  %v6009_v31 = vpop.permute.xlu0 %6008 }
0x166f   : > { %v6030_v18 = vpop.permute.xlu1 %6029  ;;  %6318 = vmatprep.subr.bf16.mxu0 %v9477_v4 }
0x1672   : > { %6319 = vmatpush1.bf16.msra.mxu0 %v9473_v33  ;;  %v6026_v21 = vpop.permute.xlu0 %6025 }
0x1673   : > { %v6007_v58 = vpop.permute.xlu1 %6006 }
0x1674   : > { %v6010_v2 = vsel %vm1113_vm5, %v6005_v42, %v6007_v58  ;;  %v6011_v40 = vsel %vm1113_vm5, %v6007_v58, %v6009_v31 }
0x1675   : > { %6320 = vmatprep.subr.bf16.mxu0 %v6011_v40 }
0x1676   : > { %6321 = vmatpush1.bf16.msra.mxu0 %v6010_v2  ;;  %v6028_v49 = vpop.permute.xlu0 %6027 }
0x1677   : > { %v6046_v3 = vpop.permute.xlu1 %6045  ;;  %v6032_v59 = vsel %vm1082_vm6, %v6028_v49, %v6030_v18  ;;  %v6031_v11 = vsel %vm1082_vm6, %v6026_v21, %v6028_v49 }
0x1678   : > { %6322 = vmatprep.subr.bf16.mxu0 %v6032_v59 }
0x167a   : > { %6323 = vmatpush1.bf16.msra.mxu0 %v6031_v11  ;;  %v6048_v27 = vpop.permute.xlu0 %6047 }
0x167b   : > { %v6044_v61 = vpop.permute.xlu1 %6043  ;;  %v6050_v51 = vsel %vm1211_vm11, %v6046_v3, %v6048_v27 }
0x167c   : > { %v6049_v23 = vsel %vm1211_vm11, %v6044_v61, %v6046_v3  ;;  %6324 = vmatprep.subr.bf16.mxu0 %v6050_v51 }
0x167e   : > { %6325 = vmatpush1.bf16.msra.mxu0 %v6049_v23  ;;  %v6067_v57 = vpop.permute.xlu0 %6066 }
0x167f   : > { %v6069_v10 = vpop.permute.xlu1 %6068 }
0x1680   : > { %v6071_v47 = vsel %vm1030_vm4, %v6067_v57, %v6069_v10 }
0x1681   : > { %6326 = vmatprep.subr.bf16.mxu0 %v6071_v47 }
0x1682   : > { %v6065_v62 = vpop.permute.xlu0 %6064 }
0x1683   : > { %v6070_v37 = vsel %vm1030_vm4, %v6065_v62, %v6067_v57 }
0x1684   : > { %6327 = vmatpush1.bf16.msra.mxu0 %v6070_v37 }
0x1687   : > { %6335 = vmatmul.mubr.bf16.vlgmr.msra.gmra.mrb[24].mxu0 %v6780_v0 }
0x1690   : > { %v6177_v6 = vpop.permute.xlu1 %6176 }
0x1691   : > { %v6585_v33 = vadd.f32 %v9521_v29, %v6177_v6  ;;  %v6587_v4 = vadd.f32 %v9525_v19, %v6177_v6  ;;  %v9829_v19 = vld [vmem:[#allocation29_spill] sm:$0xff] }
0x1693   : > { %v6182_v7 = vpop.permute.xlu0 %6181 }
0x1694   : > { %v6589_v55 = vadd.f32 %v9539_v54, %v6182_v7  ;;  %v6591_v26 = vadd.f32 %v9541_v52, %v6182_v7  ;;  %v6370_v52 = vld [vmem:[%s7020_s26 + $0x8] sm:$0xff] }
0x175a   : > { %v6336_v53 = vpop.f32.mrb[24].mxu0 }
0x175b   : > { %v6586_v12 = vadd.f32 %v6585_v33, %v6336_v53  ;;  %v6338_v41 = vpop.f32.mrb[25].mxu0 }
0x175c   : > { %v6588_v28 = vadd.f32 %v6587_v4, %v6338_v41  ;;  %v6340_v35 = vpop.f32.mrb[26].mxu0 }
0x175d   : > { %v6345_v25 = vmul.f32 0.2, %v6586_v12  ;;  %v6590_v36 = vadd.f32 %v6589_v55, %v6340_v35  ;;  %v6342_v30 = vpop.f32.mrb[27].mxu0 }
0x175e   : > { %v6346_v38 = vmul.f32 0.2, %v6588_v28  ;;  %v6592_v29 = vadd.f32 %v6591_v26, %v6342_v30 }
0x175f   : > { %v6353_v13 = vadd.f32 %v6345_v25, %v9829_v19  ;;  %v6347_v50 = vmul.f32 0.2, %v6590_v36 }
0x1760   : > { %v6354_v54 = vadd.f32 %v6346_v38, %v9830_v5  ;;  %v6348_v39 = vmul.f32 0.2, %v6592_v29 }
0x1761   : > { %v6365_v20 = vmul.f32 0.2, %v6353_v13  ;;  %v6355_v60 = vadd.f32 %v6347_v50, %v9831_v14 }
0x1762   : > { %v6366_v43 = vmul.f32 0.2, %v6354_v54  ;;  %v6356_v56 = vadd.f32 %v6348_v39, %v9833_v48 }
0x1763   : > { %v6373_v44 = vadd.f32 %v6369_v17, %v6365_v20  ;;  %v6367_v1 = vmul.f32 0.2, %v6355_v60 }
0x1764   : > { %v6374_v32 = vadd.f32 %v6370_v52, %v6366_v43  ;;  %v6368_v9 = vmul.f32 0.2, %v6356_v56 }
0x1765   : > { %6377 = vst [vmem:[%s958_s28] sm:$0xff] %v6373_v44  ;;  %v6375_v16 = vadd.f32 %v6371_v24, %v6367_v1 }
0x1766   : > { %6378 = vst [vmem:[%s958_s28 + $0x8] sm:$0xff] %v6374_v32  ;;  %v6376_v42 = vadd.f32 %v6372_v8, %v6368_v9 }
0x1767   : > { %6379 = vst [vmem:[%s958_s28 + $0x10] sm:$0xff] %v6375_v16 }
0x1768   : > { %6380 = vst [vmem:[%s958_s28 + $0x18] sm:$0xff] %v6376_v42 }
0x1769 PF: > { %s73_s22 = sadd.s32 1, %s6795_s22  }
0x176a   : > { %p70_p4 = scmp.ge.s32.totalorder %s73_s22, 4  }
0x176c   :  { %72 = sbr.rel (!%p70_p4) target bundleno = 57 (0x39), region = 205 }

</bundles_post_ra>
